<compile_context>
chip_gen: v7x
topology: tpu7x:2x2x1
jax: 0.10.0
libtpu: 0.0.40
codegen_flags: <defaults>
</compile_context>

<pallas_src>
import math

import jax
import jax.numpy as jnp
from jax.experimental import pallas as pl
from jax.experimental.pallas import tpu as pltpu

D_MODEL = 512            # forced by InceptionModule(nf=512//4): 4*128 output channels
NF = 512 // 4            # 128
KS = (39, 19, 9)         # InceptionModule default ks=40 -> [39, 19, 9] (forced odd)
KMAX = KS[0]
EPS = 1e-5


# ----------------------------------------------------------------------------- helpers
def _erf(x):
    # Eigen/XLA float32 rational approximation of erf (what XLA/PyTorch use for f32),
    # built only from mul/add/div so it is guaranteed to lower in Mosaic.
    a = (-2.72614225801306e-10, 2.77068142495902e-08, -2.10102402082508e-06,
         -5.69250639462346e-05, -7.34990630326855e-04, -2.95459980854025e-03,
         -1.60960333262415e-02)
    b = (-1.45660718464996e-05, -2.13374055278905e-04, -1.68282697438203e-03,
         -7.37332916720468e-03, -1.42647390514189e-02)
    x = jnp.clip(x, -4.0, 4.0)
    x2 = x * x
    p = jnp.full_like(x, a[0])
    for c in a[1:]:
        p = p * x2 + c
    p = p * x
    q = jnp.full_like(x, b[0])
    for c in b[1:]:
        q = q * x2 + c
    return p / q


def _gelu(x):
    # exact (erf-based) gelu, matching F.gelu default
    return 0.5 * x * (1.0 + _erf(x * (1.0 / math.sqrt(2.0))))


def _full_spec(shape):
    nd = len(shape)
    return pl.BlockSpec(tuple(shape), lambda b, nd=nd: (0,) * nd)


def _pick_tb(B, L):
    """Batch rows per grid step: fill ~256 MXU rows, but keep >=2 steps for megacore."""
    target = max(1, 256 // max(L, 1))
    divs = [d for d in range(1, B + 1) if B % d == 0]
    for d in reversed(divs):
        if d <= target and B // d >= 2:
            return d
    cands = [d for d in divs if d <= target]
    return cands[-1] if cands else 1


# ----------------------------------------------------------------------------- fused kernel
def _fused_kernel(x_ref, wproj_ref, wb_ref, wconv_ref, wmp_ref,
                  bn1s_ref, bn1b_ref, bn2s_ref, bn2b_ref, o_ref):
    TB, L, F = x_ref.shape
    NL = wb_ref.shape[0]

    # ---- project_inp: 1x1 conv (no bias) == matmul; sqrt(d_model) pre-folded into wproj
    x = x_ref[...].reshape(TB * L, F).astype(jnp.float32)
    h = jnp.dot(x, wproj_ref[...], preferred_element_type=jnp.float32)       # (TB*L, 512)

    pad = KMAX // 2
    for li in range(NL):   # static unroll; activations never leave VMEM between layers
        src = h                                                              # (TB*L, 512) f32

        # --- InceptionModule ---
        # bottleneck 1x1 conv (512 -> 128)
        y = jnp.dot(src.astype(jnp.bfloat16), wb_ref[li],
                    preferred_element_type=jnp.float32)                      # (TB*L, 128)

        # im2col slab over the widest halo; all three branch convs = one big-K matmul
        y3 = y.reshape(TB, L, NF)
        zp = jnp.zeros((TB, pad, NF), jnp.float32)
        yp = jnp.concatenate([zp, y3, zp], axis=1)                           # (TB, L+2*pad, 128)
        slab = jnp.concatenate([yp[:, j:j + L, :] for j in range(KMAX)], axis=-1)
        slab = slab.reshape(TB * L, KMAX * NF).astype(jnp.bfloat16)          # (TB*L, 4992)
        bconv = jnp.dot(slab, wconv_ref[li],
                        preferred_element_type=jnp.float32)                  # (TB*L, 384) = [b39|b19|b9]

        # MaxPool1d(3, stride=1, padding=1) on the layer input, then 1x1 conv (512 -> 128)
        s3 = src.reshape(TB, L, D_MODEL)
        ninf = jnp.full((TB, 1, D_MODEL), -jnp.inf, jnp.float32)
        sp = jnp.concatenate([ninf, s3, ninf], axis=1)                       # (TB, L+2, 512)
        mp = jnp.maximum(jnp.maximum(sp[:, 0:L], sp[:, 1:L + 1]), sp[:, 2:L + 2])
        bmp = jnp.dot(mp.reshape(TB * L, D_MODEL).astype(jnp.bfloat16), wmp_ref[li],
                      preferred_element_type=jnp.float32)                    # (TB*L, 128)

        cat = jnp.concatenate([bconv, bmp], axis=-1)                         # (TB*L, 512)
        # InceptionModule BatchNorm1d (eval) + ReLU
        src2 = jnp.maximum(cat * bn1s_ref[li] + bn1b_ref[li], 0.0)
        # residual (+ dropout == id in eval) + encoder BatchNorm1d (eval)
        h = (src + src2) * bn2s_ref[li] + bn2b_ref[li]

    # ---- head: gelu -> global average pool over time (final Linear runs in XLA)
    g = _gelu(h).reshape(TB, L, D_MODEL)
    o_ref[...] = jnp.mean(g, axis=1, keepdims=True)                          # (TB, 1, 512)


# ----------------------------------------------------------------------------- wrapper
def ts_inception_only_classifier(params, X):
    """X: (batch, feat_dim, seq_len) like the PyTorch module. Returns (batch, num_classes)."""
    B, F, L = X.shape
    x = jnp.transpose(X, (0, 2, 1)).astype(jnp.float32)                      # (B, L, F)
    p = params
    TB = _pick_tb(B, L)
    args = (x, p["w_proj"], p["wb"], p["wconv"], p["wmp"],
            p["bn1_scale"], p["bn1_shift"], p["bn2_scale"], p["bn2_shift"])
    in_specs = [pl.BlockSpec((TB, L, F), lambda b: (b, 0, 0))] + \
               [_full_spec(a.shape) for a in args[1:]]
    pooled = pl.pallas_call(
        _fused_kernel,
        out_shape=jax.ShapeDtypeStruct((B, 1, D_MODEL), jnp.float32),
        grid=(B // TB,),
        in_specs=in_specs,
        out_specs=pl.BlockSpec((TB, 1, D_MODEL), lambda b: (b, 0, 0)),
        compiler_params=pltpu.CompilerParams(
            dimension_semantics=("parallel",),
            vmem_limit_bytes=48 * 1024 * 1024),   # fits v7x's 64 MiB/TC with headroom
    )(*args)[:, 0, :]                                                         # (B, 512)
    # Tiny (B,512)@(512,num_classes) linear + bias: cheaper in XLA than a lane-sparse
    # Pallas store, and it drops one kernel launch.
    return pooled @ p["w_out"] + p["b_out"]


# ----------------------------------------------------------------------------- params
def _bn_scale_shift(key):
    kg, kb, km, kv = jax.random.split(key, 4)
    gamma = 1.0 + 0.1 * jax.random.normal(kg, (1, D_MODEL), jnp.float32)
    beta = 0.1 * jax.random.normal(kb, (1, D_MODEL), jnp.float32)
    r_mean = 0.05 * jax.random.normal(km, (1, D_MODEL), jnp.float32)
    r_var = 1.0 + 0.2 * jax.random.uniform(kv, (1, D_MODEL), jnp.float32)
    scale = gamma / jnp.sqrt(r_var + EPS)
    shift = beta - r_mean * scale
    return scale, shift


def _combined_conv_weight(w39, w19, w9):
    # Zero-embed the ks=19 and ks=9 conv weights into the 39-tap frame so the three
    # branch convolutions become one (39*128, 384) matmul against a single im2col slab.
    wc = jnp.zeros((KMAX, NF, 3 * NF), jnp.float32)
    wc = wc.at[:, :, 0:NF].set(w39)
    o19 = (KMAX - KS[1]) // 2                          # 10
    wc = wc.at[o19:o19 + KS[1], :, NF:2 * NF].set(w19)
    o9 = (KMAX - KS[2]) // 2                           # 15
    wc = wc.at[o9:o9 + KS[2], :, 2 * NF:3 * NF].set(w9)
    return wc.reshape(KMAX * NF, 3 * NF)


def init_params(key, feat_dim, num_layers, num_classes):
    keys = jax.random.split(key, 3 + num_layers)
    # Conv1d(feat_dim, d_model, k=1, bias=False) weight stored transposed (feat_dim, d_model),
    # with the * sqrt(d_model) scale folded in.
    w_proj = 0.1 * jax.random.normal(keys[0], (feat_dim, D_MODEL), jnp.float32)
    wb, wconv, wmp = [], [], []
    bn1s, bn1b, bn2s, bn2b = [], [], [], []
    for li in range(num_layers):
        k = jax.random.split(keys[1 + li], 7)
        wb.append(0.05 * jax.random.normal(k[0], (D_MODEL, NF), jnp.float32))
        w39 = 0.02 * jax.random.normal(k[1], (KS[0], NF, NF), jnp.float32)   # (tap, c_in, c_out)
        w19 = 0.03 * jax.random.normal(k[2], (KS[1], NF, NF), jnp.float32)
        w9 = 0.05 * jax.random.normal(k[3], (KS[2], NF, NF), jnp.float32)
        wconv.append(_combined_conv_weight(w39, w19, w9))
        wmp.append(0.05 * jax.random.normal(k[4], (D_MODEL, NF), jnp.float32))
        s1, b1 = _bn_scale_shift(k[5])
        s2, b2 = _bn_scale_shift(k[6])
        bn1s.append(s1); bn1b.append(b1); bn2s.append(s2); bn2b.append(b2)
    params = {
        "w_proj": (w_proj * math.sqrt(D_MODEL)).astype(jnp.float32),
        # matmul weights in bf16 (f32 accumulation inside the kernel)
        "wb": jnp.stack(wb).astype(jnp.bfloat16),        # (NL, 512, 128)
        "wconv": jnp.stack(wconv).astype(jnp.bfloat16),  # (NL, 39*128, 384)
        "wmp": jnp.stack(wmp).astype(jnp.bfloat16),      # (NL, 512, 128)
        # BN scale/shift stay f32 (VPU work)
        "bn1_scale": jnp.stack(bn1s), "bn1_shift": jnp.stack(bn1b),
        "bn2_scale": jnp.stack(bn2s), "bn2_shift": jnp.stack(bn2b),
        # Linear(d_model, num_classes) stored transposed; applied in XLA.
        "w_out": 0.05 * jax.random.normal(keys[1 + num_layers],
                                          (D_MODEL, num_classes), jnp.float32),
        "b_out": 0.1 * jax.random.normal(keys[2 + num_layers],
                                         (1, num_classes), jnp.float32),
    }
    return params


# ----------------------------------------------------------------------------- main
if __name__ == "__main__":
    B, FEAT, L = 2, 4, 16           # batch, feat_dim, seq_len (small)
    NUM_LAYERS, NUM_CLASSES = 2, 3  # d_model must be 512 (hard-coded nf=512//4)

    key = jax.random.PRNGKey(0)
    kx, kp = jax.random.split(key)
    X = jax.random.normal(kx, (B, FEAT, L), jnp.float32)
    params = init_params(kp, FEAT, NUM_LAYERS, NUM_CLASSES)

    fwd = jax.jit(ts_inception_only_classifier)
    out = fwd(params, X)
    jax.block_until_ready(out)
    assert out.shape == (B, NUM_CLASSES), out.shape
    assert bool(jnp.all(jnp.isfinite(out)))
    print("KERNEL_OK")
</pallas_src>

<mosaic_0001>
module attributes {stable_mosaic.version = 11 : i64} {
  func.func @_fused_kernel(%arg0: i32, %arg1: memref<1x16x4xf32, #tpu.memory_space<vmem>>, %arg2: memref<4x512xf32, #tpu.memory_space<vmem>>, %arg3: memref<2x512x128xbf16, #tpu.memory_space<vmem>>, %arg4: memref<2x4992x384xbf16, #tpu.memory_space<vmem>>, %arg5: memref<2x512x128xbf16, #tpu.memory_space<vmem>>, %arg6: memref<2x1x512xf32, #tpu.memory_space<vmem>>, %arg7: memref<2x1x512xf32, #tpu.memory_space<vmem>>, %arg8: memref<2x1x512xf32, #tpu.memory_space<vmem>>, %arg9: memref<2x1x512xf32, #tpu.memory_space<vmem>>, %arg10: memref<1x1x512xf32, #tpu.memory_space<vmem>>) attributes {dimension_semantics = [#tpu.dimension_semantics<parallel>], iteration_bounds = array<i64: 2>, scalar_prefetch = 0 : i64, scratch_operands = 0 : i64, tpu.core_type = #tpu.core_type<tc>, window_params = [{transform_indices = @transform_0, window_bounds = array<i64: 1, 16, 4>}, {pipeline_mode = #tpu.pipeline_mode<synchronous>, transform_indices = @transform_1, window_bounds = array<i64: 4, 512>}, {pipeline_mode = #tpu.pipeline_mode<synchronous>, transform_indices = @transform_2, window_bounds = array<i64: 2, 512, 128>}, {pipeline_mode = #tpu.pipeline_mode<synchronous>, transform_indices = @transform_3, window_bounds = array<i64: 2, 4992, 384>}, {pipeline_mode = #tpu.pipeline_mode<synchronous>, transform_indices = @transform_4, window_bounds = array<i64: 2, 512, 128>}, {pipeline_mode = #tpu.pipeline_mode<synchronous>, transform_indices = @transform_5, window_bounds = array<i64: 2, 1, 512>}, {pipeline_mode = #tpu.pipeline_mode<synchronous>, transform_indices = @transform_6, window_bounds = array<i64: 2, 1, 512>}, {pipeline_mode = #tpu.pipeline_mode<synchronous>, transform_indices = @transform_7, window_bounds = array<i64: 2, 1, 512>}, {pipeline_mode = #tpu.pipeline_mode<synchronous>, transform_indices = @transform_8, window_bounds = array<i64: 2, 1, 512>}, {transform_indices = @transform_9, window_bounds = array<i64: 1, 1, 512>}]} {
    %c0 = arith.constant 0 : index
    %c0_0 = arith.constant 0 : index
    %c0_1 = arith.constant 0 : index
    %0 = vector.load %arg1[%c0, %c0_0, %c0_1] : memref<1x16x4xf32, #tpu.memory_space<vmem>>, vector<1x16x4xf32>
    %1 = vector.shape_cast %0 : vector<1x16x4xf32> to vector<16x4xf32>
    %c0_2 = arith.constant 0 : index
    %c0_3 = arith.constant 0 : index
    %2 = vector.load %arg2[%c0_2, %c0_3] : memref<4x512xf32, #tpu.memory_space<vmem>>, vector<4x512xf32>
    %cst = arith.constant dense<0.000000e+00> : vector<16x512xf32>
    %3 = tpu.matmul %1, %2, %cst {dimension_numbers = #tpu.dot_dimension_numbers<[1], [0], [0], [1], [0, 0, 1, 1], [], []>} : vector<16x4xf32>, vector<4x512xf32>, vector<16x512xf32> -> vector<16x512xf32>
    %4 = arith.truncf %3 : vector<16x512xf32> to vector<16x512xbf16>
    %c0_4 = arith.constant 0 : index
    %c0_5 = arith.constant 0 : index
    %c0_6 = arith.constant 0 : index
    %5 = vector.load %arg3[%c0_4, %c0_5, %c0_6] : memref<2x512x128xbf16, #tpu.memory_space<vmem>>, vector<1x512x128xbf16>
    %6 = vector.shape_cast %5 : vector<1x512x128xbf16> to vector<512x128xbf16>
    %cst_7 = arith.constant dense<0.000000e+00> : vector<16x128xf32>
    %7 = tpu.matmul %4, %6, %cst_7 {dimension_numbers = #tpu.dot_dimension_numbers<[1], [0], [0], [1], [0, 0, 1, 1], [], []>} : vector<16x512xbf16>, vector<512x128xbf16>, vector<16x128xf32> -> vector<16x128xf32>
    %8 = vector.shape_cast %7 : vector<16x128xf32> to vector<1x16x128xf32>
    %cst_8 = arith.constant 0.000000e+00 : f32
    %9 = vector.broadcast %cst_8 : f32 to vector<1x19x128xf32>
    %10 = tpu.concatenate %9, %8, %9 in 1 : vector<1x19x128xf32>, vector<1x16x128xf32>, vector<1x19x128xf32> -> vector<1x54x128xf32>
    %11 = vector.extract_strided_slice %10 {offsets = [0, 0, 0], sizes = [1, 16, 128], strides = [1, 1, 1]} : vector<1x54x128xf32> to vector<1x16x128xf32>
    %12 = vector.extract_strided_slice %10 {offsets = [0, 1, 0], sizes = [1, 16, 128], strides = [1, 1, 1]} : vector<1x54x128xf32> to vector<1x16x128xf32>
    %13 = vector.extract_strided_slice %10 {offsets = [0, 2, 0], sizes = [1, 16, 128], strides = [1, 1, 1]} : vector<1x54x128xf32> to vector<1x16x128xf32>
    %14 = vector.extract_strided_slice %10 {offsets = [0, 3, 0], sizes = [1, 16, 128], strides = [1, 1, 1]} : vector<1x54x128xf32> to vector<1x16x128xf32>
    %15 = vector.extract_strided_slice %10 {offsets = [0, 4, 0], sizes = [1, 16, 128], strides = [1, 1, 1]} : vector<1x54x128xf32> to vector<1x16x128xf32>
    %16 = vector.extract_strided_slice %10 {offsets = [0, 5, 0], sizes = [1, 16, 128], strides = [1, 1, 1]} : vector<1x54x128xf32> to vector<1x16x128xf32>
    %17 = vector.extract_strided_slice %10 {offsets = [0, 6, 0], sizes = [1, 16, 128], strides = [1, 1, 1]} : vector<1x54x128xf32> to vector<1x16x128xf32>
    %18 = vector.extract_strided_slice %10 {offsets = [0, 7, 0], sizes = [1, 16, 128], strides = [1, 1, 1]} : vector<1x54x128xf32> to vector<1x16x128xf32>
    %19 = vector.extract_strided_slice %10 {offsets = [0, 8, 0], sizes = [1, 16, 128], strides = [1, 1, 1]} : vector<1x54x128xf32> to vector<1x16x128xf32>
    %20 = vector.extract_strided_slice %10 {offsets = [0, 9, 0], sizes = [1, 16, 128], strides = [1, 1, 1]} : vector<1x54x128xf32> to vector<1x16x128xf32>
    %21 = vector.extract_strided_slice %10 {offsets = [0, 10, 0], sizes = [1, 16, 128], strides = [1, 1, 1]} : vector<1x54x128xf32> to vector<1x16x128xf32>
    %22 = vector.extract_strided_slice %10 {offsets = [0, 11, 0], sizes = [1, 16, 128], strides = [1, 1, 1]} : vector<1x54x128xf32> to vector<1x16x128xf32>
    %23 = vector.extract_strided_slice %10 {offsets = [0, 12, 0], sizes = [1, 16, 128], strides = [1, 1, 1]} : vector<1x54x128xf32> to vector<1x16x128xf32>
    %24 = vector.extract_strided_slice %10 {offsets = [0, 13, 0], sizes = [1, 16, 128], strides = [1, 1, 1]} : vector<1x54x128xf32> to vector<1x16x128xf32>
    %25 = vector.extract_strided_slice %10 {offsets = [0, 14, 0], sizes = [1, 16, 128], strides = [1, 1, 1]} : vector<1x54x128xf32> to vector<1x16x128xf32>
    %26 = vector.extract_strided_slice %10 {offsets = [0, 15, 0], sizes = [1, 16, 128], strides = [1, 1, 1]} : vector<1x54x128xf32> to vector<1x16x128xf32>
    %27 = vector.extract_strided_slice %10 {offsets = [0, 16, 0], sizes = [1, 16, 128], strides = [1, 1, 1]} : vector<1x54x128xf32> to vector<1x16x128xf32>
    %28 = vector.extract_strided_slice %10 {offsets = [0, 17, 0], sizes = [1, 16, 128], strides = [1, 1, 1]} : vector<1x54x128xf32> to vector<1x16x128xf32>
    %29 = vector.extract_strided_slice %10 {offsets = [0, 18, 0], sizes = [1, 16, 128], strides = [1, 1, 1]} : vector<1x54x128xf32> to vector<1x16x128xf32>
    %30 = vector.extract_strided_slice %10 {offsets = [0, 19, 0], sizes = [1, 16, 128], strides = [1, 1, 1]} : vector<1x54x128xf32> to vector<1x16x128xf32>
    %31 = vector.extract_strided_slice %10 {offsets = [0, 20, 0], sizes = [1, 16, 128], strides = [1, 1, 1]} : vector<1x54x128xf32> to vector<1x16x128xf32>
    %32 = vector.extract_strided_slice %10 {offsets = [0, 21, 0], sizes = [1, 16, 128], strides = [1, 1, 1]} : vector<1x54x128xf32> to vector<1x16x128xf32>
    %33 = vector.extract_strided_slice %10 {offsets = [0, 22, 0], sizes = [1, 16, 128], strides = [1, 1, 1]} : vector<1x54x128xf32> to vector<1x16x128xf32>
    %34 = vector.extract_strided_slice %10 {offsets = [0, 23, 0], sizes = [1, 16, 128], strides = [1, 1, 1]} : vector<1x54x128xf32> to vector<1x16x128xf32>
    %35 = vector.extract_strided_slice %10 {offsets = [0, 24, 0], sizes = [1, 16, 128], strides = [1, 1, 1]} : vector<1x54x128xf32> to vector<1x16x128xf32>
    %36 = vector.extract_strided_slice %10 {offsets = [0, 25, 0], sizes = [1, 16, 128], strides = [1, 1, 1]} : vector<1x54x128xf32> to vector<1x16x128xf32>
    %37 = vector.extract_strided_slice %10 {offsets = [0, 26, 0], sizes = [1, 16, 128], strides = [1, 1, 1]} : vector<1x54x128xf32> to vector<1x16x128xf32>
    %38 = vector.extract_strided_slice %10 {offsets = [0, 27, 0], sizes = [1, 16, 128], strides = [1, 1, 1]} : vector<1x54x128xf32> to vector<1x16x128xf32>
    %39 = vector.extract_strided_slice %10 {offsets = [0, 28, 0], sizes = [1, 16, 128], strides = [1, 1, 1]} : vector<1x54x128xf32> to vector<1x16x128xf32>
    %40 = vector.extract_strided_slice %10 {offsets = [0, 29, 0], sizes = [1, 16, 128], strides = [1, 1, 1]} : vector<1x54x128xf32> to vector<1x16x128xf32>
    %41 = vector.extract_strided_slice %10 {offsets = [0, 30, 0], sizes = [1, 16, 128], strides = [1, 1, 1]} : vector<1x54x128xf32> to vector<1x16x128xf32>
    %42 = vector.extract_strided_slice %10 {offsets = [0, 31, 0], sizes = [1, 16, 128], strides = [1, 1, 1]} : vector<1x54x128xf32> to vector<1x16x128xf32>
    %43 = vector.extract_strided_slice %10 {offsets = [0, 32, 0], sizes = [1, 16, 128], strides = [1, 1, 1]} : vector<1x54x128xf32> to vector<1x16x128xf32>
    %44 = vector.extract_strided_slice %10 {offsets = [0, 33, 0], sizes = [1, 16, 128], strides = [1, 1, 1]} : vector<1x54x128xf32> to vector<1x16x128xf32>
    %45 = vector.extract_strided_slice %10 {offsets = [0, 34, 0], sizes = [1, 16, 128], strides = [1, 1, 1]} : vector<1x54x128xf32> to vector<1x16x128xf32>
    %46 = vector.extract_strided_slice %10 {offsets = [0, 35, 0], sizes = [1, 16, 128], strides = [1, 1, 1]} : vector<1x54x128xf32> to vector<1x16x128xf32>
    %47 = vector.extract_strided_slice %10 {offsets = [0, 36, 0], sizes = [1, 16, 128], strides = [1, 1, 1]} : vector<1x54x128xf32> to vector<1x16x128xf32>
    %48 = vector.extract_strided_slice %10 {offsets = [0, 37, 0], sizes = [1, 16, 128], strides = [1, 1, 1]} : vector<1x54x128xf32> to vector<1x16x128xf32>
    %49 = vector.extract_strided_slice %10 {offsets = [0, 38, 0], sizes = [1, 16, 128], strides = [1, 1, 1]} : vector<1x54x128xf32> to vector<1x16x128xf32>
    %50 = tpu.concatenate %11, %12, %13, %14, %15, %16, %17, %18, %19, %20, %21, %22, %23, %24, %25, %26 in 2 : vector<1x16x128xf32>, vector<1x16x128xf32>, vector<1x16x128xf32>, vector<1x16x128xf32>, vector<1x16x128xf32>, vector<1x16x128xf32>, vector<1x16x128xf32>, vector<1x16x128xf32>, vector<1x16x128xf32>, vector<1x16x128xf32>, vector<1x16x128xf32>, vector<1x16x128xf32>, vector<1x16x128xf32>, vector<1x16x128xf32>, vector<1x16x128xf32>, vector<1x16x128xf32> -> vector<1x16x2048xf32>
    %51 = tpu.concatenate %27, %28, %29, %30, %31, %32, %33, %34, %35, %36, %37, %38, %39, %40, %41, %42 in 2 : vector<1x16x128xf32>, vector<1x16x128xf32>, vector<1x16x128xf32>, vector<1x16x128xf32>, vector<1x16x128xf32>, vector<1x16x128xf32>, vector<1x16x128xf32>, vector<1x16x128xf32>, vector<1x16x128xf32>, vector<1x16x128xf32>, vector<1x16x128xf32>, vector<1x16x128xf32>, vector<1x16x128xf32>, vector<1x16x128xf32>, vector<1x16x128xf32>, vector<1x16x128xf32> -> vector<1x16x2048xf32>
    %52 = tpu.concatenate %43, %44, %45, %46, %47, %48, %49 in 2 : vector<1x16x128xf32>, vector<1x16x128xf32>, vector<1x16x128xf32>, vector<1x16x128xf32>, vector<1x16x128xf32>, vector<1x16x128xf32>, vector<1x16x128xf32> -> vector<1x16x896xf32>
    %53 = tpu.concatenate %50, %51, %52 in 2 : vector<1x16x2048xf32>, vector<1x16x2048xf32>, vector<1x16x896xf32> -> vector<1x16x4992xf32>
    %54 = vector.shape_cast %53 : vector<1x16x4992xf32> to vector<16x4992xf32>
    %55 = arith.truncf %54 : vector<16x4992xf32> to vector<16x4992xbf16>
    %c0_9 = arith.constant 0 : index
    %c0_10 = arith.constant 0 : index
    %c0_11 = arith.constant 0 : index
    %56 = vector.load %arg4[%c0_9, %c0_10, %c0_11] : memref<2x4992x384xbf16, #tpu.memory_space<vmem>>, vector<1x4992x384xbf16>
    %57 = vector.shape_cast %56 : vector<1x4992x384xbf16> to vector<4992x384xbf16>
    %cst_12 = arith.constant dense<0.000000e+00> : vector<16x384xf32>
    %58 = tpu.matmul %55, %57, %cst_12 {dimension_numbers = #tpu.dot_dimension_numbers<[1], [0], [0], [1], [0, 0, 1, 1], [], []>} : vector<16x4992xbf16>, vector<4992x384xbf16>, vector<16x384xf32> -> vector<16x384xf32>
    %59 = vector.shape_cast %3 : vector<16x512xf32> to vector<1x16x512xf32>
    %cst_13 = arith.constant 0xFF800000 : f32
    %60 = vector.broadcast %cst_13 : f32 to vector<1x1x512xf32>
    %61 = tpu.concatenate %60, %59, %60 in 1 : vector<1x1x512xf32>, vector<1x16x512xf32>, vector<1x1x512xf32> -> vector<1x18x512xf32>
    %62 = vector.extract_strided_slice %61 {offsets = [0, 0, 0], sizes = [1, 16, 512], strides = [1, 1, 1]} : vector<1x18x512xf32> to vector<1x16x512xf32>
    %63 = vector.extract_strided_slice %61 {offsets = [0, 1, 0], sizes = [1, 16, 512], strides = [1, 1, 1]} : vector<1x18x512xf32> to vector<1x16x512xf32>
    %64 = arith.maximumf %62, %63 : vector<1x16x512xf32>
    %65 = vector.extract_strided_slice %61 {offsets = [0, 2, 0], sizes = [1, 16, 512], strides = [1, 1, 1]} : vector<1x18x512xf32> to vector<1x16x512xf32>
    %66 = arith.maximumf %64, %65 : vector<1x16x512xf32>
    %67 = vector.shape_cast %66 : vector<1x16x512xf32> to vector<16x512xf32>
    %68 = arith.truncf %67 : vector<16x512xf32> to vector<16x512xbf16>
    %c0_14 = arith.constant 0 : index
    %c0_15 = arith.constant 0 : index
    %c0_16 = arith.constant 0 : index
    %69 = vector.load %arg5[%c0_14, %c0_15, %c0_16] : memref<2x512x128xbf16, #tpu.memory_space<vmem>>, vector<1x512x128xbf16>
    %70 = vector.shape_cast %69 : vector<1x512x128xbf16> to vector<512x128xbf16>
    %cst_17 = arith.constant dense<0.000000e+00> : vector<16x128xf32>
    %71 = tpu.matmul %68, %70, %cst_17 {dimension_numbers = #tpu.dot_dimension_numbers<[1], [0], [0], [1], [0, 0, 1, 1], [], []>} : vector<16x512xbf16>, vector<512x128xbf16>, vector<16x128xf32> -> vector<16x128xf32>
    %72 = tpu.concatenate %58, %71 in 1 : vector<16x384xf32>, vector<16x128xf32> -> vector<16x512xf32>
    %c0_18 = arith.constant 0 : index
    %c0_19 = arith.constant 0 : index
    %c0_20 = arith.constant 0 : index
    %73 = vector.load %arg6[%c0_18, %c0_19, %c0_20] : memref<2x1x512xf32, #tpu.memory_space<vmem>>, vector<1x1x512xf32>
    %74 = vector.shape_cast %73 : vector<1x1x512xf32> to vector<1x512xf32>
    %75 = vector.broadcast %74 : vector<1x512xf32> to vector<16x512xf32>
    %76 = arith.mulf %72, %75 : vector<16x512xf32>
    %c0_21 = arith.constant 0 : index
    %c0_22 = arith.constant 0 : index
    %c0_23 = arith.constant 0 : index
    %77 = vector.load %arg7[%c0_21, %c0_22, %c0_23] : memref<2x1x512xf32, #tpu.memory_space<vmem>>, vector<1x1x512xf32>
    %78 = vector.shape_cast %77 : vector<1x1x512xf32> to vector<1x512xf32>
    %79 = vector.broadcast %78 : vector<1x512xf32> to vector<16x512xf32>
    %80 = arith.addf %76, %79 : vector<16x512xf32>
    %cst_24 = arith.constant 0.000000e+00 : f32
    %81 = vector.broadcast %cst_24 : f32 to vector<16x512xf32>
    %82 = arith.maximumf %80, %81 : vector<16x512xf32>
    %83 = arith.addf %3, %82 : vector<16x512xf32>
    %c0_25 = arith.constant 0 : index
    %c0_26 = arith.constant 0 : index
    %c0_27 = arith.constant 0 : index
    %84 = vector.load %arg8[%c0_25, %c0_26, %c0_27] : memref<2x1x512xf32, #tpu.memory_space<vmem>>, vector<1x1x512xf32>
    %85 = vector.shape_cast %84 : vector<1x1x512xf32> to vector<1x512xf32>
    %86 = vector.broadcast %85 : vector<1x512xf32> to vector<16x512xf32>
    %87 = arith.mulf %83, %86 : vector<16x512xf32>
    %c0_28 = arith.constant 0 : index
    %c0_29 = arith.constant 0 : index
    %c0_30 = arith.constant 0 : index
    %88 = vector.load %arg9[%c0_28, %c0_29, %c0_30] : memref<2x1x512xf32, #tpu.memory_space<vmem>>, vector<1x1x512xf32>
    %89 = vector.shape_cast %88 : vector<1x1x512xf32> to vector<1x512xf32>
    %90 = vector.broadcast %89 : vector<1x512xf32> to vector<16x512xf32>
    %91 = arith.addf %87, %90 : vector<16x512xf32>
    %92 = arith.truncf %91 : vector<16x512xf32> to vector<16x512xbf16>
    %c1 = arith.constant 1 : index
    %c0_31 = arith.constant 0 : index
    %c0_32 = arith.constant 0 : index
    %93 = vector.load %arg3[%c1, %c0_31, %c0_32] : memref<2x512x128xbf16, #tpu.memory_space<vmem>>, vector<1x512x128xbf16>
    %94 = vector.shape_cast %93 : vector<1x512x128xbf16> to vector<512x128xbf16>
    %cst_33 = arith.constant dense<0.000000e+00> : vector<16x128xf32>
    %95 = tpu.matmul %92, %94, %cst_33 {dimension_numbers = #tpu.dot_dimension_numbers<[1], [0], [0], [1], [0, 0, 1, 1], [], []>} : vector<16x512xbf16>, vector<512x128xbf16>, vector<16x128xf32> -> vector<16x128xf32>
    %96 = vector.shape_cast %95 : vector<16x128xf32> to vector<1x16x128xf32>
    %cst_34 = arith.constant 0.000000e+00 : f32
    %97 = vector.broadcast %cst_34 : f32 to vector<1x19x128xf32>
    %98 = tpu.concatenate %97, %96, %97 in 1 : vector<1x19x128xf32>, vector<1x16x128xf32>, vector<1x19x128xf32> -> vector<1x54x128xf32>
    %99 = vector.extract_strided_slice %98 {offsets = [0, 0, 0], sizes = [1, 16, 128], strides = [1, 1, 1]} : vector<1x54x128xf32> to vector<1x16x128xf32>
    %100 = vector.extract_strided_slice %98 {offsets = [0, 1, 0], sizes = [1, 16, 128], strides = [1, 1, 1]} : vector<1x54x128xf32> to vector<1x16x128xf32>
    %101 = vector.extract_strided_slice %98 {offsets = [0, 2, 0], sizes = [1, 16, 128], strides = [1, 1, 1]} : vector<1x54x128xf32> to vector<1x16x128xf32>
    %102 = vector.extract_strided_slice %98 {offsets = [0, 3, 0], sizes = [1, 16, 128], strides = [1, 1, 1]} : vector<1x54x128xf32> to vector<1x16x128xf32>
    %103 = vector.extract_strided_slice %98 {offsets = [0, 4, 0], sizes = [1, 16, 128], strides = [1, 1, 1]} : vector<1x54x128xf32> to vector<1x16x128xf32>
    %104 = vector.extract_strided_slice %98 {offsets = [0, 5, 0], sizes = [1, 16, 128], strides = [1, 1, 1]} : vector<1x54x128xf32> to vector<1x16x128xf32>
    %105 = vector.extract_strided_slice %98 {offsets = [0, 6, 0], sizes = [1, 16, 128], strides = [1, 1, 1]} : vector<1x54x128xf32> to vector<1x16x128xf32>
    %106 = vector.extract_strided_slice %98 {offsets = [0, 7, 0], sizes = [1, 16, 128], strides = [1, 1, 1]} : vector<1x54x128xf32> to vector<1x16x128xf32>
    %107 = vector.extract_strided_slice %98 {offsets = [0, 8, 0], sizes = [1, 16, 128], strides = [1, 1, 1]} : vector<1x54x128xf32> to vector<1x16x128xf32>
    %108 = vector.extract_strided_slice %98 {offsets = [0, 9, 0], sizes = [1, 16, 128], strides = [1, 1, 1]} : vector<1x54x128xf32> to vector<1x16x128xf32>
    %109 = vector.extract_strided_slice %98 {offsets = [0, 10, 0], sizes = [1, 16, 128], strides = [1, 1, 1]} : vector<1x54x128xf32> to vector<1x16x128xf32>
    %110 = vector.extract_strided_slice %98 {offsets = [0, 11, 0], sizes = [1, 16, 128], strides = [1, 1, 1]} : vector<1x54x128xf32> to vector<1x16x128xf32>
    %111 = vector.extract_strided_slice %98 {offsets = [0, 12, 0], sizes = [1, 16, 128], strides = [1, 1, 1]} : vector<1x54x128xf32> to vector<1x16x128xf32>
    %112 = vector.extract_strided_slice %98 {offsets = [0, 13, 0], sizes = [1, 16, 128], strides = [1, 1, 1]} : vector<1x54x128xf32> to vector<1x16x128xf32>
    %113 = vector.extract_strided_slice %98 {offsets = [0, 14, 0], sizes = [1, 16, 128], strides = [1, 1, 1]} : vector<1x54x128xf32> to vector<1x16x128xf32>
    %114 = vector.extract_strided_slice %98 {offsets = [0, 15, 0], sizes = [1, 16, 128], strides = [1, 1, 1]} : vector<1x54x128xf32> to vector<1x16x128xf32>
    %115 = vector.extract_strided_slice %98 {offsets = [0, 16, 0], sizes = [1, 16, 128], strides = [1, 1, 1]} : vector<1x54x128xf32> to vector<1x16x128xf32>
    %116 = vector.extract_strided_slice %98 {offsets = [0, 17, 0], sizes = [1, 16, 128], strides = [1, 1, 1]} : vector<1x54x128xf32> to vector<1x16x128xf32>
    %117 = vector.extract_strided_slice %98 {offsets = [0, 18, 0], sizes = [1, 16, 128], strides = [1, 1, 1]} : vector<1x54x128xf32> to vector<1x16x128xf32>
    %118 = vector.extract_strided_slice %98 {offsets = [0, 19, 0], sizes = [1, 16, 128], strides = [1, 1, 1]} : vector<1x54x128xf32> to vector<1x16x128xf32>
    %119 = vector.extract_strided_slice %98 {offsets = [0, 20, 0], sizes = [1, 16, 128], strides = [1, 1, 1]} : vector<1x54x128xf32> to vector<1x16x128xf32>
    %120 = vector.extract_strided_slice %98 {offsets = [0, 21, 0], sizes = [1, 16, 128], strides = [1, 1, 1]} : vector<1x54x128xf32> to vector<1x16x128xf32>
    %121 = vector.extract_strided_slice %98 {offsets = [0, 22, 0], sizes = [1, 16, 128], strides = [1, 1, 1]} : vector<1x54x128xf32> to vector<1x16x128xf32>
    %122 = vector.extract_strided_slice %98 {offsets = [0, 23, 0], sizes = [1, 16, 128], strides = [1, 1, 1]} : vector<1x54x128xf32> to vector<1x16x128xf32>
    %123 = vector.extract_strided_slice %98 {offsets = [0, 24, 0], sizes = [1, 16, 128], strides = [1, 1, 1]} : vector<1x54x128xf32> to vector<1x16x128xf32>
    %124 = vector.extract_strided_slice %98 {offsets = [0, 25, 0], sizes = [1, 16, 128], strides = [1, 1, 1]} : vector<1x54x128xf32> to vector<1x16x128xf32>
    %125 = vector.extract_strided_slice %98 {offsets = [0, 26, 0], sizes = [1, 16, 128], strides = [1, 1, 1]} : vector<1x54x128xf32> to vector<1x16x128xf32>
    %126 = vector.extract_strided_slice %98 {offsets = [0, 27, 0], sizes = [1, 16, 128], strides = [1, 1, 1]} : vector<1x54x128xf32> to vector<1x16x128xf32>
    %127 = vector.extract_strided_slice %98 {offsets = [0, 28, 0], sizes = [1, 16, 128], strides = [1, 1, 1]} : vector<1x54x128xf32> to vector<1x16x128xf32>
    %128 = vector.extract_strided_slice %98 {offsets = [0, 29, 0], sizes = [1, 16, 128], strides = [1, 1, 1]} : vector<1x54x128xf32> to vector<1x16x128xf32>
    %129 = vector.extract_strided_slice %98 {offsets = [0, 30, 0], sizes = [1, 16, 128], strides = [1, 1, 1]} : vector<1x54x128xf32> to vector<1x16x128xf32>
    %130 = vector.extract_strided_slice %98 {offsets = [0, 31, 0], sizes = [1, 16, 128], strides = [1, 1, 1]} : vector<1x54x128xf32> to vector<1x16x128xf32>
    %131 = vector.extract_strided_slice %98 {offsets = [0, 32, 0], sizes = [1, 16, 128], strides = [1, 1, 1]} : vector<1x54x128xf32> to vector<1x16x128xf32>
    %132 = vector.extract_strided_slice %98 {offsets = [0, 33, 0], sizes = [1, 16, 128], strides = [1, 1, 1]} : vector<1x54x128xf32> to vector<1x16x128xf32>
    %133 = vector.extract_strided_slice %98 {offsets = [0, 34, 0], sizes = [1, 16, 128], strides = [1, 1, 1]} : vector<1x54x128xf32> to vector<1x16x128xf32>
    %134 = vector.extract_strided_slice %98 {offsets = [0, 35, 0], sizes = [1, 16, 128], strides = [1, 1, 1]} : vector<1x54x128xf32> to vector<1x16x128xf32>
    %135 = vector.extract_strided_slice %98 {offsets = [0, 36, 0], sizes = [1, 16, 128], strides = [1, 1, 1]} : vector<1x54x128xf32> to vector<1x16x128xf32>
    %136 = vector.extract_strided_slice %98 {offsets = [0, 37, 0], sizes = [1, 16, 128], strides = [1, 1, 1]} : vector<1x54x128xf32> to vector<1x16x128xf32>
    %137 = vector.extract_strided_slice %98 {offsets = [0, 38, 0], sizes = [1, 16, 128], strides = [1, 1, 1]} : vector<1x54x128xf32> to vector<1x16x128xf32>
    %138 = tpu.concatenate %99, %100, %101, %102, %103, %104, %105, %106, %107, %108, %109, %110, %111, %112, %113, %114 in 2 : vector<1x16x128xf32>, vector<1x16x128xf32>, vector<1x16x128xf32>, vector<1x16x128xf32>, vector<1x16x128xf32>, vector<1x16x128xf32>, vector<1x16x128xf32>, vector<1x16x128xf32>, vector<1x16x128xf32>, vector<1x16x128xf32>, vector<1x16x128xf32>, vector<1x16x128xf32>, vector<1x16x128xf32>, vector<1x16x128xf32>, vector<1x16x128xf32>, vector<1x16x128xf32> -> vector<1x16x2048xf32>
    %139 = tpu.concatenate %115, %116, %117, %118, %119, %120, %121, %122, %123, %124, %125, %126, %127, %128, %129, %130 in 2 : vector<1x16x128xf32>, vector<1x16x128xf32>, vector<1x16x128xf32>, vector<1x16x128xf32>, vector<1x16x128xf32>, vector<1x16x128xf32>, vector<1x16x128xf32>, vector<1x16x128xf32>, vector<1x16x128xf32>, vector<1x16x128xf32>, vector<1x16x128xf32>, vector<1x16x128xf32>, vector<1x16x128xf32>, vector<1x16x128xf32>, vector<1x16x128xf32>, vector<1x16x128xf32> -> vector<1x16x2048xf32>
    %140 = tpu.concatenate %131, %132, %133, %134, %135, %136, %137 in 2 : vector<1x16x128xf32>, vector<1x16x128xf32>, vector<1x16x128xf32>, vector<1x16x128xf32>, vector<1x16x128xf32>, vector<1x16x128xf32>, vector<1x16x128xf32> -> vector<1x16x896xf32>
    %141 = tpu.concatenate %138, %139, %140 in 2 : vector<1x16x2048xf32>, vector<1x16x2048xf32>, vector<1x16x896xf32> -> vector<1x16x4992xf32>
    %142 = vector.shape_cast %141 : vector<1x16x4992xf32> to vector<16x4992xf32>
    %143 = arith.truncf %142 : vector<16x4992xf32> to vector<16x4992xbf16>
    %c1_35 = arith.constant 1 : index
    %c0_36 = arith.constant 0 : index
    %c0_37 = arith.constant 0 : index
    %144 = vector.load %arg4[%c1_35, %c0_36, %c0_37] : memref<2x4992x384xbf16, #tpu.memory_space<vmem>>, vector<1x4992x384xbf16>
    %145 = vector.shape_cast %144 : vector<1x4992x384xbf16> to vector<4992x384xbf16>
    %cst_38 = arith.constant dense<0.000000e+00> : vector<16x384xf32>
    %146 = tpu.matmul %143, %145, %cst_38 {dimension_numbers = #tpu.dot_dimension_numbers<[1], [0], [0], [1], [0, 0, 1, 1], [], []>} : vector<16x4992xbf16>, vector<4992x384xbf16>, vector<16x384xf32> -> vector<16x384xf32>
    %147 = vector.shape_cast %91 : vector<16x512xf32> to vector<1x16x512xf32>
    %cst_39 = arith.constant 0xFF800000 : f32
    %148 = vector.broadcast %cst_39 : f32 to vector<1x1x512xf32>
    %149 = tpu.concatenate %148, %147, %148 in 1 : vector<1x1x512xf32>, vector<1x16x512xf32>, vector<1x1x512xf32> -> vector<1x18x512xf32>
    %150 = vector.extract_strided_slice %149 {offsets = [0, 0, 0], sizes = [1, 16, 512], strides = [1, 1, 1]} : vector<1x18x512xf32> to vector<1x16x512xf32>
    %151 = vector.extract_strided_slice %149 {offsets = [0, 1, 0], sizes = [1, 16, 512], strides = [1, 1, 1]} : vector<1x18x512xf32> to vector<1x16x512xf32>
    %152 = arith.maximumf %150, %151 : vector<1x16x512xf32>
    %153 = vector.extract_strided_slice %149 {offsets = [0, 2, 0], sizes = [1, 16, 512], strides = [1, 1, 1]} : vector<1x18x512xf32> to vector<1x16x512xf32>
    %154 = arith.maximumf %152, %153 : vector<1x16x512xf32>
    %155 = vector.shape_cast %154 : vector<1x16x512xf32> to vector<16x512xf32>
    %156 = arith.truncf %155 : vector<16x512xf32> to vector<16x512xbf16>
    %c1_40 = arith.constant 1 : index
    %c0_41 = arith.constant 0 : index
    %c0_42 = arith.constant 0 : index
    %157 = vector.load %arg5[%c1_40, %c0_41, %c0_42] : memref<2x512x128xbf16, #tpu.memory_space<vmem>>, vector<1x512x128xbf16>
    %158 = vector.shape_cast %157 : vector<1x512x128xbf16> to vector<512x128xbf16>
    %cst_43 = arith.constant dense<0.000000e+00> : vector<16x128xf32>
    %159 = tpu.matmul %156, %158, %cst_43 {dimension_numbers = #tpu.dot_dimension_numbers<[1], [0], [0], [1], [0, 0, 1, 1], [], []>} : vector<16x512xbf16>, vector<512x128xbf16>, vector<16x128xf32> -> vector<16x128xf32>
    %160 = tpu.concatenate %146, %159 in 1 : vector<16x384xf32>, vector<16x128xf32> -> vector<16x512xf32>
    %c1_44 = arith.constant 1 : index
    %c0_45 = arith.constant 0 : index
    %c0_46 = arith.constant 0 : index
    %161 = vector.load %arg6[%c1_44, %c0_45, %c0_46] : memref<2x1x512xf32, #tpu.memory_space<vmem>>, vector<1x1x512xf32>
    %162 = vector.shape_cast %161 : vector<1x1x512xf32> to vector<1x512xf32>
    %163 = vector.broadcast %162 : vector<1x512xf32> to vector<16x512xf32>
    %164 = arith.mulf %160, %163 : vector<16x512xf32>
    %c1_47 = arith.constant 1 : index
    %c0_48 = arith.constant 0 : index
    %c0_49 = arith.constant 0 : index
    %165 = vector.load %arg7[%c1_47, %c0_48, %c0_49] : memref<2x1x512xf32, #tpu.memory_space<vmem>>, vector<1x1x512xf32>
    %166 = vector.shape_cast %165 : vector<1x1x512xf32> to vector<1x512xf32>
    %167 = vector.broadcast %166 : vector<1x512xf32> to vector<16x512xf32>
    %168 = arith.addf %164, %167 : vector<16x512xf32>
    %cst_50 = arith.constant 0.000000e+00 : f32
    %169 = vector.broadcast %cst_50 : f32 to vector<16x512xf32>
    %170 = arith.maximumf %168, %169 : vector<16x512xf32>
    %171 = arith.addf %91, %170 : vector<16x512xf32>
    %c1_51 = arith.constant 1 : index
    %c0_52 = arith.constant 0 : index
    %c0_53 = arith.constant 0 : index
    %172 = vector.load %arg8[%c1_51, %c0_52, %c0_53] : memref<2x1x512xf32, #tpu.memory_space<vmem>>, vector<1x1x512xf32>
    %173 = vector.shape_cast %172 : vector<1x1x512xf32> to vector<1x512xf32>
    %174 = vector.broadcast %173 : vector<1x512xf32> to vector<16x512xf32>
    %175 = arith.mulf %171, %174 : vector<16x512xf32>
    %c1_54 = arith.constant 1 : index
    %c0_55 = arith.constant 0 : index
    %c0_56 = arith.constant 0 : index
    %176 = vector.load %arg9[%c1_54, %c0_55, %c0_56] : memref<2x1x512xf32, #tpu.memory_space<vmem>>, vector<1x1x512xf32>
    %177 = vector.shape_cast %176 : vector<1x1x512xf32> to vector<1x512xf32>
    %178 = vector.broadcast %177 : vector<1x512xf32> to vector<16x512xf32>
    %179 = arith.addf %175, %178 : vector<16x512xf32>
    %cst_57 = arith.constant 5.000000e-01 : f32
    %180 = vector.broadcast %cst_57 : f32 to vector<16x512xf32>
    %181 = arith.mulf %180, %179 : vector<16x512xf32>
    %cst_58 = arith.constant 0.707106769 : f32
    %182 = vector.broadcast %cst_58 : f32 to vector<16x512xf32>
    %183 = arith.mulf %179, %182 : vector<16x512xf32>
    %cst_59 = arith.constant -4.000000e+00 : f32
    %cst_60 = arith.constant 4.000000e+00 : f32
    %184 = vector.broadcast %cst_59 : f32 to vector<16x512xf32>
    %185 = arith.maximumf %184, %183 : vector<16x512xf32>
    %186 = vector.broadcast %cst_60 : f32 to vector<16x512xf32>
    %187 = arith.minimumf %186, %185 : vector<16x512xf32>
    %188 = arith.mulf %187, %187 : vector<16x512xf32>
    %cst_61 = arith.constant -2.72614237E-10 : f32
    %189 = vector.broadcast %cst_61 : f32 to vector<16x512xf32>
    %190 = arith.mulf %189, %188 : vector<16x512xf32>
    %cst_62 = arith.constant 2.77068146E-8 : f32
    %191 = vector.broadcast %cst_62 : f32 to vector<16x512xf32>
    %192 = arith.addf %190, %191 : vector<16x512xf32>
    %193 = arith.mulf %192, %188 : vector<16x512xf32>
    %cst_63 = arith.constant -2.10102394E-6 : f32
    %194 = vector.broadcast %cst_63 : f32 to vector<16x512xf32>
    %195 = arith.addf %193, %194 : vector<16x512xf32>
    %196 = arith.mulf %195, %188 : vector<16x512xf32>
    %cst_64 = arith.constant -5.69250624E-5 : f32
    %197 = vector.broadcast %cst_64 : f32 to vector<16x512xf32>
    %198 = arith.addf %196, %197 : vector<16x512xf32>
    %199 = arith.mulf %198, %188 : vector<16x512xf32>
    %cst_65 = arith.constant -7.34990637E-4 : f32
    %200 = vector.broadcast %cst_65 : f32 to vector<16x512xf32>
    %201 = arith.addf %199, %200 : vector<16x512xf32>
    %202 = arith.mulf %201, %188 : vector<16x512xf32>
    %cst_66 = arith.constant -2.954600e-03 : f32
    %203 = vector.broadcast %cst_66 : f32 to vector<16x512xf32>
    %204 = arith.addf %202, %203 : vector<16x512xf32>
    %205 = arith.mulf %204, %188 : vector<16x512xf32>
    %cst_67 = arith.constant -0.0160960332 : f32
    %206 = vector.broadcast %cst_67 : f32 to vector<16x512xf32>
    %207 = arith.addf %205, %206 : vector<16x512xf32>
    %208 = arith.mulf %207, %187 : vector<16x512xf32>
    %cst_68 = arith.constant -1.45660715E-5 : f32
    %209 = vector.broadcast %cst_68 : f32 to vector<16x512xf32>
    %210 = arith.mulf %209, %188 : vector<16x512xf32>
    %cst_69 = arith.constant -2.13374049E-4 : f32
    %211 = vector.broadcast %cst_69 : f32 to vector<16x512xf32>
    %212 = arith.addf %210, %211 : vector<16x512xf32>
    %213 = arith.mulf %212, %188 : vector<16x512xf32>
    %cst_70 = arith.constant -0.00168282702 : f32
    %214 = vector.broadcast %cst_70 : f32 to vector<16x512xf32>
    %215 = arith.addf %213, %214 : vector<16x512xf32>
    %216 = arith.mulf %215, %188 : vector<16x512xf32>
    %cst_71 = arith.constant -0.00737332925 : f32
    %217 = vector.broadcast %cst_71 : f32 to vector<16x512xf32>
    %218 = arith.addf %216, %217 : vector<16x512xf32>
    %219 = arith.mulf %218, %188 : vector<16x512xf32>
    %cst_72 = arith.constant -0.0142647391 : f32
    %220 = vector.broadcast %cst_72 : f32 to vector<16x512xf32>
    %221 = arith.addf %219, %220 : vector<16x512xf32>
    %222 = arith.divf %208, %221 : vector<16x512xf32>
    %cst_73 = arith.constant 1.000000e+00 : f32
    %223 = vector.broadcast %cst_73 : f32 to vector<16x512xf32>
    %224 = arith.addf %223, %222 : vector<16x512xf32>
    %225 = arith.mulf %181, %224 : vector<16x512xf32>
    %226 = vector.shape_cast %225 : vector<16x512xf32> to vector<1x16x512xf32>
    %cst_74 = arith.constant dense<0.000000e+00> : vector<1x512xf32>
    %227 = vector.multi_reduction <add>, %226, %cst_74 [1] : vector<1x16x512xf32> to vector<1x512xf32>
    %228 = vector.shape_cast %227 : vector<1x512xf32> to vector<1x1x512xf32>
    %cst_75 = arith.constant 1.600000e+01 : f32
    %229 = vector.broadcast %cst_75 : f32 to vector<1x1x512xf32>
    %230 = arith.divf %228, %229 : vector<1x1x512xf32>
    %c0_76 = arith.constant 0 : index
    %c0_77 = arith.constant 0 : index
    %c0_78 = arith.constant 0 : index
    %231 = vector.load %arg10[%c0_76, %c0_77, %c0_78] : memref<1x1x512xf32, #tpu.memory_space<vmem>>, vector<1x1x512xf32>
    tpu.vector_store %arg10[%c0_76, %c0_77, %c0_78], %230 {strides = array<i32>} : memref<1x1x512xf32, #tpu.memory_space<vmem>>, vector<1x1x512xf32>,
    return
  }
  func.func @transform_0(%arg0: i32) -> (i32, i32, i32) {
    %c0_i32 = arith.constant 0 : i32
    %c0_i32_0 = arith.constant 0 : i32
    %c0_i32_1 = arith.constant 0 : i32
    return %arg0, %c0_i32, %c0_i32_0 : i32, i32, i32
  }
  func.func @transform_1(%arg0: i32) -> (i32, i32) {
    %c0_i32 = arith.constant 0 : i32
    %c0_i32_0 = arith.constant 0 : i32
    %c0_i32_1 = arith.constant 0 : i32
    return %c0_i32, %c0_i32_0 : i32, i32
  }
  func.func @transform_2(%arg0: i32) -> (i32, i32, i32) {
    %c0_i32 = arith.constant 0 : i32
    %c0_i32_0 = arith.constant 0 : i32
    %c0_i32_1 = arith.constant 0 : i32
    %c0_i32_2 = arith.constant 0 : i32
    return %c0_i32, %c0_i32_0, %c0_i32_1 : i32, i32, i32
  }
  func.func @transform_3(%arg0: i32) -> (i32, i32, i32) {
    %c0_i32 = arith.constant 0 : i32
    %c0_i32_0 = arith.constant 0 : i32
    %c0_i32_1 = arith.constant 0 : i32
    %c0_i32_2 = arith.constant 0 : i32
    return %c0_i32, %c0_i32_0, %c0_i32_1 : i32, i32, i32
  }
  func.func @transform_4(%arg0: i32) -> (i32, i32, i32) {
    %c0_i32 = arith.constant 0 : i32
    %c0_i32_0 = arith.constant 0 : i32
    %c0_i32_1 = arith.constant 0 : i32
    %c0_i32_2 = arith.constant 0 : i32
    return %c0_i32, %c0_i32_0, %c0_i32_1 : i32, i32, i32
  }
  func.func @transform_5(%arg0: i32) -> (i32, i32, i32) {
    %c0_i32 = arith.constant 0 : i32
    %c0_i32_0 = arith.constant 0 : i32
    %c0_i32_1 = arith.constant 0 : i32
    %c0_i32_2 = arith.constant 0 : i32
    return %c0_i32, %c0_i32_0, %c0_i32_1 : i32, i32, i32
  }
  func.func @transform_6(%arg0: i32) -> (i32, i32, i32) {
    %c0_i32 = arith.constant 0 : i32
    %c0_i32_0 = arith.constant 0 : i32
    %c0_i32_1 = arith.constant 0 : i32
    %c0_i32_2 = arith.constant 0 : i32
    return %c0_i32, %c0_i32_0, %c0_i32_1 : i32, i32, i32
  }
  func.func @transform_7(%arg0: i32) -> (i32, i32, i32) {
    %c0_i32 = arith.constant 0 : i32
    %c0_i32_0 = arith.constant 0 : i32
    %c0_i32_1 = arith.constant 0 : i32
    %c0_i32_2 = arith.constant 0 : i32
    return %c0_i32, %c0_i32_0, %c0_i32_1 : i32, i32, i32
  }
  func.func @transform_8(%arg0: i32) -> (i32, i32, i32) {
    %c0_i32 = arith.constant 0 : i32
    %c0_i32_0 = arith.constant 0 : i32
    %c0_i32_1 = arith.constant 0 : i32
    %c0_i32_2 = arith.constant 0 : i32
    return %c0_i32, %c0_i32_0, %c0_i32_1 : i32, i32, i32
  }
  func.func @transform_9(%arg0: i32) -> (i32, i32, i32) {
    %c0_i32 = arith.constant 0 : i32
    %c0_i32_0 = arith.constant 0 : i32
    %c0_i32_1 = arith.constant 0 : i32
    return %arg0, %c0_i32, %c0_i32_0 : i32, i32, i32
  }
}

</mosaic_0001>

<bundles_post_ra>
// kernel: ts_inception_only_classifier.1
= control target key start
LH: loop header
LB: loop body
LE: loop exit
PB: predicated region body
PF: predicated region fallthrough
CT: control target
= control target key end

     0   :  { %14 = vsyncpa [#allocation3], 0  ;;  %s27056_s0 = inlined_call_operand.vmem [shape: f32[2,16,4], index: 0, kind: input, shape index: {}]   ;;  %s27057_s1 = inlined_call_operand.hbm [shape: f32[4,512], index: 1, kind: input, shape index: {}]   ;;  %s27058_s2 = inlined_call_operand.hbm [shape: bf16[2,512,128], index: 2, kind: input, shape index: {}]   ;;  %s27059_s3 = inlined_call_operand.hbm [shape: bf16[2,4992,384], index: 3, kind: input, shape index: {}]   ;;  %s27060_s4 = inlined_call_operand.hbm [shape: bf16[2,512,128], index: 4, kind: input, shape index: {}]   ;;  %s27061_s5 = inlined_call_operand.hbm [shape: f32[2,1,512], index: 5, kind: input, shape index: {}]   ;;  %s27062_s6 = inlined_call_operand.hbm [shape: f32[2,1,512], index: 6, kind: input, shape index: {}]   ;;  %s27063_s7 = inlined_call_operand.hbm [shape: f32[2,1,512], index: 7, kind: input, shape index: {}]   ;;  %s27064_s8 = inlined_call_operand.hbm [shape: f32[2,1,512], index: 8, kind: input, shape index: {}]   ;;  %s27065_s9 = inlined_call_operand.vmem [shape: f32[2,1,512], index: 9, kind: output, shape index: {}]  }
   0x1   :  { %15 = vsyncpa [#allocation5], 0 }
   0x2   :  { %16 = vsyncpa [#allocation8], 0 }
   0x3   :  { %17 = vsyncpa [#allocation11], 0 }
   0x4   :  { %18 = vsyncpa [#allocation14], 0  ;;  %s25460_s30 = smov 0  }
   0x5 LB: > { %s25392_s10 = smov [#allocation4]   ;;  %s25466_s12 = sadd.s32 4294967295, %s25390_s30   ;;  %s25390_s30 = sphi %s25460_s30, %s24_s30  }
   0x6   : > { %s272_s11 = sshll.u32 %s25392_s10, 4  ;;  %p19076_p0 = scmp.ge.s32.totalorder %s25390_s30, 1  ;;  %s25471_s11 = int_to_ptr.vmem [resolvable:$true] %s272_s11 }
   0x7   : > { %p249_p1 = scmp.lt.s32.totalorder %s25390_s30, 3  ;;  %p27066_p2 = scmp.eq.s32.totalorder %s25466_s12, 0 }
   0x8   : > { %s25393_s14 = smov [#allocation7]   ;;  %s25394_s17 = smov [#allocation10]  }
   0x9   : > { %p25473_p3 = pnand %p19076_p0, %p249_p1  ;;  %s298_s15 = sshll.u32 %s25393_s14, 4  ;;  %s25479_s15 = int_to_ptr.vmem [resolvable:$true] %s298_s15 }
   0xa   : > { %s324_s18 = sshll.u32 %s25394_s17, 4  ;;  %s25395_s19 = smov [#allocation2]   ;;  %s25487_s18 = int_to_ptr.vmem [resolvable:$true] %s324_s18 }
   0xb   : > { %s27112_s13 = scalar_select %p25473_p3, 1, 0 }
   0xc   : > { %p22427_p4 = pneg %p25473_p3  ;;  %s25489_s20 = sshll.u32 %s25395_s19, 4  ;;  %s263_s20 = int_to_ptr.vmem [resolvable:$true] %s25489_s20 }
   0xd   : > { %s25140_s23 = scalar_lea.hbm %s27058_s2, 8192 }
   0xe   : > { %p25483_p5 = pnand %p27066_p2, %p22427_p4  ;;  %p25141_p6 = scmp.ne.s32.totalorder %s27058_s2, %s25140_s23 }
   0xf   : > { %p25147_p10 = scmp.lt.u32.totalorder %s25140_s23, %s27058_s2 }
  0x10   : > { %p25499_p7 = pneg %p25483_p5 }
  0x12   : > { %p25143_p8 = pnand %p25499_p7, %p25141_p6 }
  0x14   : > { %p25144_p9 = pneg %p25143_p8 }
  0x16   : > { %p25149_p11 = pnand %p25147_p10, %p25144_p9 }
  0x18   : > { %25152 = shalt.err (!%p25149_p11)
}
  0x19   : > { %s25153_s29 = scalar_lea.vmem %s25471_s11, 8192  ;;  %p25161_p1 = scmp.lt.s32.totalorder %s25471_s11, %s25471_s11 }
  0x1a   : > { %p25154_p12 = scmp.ne.s32.totalorder %s25471_s11, %s25153_s29  ;;  %p25162_p4 = scmp.lt.s32.totalorder %s25153_s29, %s25153_s29 }
  0x1c   : > { %p25156_p13 = pnand %p25154_p12, %p25499_p7  ;;  %p25163_p6 = por %p25162_p4, %p25161_p1 }
  0x1e   : > { %p25157_p0 = pneg %p25156_p13 }
  0x20   : > { %p25164_p8 = pnand %p25163_p6, %p25157_p0 }
  0x22   : > { %25167 = shalt.err (!%p25164_p8)
}
  0x23   : > { %s25396_s10 = smov 64   ;;  %s25397_s14 = smov 4  }
  0x24   : > { %22433 = dma.hbm_to_vmem [thread:$0]  (!%p25483_p5), %s27058_s2, 8192, %s25471_s11, [#allocation5], %s25396_s10, %s25396_s10, %s25397_s14  }
  0x25   : > { %s25168_s23 = scalar_lea.hbm %s27060_s4, 8192 }
  0x26   : > { %p25169_p9 = scmp.ne.s32.totalorder %s27060_s4, %s25168_s23  ;;  %p25175_p12 = scmp.lt.u32.totalorder %s25168_s23, %s27060_s4 }
  0x28   : > { %p25171_p10 = pnand %p25169_p9, %p25499_p7 }
  0x2a   : > { %p25172_p11 = pneg %p25171_p10 }
  0x2c   : > { %p25177_p13 = pnand %p25175_p12, %p25172_p11 }
  0x2e   : > { %25180 = shalt.err (!%p25177_p13)
}
  0x2f   : > { %s25181_s11 = scalar_lea.vmem %s25479_s15, 8192  ;;  %p25189_p6 = scmp.lt.s32.totalorder %s25479_s15, %s25479_s15 }
  0x30   : > { %p25182_p0 = scmp.ne.s32.totalorder %s25479_s15, %s25181_s11  ;;  %p25190_p8 = scmp.lt.s32.totalorder %s25181_s11, %s25181_s11 }
  0x32   : > { %p25184_p1 = pnand %p25182_p0, %p25499_p7  ;;  %p25191_p9 = por %p25190_p8, %p25189_p6 }
  0x34   : > { %p25185_p4 = pneg %p25184_p1 }
  0x36   : > { %p25192_p10 = pnand %p25191_p9, %p25185_p4 }
  0x38   : > { %25195 = shalt.err (!%p25192_p10)
}
  0x39   : > { %22439 = dma.hbm_to_vmem [thread:$0]  (!%p25483_p5), %s27060_s4, 8192, %s25479_s15, [#allocation8], %s25396_s10, %s25396_s10, %s25397_s14  }
  0x3a   : > { %s25196_s22 = scalar_lea.hbm %s27062_s6, 128 }
  0x3b   : > { %p25197_p11 = scmp.ne.s32.totalorder %s27062_s6, %s25196_s22  ;;  %p25203_p0 = scmp.lt.u32.totalorder %s25196_s22, %s27062_s6 }
  0x3d   : > { %p25199_p12 = pnand %p25197_p11, %p25499_p7 }
  0x3f   : > { %p25200_p13 = pneg %p25199_p12 }
  0x41   : > { %p25205_p1 = pnand %p25203_p0, %p25200_p13 }
  0x43   : > { %25208 = shalt.err (!%p25205_p1)
}
  0x44   : > { %s25209_s15 = scalar_lea.vmem %s25487_s18, 128  ;;  %p25217_p9 = scmp.lt.s32.totalorder %s25487_s18, %s25487_s18 }
  0x45   : > { %p25210_p4 = scmp.ne.s32.totalorder %s25487_s18, %s25209_s15  ;;  %p25218_p10 = scmp.lt.s32.totalorder %s25209_s15, %s25209_s15 }
  0x47   : > { %p25212_p6 = pnand %p25210_p4, %p25499_p7  ;;  %p25219_p11 = por %p25218_p10, %p25217_p9 }
  0x49   : > { %p25213_p8 = pneg %p25212_p6 }
  0x4b   : > { %p25220_p12 = pnand %p25219_p11, %p25213_p8 }
  0x4d   : > { %25223 = shalt.err (!%p25220_p12)
}
  0x4e   : > { %22445 = dma.hbm_to_vmem [thread:$0]  (!%p25483_p5), %s27062_s6, 128, %s25487_s18, [#allocation11], %s25396_s10, %s25396_s10, %s25397_s14  }
  0x4f   : > { %s25224_s19 = scalar_lea.hbm %s27057_s1, 256 }
  0x50   : > { %p25225_p13 = scmp.ne.s32.totalorder %s27057_s1, %s25224_s19  ;;  %p25231_p4 = scmp.lt.u32.totalorder %s25224_s19, %s27057_s1 }
  0x52   : > { %p25227_p0 = pnand %p25225_p13, %p25499_p7 }
  0x54   : > { %p25228_p1 = pneg %p25227_p0 }
  0x56   : > { %p25233_p6 = pnand %p25231_p4, %p25228_p1 }
  0x58   : > { %25236 = shalt.err (!%p25233_p6)
}
  0x59   : > { %s25237_s25 = scalar_lea.vmem %s263_s20, 256  ;;  %p25245_p11 = scmp.lt.s32.totalorder %s263_s20, %s263_s20 }
  0x5a   : > { %p25238_p8 = scmp.ne.s32.totalorder %s263_s20, %s25237_s25  ;;  %p25246_p12 = scmp.lt.s32.totalorder %s25237_s25, %s25237_s25 }
  0x5c   : > { %p25240_p9 = pnand %p25238_p8, %p25499_p7  ;;  %p25247_p2 = por %p25246_p12, %p25245_p11 }
  0x5e   : > { %p25241_p10 = pneg %p25240_p9 }
  0x60   : > { %p25248_p3 = pnand %p25247_p2, %p25241_p10 }
  0x62   : > { %25251 = shalt.err (!%p25248_p3)
}
  0x63   : > { %22430 = dma.hbm_to_vmem [thread:$0]  (!%p25483_p5), %s27057_s1, 256, %s263_s20, [#allocation3]  }
  0x64   : > { %s25398_s15 = smov [#allocation6]   ;;  %s25252_s17 = scalar_lea.hbm %s27059_s3, 239616 }
  0x65   : > { %s285_s28 = sshll.u32 %s25398_s15, 4  ;;  %p25253_p13 = scmp.ne.s32.totalorder %s27059_s3, %s25252_s17  ;;  %s286_s28 = int_to_ptr.vmem [resolvable:$true] %s285_s28 }
  0x66   : > { %p25259_p0 = scmp.lt.u32.totalorder %s25252_s17, %s27059_s3 }
  0x67   : > { %p25255_p2 = pnand %p25253_p13, %p25499_p7 }
  0x69   : > { %p25256_p3 = pneg %p25255_p2 }
  0x6b   : > { %p25261_p1 = pnand %p25259_p0, %p25256_p3 }
  0x6d   : > { %25264 = shalt.err (!%p25261_p1)
}
  0x6e   : > { %s25265_s20 = scalar_lea.vmem %s286_s28, 239616  ;;  %p25273_p9 = scmp.lt.s32.totalorder %s286_s28, %s286_s28 }
  0x6f   : > { %p25266_p4 = scmp.ne.s32.totalorder %s286_s28, %s25265_s20  ;;  %p25274_p10 = scmp.lt.s32.totalorder %s25265_s20, %s25265_s20 }
  0x71   : > { %p25268_p6 = pnand %p25266_p4, %p25499_p7  ;;  %p25275_p11 = por %p25274_p10, %p25273_p9 }
  0x73   : > { %p25269_p8 = pneg %p25268_p6 }
  0x75   : > { %p25276_p12 = pnand %p25275_p11, %p25269_p8 }
  0x77   : > { %25279 = shalt.err (!%p25276_p12)
}
  0x78   : > { %s25399_s24 = smov 192   ;;  %s25400_s25 = smov 12  }
  0x79   : > { %22436 = dma.hbm_to_vmem [thread:$0]  (!%p25483_p5), %s27059_s3, 239616, %s286_s28, [#allocation5], %s25399_s24, %s25399_s24, %s25400_s25  }
  0x7a   : > { %s25401_s15 = smov [#allocation9]   ;;  %s25402_s29 = smov [#allocation12]  }
  0x7b   : > { %s311_s11 = sshll.u32 %s25401_s15, 4  ;;  %s337_s17 = sshll.u32 %s25402_s29, 4  ;;  %s312_s11 = int_to_ptr.vmem [resolvable:$true] %s311_s11  ;;  %s25612_s17 = int_to_ptr.vmem [resolvable:$true] %s337_s17 }
  0x7c   : > { %s25280_s22 = scalar_lea.hbm %s27061_s5, 128 }
  0x7d   : > { %p25281_p13 = scmp.ne.s32.totalorder %s27061_s5, %s25280_s22  ;;  %p25287_p0 = scmp.lt.u32.totalorder %s25280_s22, %s27061_s5 }
  0x7f   : > { %p25283_p2 = pnand %p25281_p13, %p25499_p7 }
  0x81   : > { %p25284_p3 = pneg %p25283_p2 }
  0x83   : > { %p25289_p1 = pnand %p25287_p0, %p25284_p3 }
  0x85   : > { %25292 = shalt.err (!%p25289_p1)
}
  0x86   : > { %s25293_s24 = scalar_lea.vmem %s312_s11, 128  ;;  %p25301_p9 = scmp.lt.s32.totalorder %s312_s11, %s312_s11 }
  0x87   : > { %p25294_p4 = scmp.ne.s32.totalorder %s312_s11, %s25293_s24  ;;  %p25302_p10 = scmp.lt.s32.totalorder %s25293_s24, %s25293_s24 }
  0x89   : > { %p25296_p6 = pnand %p25294_p4, %p25499_p7  ;;  %p25303_p11 = por %p25302_p10, %p25301_p9 }
  0x8b   : > { %p25297_p8 = pneg %p25296_p6 }
  0x8d   : > { %p25304_p12 = pnand %p25303_p11, %p25297_p8 }
  0x8f   : > { %25307 = shalt.err (!%p25304_p12)
}
  0x90   : > { %22442 = dma.hbm_to_vmem [thread:$0]  (!%p25483_p5), %s27061_s5, 128, %s312_s11, [#allocation8], %s25396_s10, %s25396_s10, %s25397_s14  }
  0x91   : > { %s25308_s19 = scalar_lea.hbm %s27063_s7, 128 }
  0x92   : > { %p25309_p13 = scmp.ne.s32.totalorder %s27063_s7, %s25308_s19  ;;  %p25315_p0 = scmp.lt.u32.totalorder %s25308_s19, %s27063_s7 }
  0x94   : > { %p25311_p2 = pnand %p25309_p13, %p25499_p7 }
  0x96   : > { %p25312_p3 = pneg %p25311_p2 }
  0x98   : > { %p25317_p1 = pnand %p25315_p0, %p25312_p3 }
  0x9a   : > { %25320 = shalt.err (!%p25317_p1)
}
  0x9b   : > { %s25321_s11 = scalar_lea.vmem %s25612_s17, 128  ;;  %p25329_p9 = scmp.lt.s32.totalorder %s25612_s17, %s25612_s17 }
  0x9c   : > { %p25322_p4 = scmp.ne.s32.totalorder %s25612_s17, %s25321_s11  ;;  %p25330_p10 = scmp.lt.s32.totalorder %s25321_s11, %s25321_s11 }
  0x9e   : > { %p25324_p6 = pnand %p25322_p4, %p25499_p7  ;;  %p25331_p11 = por %p25330_p10, %p25329_p9 }
  0xa0   : > { %p25325_p8 = pneg %p25324_p6 }
  0xa2   : > { %p25332_p12 = pnand %p25331_p11, %p25325_p8 }
  0xa4   : > { %25335 = shalt.err (!%p25332_p12)
}
  0xa5   : > { %22448 = dma.hbm_to_vmem [thread:$0]  (!%p25483_p5), %s27063_s7, 128, %s25612_s17, [#allocation11], %s25396_s10, %s25396_s10, %s25397_s14  }
  0xa6   : > { %s25403_s24 = smov [#allocation13]   ;;  %s25336_s29 = scalar_lea.hbm %s27064_s8, 128 }
  0xa7   : > { %s350_s25 = sshll.u32 %s25403_s24, 4  ;;  %p25337_p13 = scmp.ne.s32.totalorder %s27064_s8, %s25336_s29  ;;  %s351_s25 = int_to_ptr.vmem [resolvable:$true] %s350_s25 }
  0xa8   : > { %p25343_p0 = scmp.lt.u32.totalorder %s25336_s29, %s27064_s8 }
  0xa9   : > { %p25339_p2 = pnand %p25337_p13, %p25499_p7 }
  0xab   : > { %p25340_p3 = pneg %p25339_p2 }
  0xad   : > { %p25345_p1 = pnand %p25343_p0, %p25340_p3 }
  0xaf   : > { %25348 = shalt.err (!%p25345_p1)
}
  0xb0   : > { %s25349_s17 = scalar_lea.vmem %s351_s25, 128  ;;  %p25357_p9 = scmp.lt.s32.totalorder %s351_s25, %s351_s25 }
  0xb1   : > { %p25350_p4 = scmp.ne.s32.totalorder %s351_s25, %s25349_s17  ;;  %p25358_p10 = scmp.lt.s32.totalorder %s25349_s17, %s25349_s17 }
  0xb3   : > { %p25352_p6 = pnand %p25350_p4, %p25499_p7  ;;  %p25359_p11 = por %p25358_p10, %p25357_p9 }
  0xb5   : > { %p25353_p8 = pneg %p25352_p6 }
  0xb7   : > { %p25360_p12 = pnand %p25359_p11, %p25353_p8 }
  0xb9   : > { %25363 = shalt.err (!%p25360_p12)
}
  0xba   : > { %22451 = dma.hbm_to_vmem [thread:$0]  (!%p25483_p5), %s27064_s8, 128, %s351_s25, [#allocation14], %s25396_s10, %s25396_s10, %s25397_s14  }
  0xbb   : > { %p27115_p13 = scmp.ne.s32.totalorder %s27112_s13, 0 }
  0xbd   : > { %374 = sbr.rel (%p27115_p13) target bundleno = 3845 (0xf05), region = 56 }
  0xc4   : > { %p27116_p7 = scmp.eq.s32.totalorder %s25466_s12, 0 }
  0xc6   : > { %25369 = dma.done.wait (%p27116_p7), [#allocation3], 256   ;;  %p27117_p2 = pmov %p27116_p7 }
  0xc8   : > { %25371 = vsyncadd (%p27117_p2), [#allocation3], 4294967040  ;;  %p27118_p3 = pmov %p27117_p2 }
  0xc9   : > { %p27119_p0 = pmov %p27117_p2 }
  0xca   : > { %25373 = dma.done.wait (%p27118_p3), [#allocation5], 247808  }
  0xcb   : > { %25375 = vsyncadd (%p27119_p0), [#allocation5], 4294719488  ;;  %p27120_p1 = pmov %p27119_p0 }
  0xcc   : > { %p27121_p5 = pmov %p27119_p0 }
  0xcd   : > { %25377 = dma.done.wait (%p27120_p1), [#allocation8], 8320  }
  0xce   : > { %25379 = vsyncadd (%p27121_p5), [#allocation8], 4294958976  ;;  %p27122_p4 = pmov %p27119_p0 }
  0xcf   : > { %p27123_p6 = pmov %p27119_p0 }
  0xd0   : > { %25381 = dma.done.wait (%p27122_p4), [#allocation11], 256  }
  0xd1   : > { %25383 = vsyncadd (%p27123_p6), [#allocation11], 4294967040  ;;  %p27124_p8 = pmov %p27119_p0 }
  0xd2   : > { %p27125_p9 = pmov %p27119_p0 }
  0xd3   : > { %25385 = dma.done.wait (%p27124_p8), [#allocation14], 128  }
  0xd4   : > { %25387 = vsyncadd (%p27125_p9), [#allocation14], 4294967168  ;;  %p437_p10 = scmp.lt.s32.totalorder %s25466_s12, 1  ;;  %v27070_v0 = vmov 0.0   ;;  %v449_v1 = vld [vmem:[#allocation2] sm:$0xff]  ;;  %vm462_vm0 = vcmask 1043456  }
  0xd5   : > { %535 = vmatprep.mubr.f32.mxu0 %v27070_v0  ;;  %612 = vmatprep.mubr.f32.mxu1 %v27070_v0  ;;  %v453_v2 = vcombine.high %v449_v1, %v449_v1  ;;  %v450_v3 = vld [vmem:[#allocation2 + $0x8] sm:$0xff]  ;;  %vm455_vm1 = vcmask 31744   ;;  %v22496_v6 = vld [vmem:[#allocation4 + $0x40] sm:$0xff]   ;;  %v22498_v8 = vld [vmem:[#allocation4 + $0x48] sm:$0xff]   ;;  %vm1020_vm2 = vcmask 1040384   ;;  %vm980_vm3 = vcmask 1046528  }
  0xd6   : > { %s27195_s12 = smov (!%p437_p10, %s25466_s12), 1  ;;  %v454_v5 = vcombine.high %v450_v3, %v450_v3  ;;  %v22497_v7 = vld [vmem:[#allocation4] sm:$0xff]   ;;  %v22499_v10 = vld [vmem:[#allocation4 + $0x8] sm:$0xff]   ;;  %v22500_v11 = vld [vmem:[#allocation4 + $0x50] sm:$0xff]   ;;  %vm987_vm4 = vcmask 1045504   ;;  %vm969_vm5 = vcmask 1042432  }
  0xd7   : > { %s21172_s13 = sshll.u32 %s27195_s12, 4  ;;  %19098 = vmatprep.subr.msk.mxu0 %vm462_vm0, %v453_v2  ;;  %v22501_v12 = vld [vmem:[#allocation4 + $0x10] sm:$0xff]   ;;  %v22502_v13 = vld [vmem:[#allocation4 + $0x58] sm:$0xff]   ;;  %v22504_v15 = vld [vmem:[#allocation4 + $0x60] sm:$0xff]   ;;  %vm994_vm6 = vcmask 1044480   ;;  %vm1013_vm7 = vcmask 1041408  }
  0xd8   : > { %s441_s10 = scalar_lea.vmem %s27056_s0, %s21172_s13  ;;  %19099 = vmatpush1.msk.msra.mxu0 %vm462_vm0, %v449_v1  ;;  %19102 = vmatprep.subr.msk.mxu1 %vm462_vm0, %v454_v5  ;;  %v22503_v14 = vld [vmem:[#allocation4 + $0x18] sm:$0xff]   ;;  %v22505_v16 = vld [vmem:[#allocation4 + $0x20] sm:$0xff]   ;;  %v22506_v17 = vld [vmem:[#allocation4 + $0x68] sm:$0xff]   ;;  %vm25406_vm9 = vmmov 1   ;;  %vm25407_vm14 = vmmov 0   ;;  %s19097_s14 = sshll.u32 %s27195_s12, 2 }
  0xd9   : > { %v447_v4 = vld [vmem:[%s441_s10] sm:$0xff]  ;;  %19103 = vmatpush1.msk.msra.mxu1 %vm462_vm0, %v450_v3  ;;  %v448_v9 = vld [vmem:[%s441_s10 + $0x8] sm:$0xff]  ;;  %21173 = vmatprep.subr.bf16.mxu0 %v22496_v6  ;;  %v22507_v18 = vld [vmem:[#allocation4 + $0x28] sm:$0xff]   ;;  %s445_s24 = scalar_lea.vmem %s27065_s9, %s19097_s14 }
  0xda   : > { %19100 = vmatmul.mubr.msk.f32.vlgmr.msra.gmra.mrb[0].mxu0 %vm455_vm1, %v447_v4  ;;  %19104 = vmatmul.mubr.msk.f32.vlgmr.msra.gmra.mrb[0].mxu1 %vm455_vm1, %v447_v4  ;;  %v22508_v19 = vld [vmem:[#allocation4 + $0x70] sm:$0xff]   ;;  %v22510_v21 = vld [vmem:[#allocation4 + $0x78] sm:$0xff]   ;;  %v22512_v23 = vld [vmem:[#allocation4 + $0xc0] sm:$0xff]  }
  0xdb   : > { %541 = vmatprep.mubr.f32.mxu0 %v27070_v0  ;;  %618 = vmatprep.mubr.f32.mxu1 %v27070_v0  ;;  %v22509_v20 = vld [vmem:[#allocation4 + $0x30] sm:$0xff]   ;;  %v22511_v22 = vld [vmem:[#allocation4 + $0x38] sm:$0xff]   ;;  %v22513_v37 = vld [vmem:[#allocation4 + $0x80] sm:$0xff]  }
  0xdc   : > { %21174 = vmatpush3.bf16.msra.mxu0 %v22497_v7  ;;  %v22514_v44 = vld [vmem:[#allocation4 + $0xc8] sm:$0xff]   ;;  %v22516_v62 = vld [vmem:[#allocation4 + $0xd0] sm:$0xff]   ;;  %vm26065_vm8 = vmneg %vm969_vm5 }
  0xdd   : > { %21175 = vmatprep.subr.bf16.mxu0 %v22498_v8  ;;  %v22515_v59 = vld [vmem:[#allocation4 + $0x88] sm:$0xff]   ;;  %vm26072_vm10 = vmpackc.low %vm26065_vm8, %vm25406_vm9 }
  0xde   : > { %19101 = vmatmul.mubr.msk.f32.gmra.mrb[2].mxu0 %vm455_vm1, %v448_v9  ;;  %19105 = vmatmul.mubr.msk.f32.gmra.mrb[2].mxu1 %vm455_vm1, %v448_v9  ;;  %vm26107_vm11 = vmpackc.low %vm25406_vm9, %vm26065_vm8 }
  0xdf   : > { %vm26153_vm12 = vmpackc.low %vm969_vm5, %vm25406_vm9 }
  0xe0   : > { %21176 = vmatpush3.bf16.msra.mxu0 %v22499_v10  ;;  %v22517_v10 = vld [vmem:[#allocation4 + $0x90] sm:$0xff]   ;;  %vm26201_vm13 = vmpackc.low %vm25406_vm9, %vm969_vm5 }
  0xe1   : > { %21177 = vmatprep.subr.bf16.mxu0 %v22500_v11 }
  0xe4   : > { %21178 = vmatpush3.bf16.msra.mxu0 %v22501_v12 }
  0xe5   : > { %21179 = vmatprep.subr.bf16.mxu0 %v22502_v13 }
  0xe8   : > { %21180 = vmatpush3.bf16.msra.mxu0 %v22503_v14 }
  0xe9   : > { %21181 = vmatprep.subr.bf16.mxu0 %v22504_v15  ;;  %v22518_v15 = vld [vmem:[#allocation4 + $0xd8] sm:$0xff]  }
  0xec   : > { %21182 = vmatpush3.bf16.msra.mxu0 %v22505_v16 }
  0xed   : > { %21183 = vmatprep.subr.bf16.mxu0 %v22506_v17 }
  0xf0   : > { %21184 = vmatpush3.bf16.msra.mxu0 %v22507_v18 }
  0xf1   : > { %21185 = vmatprep.subr.bf16.mxu0 %v22508_v19 }
  0xf4   : > { %21186 = vmatpush3.bf16.msra.mxu0 %v22509_v20 }
  0xf5   : > { %21187 = vmatprep.subr.bf16.mxu0 %v22510_v21 }
  0xf8   : > { %21188 = vmatpush3.bf16.msra.mxu0 %v22511_v22 }
  0xf9   : > { %21195 = vmatprep.subr.bf16.mxu0 %v22512_v23 }
 0x1ad   : > { %v25724_v24 = vpop.f32.mrb[0].mxu0  ;;  %v25729_v27 = vpop.f32.mrb[0].mxu1 }
 0x1ae   : > { %27126 = vst [vmem:[#allocation20_spill] sm:$0xff] %v25724_v24  ;;  %v9051_v25 = vrot.slane %v25724_v24, 7  ;;  %v25727_v26 = vpop.f32.mrb[1].mxu0  ;;  %27128 = vst [vmem:[#allocation22_spill] sm:$0xff] %v25729_v27  ;;  %v9053_v29 = vrot.slane %v25729_v27, 7  ;;  %v25733_v30 = vpop.f32.mrb[1].mxu1 }
 0x1af   : > { %27127 = vst [vmem:[#allocation21_spill] sm:$0xff] %v25727_v26  ;;  %v9052_v28 = vrot.slane %v25727_v26, 7  ;;  %27129 = vst [vmem:[#allocation23_spill] sm:$0xff] %v25733_v30  ;;  %v9054_v32 = vrot.slane %v25733_v30, 7 }
 0x1b0   : > { %v25736_v31 = vsel %vm1020_vm2, -inf, %v9051_v25  ;;  %v25747_v38 = vsel %vm1020_vm2, -inf, %v9053_v29 }
 0x1b1   : > { %v9091_v33 = vrot.slane %v25736_v31, 1  ;;  %v9127_v34 = vrot.slane %v25736_v31, 2  ;;  %v25742_v35 = vsel %vm1020_vm2, -inf, %v9052_v28  ;;  %v25744_v36 = vpop.f32.mrb[2].mxu0  ;;  %v25756_v45 = vpop.f32.mrb[2].mxu1  ;;  %v9097_v48 = vrot.slane %v25747_v38, 1 }
 0x1b2   : > { %27130 = vst [vmem:[#allocation24_spill] sm:$0xff] %v25744_v36  ;;  %v9094_v39 = vrot.slane %v25742_v35, 1  ;;  %v9130_v40 = vrot.slane %v25742_v35, 2  ;;  %v625_v41 = vpack.c.bf16 %v25744_v36, %v25724_v24  ;;  %v9055_v42 = vrot.slane %v25744_v36, 7  ;;  %v25754_v43 = vpop.f32.mrb[3].mxu0  ;;  %27132 = vst [vmem:[#allocation26_spill] sm:$0xff] %v25756_v45 }
 0x1b3   : > { %27131 = vst [vmem:[#allocation25_spill] sm:$0xff] %v25754_v43  ;;  %v626_v46 = vpack.c.bf16 %v25754_v43, %v25727_v26  ;;  %v9057_v47 = vrot.slane %v25754_v43, 7  ;;  %v9133_v49 = vrot.slane %v25747_v38, 2  ;;  %v25763_v50 = vpop.f32.mrb[3].mxu1  ;;  %v25772_v53 = vsel %vm1020_vm2, -inf, %v9054_v32 }
 0x1b4   : > { %27133 = vst [vmem:[#allocation27_spill] sm:$0xff] %v25763_v50  ;;  %v25766_v51 = vsel %vm1020_vm2, %v9051_v25, %v9055_v42  ;;  %v9079_v52 = vsel %vm1020_vm2, %v9055_v42, -inf  ;;  %v627_v54 = vpack.c.bf16 %v25756_v45, %v25729_v27  ;;  %v9100_v63 = vrot.slane %v25772_v53, 1  ;;  %v22615_v27 = vld [vmem:[#allocation6 + $0x2a8] ss:$12 sps:$4 sm:$0xff]  }
 0x1b5   : > { %v9092_v55 = vrot.slane %v25766_v51, 1  ;;  %v9103_v56 = vrot.slane %v9079_v52, 1  ;;  %v9128_v57 = vrot.slane %v25766_v51, 2  ;;  %v9139_v58 = vrot.slane %v9079_v52, 2  ;;  %917 = vmatprep.mubr.bf16.mxu0 %v626_v46 }
 0x1b6   : > { %v9058_v60 = vsel %vm1020_vm2, %v9052_v28, %v9057_v47  ;;  %v9080_v61 = vsel %vm1020_vm2, %v9057_v47, -inf  ;;  %918 = vmatmul.mubr.bf16.vlgmr.msra.gmra.mrb[4].mxu0 %v625_v41  ;;  %v9136_v1 = vrot.slane %v25772_v53, 2  ;;  %v9059_v8 = vrot.slane %v25756_v45, 7 }
 0x1b7   : > { %v9104_v2 = vsel %vm980_vm3, %v9092_v55, %v9103_v56  ;;  %v9095_v3 = vrot.slane %v9058_v60, 1  ;;  %v9105_v4 = vrot.slane %v9080_v61, 1  ;;  %v9131_v5 = vrot.slane %v9058_v60, 2  ;;  %21196 = vmatpush3.bf16.msra.mxu0 %v22513_v37 }
 0x1b8   : > { %v9123_v6 = vmax.f32 %v25766_v51, %v9104_v2  ;;  %v9141_v7 = vrot.slane %v9080_v61, 2  ;;  %21197 = vmatprep.subr.bf16.mxu0 %v22514_v44  ;;  %v628_v9 = vpack.c.bf16 %v25763_v50, %v25733_v30  ;;  %v9061_v11 = vrot.slane %v25763_v50, 7  ;;  %v22520_v44 = vld [vmem:[#allocation4 + $0xe0] sm:$0xff]   ;;  %v22607_v61 = vld [vmem:[#allocation6 + $0x1c8] ss:$12 sps:$4 sm:$0xff]  }
 0x1b9   : > { %v9096_v12 = vsel %vm980_vm3, %v9094_v39, %v9095_v3  ;;  %v9106_v13 = vsel %vm980_vm3, %v9095_v3, %v9105_v4  ;;  %v9132_v14 = vsel %vm987_vm4, %v9130_v40, %v9131_v5  ;;  %v9060_v16 = vsel %vm1020_vm2, %v9053_v29, %v9059_v8  ;;  %v22519_v39 = vld [vmem:[#allocation4 + $0x98] sm:$0xff]  }
 0x1ba   : > { %v9081_v17 = vsel %vm1020_vm2, %v9059_v8, -inf  ;;  %958 = vmatprep.mubr.bf16.mxu0 %v628_v9  ;;  %v9120_v18 = vmax.f32 %v25742_v35, %v9096_v12  ;;  %v9124_v19 = vmax.f32 %v9058_v60, %v9106_v13  ;;  %v9098_v20 = vrot.slane %v9060_v16, 1  ;;  %v22523_v9 = vld [vmem:[#allocation4 + $0xa8] sm:$0xff]   ;;  %v22525_v12 = vld [vmem:[#allocation4 + $0xb0] sm:$0xff]   ;;  %v22526_v13 = vld [vmem:[#allocation4 + $0xf8] sm:$0xff]  }
 0x1bb   : > { %21198 = vmatpush3.bf16.msra.mxu0 %v22515_v59  ;;  %v9107_v21 = vrot.slane %v9081_v17, 1  ;;  %v9134_v22 = vrot.slane %v9060_v16, 2  ;;  %v9143_v23 = vrot.slane %v9081_v17, 2  ;;  %v9062_v25 = vsel %vm1020_vm2, %v9054_v32, %v9061_v11  ;;  %v22531_v17 = vld [vmem:[#allocation6 + $0x18] ss:$12 sps:$4 sm:$0xff]  }
 0x1bc   : > { %21199 = vmatprep.subr.bf16.mxu0 %v22516_v62  ;;  %v9082_v28 = vsel %vm1020_vm2, %v9061_v11, -inf  ;;  %v9142_v29 = vsel %vm987_vm4, %v9131_v5, %v9141_v7  ;;  %v25799_v37 = vmax.f32 %v9120_v18, %v9132_v14  ;;  %v9101_v40 = vrot.slane %v9062_v25, 1  ;;  %v22530_v14 = vld [vmem:[#allocation6 + $0x4] ss:$12 sps:$4 sm:$0xff]   ;;  %v22536_v18 = vld [vmem:[#allocation6 + $0x34] ss:$12 sps:$4 sm:$0xff]  }
 0x1bd   : > { %v9108_v35 = vsel %vm980_vm3, %v9098_v20, %v9107_v21  ;;  %v9109_v41 = vrot.slane %v9082_v28, 1  ;;  %v9137_v42 = vrot.slane %v9062_v25, 2  ;;  %v9145_v47 = vrot.slane %v9082_v28, 2  ;;  %v22537_v21 = vld [vmem:[#allocation6 + $0x48] ss:$12 sps:$4 sm:$0xff]  }
 0x1be   : > { %v9125_v46 = vmax.f32 %v9060_v16, %v9108_v35  ;;  %v25802_v51 = vmax.f32 %v9124_v19, %v9142_v29  ;;  %v9093_v32 = vsel %vm980_vm3, %v9091_v33, %v9092_v55  ;;  %v9129_v56 = vsel %vm987_vm4, %v9127_v34, %v9128_v57  ;;  %v22521_v55 = vld [vmem:[#allocation4 + $0xa0] sm:$0xff]   ;;  %v22533_v16 = vld [vmem:[#allocation6 + $0x1c] ss:$12 sps:$4 sm:$0xff]  }
 0x1bf   : > { %21200 = vmatpush3.bf16.msra.mxu0 %v22517_v10  ;;  %v9119_v52 = vmax.f32 %v25736_v31, %v9093_v32  ;;  %v9140_v59 = vsel %vm987_vm4, %v9128_v57, %v9139_v58  ;;  %v9102_v60 = vsel %vm980_vm3, %v9100_v63, %v9101_v40  ;;  %v9110_v2 = vsel %vm980_vm3, %v9101_v40, %v9109_v41  ;;  %v22522_v58 = vld [vmem:[#allocation4 + $0xe8] sm:$0xff]   ;;  %v22534_v19 = vld [vmem:[#allocation6 + $0x30] ss:$12 sps:$4 sm:$0xff]   ;;  %v22543_v28 = vld [vmem:[#allocation6 + $0x78] ss:$12 sps:$4 sm:$0xff]  }
 0x1c0   : > { %21201 = vmatprep.subr.bf16.mxu0 %v22518_v15  ;;  %v25815_v62 = vmax.f32 %v9123_v6, %v9140_v59  ;;  %v9122_v33 = vmax.f32 %v25772_v53, %v9102_v60  ;;  %v9126_v31 = vmax.f32 %v9062_v25, %v9110_v2  ;;  %v9138_v34 = vsel %vm987_vm4, %v9136_v1, %v9137_v42  ;;  %v22528_v15 = vld [vmem:[#allocation6] ss:$12 sps:$4 sm:$0xff]   ;;  %v22545_v25 = vld [vmem:[#allocation6 + $0x7c] ss:$12 sps:$4 sm:$0xff]   ;;  %v22557_v60 = vld [vmem:[#allocation6 + $0xd8] ss:$12 sps:$4 sm:$0xff]  }
 0x1c1   : > { %v25819_v3 = vmax.f32 %v9119_v52, %v9129_v56  ;;  %v9146_v57 = vsel %vm987_vm4, %v9137_v42, %v9145_v47  ;;  %v9099_v4 = vsel %vm980_vm3, %v9097_v48, %v9098_v20  ;;  %v9135_v5 = vsel %vm987_vm4, %v9133_v49, %v9134_v22  ;;  %v22524_v49 = vld [vmem:[#allocation4 + $0xf0] sm:$0xff]   ;;  %v22539_v20 = vld [vmem:[#allocation6 + $0x4c] ss:$12 sps:$4 sm:$0xff]   ;;  %v22559_v52 = vld [vmem:[#allocation6 + $0xdc] ss:$12 sps:$4 sm:$0xff]  }
 0x1c2   : > { %v25823_v63 = vmax.f32 %v9122_v33, %v9138_v34  ;;  %v9144_v53 = vsel %vm987_vm4, %v9134_v22, %v9143_v23  ;;  %v25834_v1 = vmax.f32 %v9126_v31, %v9146_v57  ;;  %v9121_v7 = vmax.f32 %v25747_v38, %v9099_v4  ;;  %v22527_v38 = vld [vmem:[#allocation4 + $0xb8] sm:$0xff]   ;;  %v22542_v22 = vld [vmem:[#allocation6 + $0x64] ss:$12 sps:$4 sm:$0xff]   ;;  %v22540_v23 = vld [vmem:[#allocation6 + $0x60] ss:$12 sps:$4 sm:$0xff]  }
 0x1c3   : > { %21202 = vmatpush3.bf16.msra.mxu0 %v22519_v39  ;;  %v25837_v8 = vmax.f32 %v9125_v46, %v9144_v53  ;;  %v22548_v29 = vld [vmem:[#allocation6 + $0x94] ss:$12 sps:$4 sm:$0xff]   ;;  %v22551_v39 = vld [vmem:[#allocation6 + $0xac] ss:$12 sps:$4 sm:$0xff]   ;;  %v22570_v59 = vld [vmem:[#allocation6 + $0x110] ss:$12 sps:$4 sm:$0xff]  }
 0x1c4   : > { %27134 = vst [vmem:[#allocation28_spill] sm:$0xff] %v25823_v63  ;;  %21203 = vmatprep.subr.bf16.mxu0 %v22520_v44  ;;  %v25841_v10 = vmax.f32 %v9121_v7, %v9135_v5  ;;  %v22555_v35 = vld [vmem:[#allocation6 + $0xc8] ss:$12 sps:$4 sm:$0xff]   ;;  %v22560_v41 = vld [vmem:[#allocation6 + $0xe0] ss:$12 sps:$4 sm:$0xff]  }
 0x1c5   : > { %27135 = vst [vmem:[#allocation29_spill] sm:$0xff] %v25837_v8  ;;  %v22556_v40 = vld [vmem:[#allocation6 + $0x8] ss:$12 sps:$4 sm:$0xff]   ;;  %21217 = vmatprep.subr.bf16.mxu1 %v22555_v35  ;;  %v22554_v44 = vld [vmem:[#allocation6 + $0xc4] ss:$12 sps:$4 sm:$0xff]  }
 0x1c6   : > { %27136 = vst [vmem:[#allocation30_spill] sm:$0xff] %v25841_v10  ;;  %v22549_v42 = vld [vmem:[#allocation6 + $0xa8] ss:$12 sps:$4 sm:$0xff]   ;;  %21218 = vmatpush3.bf16.msra.mxu1 %v22556_v40  ;;  %v22561_v46 = vld [vmem:[#allocation6 + $0x20] ss:$12 sps:$4 sm:$0xff]  }
 0x1c7   : > { %21204 = vmatpush3.bf16.msra.mxu0 %v22521_v55  ;;  %21219 = vmatprep.subr.bf16.mxu1 %v22560_v41  ;;  %v22565_v47 = vld [vmem:[#allocation6 + $0xf8] ss:$12 sps:$4 sm:$0xff]   ;;  %v22552_v32 = vld [vmem:[#allocation6 + $0xc0] ss:$12 sps:$4 sm:$0xff]   ;;  %v22571_v33 = vld [vmem:[#allocation6 + $0x50] ss:$12 sps:$4 sm:$0xff]  }
 0x1c8   : > { %21205 = vmatprep.subr.bf16.mxu0 %v22522_v58  ;;  %v22566_v56 = vld [vmem:[#allocation6 + $0x38] ss:$12 sps:$4 sm:$0xff]   ;;  %v22564_v2 = vld [vmem:[#allocation6 + $0xf4] ss:$12 sps:$4 sm:$0xff]   ;;  %v22562_v31 = vld [vmem:[#allocation6 + $0xf0] ss:$12 sps:$4 sm:$0xff]  }
 0x1c9   : > { %v22575_v55 = vld [vmem:[#allocation6 + $0x128] ss:$12 sps:$4 sm:$0xff]   ;;  %v22569_v34 = vld [vmem:[#allocation6 + $0x10c] ss:$12 sps:$4 sm:$0xff]   ;;  %v22574_v4 = vld [vmem:[#allocation6 + $0x124] ss:$12 sps:$4 sm:$0xff]  }
 0x1ca   : > { %21220 = vmatpush3.bf16.msra.mxu1 %v22561_v46  ;;  %v22576_v57 = vld [vmem:[#allocation6 + $0x68] ss:$12 sps:$4 sm:$0xff]   ;;  %v22572_v5 = vld [vmem:[#allocation6 + $0x120] ss:$12 sps:$4 sm:$0xff]   ;;  %v22602_v11 = vld [vmem:[#allocation6 + $0x1b0] ss:$12 sps:$4 sm:$0xff]  }
 0x1cb   : > { %21206 = vmatpush3.bf16.msra.mxu0 %v22523_v9  ;;  %21221 = vmatprep.subr.bf16.mxu1 %v22565_v47  ;;  %v22567_v58 = vld [vmem:[#allocation6 + $0x108] ss:$12 sps:$4 sm:$0xff]   ;;  %v22580_v7 = vld [vmem:[#allocation6 + $0x140] ss:$12 sps:$4 sm:$0xff]   ;;  %v22577_v9 = vld [vmem:[#allocation6 + $0x138] ss:$12 sps:$4 sm:$0xff]  }
 0x1cc   : > { %21207 = vmatprep.subr.bf16.mxu0 %v22524_v49  ;;  %v22579_v53 = vld [vmem:[#allocation6 + $0x13c] ss:$12 sps:$4 sm:$0xff]   ;;  %v22581_v49 = vld [vmem:[#allocation6 + $0x80] ss:$12 sps:$4 sm:$0xff]  }
 0x1ce   : > { %21222 = vmatpush3.bf16.msra.mxu1 %v22566_v56 }
 0x1cf   : > { %21208 = vmatpush3.bf16.msra.mxu0 %v22525_v12  ;;  %21223 = vmatprep.subr.bf16.mxu1 %v22570_v59  ;;  %v22584_v12 = vld [vmem:[#allocation6 + $0x154] ss:$12 sps:$4 sm:$0xff]   ;;  %v25860_v59 = vrot.slane %v27070_v0, 3 }
 0x1d0   : > { %21209 = vmatprep.subr.bf16.mxu0 %v22526_v13  ;;  %v22585_v13 = vld [vmem:[#allocation6 + $0x158] ss:$12 sps:$4 sm:$0xff]  }
 0x1d2   : > { %21224 = vmatpush3.bf16.msra.mxu1 %v22571_v33  ;;  %v25865_v33 = vrot.slane %v27070_v0, 2 }
 0x1d3   : > { %21210 = vmatpush3.bf16.msra.mxu0 %v22527_v38  ;;  %21225 = vmatprep.subr.bf16.mxu1 %v22575_v55  ;;  %v22582_v38 = vld [vmem:[#allocation6 + $0x150] ss:$12 sps:$4 sm:$0xff]   ;;  %v25868_v55 = vrot.slane %v27070_v0, 5 }
 0x1d4   : > { %7363 = vmatprep.subr.bf16.mxu0 %v22530_v14  ;;  %v22586_v14 = vld [vmem:[#allocation6 + $0x98] ss:$12 sps:$4 sm:$0xff]  }
 0x1d6   : > { %959 = vmatmul.mubr.bf16.vlgmr.msra.gmra.mrb[8].mxu0 %v627_v54  ;;  %v22546_v54 = vld [vmem:[#allocation6 + $0x90] ss:$12 sps:$4 sm:$0xff]   ;;  %21226 = vmatpush3.bf16.msra.mxu1 %v22576_v57  ;;  %v22596_v57 = vld [vmem:[#allocation6 + $0x188] ss:$12 sps:$4 sm:$0xff]  }
 0x1d7   : > { %7364 = vmatpush1.bf16.msra.mxu0 %v22528_v15  ;;  %21227 = vmatprep.subr.bf16.mxu1 %v22580_v7  ;;  %v22589_v15 = vld [vmem:[#allocation6 + $0x16c] ss:$12 sps:$4 sm:$0xff]  }
 0x1d8   : > { %7365 = vmatprep.subr.bf16.mxu0 %v22533_v16  ;;  %v22590_v16 = vld [vmem:[#allocation6 + $0x170] ss:$12 sps:$4 sm:$0xff]  }
 0x1da   : > { %21228 = vmatpush3.bf16.msra.mxu1 %v22581_v49 }
 0x1db   : > { %7366 = vmatpush1.bf16.msra.mxu0 %v22531_v17  ;;  %21229 = vmatprep.subr.bf16.mxu1 %v22585_v13  ;;  %v22587_v17 = vld [vmem:[#allocation6 + $0x168] ss:$12 sps:$4 sm:$0xff]  }
 0x1dc   : > { %7367 = vmatprep.subr.bf16.mxu0 %v22536_v18  ;;  %v22591_v18 = vld [vmem:[#allocation6 + $0xb0] ss:$12 sps:$4 sm:$0xff]  }
 0x1dd   : > { %v22599_v13 = vld [vmem:[#allocation6 + $0x19c] ss:$12 sps:$4 sm:$0xff]  }
 0x1de   : > { %21230 = vmatpush3.bf16.msra.mxu1 %v22586_v14  ;;  %v25891_v14 = vrot.slane %v27070_v0, 7 }
 0x1df   : > { %7368 = vmatpush1.bf16.msra.mxu0 %v22534_v19  ;;  %21231 = vmatprep.subr.bf16.mxu1 %v22590_v16  ;;  %v22594_v19 = vld [vmem:[#allocation6 + $0x184] ss:$12 sps:$4 sm:$0xff]  }
 0x1e0   : > { %7369 = vmatprep.subr.bf16.mxu0 %v22539_v20  ;;  %v22595_v20 = vld [vmem:[#allocation6 + $0x248] ss:$12 sps:$4 sm:$0xff]   ;;  %27137 = vst [vmem:[#allocation31_spill] sm:$0xff] %v25891_v14 }
 0x1e2   : > { %21232 = vmatpush3.bf16.msra.mxu1 %v22591_v18 }
 0x1e3   : > { %7370 = vmatpush1.bf16.msra.mxu0 %v22537_v21  ;;  %21239 = vmatprep.subr.bf16.mxu1 %v22595_v20 }
 0x1e4   : > { %7371 = vmatprep.subr.bf16.mxu0 %v22542_v22 }
 0x1e7   : > { %7372 = vmatpush1.bf16.msra.mxu0 %v22540_v23 }
 0x1e8   : > { %7373 = vmatprep.subr.bf16.mxu0 %v22545_v25 }
 0x1eb   : > { %7374 = vmatpush1.bf16.msra.mxu0 %v22543_v28 }
 0x1ec   : > { %7375 = vmatprep.subr.bf16.mxu0 %v22548_v29 }
 0x1ef   : > { %7376 = vmatpush1.bf16.msra.mxu0 %v22546_v54 }
 0x1f0   : > { %7377 = vmatprep.subr.bf16.mxu0 %v22551_v39 }
 0x1f3   : > { %7378 = vmatpush1.bf16.msra.mxu0 %v22549_v42 }
 0x1f4   : > { %7379 = vmatprep.subr.bf16.mxu0 %v22554_v44 }
 0x1f7   : > { %7380 = vmatpush1.bf16.msra.mxu0 %v22552_v32  ;;  %v25851_v32 = vrot.slane %v27070_v0, 1 }
 0x1f8   : > { %7381 = vmatprep.subr.bf16.mxu0 %v22559_v52 }
 0x1fb   : > { %7382 = vmatpush1.bf16.msra.mxu0 %v22557_v60 }
 0x1fc   : > { %7383 = vmatprep.subr.bf16.mxu0 %v22564_v2 }
 0x1ff   : > { %7384 = vmatpush1.bf16.msra.mxu0 %v22562_v31 }
 0x200   : > { %7385 = vmatprep.subr.bf16.mxu0 %v22569_v34  ;;  %v22592_v34 = vld [vmem:[#allocation6 + $0x180] ss:$12 sps:$4 sm:$0xff]  }
 0x203   : > { %7386 = vmatpush1.bf16.msra.mxu0 %v22567_v58 }
 0x204   : > { %7387 = vmatprep.subr.bf16.mxu0 %v22574_v4  ;;  %v25877_v4 = vrot.slane %v27070_v0, 4 }
 0x207   : > { %7388 = vmatpush1.bf16.msra.mxu0 %v22572_v5 }
 0x208   : > { %7389 = vmatprep.subr.bf16.mxu0 %v22579_v53 }
 0x20b   : > { %7390 = vmatpush1.bf16.msra.mxu0 %v22577_v9 }
 0x20c   : > { %7391 = vmatprep.subr.bf16.mxu0 %v22584_v12 }
 0x20f   : > { %7392 = vmatpush1.bf16.msra.mxu0 %v22582_v38  ;;  %v22600_v38 = vld [vmem:[#allocation6 + $0x260] ss:$12 sps:$4 sm:$0xff]  }
 0x210   : > { %7393 = vmatprep.subr.bf16.mxu0 %v22589_v15 }
 0x213   : > { %7394 = vmatpush1.bf16.msra.mxu0 %v22587_v17  ;;  %v25899_v17 = vrot.slane %v27070_v0, 6 }
 0x214   : > { %7406 = vmatprep.subr.bf16.mxu0 %v22594_v19 }
 0x289   : > { %v21189_v21 = vpop.f32.mrb[4].mxu0 }
 0x28a   : > { %v21190_v22 = vpop.f32.mrb[5].mxu0 }
 0x28b   : > { %v21191_v23 = vadd.f32 %v21190_v22, %v21189_v21  ;;  %v21192_v25 = vpop.f32.mrb[6].mxu0  ;;  %v27068_v22 = vmov 0.0|0.0  }
 0x28c   : > { %v21193_v28 = vpop.f32.mrb[7].mxu0 }
 0x28d   : > { %v21194_v54 = vadd.f32 %v21193_v28, %v21192_v25  ;;  %v22597_v25 = vld [vmem:[#allocation6 + $0x198] ss:$12 sps:$4 sm:$0xff]   ;;  %v22601_v28 = vld [vmem:[#allocation6 + $0x1a0] ss:$12 sps:$4 sm:$0xff]  }
 0x2a9   : > { %v21211_v29 = vpop.f32.mrb[8].mxu0 }
 0x2aa   : > { %v21212_v39 = vpop.f32.mrb[9].mxu0 }
 0x2ab   : > { %v21213_v35 = vadd.f32 %v21212_v39, %v21211_v29  ;;  %v21214_v40 = vpop.f32.mrb[10].mxu0 }
 0x2ac   : > { %v21215_v41 = vpop.f32.mrb[11].mxu0 }
 0x2ad   : > { %v961_v42 = vadd.f32 %v21213_v35, %v21191_v23  ;;  %v21216_v44 = vadd.f32 %v21215_v41, %v21214_v40  ;;  %v22604_v35 = vld [vmem:[#allocation6 + $0x1b4] ss:$12 sps:$4 sm:$0xff]  }
 0x2af   : > { %v25848_v46 = vrot.slane %v961_v42, 5  ;;  %v964_v47 = vadd.f32 %v21216_v44, %v21194_v54 }
 0x2b1   : > { %v25855_v52 = vsel %vm969_vm5, 0.0, %v25848_v46  ;;  %v25857_v56 = vrot.slane %v964_v47, 5  ;;  %v22605_v47 = vld [vmem:[#allocation6 + $0x278] ss:$12 sps:$4 sm:$0xff]  }
 0x2b2   : > { %v983_v60 = vrot.slane %v25855_v52, 1  ;;  %v997_v2 = vrot.slane %v25855_v52, 3  ;;  %v990_v58 = vrot.slane %v25855_v52, 2  ;;  %v1009_v7 = vrot.slane %v25855_v52, 5 }
 0x2b3   : > { %v25873_v31 = vsel %vm969_vm5, %v25848_v46, %v25857_v56  ;;  %v1003_v9 = vrot.slane %v25855_v52, 4  ;;  %v25895_v15 = vsel %vm969_vm5, %v25857_v56, 0.0  ;;  %v1023_v16 = vrot.slane %v25855_v52, 7 }
 0x2b4   : > { %v25881_v5 = vpack.c.bf16 %v25857_v56, %v25873_v31  ;;  %v984_v53 = vsel %vm980_vm3, %v25851_v32, %v983_v60  ;;  %v998_v12 = vsel %vm994_vm6, %v25860_v59, %v997_v2  ;;  %v25903_v18 = vsel %vm987_vm4, %v25865_v33, %v990_v58 }
 0x2b5   : > { %v1085_v49 = vpack.c.bf16 %v984_v53, %v25851_v32  ;;  %v1027_v19 = vrot.slane %v25873_v31, 1  ;;  %v1033_v20 = vrot.slane %v25873_v31, 3  ;;  %v1030_v21 = vrot.slane %v25873_v31, 2 }
 0x2b6   : > { %v1087_v23 = vpack.c.bf16 %v998_v12, %v25860_v59  ;;  %v25913_v54 = vsel %vm969_vm5, %v25868_v55, %v1009_v7  ;;  %v25917_v29 = vsel %vm462_vm0, %v25877_v4, %v1003_v9  ;;  %v1039_v39 = vrot.slane %v25873_v31, 5 }
 0x2b7   : > { %7395 = vmatprep.mubr.bf16.mxu0 %v1085_v49  ;;  %8255 = vmatprep.mubr.bf16.mxu1 %v1085_v49  ;;  %v25922_v40 = vsel %vm1020_vm2, %v25891_v14, %v1023_v16  ;;  %v1016_v41 = vrot.slane %v25855_v52, 6  ;;  %v1028_v42 = vsel %vm980_vm3, %v983_v60, %v1027_v19  ;;  %v1036_v44 = vrot.slane %v25873_v31, 4 }
 0x2b8   : > { %7396 = vmatmul.mubr.bf16.vlgmr.msra.gmra.mrb[12].mxu0 %v27068_v22  ;;  %8256 = vmatmul.mubr.bf16.vlgmr.msra.gmra.mrb[4].mxu1 %v27068_v22  ;;  %v25927_v49 = vpack.c.bf16 %v1028_v42, %v984_v53  ;;  %v1034_v22 = vsel %vm994_vm6, %v997_v2, %v1033_v20  ;;  %v1042_v48 = vrot.slane %v25873_v31, 6  ;;  %v25953_v6 = vpack.c.bf16 %v25873_v31, %v25848_v46 }
 0x2b9   : > { %7407 = vmatpush1.bf16.msra.mxu0 %v22592_v34  ;;  %21240 = vmatpush3.bf16.msra.mxu1 %v22596_v57  ;;  %v1031_v34 = vsel %vm987_vm4, %v990_v58, %v1030_v21  ;;  %v1045_v57 = vrot.slane %v25873_v31, 7  ;;  %v25932_v52 = vpack.c.bf16 %v1034_v22, %v998_v12  ;;  %v1037_v2 = vsel %vm462_vm0, %v1003_v9, %v1036_v44  ;;  %v22609_v9 = vld [vmem:[#allocation6 + $0x1cc] ss:$12 sps:$4 sm:$0xff]  }
 0x2ba   : > { %7438 = vmatprep.mubr.bf16.mxu0 %v1087_v23  ;;  %8296 = vmatprep.mubr.bf16.mxu1 %v1087_v23  ;;  %v25935_v60 = vpack.c.bf16 %v1031_v34, %v25903_v18  ;;  %v1040_v23 = vsel %vm969_vm5, %v1009_v7, %v1039_v39  ;;  %v25945_v12 = vpack.c.bf16 %v1037_v2, %v25917_v29  ;;  %v1049_v7 = vrot.slane %v25895_v15, 1 }
 0x2bb   : > { %7408 = vmatprep.subr.bf16.mxu0 %v22599_v13  ;;  %21241 = vmatprep.subr.bf16.mxu1 %v22600_v38  ;;  %v25939_v53 = vpack.c.bf16 %v1040_v23, %v25913_v54  ;;  %v1046_v58 = vsel %vm1020_vm2, %v1023_v16, %v1045_v57  ;;  %v22606_v13 = vld [vmem:[#allocation6 + $0x1b8] ss:$12 sps:$4 sm:$0xff]   ;;  %v22610_v16 = vld [vmem:[#allocation6 + $0x290] ss:$12 sps:$4 sm:$0xff]   ;;  %v1055_v36 = vrot.slane %v25895_v15, 3  ;;  %v1052_v31 = vrot.slane %v25895_v15, 2 }
 0x2bc   : > { %v25948_v38 = vpack.c.bf16 %v1046_v58, %v25922_v40  ;;  %v1050_v43 = vsel %vm980_vm3, %v1027_v19, %v1049_v7  ;;  %v1058_v26 = vrot.slane %v25895_v15, 4  ;;  %v1067_v24 = vrot.slane %v25895_v15, 7 }
 0x2bd   : > { %7409 = vmatpush1.bf16.msra.mxu0 %v22597_v25  ;;  %21242 = vmatpush3.bf16.msra.mxu1 %v22601_v28  ;;  %v25957_v25 = vsel %vm1013_vm7, %v25899_v17, %v1016_v41  ;;  %v1043_v28 = vsel %vm1013_vm7, %v1016_v41, %v1042_v48  ;;  %v22611_v41 = vld [vmem:[#allocation6 + $0x1d0] ss:$12 sps:$4 sm:$0xff]   ;;  %v1056_v50 = vsel %vm994_vm6, %v1033_v20, %v1055_v36  ;;  %v1064_v19 = vrot.slane %v25895_v15, 6 }
 0x2be   : > { %7410 = vmatprep.subr.bf16.mxu0 %v22604_v35  ;;  %21243 = vmatprep.subr.bf16.mxu1 %v22605_v47  ;;  %v25961_v0 = vpack.c.bf16 %v1043_v28, %v25957_v25  ;;  %v25966_v35 = vpack.c.bf16 %v1050_v43, %v1028_v42  ;;  %v1061_v47 = vrot.slane %v25895_v15, 5  ;;  %v1053_v30 = vsel %vm987_vm4, %v1030_v21, %v1052_v31  ;;  %v22614_v42 = vld [vmem:[#allocation6 + $0x1e4] ss:$12 sps:$4 sm:$0xff]  }
 0x2bf   : > { %v25976_v45 = vsel %vm980_vm3, %v1049_v7, %v25851_v32  ;;  %v25978_v10 = vpack.c.bf16 %v1056_v50, %v1034_v22  ;;  %v25980_v8 = vpack.c.bf16 %v1053_v30, %v1031_v34  ;;  %v1059_v21 = vsel %vm462_vm0, %v1036_v44, %v1058_v26 }
 0x2c0   : > { %v1068_v15 = vsel %vm1020_vm2, %v1045_v57, %v1067_v24  ;;  %v1065_v7 = vsel %vm1013_vm7, %v1042_v48, %v1064_v19  ;;  %v25988_v63 = vpack.c.bf16 %v1059_v21, %v1037_v2  ;;  %v25995_v22 = vpack.c.bf16 %v25976_v45, %v1050_v43  ;;  %v22619_v57 = vld [vmem:[#allocation6 + $0x1fc] ss:$12 sps:$4 sm:$0xff]   ;;  %v22620_v43 = vld [vmem:[#allocation6 + $0x2c0] ss:$12 sps:$4 sm:$0xff]   ;;  %v22617_v2 = vld [vmem:[#allocation6 + $0x1f8] ss:$12 sps:$4 sm:$0xff]  }
 0x2c1   : > { %7411 = vmatpush1.bf16.msra.mxu0 %v22602_v11  ;;  %21244 = vmatpush3.bf16.msra.mxu1 %v22606_v13  ;;  %v1062_v11 = vsel %vm969_vm5, %v1039_v39, %v1061_v47  ;;  %v22612_v13 = vld [vmem:[#allocation6 + $0x1e0] ss:$12 sps:$4 sm:$0xff]   ;;  %v22616_v39 = vld [vmem:[#allocation6 + $0x1e8] ss:$12 sps:$4 sm:$0xff]   ;;  %v25999_v34 = vsel %vm994_vm6, %v1055_v36, %v25860_v59  ;;  %v26003_v44 = vsel %vm987_vm4, %v1052_v31, %v25865_v33 }
 0x2c2   : > { %7412 = vmatprep.subr.bf16.mxu0 %v22609_v9  ;;  %21245 = vmatprep.subr.bf16.mxu1 %v22610_v16  ;;  %v25983_v20 = vpack.c.bf16 %v1062_v11, %v1040_v23  ;;  %v25990_v9 = vpack.c.bf16 %v1068_v15, %v1046_v58  ;;  %v25992_v16 = vpack.c.bf16 %v1065_v7, %v1043_v28 }
 0x2c3   : > { %v26007_v48 = vsel %vm969_vm5, %v1061_v47, %v25868_v55  ;;  %v26013_v23 = vpack.c.bf16 %v26003_v44, %v1053_v30  ;;  %v26020_v58 = vsel %vm462_vm0, %v1058_v26, %v25877_v4  ;;  %v1082_v28 = vsel %vm1020_vm2, %v1067_v24, %v25891_v14  ;;  %v22621_v47 = vld [vmem:[#allocation6 + $0x200] ss:$12 sps:$4 sm:$0xff]   ;;  %v22622_v24 = vld [vmem:[#allocation6 + $0x210] ss:$12 sps:$4 sm:$0xff]  }
 0x2c4   : > { %v26016_v36 = vpack.c.bf16 %v26007_v48, %v1062_v11  ;;  %v26031_v30 = vpack.c.bf16 %v1082_v28, %v1068_v15  ;;  %v22624_v26 = vld [vmem:[#allocation6 + $0x214] ss:$12 sps:$4 sm:$0xff]   ;;  %v22630_v11 = vld [vmem:[#allocation6 + $0x2f0] ss:$12 sps:$4 sm:$0xff]  }
 0x2c5   : > { %7413 = vmatpush1.bf16.msra.mxu0 %v22607_v61  ;;  %21246 = vmatpush3.bf16.msra.mxu1 %v22611_v41  ;;  %v26010_v61 = vpack.c.bf16 %v25999_v34, %v1056_v50  ;;  %v26029_v50 = vpack.c.bf16 %v26020_v58, %v1059_v21  ;;  %v22625_v41 = vld [vmem:[#allocation6 + $0x2d8] ss:$12 sps:$4 sm:$0xff]   ;;  %v22627_v21 = vld [vmem:[#allocation6 + $0x228] ss:$12 sps:$4 sm:$0xff]   ;;  %v22631_v15 = vld [vmem:[#allocation6 + $0x230] ss:$12 sps:$4 sm:$0xff]  }
 0x2c6   : > { %7414 = vmatprep.subr.bf16.mxu0 %v22614_v42  ;;  %21247 = vmatprep.subr.bf16.mxu1 %v22615_v27  ;;  %v26026_v27 = vsel %vm1013_vm7, %v1064_v19, %v25899_v17  ;;  %v22626_v19 = vld [vmem:[#allocation6 + $0x218] ss:$12 sps:$4 sm:$0xff]   ;;  %v22640_v28 = vld [vmem:[#allocation6 + $0x3e0] ss:$12 sps:$4 sm:$0xff]  }
 0x2c7   : > { %v26034_v31 = vpack.c.bf16 %v26026_v27, %v1065_v7  ;;  %v22629_v42 = vld [vmem:[#allocation6 + $0x22c] ss:$12 sps:$4 sm:$0xff]   ;;  %v22635_v7 = vld [vmem:[#allocation6 + $0x3c8] ss:$12 sps:$4 sm:$0xff]  }
 0x2c9   : > { %7415 = vmatpush1.bf16.msra.mxu0 %v22612_v13  ;;  %21248 = vmatpush3.bf16.msra.mxu1 %v22616_v39  ;;  %v22634_v13 = vld [vmem:[#allocation6 + $0x244] ss:$12 sps:$4 sm:$0xff]   ;;  %v22632_v39 = vld [vmem:[#allocation6 + $0x240] ss:$12 sps:$4 sm:$0xff]  }
 0x2ca   : > { %7416 = vmatprep.subr.bf16.mxu0 %v22619_v57  ;;  %21249 = vmatprep.subr.bf16.mxu1 %v22620_v43  ;;  %v22636_v57 = vld [vmem:[#allocation6 + $0x308] ss:$12 sps:$4 sm:$0xff]   ;;  %v26038_v43 = vpack.c.bf16 %v25903_v18, %v25865_v33  ;;  %v22642_v18 = vld [vmem:[#allocation6 + $0x270] ss:$12 sps:$4 sm:$0xff]  }
 0x2cd   : > { %7417 = vmatpush1.bf16.msra.mxu0 %v22617_v2  ;;  %21250 = vmatpush3.bf16.msra.mxu1 %v22621_v47  ;;  %v22639_v2 = vld [vmem:[#allocation6 + $0x25c] ss:$12 sps:$4 sm:$0xff]   ;;  %v26043_v47 = vpack.c.bf16 %v25913_v54, %v25868_v55 }
 0x2ce   : > { %7418 = vmatprep.subr.bf16.mxu0 %v22624_v26  ;;  %21251 = vmatprep.subr.bf16.mxu1 %v22625_v41  ;;  %v22637_v26 = vld [vmem:[#allocation6 + $0x258] ss:$12 sps:$4 sm:$0xff]   ;;  %v22641_v41 = vld [vmem:[#allocation6 + $0x320] ss:$12 sps:$4 sm:$0xff]   ;;  %v22647_v54 = vld [vmem:[#allocation6 + $0x288] ss:$12 sps:$4 sm:$0xff]  }
 0x2d1   : > { %7419 = vmatpush1.bf16.msra.mxu0 %v22622_v24  ;;  %21252 = vmatpush3.bf16.msra.mxu1 %v22626_v19  ;;  %v22644_v24 = vld [vmem:[#allocation6 + $0x274] ss:$12 sps:$4 sm:$0xff]   ;;  %v22645_v19 = vld [vmem:[#allocation6 + $0x3f8] ss:$12 sps:$4 sm:$0xff]  }
 0x2d2   : > { %7420 = vmatprep.subr.bf16.mxu0 %v22629_v42  ;;  %21253 = vmatprep.subr.bf16.mxu1 %v22630_v11  ;;  %v22646_v42 = vld [vmem:[#allocation6 + $0x338] ss:$12 sps:$4 sm:$0xff]  }
 0x2d3   : > { %v22649_v11 = vld [vmem:[#allocation6 + $0x28c] ss:$12 sps:$4 sm:$0xff]  }
 0x2d5   : > { %7421 = vmatpush1.bf16.msra.mxu0 %v22627_v21  ;;  %21254 = vmatpush3.bf16.msra.mxu1 %v22631_v15  ;;  %v22650_v21 = vld [vmem:[#allocation6 + $0x410] ss:$12 sps:$4 sm:$0xff]  }
 0x2d6   : > { %7422 = vmatprep.subr.bf16.mxu0 %v22634_v13  ;;  %21261 = vmatprep.subr.bf16.mxu1 %v22635_v7  ;;  %v22651_v15 = vld [vmem:[#allocation6 + $0x350] ss:$12 sps:$4 sm:$0xff]   ;;  %v22655_v7 = vld [vmem:[#allocation6 + $0x428] ss:$12 sps:$4 sm:$0xff]  }
 0x2d7   : > { %v22654_v13 = vld [vmem:[#allocation6 + $0x2a4] ss:$12 sps:$4 sm:$0xff]  }
 0x2d8   : > { %8297 = vmatmul.mubr.bf16.vlgmr.msra.gmra.mrb[8].mxu1 %v26038_v43 }
 0x2d9   : > { %7423 = vmatpush1.bf16.msra.mxu0 %v22632_v39  ;;  %21262 = vmatpush3.bf16.msra.mxu1 %v22636_v57  ;;  %v22652_v39 = vld [vmem:[#allocation6 + $0x2a0] ss:$12 sps:$4 sm:$0xff]   ;;  %v22656_v57 = vld [vmem:[#allocation6 + $0x368] ss:$12 sps:$4 sm:$0xff]  }
 0x2da   : > { %8337 = vmatprep.mubr.bf16.mxu1 %v26043_v47  ;;  %7424 = vmatprep.subr.bf16.mxu0 %v22639_v2  ;;  %v22659_v2 = vld [vmem:[#allocation6 + $0x2bc] ss:$12 sps:$4 sm:$0xff]  }
 0x2db   : > { %21263 = vmatprep.subr.bf16.mxu1 %v22640_v28  ;;  %v22660_v28 = vld [vmem:[#allocation6 + $0x440] ss:$12 sps:$4 sm:$0xff]  }
 0x2dd   : > { %7425 = vmatpush1.bf16.msra.mxu0 %v22637_v26  ;;  %21264 = vmatpush3.bf16.msra.mxu1 %v22641_v41  ;;  %v22657_v26 = vld [vmem:[#allocation6 + $0x2b8] ss:$12 sps:$4 sm:$0xff]   ;;  %v22661_v41 = vld [vmem:[#allocation6 + $0x380] ss:$12 sps:$4 sm:$0xff]  }
 0x2de   : > { %7426 = vmatprep.subr.bf16.mxu0 %v22644_v24  ;;  %21265 = vmatprep.subr.bf16.mxu1 %v22645_v19  ;;  %v22664_v24 = vld [vmem:[#allocation6 + $0x2d4] ss:$12 sps:$4 sm:$0xff]   ;;  %v22665_v19 = vld [vmem:[#allocation6 + $0x458] ss:$12 sps:$4 sm:$0xff]  }
 0x2e1   : > { %7427 = vmatpush1.bf16.msra.mxu0 %v22642_v18  ;;  %21266 = vmatpush3.bf16.msra.mxu1 %v22646_v42  ;;  %v22662_v18 = vld [vmem:[#allocation6 + $0x2d0] ss:$12 sps:$4 sm:$0xff]   ;;  %v22666_v42 = vld [vmem:[#allocation6 + $0x398] ss:$12 sps:$4 sm:$0xff]  }
 0x2e2   : > { %7428 = vmatprep.subr.bf16.mxu0 %v22649_v11  ;;  %21267 = vmatprep.subr.bf16.mxu1 %v22650_v21  ;;  %v22669_v11 = vld [vmem:[#allocation6 + $0x2ec] ss:$12 sps:$4 sm:$0xff]   ;;  %v22670_v21 = vld [vmem:[#allocation6 + $0x470] ss:$12 sps:$4 sm:$0xff]  }
 0x2e5   : > { %7429 = vmatpush1.bf16.msra.mxu0 %v22647_v54  ;;  %21268 = vmatpush3.bf16.msra.mxu1 %v22651_v15  ;;  %v22667_v54 = vld [vmem:[#allocation6 + $0x2e8] ss:$12 sps:$4 sm:$0xff]   ;;  %v22671_v15 = vld [vmem:[#allocation6 + $0x3b0] ss:$12 sps:$4 sm:$0xff]  }
 0x2e6   : > { %7430 = vmatprep.subr.bf16.mxu0 %v22654_v13  ;;  %21269 = vmatprep.subr.bf16.mxu1 %v22655_v7  ;;  %v22674_v13 = vld [vmem:[#allocation6 + $0x304] ss:$12 sps:$4 sm:$0xff]   ;;  %v22675_v7 = vld [vmem:[#allocation6 + $0x548] ss:$12 sps:$4 sm:$0xff]  }
 0x2e9   : > { %7431 = vmatpush1.bf16.msra.mxu0 %v22652_v39  ;;  %21270 = vmatpush3.bf16.msra.mxu1 %v22656_v57  ;;  %v22672_v39 = vld [vmem:[#allocation6 + $0x300] ss:$12 sps:$4 sm:$0xff]   ;;  %v22676_v57 = vld [vmem:[#allocation6 + $0x488] ss:$12 sps:$4 sm:$0xff]  }
 0x2ea   : > { %7432 = vmatprep.subr.bf16.mxu0 %v22659_v2  ;;  %21271 = vmatprep.subr.bf16.mxu1 %v22660_v28  ;;  %v22679_v2 = vld [vmem:[#allocation6 + $0x31c] ss:$12 sps:$4 sm:$0xff]   ;;  %v22680_v28 = vld [vmem:[#allocation6 + $0x560] ss:$12 sps:$4 sm:$0xff]  }
 0x2ed   : > { %7433 = vmatpush1.bf16.msra.mxu0 %v22657_v26  ;;  %21272 = vmatpush3.bf16.msra.mxu1 %v22661_v41  ;;  %v26048_v26 = vpack.c.bf16 %v25917_v29, %v25877_v4  ;;  %v26054_v41 = vpack.c.bf16 %v25922_v40, %v25891_v14  ;;  %v22685_v29 = vld [vmem:[#allocation6 + $0x578] ss:$12 sps:$4 sm:$0xff]   ;;  %v22690_v40 = vld [vmem:[#allocation6 + $0x590] ss:$12 sps:$4 sm:$0xff]  }
 0x2ee   : > { %7434 = vmatprep.subr.bf16.mxu0 %v22664_v24  ;;  %21273 = vmatprep.subr.bf16.mxu1 %v22665_v19  ;;  %v22677_v24 = vld [vmem:[#allocation6 + $0x318] ss:$12 sps:$4 sm:$0xff]   ;;  %v22681_v19 = vld [vmem:[#allocation6 + $0x4a0] ss:$12 sps:$4 sm:$0xff]  }
 0x2f1   : > { %7435 = vmatpush1.bf16.msra.mxu0 %v22662_v18  ;;  %21274 = vmatpush3.bf16.msra.mxu1 %v22666_v42  ;;  %v22684_v18 = vld [vmem:[#allocation6 + $0x334] ss:$12 sps:$4 sm:$0xff]   ;;  %v22686_v42 = vld [vmem:[#allocation6 + $0x4b8] ss:$12 sps:$4 sm:$0xff]  }
 0x2f2   : > { %7436 = vmatprep.subr.bf16.mxu0 %v22669_v11  ;;  %21275 = vmatprep.subr.bf16.mxu1 %v22670_v21  ;;  %v22689_v11 = vld [vmem:[#allocation6 + $0x34c] ss:$12 sps:$4 sm:$0xff]   ;;  %v22687_v21 = vld [vmem:[#allocation6 + $0x348] ss:$12 sps:$4 sm:$0xff]  }
 0x2f5   : > { %7437 = vmatpush1.bf16.msra.mxu0 %v22667_v54  ;;  %21276 = vmatpush3.bf16.msra.mxu1 %v22671_v15  ;;  %v22694_v54 = vld [vmem:[#allocation6 + $0x364] ss:$12 sps:$4 sm:$0xff]   ;;  %v22695_v15 = vld [vmem:[#allocation6 + $0x5a8] ss:$12 sps:$4 sm:$0xff]  }
 0x2f6   : > { %7449 = vmatprep.subr.bf16.mxu0 %v22674_v13  ;;  %21283 = vmatprep.subr.bf16.mxu1 %v22675_v7  ;;  %v22692_v13 = vld [vmem:[#allocation6 + $0x360] ss:$12 sps:$4 sm:$0xff]   ;;  %v22696_v7 = vld [vmem:[#allocation6 + $0x4e8] ss:$12 sps:$4 sm:$0xff]  }
 0x2f8   : > { %7439 = vmatmul.mubr.bf16.vlgmr.msra.gmra.mrb[12].mxu0 %v26038_v43  ;;  %8338 = vmatmul.mubr.bf16.vlgmr.msra.gmra.mrb[12].mxu1 %v26048_v26  ;;  %v22682_v43 = vld [vmem:[#allocation6 + $0x330] ss:$12 sps:$4 sm:$0xff]  }
 0x2f9   : > { %7450 = vmatpush1.bf16.msra.mxu0 %v22672_v39  ;;  %7481 = vmatprep.mubr.bf16.mxu0 %v26043_v47  ;;  %v22691_v47 = vld [vmem:[#allocation6 + $0x4d0] ss:$12 sps:$4 sm:$0xff]  }
 0x2fa   : > { %21284 = vmatpush3.bf16.msra.mxu1 %v22676_v57  ;;  %8378 = vmatprep.mubr.bf16.mxu1 %v26054_v41  ;;  %v22699_v39 = vld [vmem:[#allocation6 + $0x37c] ss:$12 sps:$4 sm:$0xff]   ;;  %v22700_v57 = vld [vmem:[#allocation6 + $0x5c0] ss:$12 sps:$4 sm:$0xff]  }
 0x2fb   : > { %7451 = vmatprep.subr.bf16.mxu0 %v22679_v2  ;;  %21285 = vmatprep.subr.bf16.mxu1 %v22680_v28  ;;  %v22697_v2 = vld [vmem:[#allocation6 + $0x378] ss:$12 sps:$4 sm:$0xff]   ;;  %v22701_v28 = vld [vmem:[#allocation6 + $0x500] ss:$12 sps:$4 sm:$0xff]  }
 0x2fd   : > { %7452 = vmatpush1.bf16.msra.mxu0 %v22677_v24  ;;  %v22704_v24 = vld [vmem:[#allocation6 + $0x394] ss:$12 sps:$4 sm:$0xff]  }
 0x2fe   : > { %21286 = vmatpush3.bf16.msra.mxu1 %v22681_v19  ;;  %7453 = vmatprep.subr.bf16.mxu0 %v22684_v18  ;;  %v22705_v19 = vld [vmem:[#allocation6 + $0x5d8] ss:$12 sps:$4 sm:$0xff]   ;;  %v22702_v18 = vld [vmem:[#allocation6 + $0x390] ss:$12 sps:$4 sm:$0xff]  }
 0x2ff   : > { %21287 = vmatprep.subr.bf16.mxu1 %v22685_v29  ;;  %v22706_v29 = vld [vmem:[#allocation6 + $0x518] ss:$12 sps:$4 sm:$0xff]  }
 0x301   : > { %7454 = vmatpush1.bf16.msra.mxu0 %v22682_v43  ;;  %v22709_v43 = vld [vmem:[#allocation6 + $0x3ac] ss:$12 sps:$4 sm:$0xff]  }
 0x302   : > { %21288 = vmatpush3.bf16.msra.mxu1 %v22686_v42  ;;  %7455 = vmatprep.subr.bf16.mxu0 %v22689_v11  ;;  %v22710_v42 = vld [vmem:[#allocation6 + $0x5f0] ss:$12 sps:$4 sm:$0xff]   ;;  %v22707_v11 = vld [vmem:[#allocation6 + $0x3a8] ss:$12 sps:$4 sm:$0xff]  }
 0x303   : > { %21289 = vmatprep.subr.bf16.mxu1 %v22690_v40  ;;  %v22711_v40 = vld [vmem:[#allocation6 + $0x530] ss:$12 sps:$4 sm:$0xff]  }
 0x305   : > { %7456 = vmatpush1.bf16.msra.mxu0 %v22687_v21  ;;  %v22714_v21 = vld [vmem:[#allocation6 + $0x3c4] ss:$12 sps:$4 sm:$0xff]  }
 0x306   : > { %21290 = vmatpush3.bf16.msra.mxu1 %v22691_v47  ;;  %7457 = vmatprep.subr.bf16.mxu0 %v22694_v54  ;;  %v22715_v47 = vld [vmem:[#allocation6 + $0x6c8] ss:$12 sps:$4 sm:$0xff]   ;;  %v22712_v54 = vld [vmem:[#allocation6 + $0x3c0] ss:$12 sps:$4 sm:$0xff]  }
 0x307   : > { %21291 = vmatprep.subr.bf16.mxu1 %v22695_v15  ;;  %v22716_v15 = vld [vmem:[#allocation6 + $0x608] ss:$12 sps:$4 sm:$0xff]  }
 0x309   : > { %7458 = vmatpush1.bf16.msra.mxu0 %v22692_v13  ;;  %v22719_v13 = vld [vmem:[#allocation6 + $0x3dc] ss:$12 sps:$4 sm:$0xff]  }
 0x30a   : > { %21292 = vmatpush3.bf16.msra.mxu1 %v22696_v7  ;;  %7459 = vmatprep.subr.bf16.mxu0 %v22699_v39  ;;  %v22720_v7 = vld [vmem:[#allocation6 + $0x6e0] ss:$12 sps:$4 sm:$0xff]   ;;  %v26060_v39 = vpack.c.bf16 %v25957_v25, %v25899_v17 }
 0x30b   : > { %21293 = vmatprep.subr.bf16.mxu1 %v22700_v57  ;;  %v22717_v57 = vld [vmem:[#allocation6 + $0x3d8] ss:$12 sps:$4 sm:$0xff]  }
 0x30c   : > { %v22729_v25 = vld [vmem:[#allocation6 + $0x40c] ss:$12 sps:$4 sm:$0xff]  }
 0x30d   : > { %7460 = vmatpush1.bf16.msra.mxu0 %v22697_v2  ;;  %v22721_v2 = vld [vmem:[#allocation6 + $0x620] ss:$12 sps:$4 sm:$0xff]  }
 0x30e   : > { %21294 = vmatpush3.bf16.msra.mxu1 %v22701_v28  ;;  %7461 = vmatprep.subr.bf16.mxu0 %v22704_v24  ;;  %v22724_v28 = vld [vmem:[#allocation6 + $0x3f4] ss:$12 sps:$4 sm:$0xff]   ;;  %v22725_v24 = vld [vmem:[#allocation6 + $0x6f8] ss:$12 sps:$4 sm:$0xff]  }
 0x30f   : > { %21295 = vmatprep.subr.bf16.mxu1 %v22705_v19  ;;  %v22722_v19 = vld [vmem:[#allocation6 + $0x3f0] ss:$12 sps:$4 sm:$0xff]  }
 0x311   : > { %7462 = vmatpush1.bf16.msra.mxu0 %v22702_v18  ;;  %v22726_v18 = vld [vmem:[#allocation6 + $0x638] ss:$12 sps:$4 sm:$0xff]  }
 0x312   : > { %21296 = vmatpush3.bf16.msra.mxu1 %v22706_v29  ;;  %7463 = vmatprep.subr.bf16.mxu0 %v22709_v43  ;;  %v22730_v29 = vld [vmem:[#allocation6 + $0x710] ss:$12 sps:$4 sm:$0xff]   ;;  %v22727_v43 = vld [vmem:[#allocation6 + $0x408] ss:$12 sps:$4 sm:$0xff]  }
 0x313   : > { %21297 = vmatprep.subr.bf16.mxu1 %v22710_v42  ;;  %v22731_v42 = vld [vmem:[#allocation6 + $0x650] ss:$12 sps:$4 sm:$0xff]  }
 0x315   : > { %7464 = vmatpush1.bf16.msra.mxu0 %v22707_v11  ;;  %v22734_v11 = vld [vmem:[#allocation6 + $0x424] ss:$12 sps:$4 sm:$0xff]  }
 0x316   : > { %21298 = vmatpush3.bf16.msra.mxu1 %v22711_v40  ;;  %7465 = vmatprep.subr.bf16.mxu0 %v22714_v21  ;;  %v22735_v40 = vld [vmem:[#allocation6 + $0x728] ss:$12 sps:$4 sm:$0xff]   ;;  %v22732_v21 = vld [vmem:[#allocation6 + $0x420] ss:$12 sps:$4 sm:$0xff]  }
 0x317   : > { %21305 = vmatprep.subr.bf16.mxu1 %v22715_v47  ;;  %v22736_v47 = vld [vmem:[#allocation6 + $0x668] ss:$12 sps:$4 sm:$0xff]  }
 0x319   : > { %8379 = vmatmul.mubr.bf16.vlgmr.msra.gmra.mrb[16].mxu1 %v26060_v39  ;;  %7466 = vmatpush1.bf16.msra.mxu0 %v22712_v54  ;;  %v22739_v54 = vld [vmem:[#allocation6 + $0x43c] ss:$12 sps:$4 sm:$0xff]  }
 0x31a   : > { %21306 = vmatpush3.bf16.msra.mxu1 %v22716_v15  ;;  %8419 = vmatprep.mubr.bf16.mxu1 %v25927_v49  ;;  %v22740_v15 = vld [vmem:[#allocation6 + $0x740] ss:$12 sps:$4 sm:$0xff]  }
 0x31b   : > { %7467 = vmatprep.subr.bf16.mxu0 %v22719_v13  ;;  %21307 = vmatprep.subr.bf16.mxu1 %v22720_v7  ;;  %v22737_v13 = vld [vmem:[#allocation6 + $0x438] ss:$12 sps:$4 sm:$0xff]   ;;  %v22741_v7 = vld [vmem:[#allocation6 + $0x680] ss:$12 sps:$4 sm:$0xff]  }
 0x31d   : > { %7468 = vmatpush1.bf16.msra.mxu0 %v22717_v57  ;;  %v22744_v57 = vld [vmem:[#allocation6 + $0x454] ss:$12 sps:$4 sm:$0xff]  }
 0x31e   : > { %21308 = vmatpush3.bf16.msra.mxu1 %v22721_v2  ;;  %7469 = vmatprep.subr.bf16.mxu0 %v22724_v28  ;;  %v22742_v2 = vld [vmem:[#allocation6 + $0x450] ss:$12 sps:$4 sm:$0xff]   ;;  %v22745_v28 = vld [vmem:[#allocation6 + $0x758] ss:$12 sps:$4 sm:$0xff]  }
 0x31f   : > { %21309 = vmatprep.subr.bf16.mxu1 %v22725_v24  ;;  %v22746_v24 = vld [vmem:[#allocation6 + $0x698] ss:$12 sps:$4 sm:$0xff]  }
 0x321   : > { %7470 = vmatpush1.bf16.msra.mxu0 %v22722_v19  ;;  %v22749_v19 = vld [vmem:[#allocation6 + $0x46c] ss:$12 sps:$4 sm:$0xff]  }
 0x322   : > { %21310 = vmatpush3.bf16.msra.mxu1 %v22726_v18  ;;  %7471 = vmatprep.subr.bf16.mxu0 %v22729_v25  ;;  %v22750_v18 = vld [vmem:[#allocation6 + $0x770] ss:$12 sps:$4 sm:$0xff]   ;;  %v22921_v25 = vld [vmem:[#allocation6 + $0xda0] ss:$12 sps:$4 sm:$0xff]  }
 0x323   : > { %21311 = vmatprep.subr.bf16.mxu1 %v22730_v29  ;;  %v22747_v29 = vld [vmem:[#allocation6 + $0x468] ss:$12 sps:$4 sm:$0xff]  }
 0x325   : > { %7472 = vmatpush1.bf16.msra.mxu0 %v22727_v43  ;;  %v22751_v43 = vld [vmem:[#allocation6 + $0x6b0] ss:$12 sps:$4 sm:$0xff]  }
 0x326   : > { %21312 = vmatpush3.bf16.msra.mxu1 %v22731_v42  ;;  %7473 = vmatprep.subr.bf16.mxu0 %v22734_v11  ;;  %v22754_v42 = vld [vmem:[#allocation6 + $0x484] ss:$12 sps:$4 sm:$0xff]  }
 0x327   : > { %21313 = vmatprep.subr.bf16.mxu1 %v22735_v40  ;;  %v22752_v40 = vld [vmem:[#allocation6 + $0x480] ss:$12 sps:$4 sm:$0xff]   ;;  %v24234_v11 = vld [vmem:[#allocation6 + $0x24f0] ss:$12 sps:$4 sm:$0xff]  }
 0x329   : > { %7474 = vmatpush1.bf16.msra.mxu0 %v22732_v21  ;;  %v22755_v21 = vld [vmem:[#allocation6 + $0x848] ss:$12 sps:$4 sm:$0xff]  }
 0x32a   : > { %21314 = vmatpush3.bf16.msra.mxu1 %v22736_v47  ;;  %7475 = vmatprep.subr.bf16.mxu0 %v22739_v54  ;;  %v22756_v47 = vld [vmem:[#allocation6 + $0x788] ss:$12 sps:$4 sm:$0xff]  }
 0x32b   : > { %21315 = vmatprep.subr.bf16.mxu1 %v22740_v15  ;;  %v22759_v54 = vld [vmem:[#allocation6 + $0x49c] ss:$12 sps:$4 sm:$0xff]   ;;  %v27142_v15 = vmov 0.0  }
 0x32d   : > { %7476 = vmatpush1.bf16.msra.mxu0 %v22737_v13  ;;  %v26078_v13 = vpack.c.bf16 %v25848_v46, %v27142_v15  ;;  %v22765_v46 = vld [vmem:[#allocation6 + $0x878] ss:$12 sps:$4 sm:$0xff]  }
 0x32e   : > { %21316 = vmatpush3.bf16.msra.mxu1 %v22741_v7  ;;  %7477 = vmatprep.subr.bf16.mxu0 %v22744_v57  ;;  %v22757_v7 = vld [vmem:[#allocation6 + $0x498] ss:$12 sps:$4 sm:$0xff]   ;;  %v22760_v57 = vld [vmem:[#allocation6 + $0x860] ss:$12 sps:$4 sm:$0xff]  }
 0x32f   : > { %21317 = vmatprep.subr.bf16.mxu1 %v22745_v28  ;;  %v22764_v28 = vld [vmem:[#allocation6 + $0x4b4] ss:$12 sps:$4 sm:$0xff]  }
 0x331   : > { %7478 = vmatpush1.bf16.msra.mxu0 %v22742_v2  ;;  %v22761_v2 = vld [vmem:[#allocation6 + $0x7a0] ss:$12 sps:$4 sm:$0xff]  }
 0x332   : > { %21318 = vmatpush3.bf16.msra.mxu1 %v22746_v24  ;;  %7479 = vmatprep.subr.bf16.mxu0 %v22749_v19  ;;  %v22762_v24 = vld [vmem:[#allocation6 + $0x4b0] ss:$12 sps:$4 sm:$0xff]   ;;  %v22769_v19 = vld [vmem:[#allocation6 + $0x4cc] ss:$12 sps:$4 sm:$0xff]  }
 0x333   : > { %21319 = vmatprep.subr.bf16.mxu1 %v22750_v18  ;;  %v22770_v18 = vld [vmem:[#allocation6 + $0x890] ss:$12 sps:$4 sm:$0xff]  }
 0x335   : > { %7480 = vmatpush1.bf16.msra.mxu0 %v22747_v29  ;;  %v22767_v29 = vld [vmem:[#allocation6 + $0x4c8] ss:$12 sps:$4 sm:$0xff]  }
 0x336   : > { %21320 = vmatpush3.bf16.msra.mxu1 %v22751_v43  ;;  %7492 = vmatprep.subr.bf16.mxu0 %v22754_v42  ;;  %v22774_v43 = vld [vmem:[#allocation6 + $0x4e4] ss:$12 sps:$4 sm:$0xff]   ;;  %v22775_v42 = vld [vmem:[#allocation6 + $0x8a8] ss:$12 sps:$4 sm:$0xff]  }
 0x337   : > { %21327 = vmatprep.subr.bf16.mxu1 %v22755_v21  ;;  %v22776_v21 = vld [vmem:[#allocation6 + $0x7e8] ss:$12 sps:$4 sm:$0xff]  }
 0x338   : > { %7482 = vmatmul.mubr.bf16.vlgmr.msra.gmra.mrb[12].mxu0 %v26048_v26  ;;  %v22766_v26 = vld [vmem:[#allocation6 + $0x7b8] ss:$12 sps:$4 sm:$0xff]  }
 0x339   : > { %20091 = vmatmul.mubr.msk.bf16.vlgmr.msra.gmra.mrb[20].mxu1 %vm26072_vm10, %v26078_v13  ;;  %7493 = vmatpush1.bf16.msra.mxu0 %v22752_v40  ;;  %v22772_v40 = vld [vmem:[#allocation6 + $0x4e0] ss:$12 sps:$4 sm:$0xff]  }
 0x33a   : > { %7524 = vmatprep.mubr.bf16.mxu0 %v26054_v41  ;;  %21328 = vmatpush3.bf16.msra.mxu1 %v22756_v47  ;;  %v22771_v41 = vld [vmem:[#allocation6 + $0x7d0] ss:$12 sps:$4 sm:$0xff]  }
 0x33b   : > { %8460 = vmatprep.mubr.bf16.mxu1 %v25932_v52  ;;  %7494 = vmatprep.subr.bf16.mxu0 %v22759_v54  ;;  %v22779_v47 = vld [vmem:[#allocation6 + $0x4fc] ss:$12 sps:$4 sm:$0xff]   ;;  %v22780_v54 = vld [vmem:[#allocation6 + $0x8c0] ss:$12 sps:$4 sm:$0xff]  }
 0x33c   : > { %21329 = vmatprep.subr.bf16.mxu1 %v22760_v57  ;;  %v22781_v57 = vld [vmem:[#allocation6 + $0x800] ss:$12 sps:$4 sm:$0xff]  }
 0x33d   : > { %7495 = vmatpush1.bf16.msra.mxu0 %v22757_v7  ;;  %v22777_v7 = vld [vmem:[#allocation6 + $0x4f8] ss:$12 sps:$4 sm:$0xff]  }
 0x33e   : > { %21330 = vmatpush3.bf16.msra.mxu1 %v22761_v2  ;;  %7496 = vmatprep.subr.bf16.mxu0 %v22764_v28  ;;  %v22784_v2 = vld [vmem:[#allocation6 + $0x514] ss:$12 sps:$4 sm:$0xff]   ;;  %v22782_v28 = vld [vmem:[#allocation6 + $0x510] ss:$12 sps:$4 sm:$0xff]  }
 0x33f   : > { %21331 = vmatprep.subr.bf16.mxu1 %v22765_v46  ;;  %v22785_v46 = vld [vmem:[#allocation6 + $0x8d8] ss:$12 sps:$4 sm:$0xff]  }
 0x341   : > { %7497 = vmatpush1.bf16.msra.mxu0 %v22762_v24  ;;  %v22786_v24 = vld [vmem:[#allocation6 + $0x818] ss:$12 sps:$4 sm:$0xff]  }
 0x342   : > { %21332 = vmatpush3.bf16.msra.mxu1 %v22766_v26  ;;  %7498 = vmatprep.subr.bf16.mxu0 %v22769_v19  ;;  %v22789_v26 = vld [vmem:[#allocation6 + $0x52c] ss:$12 sps:$4 sm:$0xff]   ;;  %v22790_v19 = vld [vmem:[#allocation6 + $0x8f0] ss:$12 sps:$4 sm:$0xff]  }
 0x343   : > { %21333 = vmatprep.subr.bf16.mxu1 %v22770_v18  ;;  %v22787_v18 = vld [vmem:[#allocation6 + $0x528] ss:$12 sps:$4 sm:$0xff]  }
 0x345   : > { %7499 = vmatpush1.bf16.msra.mxu0 %v22767_v29  ;;  %v22791_v29 = vld [vmem:[#allocation6 + $0x830] ss:$12 sps:$4 sm:$0xff]  }
 0x346   : > { %21334 = vmatpush3.bf16.msra.mxu1 %v22771_v41  ;;  %7500 = vmatprep.subr.bf16.mxu0 %v22774_v43  ;;  %v22794_v41 = vld [vmem:[#allocation6 + $0x544] ss:$12 sps:$4 sm:$0xff]   ;;  %v22792_v43 = vld [vmem:[#allocation6 + $0x540] ss:$12 sps:$4 sm:$0xff]  }
 0x347   : > { %21335 = vmatprep.subr.bf16.mxu1 %v22775_v42  ;;  %v22795_v42 = vld [vmem:[#allocation6 + $0x9c8] ss:$12 sps:$4 sm:$0xff]  }
 0x349   : > { %7501 = vmatpush1.bf16.msra.mxu0 %v22772_v40  ;;  %v22796_v40 = vld [vmem:[#allocation6 + $0x908] ss:$12 sps:$4 sm:$0xff]  }
 0x34a   : > { %21336 = vmatpush3.bf16.msra.mxu1 %v22776_v21  ;;  %7502 = vmatprep.subr.bf16.mxu0 %v22779_v47  ;;  %v22799_v21 = vld [vmem:[#allocation6 + $0x55c] ss:$12 sps:$4 sm:$0xff]   ;;  %v22800_v47 = vld [vmem:[#allocation6 + $0x9e0] ss:$12 sps:$4 sm:$0xff]  }
 0x34b   : > { %21337 = vmatprep.subr.bf16.mxu1 %v22780_v54  ;;  %v22797_v54 = vld [vmem:[#allocation6 + $0x558] ss:$12 sps:$4 sm:$0xff]  }
 0x34d   : > { %7503 = vmatpush1.bf16.msra.mxu0 %v22777_v7  ;;  %v22801_v7 = vld [vmem:[#allocation6 + $0x920] ss:$12 sps:$4 sm:$0xff]  }
 0x34e   : > { %21338 = vmatpush3.bf16.msra.mxu1 %v22781_v57  ;;  %7504 = vmatprep.subr.bf16.mxu0 %v22784_v2  ;;  %v22804_v57 = vld [vmem:[#allocation6 + $0x574] ss:$12 sps:$4 sm:$0xff]   ;;  %v22805_v2 = vld [vmem:[#allocation6 + $0x9f8] ss:$12 sps:$4 sm:$0xff]  }
 0x34f   : > { %21339 = vmatprep.subr.bf16.mxu1 %v22785_v46  ;;  %v22806_v46 = vld [vmem:[#allocation6 + $0x938] ss:$12 sps:$4 sm:$0xff]  }
 0x351   : > { %7505 = vmatpush1.bf16.msra.mxu0 %v22782_v28  ;;  %v22802_v28 = vld [vmem:[#allocation6 + $0x570] ss:$12 sps:$4 sm:$0xff]  }
 0x352   : > { %21340 = vmatpush3.bf16.msra.mxu1 %v22786_v24  ;;  %7506 = vmatprep.subr.bf16.mxu0 %v22789_v26  ;;  %v22809_v24 = vld [vmem:[#allocation6 + $0x58c] ss:$12 sps:$4 sm:$0xff]   ;;  %v22810_v26 = vld [vmem:[#allocation6 + $0xa10] ss:$12 sps:$4 sm:$0xff]  }
 0x353   : > { %21341 = vmatprep.subr.bf16.mxu1 %v22790_v19  ;;  %v22807_v19 = vld [vmem:[#allocation6 + $0x588] ss:$12 sps:$4 sm:$0xff]  }
 0x355   : > { %7507 = vmatpush1.bf16.msra.mxu0 %v22787_v18  ;;  %v22811_v18 = vld [vmem:[#allocation6 + $0x950] ss:$12 sps:$4 sm:$0xff]  }
 0x356   : > { %21342 = vmatpush3.bf16.msra.mxu1 %v22791_v29  ;;  %7508 = vmatprep.subr.bf16.mxu0 %v22794_v41  ;;  %v22814_v29 = vld [vmem:[#allocation6 + $0x5a4] ss:$12 sps:$4 sm:$0xff]   ;;  %v22815_v41 = vld [vmem:[#allocation6 + $0xa28] ss:$12 sps:$4 sm:$0xff]  }
 0x357   : > { %21349 = vmatprep.subr.bf16.mxu1 %v22795_v42  ;;  %v22816_v42 = vld [vmem:[#allocation6 + $0x968] ss:$12 sps:$4 sm:$0xff]  }
 0x359   : > { %8461 = vmatmul.mubr.bf16.vlgmr.msra.gmra.mrb[24].mxu1 %v25935_v60  ;;  %7509 = vmatpush1.bf16.msra.mxu0 %v22792_v43  ;;  %v22812_v43 = vld [vmem:[#allocation6 + $0x5a0] ss:$12 sps:$4 sm:$0xff]  }
 0x35a   : > { %21350 = vmatpush3.bf16.msra.mxu1 %v22796_v40  ;;  %8501 = vmatprep.mubr.bf16.mxu1 %v25939_v53  ;;  %v22819_v40 = vld [vmem:[#allocation6 + $0x5bc] ss:$12 sps:$4 sm:$0xff]  }
 0x35b   : > { %7510 = vmatprep.subr.bf16.mxu0 %v22799_v21  ;;  %21351 = vmatprep.subr.bf16.mxu1 %v22800_v47  ;;  %v22820_v21 = vld [vmem:[#allocation6 + $0xa40] ss:$12 sps:$4 sm:$0xff]   ;;  %v22817_v47 = vld [vmem:[#allocation6 + $0x5b8] ss:$12 sps:$4 sm:$0xff]  }
 0x35d   : > { %7511 = vmatpush1.bf16.msra.mxu0 %v22797_v54  ;;  %v22821_v54 = vld [vmem:[#allocation6 + $0x980] ss:$12 sps:$4 sm:$0xff]  }
 0x35e   : > { %21352 = vmatpush3.bf16.msra.mxu1 %v22801_v7  ;;  %7512 = vmatprep.subr.bf16.mxu0 %v22804_v57  ;;  %v22824_v7 = vld [vmem:[#allocation6 + $0x5d4] ss:$12 sps:$4 sm:$0xff]   ;;  %v22825_v57 = vld [vmem:[#allocation6 + $0xa58] ss:$12 sps:$4 sm:$0xff]  }
 0x35f   : > { %21353 = vmatprep.subr.bf16.mxu1 %v22805_v2  ;;  %v22822_v2 = vld [vmem:[#allocation6 + $0x5d0] ss:$12 sps:$4 sm:$0xff]  }
 0x361   : > { %7513 = vmatpush1.bf16.msra.mxu0 %v22802_v28  ;;  %v22826_v28 = vld [vmem:[#allocation6 + $0x998] ss:$12 sps:$4 sm:$0xff]  }
 0x362   : > { %21354 = vmatpush3.bf16.msra.mxu1 %v22806_v46  ;;  %7514 = vmatprep.subr.bf16.mxu0 %v22809_v24  ;;  %v22829_v46 = vld [vmem:[#allocation6 + $0x5ec] ss:$12 sps:$4 sm:$0xff]   ;;  %v22830_v24 = vld [vmem:[#allocation6 + $0xa70] ss:$12 sps:$4 sm:$0xff]  }
 0x363   : > { %21355 = vmatprep.subr.bf16.mxu1 %v22810_v26  ;;  %v22827_v26 = vld [vmem:[#allocation6 + $0x5e8] ss:$12 sps:$4 sm:$0xff]  }
 0x365   : > { %7515 = vmatpush1.bf16.msra.mxu0 %v22807_v19  ;;  %v22831_v19 = vld [vmem:[#allocation6 + $0x9b0] ss:$12 sps:$4 sm:$0xff]  }
 0x366   : > { %21356 = vmatpush3.bf16.msra.mxu1 %v22811_v18  ;;  %7516 = vmatprep.subr.bf16.mxu0 %v22814_v29  ;;  %v22834_v18 = vld [vmem:[#allocation6 + $0x604] ss:$12 sps:$4 sm:$0xff]   ;;  %v22832_v29 = vld [vmem:[#allocation6 + $0x600] ss:$12 sps:$4 sm:$0xff]  }
 0x367   : > { %21357 = vmatprep.subr.bf16.mxu1 %v22815_v41  ;;  %v22835_v41 = vld [vmem:[#allocation6 + $0xb48] ss:$12 sps:$4 sm:$0xff]  }
 0x369   : > { %7517 = vmatpush1.bf16.msra.mxu0 %v22812_v43  ;;  %v22836_v43 = vld [vmem:[#allocation6 + $0xa88] ss:$12 sps:$4 sm:$0xff]  }
 0x36a   : > { %21358 = vmatpush3.bf16.msra.mxu1 %v22816_v42  ;;  %7518 = vmatprep.subr.bf16.mxu0 %v22819_v40  ;;  %v22839_v42 = vld [vmem:[#allocation6 + $0x61c] ss:$12 sps:$4 sm:$0xff]   ;;  %v22837_v40 = vld [vmem:[#allocation6 + $0x618] ss:$12 sps:$4 sm:$0xff]  }
 0x36b   : > { %21359 = vmatprep.subr.bf16.mxu1 %v22820_v21  ;;  %v22840_v21 = vld [vmem:[#allocation6 + $0xb60] ss:$12 sps:$4 sm:$0xff]  }
 0x36d   : > { %7519 = vmatpush1.bf16.msra.mxu0 %v22817_v47  ;;  %v22841_v47 = vld [vmem:[#allocation6 + $0xaa0] ss:$12 sps:$4 sm:$0xff]  }
 0x36e   : > { %21360 = vmatpush3.bf16.msra.mxu1 %v22821_v54  ;;  %7520 = vmatprep.subr.bf16.mxu0 %v22824_v7  ;;  %v22844_v54 = vld [vmem:[#allocation6 + $0x634] ss:$12 sps:$4 sm:$0xff]   ;;  %v22845_v7 = vld [vmem:[#allocation6 + $0xb78] ss:$12 sps:$4 sm:$0xff]  }
 0x36f   : > { %21361 = vmatprep.subr.bf16.mxu1 %v22825_v57  ;;  %v22842_v57 = vld [vmem:[#allocation6 + $0x630] ss:$12 sps:$4 sm:$0xff]  }
 0x371   : > { %7521 = vmatpush1.bf16.msra.mxu0 %v22822_v2  ;;  %v22849_v2 = vld [vmem:[#allocation6 + $0x64c] ss:$12 sps:$4 sm:$0xff]  }
 0x372   : > { %21362 = vmatpush3.bf16.msra.mxu1 %v22826_v28  ;;  %7522 = vmatprep.subr.bf16.mxu0 %v22829_v46  ;;  %v22850_v28 = vld [vmem:[#allocation6 + $0xb90] ss:$12 sps:$4 sm:$0xff]   ;;  %v22847_v46 = vld [vmem:[#allocation6 + $0x648] ss:$12 sps:$4 sm:$0xff]  }
 0x373   : > { %21363 = vmatprep.subr.bf16.mxu1 %v22830_v24  ;;  %v22854_v24 = vld [vmem:[#allocation6 + $0x664] ss:$12 sps:$4 sm:$0xff]  }
 0x375   : > { %7523 = vmatpush1.bf16.msra.mxu0 %v22827_v26  ;;  %v22855_v26 = vld [vmem:[#allocation6 + $0xba8] ss:$12 sps:$4 sm:$0xff]  }
 0x376   : > { %21364 = vmatpush3.bf16.msra.mxu1 %v22831_v19  ;;  %7535 = vmatprep.subr.bf16.mxu0 %v22834_v18  ;;  %v22852_v19 = vld [vmem:[#allocation6 + $0x660] ss:$12 sps:$4 sm:$0xff]   ;;  %v22856_v18 = vld [vmem:[#allocation6 + $0xae8] ss:$12 sps:$4 sm:$0xff]  }
 0x377   : > { %21371 = vmatprep.subr.bf16.mxu1 %v22835_v41  ;;  %v22860_v41 = vld [vmem:[#allocation6 + $0xbc0] ss:$12 sps:$4 sm:$0xff]  }
 0x378   : > { %7525 = vmatmul.mubr.bf16.vlgmr.msra.gmra.mrb[12].mxu0 %v26060_v39  ;;  %v22846_v39 = vld [vmem:[#allocation6 + $0xab8] ss:$12 sps:$4 sm:$0xff]  }
 0x379   : > { %8502 = vmatmul.mubr.bf16.vlgmr.msra.gmra.mrb[28].mxu1 %v25945_v12  ;;  %7536 = vmatpush1.bf16.msra.mxu0 %v22832_v29  ;;  %v22859_v29 = vld [vmem:[#allocation6 + $0x67c] ss:$12 sps:$4 sm:$0xff]  }
 0x37a   : > { %7567 = vmatprep.mubr.bf16.mxu0 %v25927_v49  ;;  %21372 = vmatpush3.bf16.msra.mxu1 %v22836_v43  ;;  %v22851_v49 = vld [vmem:[#allocation6 + $0xad0] ss:$12 sps:$4 sm:$0xff]   ;;  %v22857_v43 = vld [vmem:[#allocation6 + $0x678] ss:$12 sps:$4 sm:$0xff]  }
 0x37b   : > { %8542 = vmatprep.mubr.bf16.mxu1 %v25948_v38  ;;  %7537 = vmatprep.subr.bf16.mxu0 %v22839_v42  ;;  %v22861_v42 = vld [vmem:[#allocation6 + $0xb00] ss:$12 sps:$4 sm:$0xff]  }
 0x37c   : > { %21373 = vmatprep.subr.bf16.mxu1 %v22840_v21  ;;  %v22865_v21 = vld [vmem:[#allocation6 + $0xbd8] ss:$12 sps:$4 sm:$0xff]  }
 0x37d   : > { %7538 = vmatpush1.bf16.msra.mxu0 %v22837_v40  ;;  %v22864_v40 = vld [vmem:[#allocation6 + $0x694] ss:$12 sps:$4 sm:$0xff]  }
 0x37e   : > { %21374 = vmatpush3.bf16.msra.mxu1 %v22841_v47  ;;  %7539 = vmatprep.subr.bf16.mxu0 %v22844_v54  ;;  %v22862_v47 = vld [vmem:[#allocation6 + $0x690] ss:$12 sps:$4 sm:$0xff]  }
 0x37f   : > { %21375 = vmatprep.subr.bf16.mxu1 %v22845_v7  ;;  %v22866_v7 = vld [vmem:[#allocation6 + $0xb18] ss:$12 sps:$4 sm:$0xff]  }
 0x381   : > { %7540 = vmatpush1.bf16.msra.mxu0 %v22842_v57  ;;  %v22869_v57 = vld [vmem:[#allocation6 + $0x6ac] ss:$12 sps:$4 sm:$0xff]  }
 0x382   : > { %21376 = vmatpush3.bf16.msra.mxu1 %v22846_v39  ;;  %7541 = vmatprep.subr.bf16.mxu0 %v22849_v2  ;;  %v22870_v2 = vld [vmem:[#allocation6 + $0xbf0] ss:$12 sps:$4 sm:$0xff]  }
 0x383   : > { %21377 = vmatprep.subr.bf16.mxu1 %v22850_v28 }
 0x385   : > { %7542 = vmatpush1.bf16.msra.mxu0 %v22847_v46 }
 0x386   : > { %21378 = vmatpush3.bf16.msra.mxu1 %v22851_v49  ;;  %7543 = vmatprep.subr.bf16.mxu0 %v22854_v24 }
 0x387   : > { %21379 = vmatprep.subr.bf16.mxu1 %v22855_v26  ;;  %v22867_v26 = vld [vmem:[#allocation6 + $0x6a8] ss:$12 sps:$4 sm:$0xff]  }
 0x389   : > { %7544 = vmatpush1.bf16.msra.mxu0 %v22852_v19  ;;  %v22871_v19 = vld [vmem:[#allocation6 + $0xb30] ss:$12 sps:$4 sm:$0xff]  }
 0x38a   : > { %21380 = vmatpush3.bf16.msra.mxu1 %v22856_v18  ;;  %7545 = vmatprep.subr.bf16.mxu0 %v22859_v29  ;;  %v22874_v18 = vld [vmem:[#allocation6 + $0x6c4] ss:$12 sps:$4 sm:$0xff]   ;;  %v22875_v29 = vld [vmem:[#allocation6 + $0xcc8] ss:$12 sps:$4 sm:$0xff]  }
 0x38b   : > { %21381 = vmatprep.subr.bf16.mxu1 %v22860_v41  ;;  %v21233_v54 = vpop.f32.mrb[4].mxu1  ;;  %v22872_v41 = vld [vmem:[#allocation6 + $0x6c0] ss:$12 sps:$4 sm:$0xff]  }
 0x38c   : > { %v21234_v39 = vpop.f32.mrb[5].mxu1 }
 0x38d   : > { %7546 = vmatpush1.bf16.msra.mxu0 %v22857_v43  ;;  %v26092_v28 = vadd.f32 %v21234_v39, %v21233_v54  ;;  %v21236_v46 = vpop.f32.mrb[6].mxu1  ;;  %v22876_v43 = vld [vmem:[#allocation6 + $0xc08] ss:$12 sps:$4 sm:$0xff]   ;;  %v22886_v39 = vld [vmem:[#allocation6 + $0xc38] ss:$12 sps:$4 sm:$0xff]  }
 0x38e   : > { %21382 = vmatpush3.bf16.msra.mxu1 %v22861_v42  ;;  %7547 = vmatprep.subr.bf16.mxu0 %v22864_v40  ;;  %v21237_v49 = vpop.f32.mrb[7].mxu1  ;;  %v22879_v54 = vld [vmem:[#allocation6 + $0x6dc] ss:$12 sps:$4 sm:$0xff]   ;;  %v22880_v42 = vld [vmem:[#allocation6 + $0xce0] ss:$12 sps:$4 sm:$0xff]  }
 0x38f   : > { %21383 = vmatprep.subr.bf16.mxu1 %v22865_v21  ;;  %v26094_v24 = vadd.f32 %v21237_v49, %v21236_v46  ;;  %v22877_v40 = vld [vmem:[#allocation6 + $0x6d8] ss:$12 sps:$4 sm:$0xff]   ;;  %v22881_v21 = vld [vmem:[#allocation6 + $0xc20] ss:$12 sps:$4 sm:$0xff]   ;;  %v22890_v46 = vld [vmem:[#allocation6 + $0xd10] ss:$12 sps:$4 sm:$0xff]  }
 0x390   : > { %v22887_v49 = vld [vmem:[#allocation6 + $0x708] ss:$12 sps:$4 sm:$0xff]  }
 0x391   : > { %7548 = vmatpush1.bf16.msra.mxu0 %v22862_v47  ;;  %v22884_v47 = vld [vmem:[#allocation6 + $0x6f4] ss:$12 sps:$4 sm:$0xff]  }
 0x392   : > { %21384 = vmatpush3.bf16.msra.mxu1 %v22866_v7  ;;  %7549 = vmatprep.subr.bf16.mxu0 %v22869_v57  ;;  %v22885_v7 = vld [vmem:[#allocation6 + $0xcf8] ss:$12 sps:$4 sm:$0xff]   ;;  %v22882_v57 = vld [vmem:[#allocation6 + $0x6f0] ss:$12 sps:$4 sm:$0xff]  }
 0x393   : > { %21385 = vmatprep.subr.bf16.mxu1 %v22870_v2  ;;  %v22889_v2 = vld [vmem:[#allocation6 + $0x70c] ss:$12 sps:$4 sm:$0xff]  }
 0x395   : > { %7550 = vmatpush1.bf16.msra.mxu0 %v22867_v26  ;;  %v22891_v26 = vld [vmem:[#allocation6 + $0xc50] ss:$12 sps:$4 sm:$0xff]  }
 0x396   : > { %21386 = vmatpush3.bf16.msra.mxu1 %v22871_v19  ;;  %7551 = vmatprep.subr.bf16.mxu0 %v22874_v18  ;;  %v22894_v19 = vld [vmem:[#allocation6 + $0x724] ss:$12 sps:$4 sm:$0xff]   ;;  %v22895_v18 = vld [vmem:[#allocation6 + $0xd28] ss:$12 sps:$4 sm:$0xff]  }
 0x397   : > { %21393 = vmatprep.subr.bf16.mxu1 %v22875_v29  ;;  %v22892_v29 = vld [vmem:[#allocation6 + $0x720] ss:$12 sps:$4 sm:$0xff]  }
 0x399   : > { %8543 = vmatmul.mubr.bf16.vlgmr.msra.gmra.mrb[32].mxu1 %v25961_v0  ;;  %7552 = vmatpush1.bf16.msra.mxu0 %v22872_v41  ;;  %v22896_v41 = vld [vmem:[#allocation6 + $0xc68] ss:$12 sps:$4 sm:$0xff]  }
 0x39a   : > { %21394 = vmatpush3.bf16.msra.mxu1 %v22876_v43  ;;  %8583 = vmatprep.mubr.bf16.mxu1 %v25966_v35  ;;  %v22899_v43 = vld [vmem:[#allocation6 + $0x73c] ss:$12 sps:$4 sm:$0xff]  }
 0x39b   : > { %7553 = vmatprep.subr.bf16.mxu0 %v22879_v54  ;;  %21395 = vmatprep.subr.bf16.mxu1 %v22880_v42  ;;  %v22900_v54 = vld [vmem:[#allocation6 + $0xd40] ss:$12 sps:$4 sm:$0xff]   ;;  %v22897_v42 = vld [vmem:[#allocation6 + $0x738] ss:$12 sps:$4 sm:$0xff]  }
 0x39d   : > { %7554 = vmatpush1.bf16.msra.mxu0 %v22877_v40  ;;  %v22901_v40 = vld [vmem:[#allocation6 + $0xc80] ss:$12 sps:$4 sm:$0xff]  }
 0x39e   : > { %21396 = vmatpush3.bf16.msra.mxu1 %v22881_v21  ;;  %7555 = vmatprep.subr.bf16.mxu0 %v22884_v47  ;;  %v22904_v21 = vld [vmem:[#allocation6 + $0x754] ss:$12 sps:$4 sm:$0xff]   ;;  %v22905_v47 = vld [vmem:[#allocation6 + $0xd58] ss:$12 sps:$4 sm:$0xff]  }
 0x39f   : > { %21397 = vmatprep.subr.bf16.mxu1 %v22885_v7 }
 0x3a1   : > { %7556 = vmatpush1.bf16.msra.mxu0 %v22882_v57  ;;  %v22902_v57 = vld [vmem:[#allocation6 + $0x750] ss:$12 sps:$4 sm:$0xff]  }
 0x3a2   : > { %21398 = vmatpush3.bf16.msra.mxu1 %v22886_v39  ;;  %7557 = vmatprep.subr.bf16.mxu0 %v22889_v2  ;;  %v22906_v2 = vld [vmem:[#allocation6 + $0xc98] ss:$12 sps:$4 sm:$0xff]  }
 0x3a3   : > { %21399 = vmatprep.subr.bf16.mxu1 %v22890_v46  ;;  %v22909_v46 = vld [vmem:[#allocation6 + $0x76c] ss:$12 sps:$4 sm:$0xff]  }
 0x3a5   : > { %7558 = vmatpush1.bf16.msra.mxu0 %v22887_v49 }
 0x3a6   : > { %21400 = vmatpush3.bf16.msra.mxu1 %v22891_v26  ;;  %7559 = vmatprep.subr.bf16.mxu0 %v22894_v19  ;;  %v22910_v19 = vld [vmem:[#allocation6 + $0xd70] ss:$12 sps:$4 sm:$0xff]  }
 0x3a7   : > { %21401 = vmatprep.subr.bf16.mxu1 %v22895_v18 }
 0x3a9   : > { %7560 = vmatpush1.bf16.msra.mxu0 %v22892_v29 }
 0x3aa   : > { %21402 = vmatpush3.bf16.msra.mxu1 %v22896_v41  ;;  %7561 = vmatprep.subr.bf16.mxu0 %v22899_v43  ;;  %v22907_v41 = vld [vmem:[#allocation6 + $0x768] ss:$12 sps:$4 sm:$0xff]  }
 0x3ab   : > { %v21255_v7 = vpop.f32.mrb[8].mxu1  ;;  %21403 = vmatprep.subr.bf16.mxu1 %v22900_v54  ;;  %v22911_v54 = vld [vmem:[#allocation6 + $0xcb0] ss:$12 sps:$4 sm:$0xff]  }
 0x3ac   : > { %v21256_v39 = vpop.f32.mrb[9].mxu1 }
 0x3ad   : > { %v21257_v49 = vadd.f32 %v21256_v39, %v21255_v7  ;;  %7562 = vmatpush1.bf16.msra.mxu0 %v22897_v42  ;;  %v21258_v26 = vpop.f32.mrb[10].mxu1  ;;  %v22914_v7 = vld [vmem:[#allocation6 + $0x784] ss:$12 sps:$4 sm:$0xff]   ;;  %v22912_v42 = vld [vmem:[#allocation6 + $0x780] ss:$12 sps:$4 sm:$0xff]  }
 0x3ae   : > { %21404 = vmatpush3.bf16.msra.mxu1 %v22901_v40  ;;  %v21259_v14 = vpop.f32.mrb[11].mxu1  ;;  %7563 = vmatprep.subr.bf16.mxu0 %v22904_v21  ;;  %v22919_v21 = vld [vmem:[#allocation6 + $0x79c] ss:$12 sps:$4 sm:$0xff]   ;;  %v22925_v39 = vld [vmem:[#allocation6 + $0xe78] ss:$12 sps:$4 sm:$0xff]  }
 0x3af   : > { %v26099_v18 = vadd.f32 %v21257_v49, %v26092_v28  ;;  %v21260_v29 = vadd.f32 %v21259_v14, %v21258_v26  ;;  %21405 = vmatprep.subr.bf16.mxu1 %v22905_v47  ;;  %v22915_v14 = vld [vmem:[#allocation6 + $0xe48] ss:$12 sps:$4 sm:$0xff]   ;;  %v22920_v47 = vld [vmem:[#allocation6 + $0xe60] ss:$12 sps:$4 sm:$0xff]   ;;  %v22930_v49 = vld [vmem:[#allocation6 + $0xe90] ss:$12 sps:$4 sm:$0xff]  }
 0x3b0   : > { %v22916_v28 = vld [vmem:[#allocation6 + $0xd88] ss:$12 sps:$4 sm:$0xff]   ;;  %v24557_v40 = vld [vmem:[#allocation6 + $0x37b8] ss:$12 sps:$4 sm:$0xff]  }
 0x3b1   : > { %v26102_v43 = vadd.f32 %v21260_v29, %v26094_v24  ;;  %7564 = vmatpush1.bf16.msra.mxu0 %v22902_v57  ;;  %v22917_v24 = vld [vmem:[#allocation6 + $0x798] ss:$12 sps:$4 sm:$0xff]   ;;  %v22924_v57 = vld [vmem:[#allocation6 + $0x7b4] ss:$12 sps:$4 sm:$0xff]  }
 0x3b2   : > { %21406 = vmatpush3.bf16.msra.mxu1 %v22906_v2  ;;  %7565 = vmatprep.subr.bf16.mxu0 %v22909_v46  ;;  %v22922_v2 = vld [vmem:[#allocation6 + $0x7b0] ss:$12 sps:$4 sm:$0xff]   ;;  %v22929_v46 = vld [vmem:[#allocation6 + $0x7cc] ss:$12 sps:$4 sm:$0xff]   ;;  %v22927_v26 = vld [vmem:[#allocation6 + $0x7c8] ss:$12 sps:$4 sm:$0xff]  }
 0x3b3   : > { %21407 = vmatprep.subr.bf16.mxu1 %v22910_v19  ;;  %v22934_v19 = vld [vmem:[#allocation6 + $0x7e4] ss:$12 sps:$4 sm:$0xff]   ;;  %v22935_v29 = vld [vmem:[#allocation6 + $0xea8] ss:$12 sps:$4 sm:$0xff]  }
 0x3b5   : > { %7566 = vmatpush1.bf16.msra.mxu0 %v22907_v41  ;;  %v22932_v41 = vld [vmem:[#allocation6 + $0x7e0] ss:$12 sps:$4 sm:$0xff]  }
 0x3b6   : > { %21408 = vmatpush3.bf16.msra.mxu1 %v22911_v54  ;;  %7578 = vmatprep.subr.bf16.mxu0 %v22914_v7  ;;  %v22936_v54 = vld [vmem:[#allocation6 + $0xde8] ss:$12 sps:$4 sm:$0xff]  }
 0x3b7   : > { %21415 = vmatprep.subr.bf16.mxu1 %v22915_v14  ;;  %v22939_v7 = vld [vmem:[#allocation6 + $0x7fc] ss:$12 sps:$4 sm:$0xff]   ;;  %v22937_v14 = vld [vmem:[#allocation6 + $0x7f8] ss:$12 sps:$4 sm:$0xff]  }
 0x3b8   : > { %20077 = vmatmul.mubr.msk.bf16.vlgmr.msra.gmra.mrb[12].mxu0 %vm26072_vm10, %v26078_v13  ;;  %v22926_v13 = vld [vmem:[#allocation6 + $0xdb8] ss:$12 sps:$4 sm:$0xff]  }
 0x3b9   : > { %20095 = vmatmul.mubr.msk.bf16.vlgmr.msra.gmra.mrb[36].mxu1 %vm26107_vm11, %v25953_v6  ;;  %7579 = vmatpush1.bf16.msra.mxu0 %v22912_v42  ;;  %v22940_v42 = vld [vmem:[#allocation6 + $0xec0] ss:$12 sps:$4 sm:$0xff]  }
 0x3ba   : > { %7610 = vmatprep.mubr.bf16.mxu0 %v25932_v52  ;;  %21416 = vmatpush3.bf16.msra.mxu1 %v22916_v28  ;;  %v22931_v52 = vld [vmem:[#allocation6 + $0xdd0] ss:$12 sps:$4 sm:$0xff]   ;;  %v22941_v28 = vld [vmem:[#allocation6 + $0xe00] ss:$12 sps:$4 sm:$0xff]  }
 0x3bb   : > { %8624 = vmatprep.mubr.bf16.mxu1 %v25978_v10  ;;  %7580 = vmatprep.subr.bf16.mxu0 %v22919_v21  ;;  %v22944_v21 = vld [vmem:[#allocation6 + $0x814] ss:$12 sps:$4 sm:$0xff]  }
 0x3bc   : > { %21417 = vmatprep.subr.bf16.mxu1 %v22920_v47 }
 0x3bd   : > { %7581 = vmatpush1.bf16.msra.mxu0 %v22917_v24  ;;  %v22945_v24 = vld [vmem:[#allocation6 + $0xed8] ss:$12 sps:$4 sm:$0xff]  }
 0x3be   : > { %21418 = vmatpush3.bf16.msra.mxu1 %v22921_v25  ;;  %7582 = vmatprep.subr.bf16.mxu0 %v22924_v57  ;;  %v22942_v25 = vld [vmem:[#allocation6 + $0x810] ss:$12 sps:$4 sm:$0xff]  }
 0x3bf   : > { %21419 = vmatprep.subr.bf16.mxu1 %v22925_v39  ;;  %v22946_v39 = vld [vmem:[#allocation6 + $0xe18] ss:$12 sps:$4 sm:$0xff]  }
 0x3c1   : > { %7583 = vmatpush1.bf16.msra.mxu0 %v22922_v2  ;;  %v22949_v2 = vld [vmem:[#allocation6 + $0x82c] ss:$12 sps:$4 sm:$0xff]  }
 0x3c2   : > { %21420 = vmatpush3.bf16.msra.mxu1 %v22926_v13  ;;  %7584 = vmatprep.subr.bf16.mxu0 %v22929_v46 }
 0x3c3   : > { %21421 = vmatprep.subr.bf16.mxu1 %v22930_v49  ;;  %v22950_v49 = vld [vmem:[#allocation6 + $0xef0] ss:$12 sps:$4 sm:$0xff]  }
 0x3c5   : > { %7585 = vmatpush1.bf16.msra.mxu0 %v22927_v26 }
 0x3c6   : > { %21422 = vmatpush3.bf16.msra.mxu1 %v22931_v52  ;;  %7586 = vmatprep.subr.bf16.mxu0 %v22934_v19 }
 0x3c7   : > { %21423 = vmatprep.subr.bf16.mxu1 %v22935_v29  ;;  %v22947_v29 = vld [vmem:[#allocation6 + $0x828] ss:$12 sps:$4 sm:$0xff]  }
 0x3c9   : > { %7587 = vmatpush1.bf16.msra.mxu0 %v22932_v41 }
 0x3ca   : > { %21424 = vmatpush3.bf16.msra.mxu1 %v22936_v54  ;;  %7588 = vmatprep.subr.bf16.mxu0 %v22939_v7  ;;  %v22951_v54 = vld [vmem:[#allocation6 + $0xe30] ss:$12 sps:$4 sm:$0xff]  }
 0x3cb   : > { %v21277_v47 = vpop.f32.mrb[12].mxu1  ;;  %21425 = vmatprep.subr.bf16.mxu1 %v22940_v42  ;;  %v22954_v7 = vld [vmem:[#allocation6 + $0x844] ss:$12 sps:$4 sm:$0xff]   ;;  %v22955_v42 = vld [vmem:[#allocation6 + $0xfc8] ss:$12 sps:$4 sm:$0xff]  }
 0x3cc   : > { %v21278_v57 = vpop.f32.mrb[13].mxu1 }
 0x3cd   : > { %v21279_v13 = vadd.f32 %v21278_v57, %v21277_v47  ;;  %7589 = vmatpush1.bf16.msra.mxu0 %v22937_v14  ;;  %v21280_v46 = vpop.f32.mrb[14].mxu1  ;;  %v22952_v14 = vld [vmem:[#allocation6 + $0x840] ss:$12 sps:$4 sm:$0xff]   ;;  %v22962_v57 = vld [vmem:[#allocation6 + $0x870] ss:$12 sps:$4 sm:$0xff]  }
 0x3ce   : > { %21426 = vmatpush3.bf16.msra.mxu1 %v22941_v28  ;;  %v21281_v26 = vpop.f32.mrb[15].mxu1  ;;  %7590 = vmatprep.subr.bf16.mxu0 %v22944_v21  ;;  %v22956_v28 = vld [vmem:[#allocation6 + $0xf08] ss:$12 sps:$4 sm:$0xff]   ;;  %v22960_v21 = vld [vmem:[#allocation6 + $0xfe0] ss:$12 sps:$4 sm:$0xff]  }
 0x3cf   : > { %v26120_v52 = vadd.f32 %v21279_v13, %v26099_v18  ;;  %v21282_v19 = vadd.f32 %v21281_v26, %v21280_v46  ;;  %21427 = vmatprep.subr.bf16.mxu1 %v22945_v24  ;;  %v22959_v18 = vld [vmem:[#allocation6 + $0x85c] ss:$12 sps:$4 sm:$0xff]   ;;  %v22961_v24 = vld [vmem:[#allocation6 + $0xf20] ss:$12 sps:$4 sm:$0xff]   ;;  %v22974_v26 = vld [vmem:[#allocation6 + $0x8a4] ss:$12 sps:$4 sm:$0xff]  }
 0x3d0   : > { %v22964_v47 = vld [vmem:[#allocation6 + $0x874] ss:$12 sps:$4 sm:$0xff]   ;;  %v22970_v13 = vld [vmem:[#allocation6 + $0x1010] ss:$12 sps:$4 sm:$0xff]  }
 0x3d1   : > { %v26123_v41 = vadd.f32 %v21282_v19, %v26102_v43  ;;  %7591 = vmatpush1.bf16.msra.mxu0 %v22942_v25  ;;  %v22957_v43 = vld [vmem:[#allocation6 + $0x858] ss:$12 sps:$4 sm:$0xff]   ;;  %v22967_v46 = vld [vmem:[#allocation6 + $0x888] ss:$12 sps:$4 sm:$0xff]  }
 0x3d2   : > { %21428 = vmatpush3.bf16.msra.mxu1 %v22946_v39  ;;  %7592 = vmatprep.subr.bf16.mxu0 %v22949_v2  ;;  %v22965_v25 = vld [vmem:[#allocation6 + $0xff8] ss:$12 sps:$4 sm:$0xff]   ;;  %v22975_v19 = vld [vmem:[#allocation6 + $0x1028] ss:$12 sps:$4 sm:$0xff]  }
 0x3d3   : > { %21429 = vmatprep.subr.bf16.mxu1 %v22950_v49  ;;  %v22966_v39 = vld [vmem:[#allocation6 + $0xf38] ss:$12 sps:$4 sm:$0xff]   ;;  %v22971_v49 = vld [vmem:[#allocation6 + $0xf50] ss:$12 sps:$4 sm:$0xff]  }
 0x3d4   : > { %v22969_v2 = vld [vmem:[#allocation6 + $0x88c] ss:$12 sps:$4 sm:$0xff]  }
 0x3d5   : > { %7593 = vmatpush1.bf16.msra.mxu0 %v22947_v29  ;;  %v22972_v29 = vld [vmem:[#allocation6 + $0x8a0] ss:$12 sps:$4 sm:$0xff]  }
 0x3d6   : > { %21430 = vmatpush3.bf16.msra.mxu1 %v22951_v54  ;;  %7594 = vmatprep.subr.bf16.mxu0 %v22954_v7  ;;  %v22976_v54 = vld [vmem:[#allocation6 + $0xf68] ss:$12 sps:$4 sm:$0xff]  }
 0x3d7   : > { %21437 = vmatprep.subr.bf16.mxu1 %v22955_v42  ;;  %v22979_v7 = vld [vmem:[#allocation6 + $0x8bc] ss:$12 sps:$4 sm:$0xff]   ;;  %v22980_v42 = vld [vmem:[#allocation6 + $0x1040] ss:$12 sps:$4 sm:$0xff]  }
 0x3d9   : > { %8625 = vmatmul.mubr.bf16.vlgmr.msra.gmra.mrb[40].mxu1 %v25980_v8  ;;  %7595 = vmatpush1.bf16.msra.mxu0 %v22952_v14  ;;  %v22977_v14 = vld [vmem:[#allocation6 + $0x8b8] ss:$12 sps:$4 sm:$0xff]  }
 0x3da   : > { %21438 = vmatpush3.bf16.msra.mxu1 %v22956_v28  ;;  %8665 = vmatprep.mubr.bf16.mxu1 %v25983_v20  ;;  %v22981_v28 = vld [vmem:[#allocation6 + $0xf80] ss:$12 sps:$4 sm:$0xff]  }
 0x3db   : > { %7596 = vmatprep.subr.bf16.mxu0 %v22959_v18  ;;  %21439 = vmatprep.subr.bf16.mxu1 %v22960_v21  ;;  %v22984_v18 = vld [vmem:[#allocation6 + $0x8d4] ss:$12 sps:$4 sm:$0xff]   ;;  %v22985_v21 = vld [vmem:[#allocation6 + $0x1058] ss:$12 sps:$4 sm:$0xff]  }
 0x3dd   : > { %7597 = vmatpush1.bf16.msra.mxu0 %v22957_v43  ;;  %v22982_v43 = vld [vmem:[#allocation6 + $0x8d0] ss:$12 sps:$4 sm:$0xff]  }
 0x3de   : > { %21440 = vmatpush3.bf16.msra.mxu1 %v22961_v24  ;;  %7598 = vmatprep.subr.bf16.mxu0 %v22964_v47  ;;  %v22986_v47 = vld [vmem:[#allocation6 + $0xf98] ss:$12 sps:$4 sm:$0xff]  }
 0x3df   : > { %21441 = vmatprep.subr.bf16.mxu1 %v22965_v25  ;;  %v22989_v25 = vld [vmem:[#allocation6 + $0x8ec] ss:$12 sps:$4 sm:$0xff]  }
 0x3e1   : > { %7599 = vmatpush1.bf16.msra.mxu0 %v22962_v57 }
 0x3e2   : > { %21442 = vmatpush3.bf16.msra.mxu1 %v22966_v39  ;;  %7600 = vmatprep.subr.bf16.mxu0 %v22969_v2  ;;  %v22990_v39 = vld [vmem:[#allocation6 + $0x1070] ss:$12 sps:$4 sm:$0xff]  }
 0x3e3   : > { %21443 = vmatprep.subr.bf16.mxu1 %v22970_v13 }
 0x3e5   : > { %7601 = vmatpush1.bf16.msra.mxu0 %v22967_v46 }
 0x3e6   : > { %21444 = vmatpush3.bf16.msra.mxu1 %v22971_v49  ;;  %7602 = vmatprep.subr.bf16.mxu0 %v22974_v26 }
 0x3e7   : > { %21445 = vmatprep.subr.bf16.mxu1 %v22975_v19  ;;  %v22987_v19 = vld [vmem:[#allocation6 + $0x8e8] ss:$12 sps:$4 sm:$0xff]  }
 0x3e9   : > { %7603 = vmatpush1.bf16.msra.mxu0 %v22972_v29 }
 0x3ea   : > { %21446 = vmatpush3.bf16.msra.mxu1 %v22976_v54  ;;  %7604 = vmatprep.subr.bf16.mxu0 %v22979_v7  ;;  %v22991_v54 = vld [vmem:[#allocation6 + $0xfb0] ss:$12 sps:$4 sm:$0xff]  }
 0x3eb   : > { %21447 = vmatprep.subr.bf16.mxu1 %v22980_v42  ;;  %v22994_v7 = vld [vmem:[#allocation6 + $0x904] ss:$12 sps:$4 sm:$0xff]   ;;  %v22992_v42 = vld [vmem:[#allocation6 + $0x900] ss:$12 sps:$4 sm:$0xff]  }
 0x3ec   : > { %v21299_v24 = vpop.f32.mrb[16].mxu1 }
 0x3ed   : > { %v21300_v57 = vpop.f32.mrb[17].mxu1  ;;  %7605 = vmatpush1.bf16.msra.mxu0 %v22977_v14  ;;  %v22995_v14 = vld [vmem:[#allocation6 + $0x1148] ss:$12 sps:$4 sm:$0xff]  }
 0x3ee   : > { %v21301_v2 = vadd.f32 %v21300_v57, %v21299_v24  ;;  %v21302_v13 = vpop.f32.mrb[18].mxu1  ;;  %21448 = vmatpush3.bf16.msra.mxu1 %v22981_v28  ;;  %7606 = vmatprep.subr.bf16.mxu0 %v22984_v18  ;;  %v22996_v28 = vld [vmem:[#allocation6 + $0x1088] ss:$12 sps:$4 sm:$0xff]   ;;  %v23005_v24 = vld [vmem:[#allocation6 + $0x1178] ss:$12 sps:$4 sm:$0xff]  }
 0x3ef   : > { %v21303_v46 = vpop.f32.mrb[19].mxu1  ;;  %21449 = vmatprep.subr.bf16.mxu1 %v22985_v21  ;;  %v22999_v18 = vld [vmem:[#allocation6 + $0x91c] ss:$12 sps:$4 sm:$0xff]   ;;  %v23000_v21 = vld [vmem:[#allocation6 + $0x1160] ss:$12 sps:$4 sm:$0xff]  }
 0x3f0   : > { %v26128_v49 = vadd.f32 %v21301_v2, %v26120_v52  ;;  %v21304_v26 = vadd.f32 %v21303_v46, %v21302_v13  ;;  %v22997_v52 = vld [vmem:[#allocation6 + $0x918] ss:$12 sps:$4 sm:$0xff]   ;;  %v23010_v57 = vld [vmem:[#allocation6 + $0x1190] ss:$12 sps:$4 sm:$0xff]   ;;  %v23015_v13 = vld [vmem:[#allocation6 + $0x11a8] ss:$12 sps:$4 sm:$0xff]  }
 0x3f1   : > { %7607 = vmatpush1.bf16.msra.mxu0 %v22982_v43  ;;  %v23004_v43 = vld [vmem:[#allocation6 + $0x934] ss:$12 sps:$4 sm:$0xff]   ;;  %v23014_v2 = vld [vmem:[#allocation6 + $0x964] ss:$12 sps:$4 sm:$0xff]  }
 0x3f2   : > { %v26131_v29 = vadd.f32 %v21304_v26, %v26123_v41  ;;  %21450 = vmatpush3.bf16.msra.mxu1 %v22986_v47  ;;  %7608 = vmatprep.subr.bf16.mxu0 %v22989_v25  ;;  %v23001_v41 = vld [vmem:[#allocation6 + $0x10a0] ss:$12 sps:$4 sm:$0xff]   ;;  %v23002_v47 = vld [vmem:[#allocation6 + $0x930] ss:$12 sps:$4 sm:$0xff]   ;;  %v23016_v26 = vld [vmem:[#allocation6 + $0x10e8] ss:$12 sps:$4 sm:$0xff]  }
 0x3f3   : > { %21451 = vmatprep.subr.bf16.mxu1 %v22990_v39  ;;  %v23009_v25 = vld [vmem:[#allocation6 + $0x94c] ss:$12 sps:$4 sm:$0xff]   ;;  %v23007_v39 = vld [vmem:[#allocation6 + $0x948] ss:$12 sps:$4 sm:$0xff]  }
 0x3f4   : > { %v23012_v46 = vld [vmem:[#allocation6 + $0x960] ss:$12 sps:$4 sm:$0xff]  }
 0x3f5   : > { %7609 = vmatpush1.bf16.msra.mxu0 %v22987_v19  ;;  %v23019_v19 = vld [vmem:[#allocation6 + $0x97c] ss:$12 sps:$4 sm:$0xff]  }
 0x3f6   : > { %21452 = vmatpush3.bf16.msra.mxu1 %v22991_v54  ;;  %7621 = vmatprep.subr.bf16.mxu0 %v22994_v7  ;;  %v23020_v54 = vld [vmem:[#allocation6 + $0x11c0] ss:$12 sps:$4 sm:$0xff]   ;;  %v23017_v7 = vld [vmem:[#allocation6 + $0x978] ss:$12 sps:$4 sm:$0xff]  }
 0x3f7   : > { %21459 = vmatprep.subr.bf16.mxu1 %v22995_v14  ;;  %v23024_v14 = vld [vmem:[#allocation6 + $0x994] ss:$12 sps:$4 sm:$0xff]  }
 0x3f8   : > { %7611 = vmatmul.mubr.bf16.vlgmr.msra.gmra.mrb[12].mxu0 %v25935_v60  ;;  %v23006_v60 = vld [vmem:[#allocation6 + $0x10b8] ss:$12 sps:$4 sm:$0xff]  }
 0x3f9   : > { %8666 = vmatmul.mubr.bf16.vlgmr.msra.gmra.mrb[44].mxu1 %v25988_v63  ;;  %7622 = vmatpush1.bf16.msra.mxu0 %v22992_v42  ;;  %v23021_v42 = vld [vmem:[#allocation6 + $0x1100] ss:$12 sps:$4 sm:$0xff]  }
 0x3fa   : > { %7653 = vmatprep.mubr.bf16.mxu0 %v25939_v53  ;;  %21460 = vmatpush3.bf16.msra.mxu1 %v22996_v28  ;;  %v23011_v53 = vld [vmem:[#allocation6 + $0x10d0] ss:$12 sps:$4 sm:$0xff]   ;;  %v23025_v28 = vld [vmem:[#allocation6 + $0x11d8] ss:$12 sps:$4 sm:$0xff]  }
 0x3fb   : > { %8706 = vmatprep.mubr.bf16.mxu1 %v25990_v9  ;;  %7623 = vmatprep.subr.bf16.mxu0 %v22999_v18  ;;  %v23022_v18 = vld [vmem:[#allocation6 + $0x990] ss:$12 sps:$4 sm:$0xff]  }
 0x3fc   : > { %21461 = vmatprep.subr.bf16.mxu1 %v23000_v21  ;;  %v23026_v21 = vld [vmem:[#allocation6 + $0x1118] ss:$12 sps:$4 sm:$0xff]  }
 0x3fd   : > { %7624 = vmatpush1.bf16.msra.mxu0 %v22997_v52 }
 0x3fe   : > { %21462 = vmatpush3.bf16.msra.mxu1 %v23001_v41  ;;  %7625 = vmatprep.subr.bf16.mxu0 %v23004_v43  ;;  %v23029_v41 = vld [vmem:[#allocation6 + $0x9ac] ss:$12 sps:$4 sm:$0xff]  }
 0x3ff   : > { %21463 = vmatprep.subr.bf16.mxu1 %v23005_v24  ;;  %v23030_v24 = vld [vmem:[#allocation6 + $0x11f0] ss:$12 sps:$4 sm:$0xff]  }
 0x401   : > { %7626 = vmatpush1.bf16.msra.mxu0 %v23002_v47 }
 0x402   : > { %21464 = vmatpush3.bf16.msra.mxu1 %v23006_v60  ;;  %7627 = vmatprep.subr.bf16.mxu0 %v23009_v25 }
 0x403   : > { %21465 = vmatprep.subr.bf16.mxu1 %v23010_v57 }
 0x405   : > { %7628 = vmatpush1.bf16.msra.mxu0 %v23007_v39 }
 0x406   : > { %21466 = vmatpush3.bf16.msra.mxu1 %v23011_v53  ;;  %7629 = vmatprep.subr.bf16.mxu0 %v23014_v2  ;;  %v23027_v53 = vld [vmem:[#allocation6 + $0x9a8] ss:$12 sps:$4 sm:$0xff]  }
 0x407   : > { %21467 = vmatprep.subr.bf16.mxu1 %v23015_v13  ;;  %v23031_v13 = vld [vmem:[#allocation6 + $0x1130] ss:$12 sps:$4 sm:$0xff]  }
 0x409   : > { %7630 = vmatpush1.bf16.msra.mxu0 %v23012_v46  ;;  %v23034_v46 = vld [vmem:[#allocation6 + $0x9c4] ss:$12 sps:$4 sm:$0xff]  }
 0x40a   : > { %21468 = vmatpush3.bf16.msra.mxu1 %v23016_v26  ;;  %7631 = vmatprep.subr.bf16.mxu0 %v23019_v19  ;;  %v23035_v26 = vld [vmem:[#allocation6 + $0x12c8] ss:$12 sps:$4 sm:$0xff]   ;;  %v23032_v19 = vld [vmem:[#allocation6 + $0x9c0] ss:$12 sps:$4 sm:$0xff]  }
 0x40b   : > { %21469 = vmatprep.subr.bf16.mxu1 %v23020_v54  ;;  %v23036_v54 = vld [vmem:[#allocation6 + $0x1208] ss:$12 sps:$4 sm:$0xff]  }
 0x40c   : > { %v21321_v52 = vpop.f32.mrb[20].mxu1 }
 0x40d   : > { %v21322_v43 = vpop.f32.mrb[21].mxu1  ;;  %7632 = vmatpush1.bf16.msra.mxu0 %v23017_v7  ;;  %v23039_v7 = vld [vmem:[#allocation6 + $0x9dc] ss:$12 sps:$4 sm:$0xff]  }
 0x40e   : > { %v21323_v47 = vadd.f32 %v21322_v43, %v21321_v52  ;;  %v21324_v60 = vpop.f32.mrb[22].mxu1  ;;  %21470 = vmatpush3.bf16.msra.mxu1 %v23021_v42  ;;  %7633 = vmatprep.subr.bf16.mxu0 %v23024_v14  ;;  %v23037_v42 = vld [vmem:[#allocation6 + $0x9d8] ss:$12 sps:$4 sm:$0xff]   ;;  %v23044_v14 = vld [vmem:[#allocation6 + $0x9f4] ss:$12 sps:$4 sm:$0xff]  }
 0x40f   : > { %v21325_v25 = vpop.f32.mrb[23].mxu1  ;;  %21471 = vmatprep.subr.bf16.mxu1 %v23025_v28  ;;  %v23045_v28 = vld [vmem:[#allocation6 + $0x12f8] ss:$12 sps:$4 sm:$0xff]   ;;  %v23047_v43 = vld [vmem:[#allocation6 + $0xa08] ss:$12 sps:$4 sm:$0xff]  }
 0x410   : > { %v26138_v57 = vadd.f32 %v21323_v47, %v26128_v49  ;;  %v21326_v39 = vadd.f32 %v21325_v25, %v21324_v60  ;;  %v23040_v49 = vld [vmem:[#allocation6 + $0x12e0] ss:$12 sps:$4 sm:$0xff]   ;;  %v23046_v52 = vld [vmem:[#allocation6 + $0x1238] ss:$12 sps:$4 sm:$0xff]   ;;  %v23055_v60 = vld [vmem:[#allocation6 + $0x1328] ss:$12 sps:$4 sm:$0xff]  }
 0x411   : > { %7634 = vmatpush1.bf16.msra.mxu0 %v23022_v18  ;;  %v23042_v18 = vld [vmem:[#allocation6 + $0x9f0] ss:$12 sps:$4 sm:$0xff]   ;;  %v23052_v25 = vld [vmem:[#allocation6 + $0xa20] ss:$12 sps:$4 sm:$0xff]  }
 0x412   : > { %v26141_v2 = vadd.f32 %v21326_v39, %v26131_v29  ;;  %21472 = vmatpush3.bf16.msra.mxu1 %v23026_v21  ;;  %7635 = vmatprep.subr.bf16.mxu0 %v23029_v41  ;;  %v23041_v29 = vld [vmem:[#allocation6 + $0x1220] ss:$12 sps:$4 sm:$0xff]   ;;  %v23050_v41 = vld [vmem:[#allocation6 + $0x1310] ss:$12 sps:$4 sm:$0xff]   ;;  %v23056_v39 = vld [vmem:[#allocation6 + $0x1268] ss:$12 sps:$4 sm:$0xff]  }
 0x413   : > { %21473 = vmatprep.subr.bf16.mxu1 %v23030_v24  ;;  %v23049_v21 = vld [vmem:[#allocation6 + $0xa0c] ss:$12 sps:$4 sm:$0xff]   ;;  %v23051_v24 = vld [vmem:[#allocation6 + $0x1250] ss:$12 sps:$4 sm:$0xff]  }
 0x414   : > { %v23054_v47 = vld [vmem:[#allocation6 + $0xa24] ss:$12 sps:$4 sm:$0xff]  }
 0x415   : > { %7636 = vmatpush1.bf16.msra.mxu0 %v23027_v53  ;;  %v23059_v53 = vld [vmem:[#allocation6 + $0xa3c] ss:$12 sps:$4 sm:$0xff]  }
 0x416   : > { %21474 = vmatpush3.bf16.msra.mxu1 %v23031_v13  ;;  %7637 = vmatprep.subr.bf16.mxu0 %v23034_v46  ;;  %v23060_v13 = vld [vmem:[#allocation6 + $0x1340] ss:$12 sps:$4 sm:$0xff]   ;;  %v23057_v46 = vld [vmem:[#allocation6 + $0xa38] ss:$12 sps:$4 sm:$0xff]  }
 0x417   : > { %21481 = vmatprep.subr.bf16.mxu1 %v23035_v26  ;;  %v23061_v26 = vld [vmem:[#allocation6 + $0x1280] ss:$12 sps:$4 sm:$0xff]  }
 0x419   : > { %8707 = vmatmul.mubr.bf16.vlgmr.msra.gmra.mrb[48].mxu1 %v25992_v16  ;;  %7638 = vmatpush1.bf16.msra.mxu0 %v23032_v19  ;;  %v23064_v19 = vld [vmem:[#allocation6 + $0xa54] ss:$12 sps:$4 sm:$0xff]  }
 0x41a   : > { %21482 = vmatpush3.bf16.msra.mxu1 %v23036_v54  ;;  %8747 = vmatprep.mubr.bf16.mxu1 %v25995_v22  ;;  %v23065_v54 = vld [vmem:[#allocation6 + $0x1358] ss:$12 sps:$4 sm:$0xff]  }
 0x41b   : > { %7639 = vmatprep.subr.bf16.mxu0 %v23039_v7  ;;  %21483 = vmatprep.subr.bf16.mxu1 %v23040_v49  ;;  %v23062_v7 = vld [vmem:[#allocation6 + $0xa50] ss:$12 sps:$4 sm:$0xff]  }
 0x41d   : > { %7640 = vmatpush1.bf16.msra.mxu0 %v23037_v42  ;;  %v23066_v42 = vld [vmem:[#allocation6 + $0x1298] ss:$12 sps:$4 sm:$0xff]  }
 0x41e   : > { %21484 = vmatpush3.bf16.msra.mxu1 %v23041_v29  ;;  %7641 = vmatprep.subr.bf16.mxu0 %v23044_v14  ;;  %v23069_v29 = vld [vmem:[#allocation6 + $0xa6c] ss:$12 sps:$4 sm:$0xff]  }
 0x41f   : > { %21485 = vmatprep.subr.bf16.mxu1 %v23045_v28  ;;  %v23070_v28 = vld [vmem:[#allocation6 + $0x1370] ss:$12 sps:$4 sm:$0xff]  }
 0x421   : > { %7642 = vmatpush1.bf16.msra.mxu0 %v23042_v18 }
 0x422   : > { %21486 = vmatpush3.bf16.msra.mxu1 %v23046_v52  ;;  %7643 = vmatprep.subr.bf16.mxu0 %v23049_v21 }
 0x423   : > { %21487 = vmatprep.subr.bf16.mxu1 %v23050_v41 }
 0x425   : > { %7644 = vmatpush1.bf16.msra.mxu0 %v23047_v43 }
 0x426   : > { %21488 = vmatpush3.bf16.msra.mxu1 %v23051_v24  ;;  %7645 = vmatprep.subr.bf16.mxu0 %v23054_v47  ;;  %v23067_v24 = vld [vmem:[#allocation6 + $0xa68] ss:$12 sps:$4 sm:$0xff]  }
 0x427   : > { %21489 = vmatprep.subr.bf16.mxu1 %v23055_v60  ;;  %v23071_v60 = vld [vmem:[#allocation6 + $0x12b0] ss:$12 sps:$4 sm:$0xff]  }
 0x429   : > { %7646 = vmatpush1.bf16.msra.mxu0 %v23052_v25  ;;  %v23074_v25 = vld [vmem:[#allocation6 + $0xa84] ss:$12 sps:$4 sm:$0xff]  }
 0x42a   : > { %21490 = vmatpush3.bf16.msra.mxu1 %v23056_v39  ;;  %7647 = vmatprep.subr.bf16.mxu0 %v23059_v53  ;;  %v23072_v39 = vld [vmem:[#allocation6 + $0xa80] ss:$12 sps:$4 sm:$0xff]   ;;  %v24823_v53 = vld [vmem:[#allocation6 + $0x3138] ss:$12 sps:$4 sm:$0xff]  }
 0x42b   : > { %21491 = vmatprep.subr.bf16.mxu1 %v23060_v13  ;;  %v23076_v13 = vld [vmem:[#allocation6 + $0x1388] ss:$12 sps:$4 sm:$0xff]  }
 0x42c   : > { %v21343_v49 = vpop.f32.mrb[24].mxu1 }
 0x42d   : > { %v21344_v14 = vpop.f32.mrb[25].mxu1  ;;  %7648 = vmatpush1.bf16.msra.mxu0 %v23057_v46  ;;  %v23079_v46 = vld [vmem:[#allocation6 + $0xa9c] ss:$12 sps:$4 sm:$0xff]  }
 0x42e   : > { %v21345_v18 = vadd.f32 %v21344_v14, %v21343_v49  ;;  %v21346_v52 = vpop.f32.mrb[26].mxu1  ;;  %21492 = vmatpush3.bf16.msra.mxu1 %v23061_v26  ;;  %7649 = vmatprep.subr.bf16.mxu0 %v23064_v19  ;;  %v23080_v26 = vld [vmem:[#allocation6 + $0x1460] ss:$12 sps:$4 sm:$0xff]   ;;  %v23082_v49 = vld [vmem:[#allocation6 + $0xab0] ss:$12 sps:$4 sm:$0xff]  }
 0x42f   : > { %v21347_v21 = vpop.f32.mrb[27].mxu1  ;;  %21493 = vmatprep.subr.bf16.mxu1 %v23065_v54  ;;  %v23081_v19 = vld [vmem:[#allocation6 + $0x13a0] ss:$12 sps:$4 sm:$0xff]   ;;  %v23087_v14 = vld [vmem:[#allocation6 + $0xac8] ss:$12 sps:$4 sm:$0xff]  }
 0x430   : > { %v26146_v41 = vadd.f32 %v21345_v18, %v26138_v57  ;;  %v21348_v43 = vadd.f32 %v21347_v21, %v21346_v52  ;;  %v23075_v57 = vld [vmem:[#allocation6 + $0x1448] ss:$12 sps:$4 sm:$0xff]   ;;  %v23092_v52 = vld [vmem:[#allocation6 + $0xae0] ss:$12 sps:$4 sm:$0xff]  }
 0x431   : > { %7650 = vmatpush1.bf16.msra.mxu0 %v23062_v7  ;;  %v23084_v54 = vld [vmem:[#allocation6 + $0xab4] ss:$12 sps:$4 sm:$0xff]   ;;  %v23085_v7 = vld [vmem:[#allocation6 + $0x1478] ss:$12 sps:$4 sm:$0xff]  }
 0x432   : > { %v26149_v47 = vadd.f32 %v21348_v43, %v26141_v2  ;;  %21494 = vmatpush3.bf16.msra.mxu1 %v23066_v42  ;;  %7651 = vmatprep.subr.bf16.mxu0 %v23069_v29  ;;  %v23077_v2 = vld [vmem:[#allocation6 + $0xa98] ss:$12 sps:$4 sm:$0xff]   ;;  %v23090_v29 = vld [vmem:[#allocation6 + $0x1490] ss:$12 sps:$4 sm:$0xff]   ;;  %v23095_v18 = vld [vmem:[#allocation6 + $0x14a8] ss:$12 sps:$4 sm:$0xff]  }
 0x433   : > { %21495 = vmatprep.subr.bf16.mxu1 %v23070_v28  ;;  %v23089_v42 = vld [vmem:[#allocation6 + $0xacc] ss:$12 sps:$4 sm:$0xff]   ;;  %v23094_v28 = vld [vmem:[#allocation6 + $0xae4] ss:$12 sps:$4 sm:$0xff]   ;;  %v23096_v21 = vld [vmem:[#allocation6 + $0x13e8] ss:$12 sps:$4 sm:$0xff]  }
 0x434   : > { %v23099_v43 = vld [vmem:[#allocation6 + $0xafc] ss:$12 sps:$4 sm:$0xff]  }
 0x435   : > { %7652 = vmatpush1.bf16.msra.mxu0 %v23067_v24  ;;  %v23100_v24 = vld [vmem:[#allocation6 + $0x14c0] ss:$12 sps:$4 sm:$0xff]  }
 0x436   : > { %21496 = vmatpush3.bf16.msra.mxu1 %v23071_v60  ;;  %7664 = vmatprep.subr.bf16.mxu0 %v23074_v25  ;;  %v23097_v60 = vld [vmem:[#allocation6 + $0xaf8] ss:$12 sps:$4 sm:$0xff]   ;;  %v23101_v25 = vld [vmem:[#allocation6 + $0x1400] ss:$12 sps:$4 sm:$0xff]  }
 0x437   : > { %21503 = vmatprep.subr.bf16.mxu1 %v23075_v57  ;;  %v23105_v57 = vld [vmem:[#allocation6 + $0x14d8] ss:$12 sps:$4 sm:$0xff]  }
 0x438   : > { %7654 = vmatmul.mubr.bf16.vlgmr.msra.gmra.mrb[12].mxu0 %v25945_v12  ;;  %v23086_v12 = vld [vmem:[#allocation6 + $0x13b8] ss:$12 sps:$4 sm:$0xff]  }
 0x439   : > { %20098 = vmatmul.mubr.msk.bf16.vlgmr.msra.gmra.mrb[52].mxu1 %vm26153_vm12, %v25881_v5  ;;  %7665 = vmatpush1.bf16.msra.mxu0 %v23072_v39  ;;  %v23104_v39 = vld [vmem:[#allocation6 + $0xb14] ss:$12 sps:$4 sm:$0xff]  }
 0x43a   : > { %7696 = vmatprep.mubr.bf16.mxu0 %v25948_v38  ;;  %21504 = vmatpush3.bf16.msra.mxu1 %v23076_v13  ;;  %v23091_v38 = vld [vmem:[#allocation6 + $0x13d0] ss:$12 sps:$4 sm:$0xff]  }
 0x43b   : > { %8788 = vmatprep.mubr.bf16.mxu1 %v26010_v61  ;;  %7666 = vmatprep.subr.bf16.mxu0 %v23079_v46  ;;  %v23102_v13 = vld [vmem:[#allocation6 + $0xb10] ss:$12 sps:$4 sm:$0xff]  }
 0x43c   : > { %21505 = vmatprep.subr.bf16.mxu1 %v23080_v26  ;;  %v23109_v26 = vld [vmem:[#allocation6 + $0xb2c] ss:$12 sps:$4 sm:$0xff]  }
 0x43d   : > { %7667 = vmatpush1.bf16.msra.mxu0 %v23077_v2  ;;  %v23106_v2 = vld [vmem:[#allocation6 + $0x1418] ss:$12 sps:$4 sm:$0xff]  }
 0x43e   : > { %21506 = vmatpush3.bf16.msra.mxu1 %v23081_v19  ;;  %7668 = vmatprep.subr.bf16.mxu0 %v23084_v54  ;;  %v23110_v54 = vld [vmem:[#allocation6 + $0x14f0] ss:$12 sps:$4 sm:$0xff]  }
 0x43f   : > { %21507 = vmatprep.subr.bf16.mxu1 %v23085_v7 }
 0x441   : > { %7669 = vmatpush1.bf16.msra.mxu0 %v23082_v49 }
 0x442   : > { %21508 = vmatpush3.bf16.msra.mxu1 %v23086_v12  ;;  %7670 = vmatprep.subr.bf16.mxu0 %v23089_v42 }
 0x443   : > { %21509 = vmatprep.subr.bf16.mxu1 %v23090_v29 }
 0x445   : > { %7671 = vmatpush1.bf16.msra.mxu0 %v23087_v14  ;;  %v23107_v14 = vld [vmem:[#allocation6 + $0xb28] ss:$12 sps:$4 sm:$0xff]  }
 0x446   : > { %21510 = vmatpush3.bf16.msra.mxu1 %v23091_v38  ;;  %7672 = vmatprep.subr.bf16.mxu0 %v23094_v28  ;;  %v23111_v28 = vld [vmem:[#allocation6 + $0x1430] ss:$12 sps:$4 sm:$0xff]  }
 0x447   : > { %21511 = vmatprep.subr.bf16.mxu1 %v23095_v18  ;;  %v23114_v18 = vld [vmem:[#allocation6 + $0xb44] ss:$12 sps:$4 sm:$0xff]  }
 0x449   : > { %7673 = vmatpush1.bf16.msra.mxu0 %v23092_v52  ;;  %v23115_v52 = vld [vmem:[#allocation6 + $0x15c8] ss:$12 sps:$4 sm:$0xff]  }
 0x44a   : > { %21512 = vmatpush3.bf16.msra.mxu1 %v23096_v21  ;;  %7674 = vmatprep.subr.bf16.mxu0 %v23099_v43  ;;  %v23112_v21 = vld [vmem:[#allocation6 + $0xb40] ss:$12 sps:$4 sm:$0xff]   ;;  %v23116_v43 = vld [vmem:[#allocation6 + $0x1508] ss:$12 sps:$4 sm:$0xff]  }
 0x44b   : > { %21513 = vmatprep.subr.bf16.mxu1 %v23100_v24  ;;  %v23119_v24 = vld [vmem:[#allocation6 + $0xb5c] ss:$12 sps:$4 sm:$0xff]  }
 0x44c   : > { %v21365_v46 = vpop.f32.mrb[28].mxu1 }
 0x44d   : > { %v21366_v19 = vpop.f32.mrb[29].mxu1  ;;  %7675 = vmatpush1.bf16.msra.mxu0 %v23097_v60  ;;  %v23117_v60 = vld [vmem:[#allocation6 + $0xb58] ss:$12 sps:$4 sm:$0xff]  }
 0x44e   : > { %v21367_v7 = vadd.f32 %v21366_v19, %v21365_v46  ;;  %v21368_v49 = vpop.f32.mrb[30].mxu1  ;;  %21514 = vmatpush3.bf16.msra.mxu1 %v23101_v25  ;;  %7676 = vmatprep.subr.bf16.mxu0 %v23104_v39  ;;  %v23124_v25 = vld [vmem:[#allocation6 + $0xb74] ss:$12 sps:$4 sm:$0xff]   ;;  %v23125_v39 = vld [vmem:[#allocation6 + $0x15f8] ss:$12 sps:$4 sm:$0xff]  }
 0x44f   : > { %v21369_v12 = vpop.f32.mrb[31].mxu1  ;;  %21515 = vmatprep.subr.bf16.mxu1 %v23105_v57  ;;  %v23122_v57 = vld [vmem:[#allocation6 + $0xb70] ss:$12 sps:$4 sm:$0xff]   ;;  %v23129_v46 = vld [vmem:[#allocation6 + $0xb8c] ss:$12 sps:$4 sm:$0xff]  }
 0x450   : > { %v26164_v42 = vadd.f32 %v21367_v7, %v26146_v41  ;;  %v21370_v29 = vadd.f32 %v21369_v12, %v21368_v49  ;;  %v23120_v41 = vld [vmem:[#allocation6 + $0x15e0] ss:$12 sps:$4 sm:$0xff]   ;;  %v23131_v19 = vld [vmem:[#allocation6 + $0x1550] ss:$12 sps:$4 sm:$0xff]   ;;  %v23135_v7 = vld [vmem:[#allocation6 + $0x1628] ss:$12 sps:$4 sm:$0xff]  }
 0x451   : > { %7677 = vmatpush1.bf16.msra.mxu0 %v23102_v13  ;;  %v23126_v13 = vld [vmem:[#allocation6 + $0x1538] ss:$12 sps:$4 sm:$0xff]   ;;  %v23132_v49 = vld [vmem:[#allocation6 + $0xba0] ss:$12 sps:$4 sm:$0xff]   ;;  %v23136_v12 = vld [vmem:[#allocation6 + $0x1568] ss:$12 sps:$4 sm:$0xff]  }
 0x452   : > { %v26167_v38 = vadd.f32 %v21370_v29, %v26149_v47  ;;  %21516 = vmatpush3.bf16.msra.mxu1 %v23106_v2  ;;  %7678 = vmatprep.subr.bf16.mxu0 %v23109_v26  ;;  %v23121_v47 = vld [vmem:[#allocation6 + $0x1520] ss:$12 sps:$4 sm:$0xff]   ;;  %v23130_v2 = vld [vmem:[#allocation6 + $0x1610] ss:$12 sps:$4 sm:$0xff]   ;;  %v23127_v26 = vld [vmem:[#allocation6 + $0xb88] ss:$12 sps:$4 sm:$0xff]  }
 0x453   : > { %21517 = vmatprep.subr.bf16.mxu1 %v23110_v54  ;;  %v23134_v54 = vld [vmem:[#allocation6 + $0xba4] ss:$12 sps:$4 sm:$0xff]   ;;  %v23139_v29 = vld [vmem:[#allocation6 + $0xbbc] ss:$12 sps:$4 sm:$0xff]  }
 0x455   : > { %7679 = vmatpush1.bf16.msra.mxu0 %v23107_v14  ;;  %v23140_v14 = vld [vmem:[#allocation6 + $0x1640] ss:$12 sps:$4 sm:$0xff]  }
 0x456   : > { %21518 = vmatpush3.bf16.msra.mxu1 %v23111_v28  ;;  %7680 = vmatprep.subr.bf16.mxu0 %v23114_v18  ;;  %v23137_v28 = vld [vmem:[#allocation6 + $0xbb8] ss:$12 sps:$4 sm:$0xff]   ;;  %v23141_v18 = vld [vmem:[#allocation6 + $0x1580] ss:$12 sps:$4 sm:$0xff]  }
 0x457   : > { %21525 = vmatprep.subr.bf16.mxu1 %v23115_v52  ;;  %v23144_v52 = vld [vmem:[#allocation6 + $0xbd4] ss:$12 sps:$4 sm:$0xff]  }
 0x459   : > { %8789 = vmatmul.mubr.bf16.vlgmr.msra.gmra.mrb[56].mxu1 %v26013_v23  ;;  %7681 = vmatpush1.bf16.msra.mxu0 %v23112_v21  ;;  %v23145_v21 = vld [vmem:[#allocation6 + $0x1658] ss:$12 sps:$4 sm:$0xff]  }
 0x45a   : > { %21526 = vmatpush3.bf16.msra.mxu1 %v23116_v43  ;;  %8829 = vmatprep.mubr.bf16.mxu1 %v26016_v36  ;;  %v23142_v43 = vld [vmem:[#allocation6 + $0xbd0] ss:$12 sps:$4 sm:$0xff]  }
 0x45b   : > { %7682 = vmatprep.subr.bf16.mxu0 %v23119_v24  ;;  %21527 = vmatprep.subr.bf16.mxu1 %v23120_v41  ;;  %v23146_v41 = vld [vmem:[#allocation6 + $0x1598] ss:$12 sps:$4 sm:$0xff]  }
 0x45d   : > { %7683 = vmatpush1.bf16.msra.mxu0 %v23117_v60  ;;  %v23149_v60 = vld [vmem:[#allocation6 + $0xbec] ss:$12 sps:$4 sm:$0xff]  }
 0x45e   : > { %21528 = vmatpush3.bf16.msra.mxu1 %v23121_v47  ;;  %7684 = vmatprep.subr.bf16.mxu0 %v23124_v25  ;;  %v23150_v25 = vld [vmem:[#allocation6 + $0x1670] ss:$12 sps:$4 sm:$0xff]  }
 0x45f   : > { %21529 = vmatprep.subr.bf16.mxu1 %v23125_v39 }
 0x461   : > { %7685 = vmatpush1.bf16.msra.mxu0 %v23122_v57 }
 0x462   : > { %21530 = vmatpush3.bf16.msra.mxu1 %v23126_v13  ;;  %7686 = vmatprep.subr.bf16.mxu0 %v23129_v46 }
 0x463   : > { %21531 = vmatprep.subr.bf16.mxu1 %v23130_v2 }
 0x465   : > { %7687 = vmatpush1.bf16.msra.mxu0 %v23127_v26  ;;  %v23147_v26 = vld [vmem:[#allocation6 + $0xbe8] ss:$12 sps:$4 sm:$0xff]  }
 0x466   : > { %21532 = vmatpush3.bf16.msra.mxu1 %v23131_v19  ;;  %7688 = vmatprep.subr.bf16.mxu0 %v23134_v54  ;;  %v23151_v54 = vld [vmem:[#allocation6 + $0x15b0] ss:$12 sps:$4 sm:$0xff]  }
 0x467   : > { %21533 = vmatprep.subr.bf16.mxu1 %v23135_v7  ;;  %v23154_v7 = vld [vmem:[#allocation6 + $0xc04] ss:$12 sps:$4 sm:$0xff]  }
 0x469   : > { %7689 = vmatpush1.bf16.msra.mxu0 %v23132_v49  ;;  %v23152_v49 = vld [vmem:[#allocation6 + $0xc00] ss:$12 sps:$4 sm:$0xff]  }
 0x46a   : > { %21534 = vmatpush3.bf16.msra.mxu1 %v23136_v12  ;;  %7690 = vmatprep.subr.bf16.mxu0 %v23139_v29  ;;  %v23155_v12 = vld [vmem:[#allocation6 + $0x1748] ss:$12 sps:$4 sm:$0xff]  }
 0x46b   : > { %21535 = vmatprep.subr.bf16.mxu1 %v23140_v14  ;;  %v23156_v29 = vld [vmem:[#allocation6 + $0x1688] ss:$12 sps:$4 sm:$0xff]  }
 0x46c   : > { %v21387_v24 = vpop.f32.mrb[32].mxu1  ;;  %v23159_v14 = vld [vmem:[#allocation6 + $0xc1c] ss:$12 sps:$4 sm:$0xff]  }
 0x46d   : > { %v21388_v47 = vpop.f32.mrb[33].mxu1  ;;  %7691 = vmatpush1.bf16.msra.mxu0 %v23137_v28  ;;  %v23160_v28 = vld [vmem:[#allocation6 + $0x1760] ss:$12 sps:$4 sm:$0xff]  }
 0x46e   : > { %v21389_v39 = vadd.f32 %v21388_v47, %v21387_v24  ;;  %v21390_v57 = vpop.f32.mrb[34].mxu1  ;;  %21536 = vmatpush3.bf16.msra.mxu1 %v23141_v18  ;;  %7692 = vmatprep.subr.bf16.mxu0 %v23144_v52  ;;  %v23164_v18 = vld [vmem:[#allocation6 + $0xc34] ss:$12 sps:$4 sm:$0xff]   ;;  %v23165_v52 = vld [vmem:[#allocation6 + $0x1778] ss:$12 sps:$4 sm:$0xff]  }
 0x46f   : > { %v21391_v13 = vpop.f32.mrb[35].mxu1  ;;  %21537 = vmatprep.subr.bf16.mxu1 %v23145_v21  ;;  %v23162_v21 = vld [vmem:[#allocation6 + $0xc30] ss:$12 sps:$4 sm:$0xff]   ;;  %v23175_v47 = vld [vmem:[#allocation6 + $0x17a8] ss:$12 sps:$4 sm:$0xff]  }
 0x470   : > { %v26172_v46 = vadd.f32 %v21389_v39, %v26164_v42  ;;  %v21392_v2 = vadd.f32 %v21391_v13, %v21390_v57  ;;  %v23157_v42 = vld [vmem:[#allocation6 + $0xc18] ss:$12 sps:$4 sm:$0xff]   ;;  %v23170_v24 = vld [vmem:[#allocation6 + $0x1790] ss:$12 sps:$4 sm:$0xff]   ;;  %v23176_v39 = vld [vmem:[#allocation6 + $0x16e8] ss:$12 sps:$4 sm:$0xff]  }
 0x471   : > { %7693 = vmatpush1.bf16.msra.mxu0 %v23142_v43  ;;  %v23166_v43 = vld [vmem:[#allocation6 + $0x16b8] ss:$12 sps:$4 sm:$0xff]   ;;  %v23179_v57 = vld [vmem:[#allocation6 + $0xc7c] ss:$12 sps:$4 sm:$0xff]   ;;  %v23180_v13 = vld [vmem:[#allocation6 + $0x17c0] ss:$12 sps:$4 sm:$0xff]  }
 0x472   : > { %v26175_v19 = vadd.f32 %v21392_v2, %v26167_v38  ;;  %21538 = vmatpush3.bf16.msra.mxu1 %v23146_v41  ;;  %7694 = vmatprep.subr.bf16.mxu0 %v23149_v60  ;;  %v23161_v38 = vld [vmem:[#allocation6 + $0x16a0] ss:$12 sps:$4 sm:$0xff]   ;;  %v23167_v41 = vld [vmem:[#allocation6 + $0xc48] ss:$12 sps:$4 sm:$0xff]   ;;  %v23171_v60 = vld [vmem:[#allocation6 + $0x16d0] ss:$12 sps:$4 sm:$0xff]  }
 0x473   : > { %21539 = vmatprep.subr.bf16.mxu1 %v23150_v25  ;;  %v23172_v25 = vld [vmem:[#allocation6 + $0xc60] ss:$12 sps:$4 sm:$0xff]   ;;  %v23177_v2 = vld [vmem:[#allocation6 + $0xc78] ss:$12 sps:$4 sm:$0xff]  }
 0x475   : > { %7695 = vmatpush1.bf16.msra.mxu0 %v23147_v26  ;;  %v23181_v26 = vld [vmem:[#allocation6 + $0x1700] ss:$12 sps:$4 sm:$0xff]  }
 0x476   : > { %21540 = vmatpush3.bf16.msra.mxu1 %v23151_v54  ;;  %7707 = vmatprep.subr.bf16.mxu0 %v23154_v7  ;;  %v23184_v54 = vld [vmem:[#allocation6 + $0xc94] ss:$12 sps:$4 sm:$0xff]   ;;  %v23185_v7 = vld [vmem:[#allocation6 + $0x17d8] ss:$12 sps:$4 sm:$0xff]  }
 0x477   : > { %21547 = vmatprep.subr.bf16.mxu1 %v23155_v12 }
 0x478   : > { %7697 = vmatmul.mubr.bf16.vlgmr.msra.gmra.mrb[12].mxu0 %v25961_v0  ;;  %v23169_v0 = vld [vmem:[#allocation6 + $0xc4c] ss:$12 sps:$4 sm:$0xff]  }
 0x479   : > { %8830 = vmatmul.mubr.bf16.vlgmr.msra.gmra.mrb[60].mxu1 %v26029_v50  ;;  %7708 = vmatpush1.bf16.msra.mxu0 %v23152_v49  ;;  %v23182_v49 = vld [vmem:[#allocation6 + $0xc90] ss:$12 sps:$4 sm:$0xff]  }
 0x47a   : > { %7739 = vmatprep.mubr.bf16.mxu0 %v25966_v35  ;;  %21548 = vmatpush3.bf16.msra.mxu1 %v23156_v29  ;;  %v23174_v35 = vld [vmem:[#allocation6 + $0xc64] ss:$12 sps:$4 sm:$0xff]  }
 0x47b   : > { %8870 = vmatprep.mubr.bf16.mxu1 %v26031_v30  ;;  %7709 = vmatprep.subr.bf16.mxu0 %v23159_v14  ;;  %v23186_v29 = vld [vmem:[#allocation6 + $0x1718] ss:$12 sps:$4 sm:$0xff]  }
 0x47c   : > { %21549 = vmatprep.subr.bf16.mxu1 %v23160_v28  ;;  %v23189_v14 = vld [vmem:[#allocation6 + $0xcac] ss:$12 sps:$4 sm:$0xff]   ;;  %v23190_v28 = vld [vmem:[#allocation6 + $0x17f0] ss:$12 sps:$4 sm:$0xff]  }
 0x47d   : > { %7710 = vmatpush1.bf16.msra.mxu0 %v23157_v42 }
 0x47e   : > { %21550 = vmatpush3.bf16.msra.mxu1 %v23161_v38  ;;  %7711 = vmatprep.subr.bf16.mxu0 %v23164_v18 }
 0x47f   : > { %21551 = vmatprep.subr.bf16.mxu1 %v23165_v52 }
 0x481   : > { %7712 = vmatpush1.bf16.msra.mxu0 %v23162_v21 }
 0x482   : > { %21552 = vmatpush3.bf16.msra.mxu1 %v23166_v43  ;;  %7713 = vmatprep.subr.bf16.mxu0 %v23169_v0  ;;  %v23187_v0 = vld [vmem:[#allocation6 + $0xca8] ss:$12 sps:$4 sm:$0xff]  }
 0x483   : > { %21553 = vmatprep.subr.bf16.mxu1 %v23170_v24 }
 0x485   : > { %7714 = vmatpush1.bf16.msra.mxu0 %v23167_v41  ;;  %v23191_v41 = vld [vmem:[#allocation6 + $0x1730] ss:$12 sps:$4 sm:$0xff]  }
 0x486   : > { %21554 = vmatpush3.bf16.msra.mxu1 %v23171_v60  ;;  %7715 = vmatprep.subr.bf16.mxu0 %v23174_v35  ;;  %v23194_v60 = vld [vmem:[#allocation6 + $0xcc4] ss:$12 sps:$4 sm:$0xff]   ;;  %v23192_v35 = vld [vmem:[#allocation6 + $0xcc0] ss:$12 sps:$4 sm:$0xff]  }
 0x487   : > { %21555 = vmatprep.subr.bf16.mxu1 %v23175_v47  ;;  %v23195_v47 = vld [vmem:[#allocation6 + $0x18c8] ss:$12 sps:$4 sm:$0xff]  }
 0x489   : > { %7716 = vmatpush1.bf16.msra.mxu0 %v23172_v25  ;;  %v23196_v25 = vld [vmem:[#allocation6 + $0x1808] ss:$12 sps:$4 sm:$0xff]  }
 0x48a   : > { %21556 = vmatpush3.bf16.msra.mxu1 %v23176_v39  ;;  %7717 = vmatprep.subr.bf16.mxu0 %v23179_v57  ;;  %v23199_v39 = vld [vmem:[#allocation6 + $0xcdc] ss:$12 sps:$4 sm:$0xff]   ;;  %v26189_v57 = vpack.c.bf16 %v25851_v32, %v25976_v45 }
 0x48b   : > { %21557 = vmatprep.subr.bf16.mxu1 %v23180_v13  ;;  %v23201_v13 = vld [vmem:[#allocation6 + $0x1820] ss:$12 sps:$4 sm:$0xff]   ;;  %v23210_v45 = vld [vmem:[#allocation6 + $0x1910] ss:$12 sps:$4 sm:$0xff]  }
 0x48c   : > { %v21409_v12 = vpop.f32.mrb[36].mxu1 }
 0x48d   : > { %v21410_v42 = vpop.f32.mrb[37].mxu1  ;;  %7718 = vmatpush1.bf16.msra.mxu0 %v23177_v2  ;;  %v23204_v2 = vld [vmem:[#allocation6 + $0xcf4] ss:$12 sps:$4 sm:$0xff]  }
 0x48e   : > { %v21411_v38 = vadd.f32 %v21410_v42, %v21409_v12  ;;  %v21412_v18 = vpop.f32.mrb[38].mxu1  ;;  %21558 = vmatpush3.bf16.msra.mxu1 %v23181_v26  ;;  %7719 = vmatprep.subr.bf16.mxu0 %v23184_v54  ;;  %v23205_v26 = vld [vmem:[#allocation6 + $0x18f8] ss:$12 sps:$4 sm:$0xff]   ;;  %v23202_v54 = vld [vmem:[#allocation6 + $0xcf0] ss:$12 sps:$4 sm:$0xff]  }
 0x48f   : > { %v21413_v52 = vpop.f32.mrb[39].mxu1  ;;  %21559 = vmatprep.subr.bf16.mxu1 %v23185_v7  ;;  %v23206_v7 = vld [vmem:[#allocation6 + $0x1838] ss:$12 sps:$4 sm:$0xff]   ;;  %v23207_v12 = vld [vmem:[#allocation6 + $0xd08] ss:$12 sps:$4 sm:$0xff]  }
 0x490   : > { %v26182_v21 = vadd.f32 %v21411_v38, %v26172_v46  ;;  %v21414_v43 = vadd.f32 %v21413_v52, %v21412_v18  ;;  %v23200_v46 = vld [vmem:[#allocation6 + $0x18e0] ss:$12 sps:$4 sm:$0xff]   ;;  %v23215_v42 = vld [vmem:[#allocation6 + $0x1928] ss:$12 sps:$4 sm:$0xff]  }
 0x491   : > { %7720 = vmatpush1.bf16.msra.mxu0 %v23182_v49  ;;  %v23209_v49 = vld [vmem:[#allocation6 + $0xd0c] ss:$12 sps:$4 sm:$0xff]   ;;  %v23216_v38 = vld [vmem:[#allocation6 + $0x1868] ss:$12 sps:$4 sm:$0xff]  }
 0x492   : > { %v26185_v24 = vadd.f32 %v21414_v43, %v26175_v19  ;;  %21560 = vmatpush3.bf16.msra.mxu1 %v23186_v29  ;;  %7721 = vmatprep.subr.bf16.mxu0 %v23189_v14  ;;  %v23197_v19 = vld [vmem:[#allocation6 + $0xcd8] ss:$12 sps:$4 sm:$0xff]   ;;  %v23211_v29 = vld [vmem:[#allocation6 + $0x1850] ss:$12 sps:$4 sm:$0xff]   ;;  %v23220_v52 = vld [vmem:[#allocation6 + $0x1940] ss:$12 sps:$4 sm:$0xff]  }
 0x493   : > { %21561 = vmatprep.subr.bf16.mxu1 %v23190_v28  ;;  %v23214_v14 = vld [vmem:[#allocation6 + $0xd24] ss:$12 sps:$4 sm:$0xff]   ;;  %v23212_v28 = vld [vmem:[#allocation6 + $0xd20] ss:$12 sps:$4 sm:$0xff]   ;;  %v23219_v18 = vld [vmem:[#allocation6 + $0xd3c] ss:$12 sps:$4 sm:$0xff]  }
 0x494   : > { %v23217_v43 = vld [vmem:[#allocation6 + $0xd38] ss:$12 sps:$4 sm:$0xff]  }
 0x495   : > { %7722 = vmatpush1.bf16.msra.mxu0 %v23187_v0  ;;  %v23221_v0 = vld [vmem:[#allocation6 + $0x1880] ss:$12 sps:$4 sm:$0xff]  }
 0x496   : > { %21562 = vmatpush3.bf16.msra.mxu1 %v23191_v41  ;;  %7723 = vmatprep.subr.bf16.mxu0 %v23194_v60  ;;  %v23224_v41 = vld [vmem:[#allocation6 + $0xd54] ss:$12 sps:$4 sm:$0xff]   ;;  %v23225_v60 = vld [vmem:[#allocation6 + $0x1958] ss:$12 sps:$4 sm:$0xff]  }
 0x497   : > { %21569 = vmatprep.subr.bf16.mxu1 %v23195_v47 }
 0x499   : > { %8871 = vmatmul.mubr.bf16.vlgmr.msra.gmra.mrb[64].mxu1 %v26034_v31  ;;  %7724 = vmatpush1.bf16.msra.mxu0 %v23192_v35  ;;  %v23222_v35 = vld [vmem:[#allocation6 + $0xd50] ss:$12 sps:$4 sm:$0xff]  }
 0x49a   : > { %21570 = vmatpush3.bf16.msra.mxu1 %v23196_v25  ;;  %8911 = vmatprep.mubr.bf16.mxu1 %v26189_v57  ;;  %v23226_v25 = vld [vmem:[#allocation6 + $0x1898] ss:$12 sps:$4 sm:$0xff]  }
 0x49b   : > { %7725 = vmatprep.subr.bf16.mxu0 %v23199_v39  ;;  %21571 = vmatprep.subr.bf16.mxu1 %v23200_v46  ;;  %v23229_v39 = vld [vmem:[#allocation6 + $0xd6c] ss:$12 sps:$4 sm:$0xff]  }
 0x49d   : > { %7726 = vmatpush1.bf16.msra.mxu0 %v23197_v19  ;;  %v23230_v19 = vld [vmem:[#allocation6 + $0x1970] ss:$12 sps:$4 sm:$0xff]  }
 0x49e   : > { %21572 = vmatpush3.bf16.msra.mxu1 %v23201_v13  ;;  %7727 = vmatprep.subr.bf16.mxu0 %v23204_v2 }
 0x49f   : > { %21573 = vmatprep.subr.bf16.mxu1 %v23205_v26 }
 0x4a1   : > { %7728 = vmatpush1.bf16.msra.mxu0 %v23202_v54 }
 0x4a2   : > { %21574 = vmatpush3.bf16.msra.mxu1 %v23206_v7  ;;  %7729 = vmatprep.subr.bf16.mxu0 %v23209_v49  ;;  %v23227_v49 = vld [vmem:[#allocation6 + $0xd68] ss:$12 sps:$4 sm:$0xff]  }
 0x4a3   : > { %21575 = vmatprep.subr.bf16.mxu1 %v23210_v45 }
 0x4a5   : > { %7730 = vmatpush1.bf16.msra.mxu0 %v23207_v12  ;;  %v23231_v12 = vld [vmem:[#allocation6 + $0x18b0] ss:$12 sps:$4 sm:$0xff]  }
 0x4a6   : > { %21576 = vmatpush3.bf16.msra.mxu1 %v23211_v29  ;;  %7731 = vmatprep.subr.bf16.mxu0 %v23214_v14  ;;  %v23234_v29 = vld [vmem:[#allocation6 + $0xd84] ss:$12 sps:$4 sm:$0xff]   ;;  %v23232_v14 = vld [vmem:[#allocation6 + $0xd80] ss:$12 sps:$4 sm:$0xff]  }
 0x4a7   : > { %21577 = vmatprep.subr.bf16.mxu1 %v23215_v42  ;;  %v25015_v42 = vld [vmem:[#allocation6 + $0x3738] ss:$12 sps:$4 sm:$0xff]  }
 0x4a9   : > { %7732 = vmatpush1.bf16.msra.mxu0 %v23212_v28  ;;  %v23236_v28 = vld [vmem:[#allocation6 + $0x1988] ss:$12 sps:$4 sm:$0xff]  }
 0x4aa   : > { %21578 = vmatpush3.bf16.msra.mxu1 %v23216_v38  ;;  %7733 = vmatprep.subr.bf16.mxu0 %v23219_v18  ;;  %v23239_v38 = vld [vmem:[#allocation6 + $0xd9c] ss:$12 sps:$4 sm:$0xff]   ;;  %v23237_v18 = vld [vmem:[#allocation6 + $0xd98] ss:$12 sps:$4 sm:$0xff]  }
 0x4ab   : > { %21579 = vmatprep.subr.bf16.mxu1 %v23220_v52  ;;  %v23240_v52 = vld [vmem:[#allocation6 + $0x1a60] ss:$12 sps:$4 sm:$0xff]  }
 0x4ac   : > { %v21431_v47 = vpop.f32.mrb[40].mxu1 }
 0x4ad   : > { %v21432_v46 = vpop.f32.mrb[41].mxu1  ;;  %7734 = vmatpush1.bf16.msra.mxu0 %v23217_v43  ;;  %v26217_v43 = vpack.c.bf16 %v25860_v59, %v25999_v34  ;;  %v23247_v34 = vld [vmem:[#allocation6 + $0xdc8] ss:$12 sps:$4 sm:$0xff]  }
 0x4ae   : > { %v21433_v13 = vadd.f32 %v21432_v46, %v21431_v47  ;;  %v21434_v2 = vpop.f32.mrb[42].mxu1  ;;  %21580 = vmatpush3.bf16.msra.mxu1 %v23221_v0  ;;  %7735 = vmatprep.subr.bf16.mxu0 %v23224_v41  ;;  %v23241_v0 = vld [vmem:[#allocation6 + $0x19a0] ss:$12 sps:$4 sm:$0xff]   ;;  %v23242_v41 = vld [vmem:[#allocation6 + $0xdb0] ss:$12 sps:$4 sm:$0xff]  }
 0x4af   : > { %v21435_v26 = vpop.f32.mrb[43].mxu1  ;;  %21581 = vmatprep.subr.bf16.mxu1 %v23225_v60  ;;  %v23246_v60 = vld [vmem:[#allocation6 + $0x19b8] ss:$12 sps:$4 sm:$0xff]   ;;  %v23250_v47 = vld [vmem:[#allocation6 + $0x1a90] ss:$12 sps:$4 sm:$0xff]  }
 0x4b0   : > { %v26194_v54 = vadd.f32 %v21433_v13, %v26182_v21  ;;  %v21436_v7 = vadd.f32 %v21435_v26, %v21434_v2  ;;  %v23235_v21 = vld [vmem:[#allocation6 + $0x1a48] ss:$12 sps:$4 sm:$0xff]   ;;  %v23252_v46 = vld [vmem:[#allocation6 + $0xde0] ss:$12 sps:$4 sm:$0xff]   ;;  %v23257_v26 = vld [vmem:[#allocation6 + $0xdf8] ss:$12 sps:$4 sm:$0xff]  }
 0x4b1   : > { %7736 = vmatpush1.bf16.msra.mxu0 %v23222_v35  ;;  %v23249_v35 = vld [vmem:[#allocation6 + $0xdcc] ss:$12 sps:$4 sm:$0xff]   ;;  %v23259_v13 = vld [vmem:[#allocation6 + $0xdfc] ss:$12 sps:$4 sm:$0xff]  }
 0x4b2   : > { %v26197_v45 = vadd.f32 %v21436_v7, %v26185_v24  ;;  %21582 = vmatpush3.bf16.msra.mxu1 %v23226_v25  ;;  %7737 = vmatprep.subr.bf16.mxu0 %v23229_v39  ;;  %v26207_v24 = vpack.c.bf16 %v27142_v15, %v25857_v56  ;;  %v23244_v56 = vld [vmem:[#allocation6 + $0xdb4] ss:$12 sps:$4 sm:$0xff]   ;;  %v23254_v25 = vld [vmem:[#allocation6 + $0xde4] ss:$12 sps:$4 sm:$0xff]  }
 0x4b3   : > { %21583 = vmatprep.subr.bf16.mxu1 %v23230_v19  ;;  %v23255_v39 = vld [vmem:[#allocation6 + $0x1aa8] ss:$12 sps:$4 sm:$0xff]   ;;  %v23260_v2 = vld [vmem:[#allocation6 + $0x1ac0] ss:$12 sps:$4 sm:$0xff]  }
 0x4b4   : > { %v23256_v19 = vld [vmem:[#allocation6 + $0x19e8] ss:$12 sps:$4 sm:$0xff]   ;;  %v23261_v7 = vld [vmem:[#allocation6 + $0x1a00] ss:$12 sps:$4 sm:$0xff]  }
 0x4b5   : > { %7738 = vmatpush1.bf16.msra.mxu0 %v23227_v49  ;;  %v23264_v49 = vld [vmem:[#allocation6 + $0xe14] ss:$12 sps:$4 sm:$0xff]  }
 0x4b6   : > { %21584 = vmatpush3.bf16.msra.mxu1 %v23231_v12  ;;  %7750 = vmatprep.subr.bf16.mxu0 %v23234_v29  ;;  %v23265_v12 = vld [vmem:[#allocation6 + $0x1ad8] ss:$12 sps:$4 sm:$0xff]   ;;  %v23262_v29 = vld [vmem:[#allocation6 + $0xe10] ss:$12 sps:$4 sm:$0xff]  }
 0x4b7   : > { %21591 = vmatprep.subr.bf16.mxu1 %v23235_v21  ;;  %v23266_v21 = vld [vmem:[#allocation6 + $0x1a18] ss:$12 sps:$4 sm:$0xff]  }
 0x4b8   : > { %20081 = vmatmul.mubr.msk.bf16.vlgmr.msra.gmra.mrb[12].mxu0 %vm26107_vm11, %v25953_v6  ;;  %v23245_v6 = vld [vmem:[#allocation6 + $0x1a78] ss:$12 sps:$4 sm:$0xff]  }
 0x4b9   : > { %20101 = vmatmul.mubr.msk.bf16.vlgmr.msra.gmra.mrb[68].mxu1 %vm26201_vm13, %v26207_v24  ;;  %7751 = vmatpush1.bf16.msra.mxu0 %v23232_v14 }
 0x4ba   : > { %7782 = vmatprep.mubr.bf16.mxu0 %v25978_v10  ;;  %21592 = vmatpush3.bf16.msra.mxu1 %v23236_v28  ;;  %v23251_v10 = vld [vmem:[#allocation6 + $0x19d0] ss:$12 sps:$4 sm:$0xff]   ;;  %v23269_v28 = vld [vmem:[#allocation6 + $0xe2c] ss:$12 sps:$4 sm:$0xff]  }
 0x4bb   : > { %8952 = vmatprep.mubr.bf16.mxu1 %v26217_v43  ;;  %7752 = vmatprep.subr.bf16.mxu0 %v23239_v38 }
 0x4bc   : > { %21593 = vmatprep.subr.bf16.mxu1 %v23240_v52 }
 0x4bd   : > { %7753 = vmatpush1.bf16.msra.mxu0 %v23237_v18  ;;  %v23270_v18 = vld [vmem:[#allocation6 + $0x1af0] ss:$12 sps:$4 sm:$0xff]  }
 0x4be   : > { %21594 = vmatpush3.bf16.msra.mxu1 %v23241_v0  ;;  %7754 = vmatprep.subr.bf16.mxu0 %v23244_v56 }
 0x4bf   : > { %21595 = vmatprep.subr.bf16.mxu1 %v23245_v6 }
 0x4c1   : > { %7755 = vmatpush1.bf16.msra.mxu0 %v23242_v41 }
 0x4c2   : > { %21596 = vmatpush3.bf16.msra.mxu1 %v23246_v60  ;;  %7756 = vmatprep.subr.bf16.mxu0 %v23249_v35  ;;  %v23267_v60 = vld [vmem:[#allocation6 + $0xe28] ss:$12 sps:$4 sm:$0xff]  }
 0x4c3   : > { %21597 = vmatprep.subr.bf16.mxu1 %v23250_v47  ;;  %v23271_v47 = vld [vmem:[#allocation6 + $0x1a30] ss:$12 sps:$4 sm:$0xff]  }
 0x4c5   : > { %7757 = vmatpush1.bf16.msra.mxu0 %v23247_v34  ;;  %v23274_v34 = vld [vmem:[#allocation6 + $0xe44] ss:$12 sps:$4 sm:$0xff]  }
 0x4c6   : > { %21598 = vmatpush3.bf16.msra.mxu1 %v23251_v10  ;;  %7758 = vmatprep.subr.bf16.mxu0 %v23254_v25  ;;  %v23275_v10 = vld [vmem:[#allocation6 + $0x1bc8] ss:$12 sps:$4 sm:$0xff]   ;;  %v23272_v25 = vld [vmem:[#allocation6 + $0xe40] ss:$12 sps:$4 sm:$0xff]  }
 0x4c7   : > { %21599 = vmatprep.subr.bf16.mxu1 %v23255_v39  ;;  %v23276_v39 = vld [vmem:[#allocation6 + $0x1b08] ss:$12 sps:$4 sm:$0xff]  }
 0x4c9   : > { %7759 = vmatpush1.bf16.msra.mxu0 %v23252_v46  ;;  %v23279_v46 = vld [vmem:[#allocation6 + $0xe5c] ss:$12 sps:$4 sm:$0xff]  }
 0x4ca   : > { %21600 = vmatpush3.bf16.msra.mxu1 %v23256_v19  ;;  %7760 = vmatprep.subr.bf16.mxu0 %v23259_v13  ;;  %v26229_v19 = vpack.c.bf16 %v25865_v33, %v26003_v44  ;;  %v26233_v13 = vpack.c.bf16 %v25868_v55, %v26007_v48  ;;  %v23286_v44 = vld [vmem:[#allocation6 + $0x1b38] ss:$12 sps:$4 sm:$0xff]   ;;  %v23287_v48 = vld [vmem:[#allocation6 + $0xe88] ss:$12 sps:$4 sm:$0xff]  }
 0x4cb   : > { %21601 = vmatprep.subr.bf16.mxu1 %v23260_v2  ;;  %v23281_v2 = vld [vmem:[#allocation6 + $0x1b20] ss:$12 sps:$4 sm:$0xff]  }
 0x4cc   : > { %v21453_v14 = vpop.f32.mrb[44].mxu1 }
 0x4cd   : > { %v21454_v38 = vpop.f32.mrb[45].mxu1  ;;  %7761 = vmatpush1.bf16.msra.mxu0 %v23257_v26  ;;  %v23284_v26 = vld [vmem:[#allocation6 + $0xe74] ss:$12 sps:$4 sm:$0xff]  }
 0x4ce   : > { %v21455_v52 = vadd.f32 %v21454_v38, %v21453_v14  ;;  %v21456_v0 = vpop.f32.mrb[46].mxu1  ;;  %21602 = vmatpush3.bf16.msra.mxu1 %v23261_v7  ;;  %7762 = vmatprep.subr.bf16.mxu0 %v23264_v49  ;;  %v23285_v7 = vld [vmem:[#allocation6 + $0x1bf8] ss:$12 sps:$4 sm:$0xff]   ;;  %v23282_v49 = vld [vmem:[#allocation6 + $0xe70] ss:$12 sps:$4 sm:$0xff]  }
 0x4cf   : > { %v21457_v56 = vpop.f32.mrb[47].mxu1  ;;  %21603 = vmatprep.subr.bf16.mxu1 %v23265_v12  ;;  %v23289_v12 = vld [vmem:[#allocation6 + $0xe8c] ss:$12 sps:$4 sm:$0xff]   ;;  %v23291_v14 = vld [vmem:[#allocation6 + $0x1b50] ss:$12 sps:$4 sm:$0xff]  }
 0x4d0   : > { %v26222_v6 = vadd.f32 %v21455_v52, %v26194_v54  ;;  %v21458_v41 = vadd.f32 %v21457_v56, %v21456_v0  ;;  %v23280_v54 = vld [vmem:[#allocation6 + $0x1be0] ss:$12 sps:$4 sm:$0xff]   ;;  %v23299_v52 = vld [vmem:[#allocation6 + $0xebc] ss:$12 sps:$4 sm:$0xff]   ;;  %v23297_v56 = vld [vmem:[#allocation6 + $0xeb8] ss:$12 sps:$4 sm:$0xff]  }
 0x4d1   : > { %7763 = vmatpush1.bf16.msra.mxu0 %v23262_v29  ;;  %v23290_v29 = vld [vmem:[#allocation6 + $0x1c10] ss:$12 sps:$4 sm:$0xff]   ;;  %v23292_v38 = vld [vmem:[#allocation6 + $0xea0] ss:$12 sps:$4 sm:$0xff]  }
 0x4d2   : > { %v26225_v35 = vadd.f32 %v21458_v41, %v26197_v45  ;;  %21604 = vmatpush3.bf16.msra.mxu1 %v23266_v21  ;;  %7764 = vmatprep.subr.bf16.mxu0 %v23269_v28  ;;  %v23277_v45 = vld [vmem:[#allocation6 + $0xe58] ss:$12 sps:$4 sm:$0xff]   ;;  %v23295_v28 = vld [vmem:[#allocation6 + $0x1c28] ss:$12 sps:$4 sm:$0xff]   ;;  %v23300_v0 = vld [vmem:[#allocation6 + $0x1c40] ss:$12 sps:$4 sm:$0xff]  }
 0x4d3   : > { %21605 = vmatprep.subr.bf16.mxu1 %v23270_v18  ;;  %v23294_v21 = vld [vmem:[#allocation6 + $0xea4] ss:$12 sps:$4 sm:$0xff]   ;;  %v23296_v18 = vld [vmem:[#allocation6 + $0x1b68] ss:$12 sps:$4 sm:$0xff]   ;;  %v23301_v41 = vld [vmem:[#allocation6 + $0x1b80] ss:$12 sps:$4 sm:$0xff]  }
 0x4d5   : > { %7765 = vmatpush1.bf16.msra.mxu0 %v23267_v60  ;;  %v23304_v60 = vld [vmem:[#allocation6 + $0xed4] ss:$12 sps:$4 sm:$0xff]  }
 0x4d6   : > { %21606 = vmatpush3.bf16.msra.mxu1 %v23271_v47  ;;  %7766 = vmatprep.subr.bf16.mxu0 %v23274_v34  ;;  %v23305_v47 = vld [vmem:[#allocation6 + $0x1c58] ss:$12 sps:$4 sm:$0xff]   ;;  %v23302_v34 = vld [vmem:[#allocation6 + $0xed0] ss:$12 sps:$4 sm:$0xff]  }
 0x4d7   : > { %21613 = vmatprep.subr.bf16.mxu1 %v23275_v10 }
 0x4d9   : > { %8953 = vmatmul.mubr.bf16.vlgmr.msra.gmra.mrb[72].mxu1 %v26229_v19  ;;  %7767 = vmatpush1.bf16.msra.mxu0 %v23272_v25  ;;  %v23306_v25 = vld [vmem:[#allocation6 + $0x1b98] ss:$12 sps:$4 sm:$0xff]  }
 0x4da   : > { %21614 = vmatpush3.bf16.msra.mxu1 %v23276_v39  ;;  %8993 = vmatprep.mubr.bf16.mxu1 %v26233_v13  ;;  %v23309_v39 = vld [vmem:[#allocation6 + $0xeec] ss:$12 sps:$4 sm:$0xff]  }
 0x4db   : > { %7768 = vmatprep.subr.bf16.mxu0 %v23279_v46  ;;  %21615 = vmatprep.subr.bf16.mxu1 %v23280_v54  ;;  %v23310_v54 = vld [vmem:[#allocation6 + $0x1c70] ss:$12 sps:$4 sm:$0xff]  }
 0x4dd   : > { %7769 = vmatpush1.bf16.msra.mxu0 %v23277_v45 }
 0x4de   : > { %21616 = vmatpush3.bf16.msra.mxu1 %v23281_v2  ;;  %7770 = vmatprep.subr.bf16.mxu0 %v23284_v26 }
 0x4df   : > { %21617 = vmatprep.subr.bf16.mxu1 %v23285_v7  ;;  %v23307_v7 = vld [vmem:[#allocation6 + $0xee8] ss:$12 sps:$4 sm:$0xff]  }
 0x4e1   : > { %7771 = vmatpush1.bf16.msra.mxu0 %v23282_v49 }
 0x4e2   : > { %21618 = vmatpush3.bf16.msra.mxu1 %v23286_v44  ;;  %7772 = vmatprep.subr.bf16.mxu0 %v23289_v12 }
 0x4e3   : > { %21619 = vmatprep.subr.bf16.mxu1 %v23290_v29  ;;  %v23311_v29 = vld [vmem:[#allocation6 + $0x1bb0] ss:$12 sps:$4 sm:$0xff]  }
 0x4e5   : > { %7773 = vmatpush1.bf16.msra.mxu0 %v23287_v48  ;;  %v23314_v48 = vld [vmem:[#allocation6 + $0xf04] ss:$12 sps:$4 sm:$0xff]  }
 0x4e6   : > { %21620 = vmatpush3.bf16.msra.mxu1 %v23291_v14  ;;  %7774 = vmatprep.subr.bf16.mxu0 %v23294_v21  ;;  %v23312_v14 = vld [vmem:[#allocation6 + $0xf00] ss:$12 sps:$4 sm:$0xff]   ;;  %v23315_v21 = vld [vmem:[#allocation6 + $0x1c88] ss:$12 sps:$4 sm:$0xff]  }
 0x4e7   : > { %21621 = vmatprep.subr.bf16.mxu1 %v23295_v28  ;;  %v23318_v28 = vld [vmem:[#allocation6 + $0xf1c] ss:$12 sps:$4 sm:$0xff]  }
 0x4e9   : > { %7775 = vmatpush1.bf16.msra.mxu0 %v23292_v38  ;;  %v23319_v38 = vld [vmem:[#allocation6 + $0x1ca0] ss:$12 sps:$4 sm:$0xff]  }
 0x4ea   : > { %21622 = vmatpush3.bf16.msra.mxu1 %v23296_v18  ;;  %7776 = vmatprep.subr.bf16.mxu0 %v23299_v52  ;;  %v23322_v18 = vld [vmem:[#allocation6 + $0xf34] ss:$12 sps:$4 sm:$0xff]   ;;  %v23320_v52 = vld [vmem:[#allocation6 + $0xf30] ss:$12 sps:$4 sm:$0xff]  }
 0x4eb   : > { %21623 = vmatprep.subr.bf16.mxu1 %v23300_v0  ;;  %v23324_v0 = vld [vmem:[#allocation6 + $0xf48] ss:$12 sps:$4 sm:$0xff]  }
 0x4ec   : > { %v21475_v10 = vpop.f32.mrb[48].mxu1 }
 0x4ed   : > { %v21476_v46 = vpop.f32.mrb[49].mxu1  ;;  %7777 = vmatpush1.bf16.msra.mxu0 %v23297_v56  ;;  %v23327_v56 = vld [vmem:[#allocation6 + $0x1cd0] ss:$12 sps:$4 sm:$0xff]  }
 0x4ee   : > { %v21477_v45 = vadd.f32 %v21476_v46, %v21475_v10  ;;  %v21478_v2 = vpop.f32.mrb[50].mxu1  ;;  %21624 = vmatpush3.bf16.msra.mxu1 %v23301_v41  ;;  %7778 = vmatprep.subr.bf16.mxu0 %v23304_v60  ;;  %v23328_v41 = vld [vmem:[#allocation6 + $0xf60] ss:$12 sps:$4 sm:$0xff]   ;;  %v23331_v60 = vld [vmem:[#allocation6 + $0x1ce8] ss:$12 sps:$4 sm:$0xff]  }
 0x4ef   : > { %v21479_v26 = vpop.f32.mrb[51].mxu1  ;;  %21625 = vmatprep.subr.bf16.mxu1 %v23305_v47  ;;  %v23334_v47 = vld [vmem:[#allocation6 + $0xf7c] ss:$12 sps:$4 sm:$0xff]   ;;  %v23335_v10 = vld [vmem:[#allocation6 + $0x1d00] ss:$12 sps:$4 sm:$0xff]  }
 0x4f0   : > { %v26238_v49 = vadd.f32 %v21477_v45, %v26222_v6  ;;  %v21480_v44 = vadd.f32 %v21479_v26, %v21478_v2  ;;  %v26245_v6 = vpack.c.bf16 %v25877_v4, %v26020_v58  ;;  %v23323_v58 = vld [vmem:[#allocation6 + $0x1cb8] ss:$12 sps:$4 sm:$0xff]  }
 0x4f1   : > { %7779 = vmatpush1.bf16.msra.mxu0 %v23302_v34  ;;  %v23332_v34 = vld [vmem:[#allocation6 + $0xf78] ss:$12 sps:$4 sm:$0xff]  }
 0x4f2   : > { %v26241_v12 = vadd.f32 %v21480_v44, %v26225_v35  ;;  %21626 = vmatpush3.bf16.msra.mxu1 %v23306_v25  ;;  %7780 = vmatprep.subr.bf16.mxu0 %v23309_v39  ;;  %v23316_v35 = vld [vmem:[#allocation6 + $0xf18] ss:$12 sps:$4 sm:$0xff]   ;;  %v23338_v25 = vld [vmem:[#allocation6 + $0xf94] ss:$12 sps:$4 sm:$0xff]   ;;  %v23336_v39 = vld [vmem:[#allocation6 + $0xf90] ss:$12 sps:$4 sm:$0xff]  }
 0x4f3   : > { %21627 = vmatprep.subr.bf16.mxu1 %v23310_v54  ;;  %v23339_v54 = vld [vmem:[#allocation6 + $0x1d18] ss:$12 sps:$4 sm:$0xff]  }
 0x4f4   : > { %v23342_v45 = vld [vmem:[#allocation6 + $0xfac] ss:$12 sps:$4 sm:$0xff]  }
 0x4f5   : > { %7781 = vmatpush1.bf16.msra.mxu0 %v23307_v7 }
 0x4f6   : > { %21628 = vmatpush3.bf16.msra.mxu1 %v23311_v29  ;;  %7793 = vmatprep.subr.bf16.mxu0 %v23314_v48  ;;  %v23340_v29 = vld [vmem:[#allocation6 + $0xfa8] ss:$12 sps:$4 sm:$0xff]  }
 0x4f7   : > { %22203 = vmatprep.subr.bf16.mxu1 %v27142_v15 }
 0x4f8   : > { %7783 = vmatmul.mubr.bf16.vlgmr.msra.gmra.mrb[12].mxu0 %v25980_v8  ;;  %v23326_v8 = vld [vmem:[#allocation6 + $0xf4c] ss:$12 sps:$4 sm:$0xff]  }
 0x4f9   : > { %8994 = vmatmul.mubr.bf16.vlgmr.msra.gmra.mrb[76].mxu1 %v26245_v6  ;;  %7794 = vmatpush1.bf16.msra.mxu0 %v23312_v14 }
 0x4fa   : > { %7825 = vmatprep.mubr.bf16.mxu0 %v25983_v20  ;;  %22204 = vmatpush3.bf16.msra.mxu1 %v23315_v21  ;;  %v23330_v20 = vld [vmem:[#allocation6 + $0xf64] ss:$12 sps:$4 sm:$0xff]  }
 0x4fb   : > { %7795 = vmatprep.subr.bf16.mxu0 %v23318_v28  ;;  %22205 = vmatprep.subr.bf16.mxu1 %v27142_v15  ;;  %v23343_v28 = vld [vmem:[#allocation6 + $0x1d30] ss:$12 sps:$4 sm:$0xff]  }
 0x4fc   : > { %22219 = vmatprep.mubr.msk.bf16.mxu1 %vm25407_vm14, %v27142_v15 }
 0x4fd   : > { %7796 = vmatpush1.bf16.msra.mxu0 %v23316_v35  ;;  %v23346_v35 = vld [vmem:[#allocation6 + $0xfc4] ss:$12 sps:$4 sm:$0xff]  }
 0x4fe   : > { %22206 = vmatpush3.bf16.msra.mxu1 %v23319_v38  ;;  %7797 = vmatprep.subr.bf16.mxu0 %v23322_v18  ;;  %v23344_v38 = vld [vmem:[#allocation6 + $0xfc0] ss:$12 sps:$4 sm:$0xff]  }
 0x4ff   : > { %22207 = vmatprep.subr.bf16.mxu1 %v27142_v15  ;;  %v23347_v18 = vld [vmem:[#allocation7 + $0x40] sm:$0xff]  }
 0x501   : > { %7798 = vmatpush1.bf16.msra.mxu0 %v23320_v52  ;;  %v23348_v52 = vld [vmem:[#allocation7] sm:$0xff]  }
 0x502   : > { %22208 = vmatpush3.bf16.msra.mxu1 %v23323_v58  ;;  %7799 = vmatprep.subr.bf16.mxu0 %v23326_v8  ;;  %v23351_v58 = vld [vmem:[#allocation6 + $0xfdc] ss:$12 sps:$4 sm:$0xff]  }
 0x503   : > { %22209 = vmatprep.subr.bf16.mxu1 %v27142_v15  ;;  %v23352_v8 = vld [vmem:[#allocation7 + $0x48] sm:$0xff]  }
 0x505   : > { %7800 = vmatpush1.bf16.msra.mxu0 %v23324_v0  ;;  %v23353_v0 = vld [vmem:[#allocation7 + $0x8] sm:$0xff]  }
 0x506   : > { %22210 = vmatpush3.bf16.msra.mxu1 %v23327_v56  ;;  %7801 = vmatprep.subr.bf16.mxu0 %v23330_v20  ;;  %v23356_v56 = vld [vmem:[#allocation6 + $0xff4] ss:$12 sps:$4 sm:$0xff]  }
 0x507   : > { %22211 = vmatprep.subr.bf16.mxu1 %v27142_v15  ;;  %v23357_v20 = vld [vmem:[#allocation7 + $0x50] sm:$0xff]  }
 0x509   : > { %7802 = vmatpush1.bf16.msra.mxu0 %v23328_v41  ;;  %v27149_v41 = vpack.c.bf16 %v25802_v51, %v25799_v37  ;;  %v23364_v37 = vld [vmem:[#allocation6 + $0x1020] ss:$12 sps:$4 sm:$0xff]  }
 0x50a   : > { %22212 = vmatpush3.bf16.msra.mxu1 %v23331_v60  ;;  %7803 = vmatprep.subr.bf16.mxu0 %v23334_v47  ;;  %v23354_v60 = vld [vmem:[#allocation6 + $0xff0] ss:$12 sps:$4 sm:$0xff]   ;;  %v23368_v51 = vld [vmem:[#allocation7 + $0x20] sm:$0xff]  }
 0x50b   : > { %22213 = vmatprep.subr.bf16.mxu1 %v27142_v15  ;;  %v23358_v47 = vld [vmem:[#allocation7 + $0x10] sm:$0xff]  }
 0x50c   : > { %v21497_v46 = vpop.f32.mrb[52].mxu1 }
 0x50d   : > { %v21498_v2 = vpop.f32.mrb[53].mxu1  ;;  %7804 = vmatpush1.bf16.msra.mxu0 %v23332_v34  ;;  %v23362_v34 = vld [vmem:[#allocation7 + $0x58] sm:$0xff]  }
 0x50e   : > { %v21499_v26 = vadd.f32 %v21498_v2, %v21497_v46  ;;  %v21500_v7 = vpop.f32.mrb[54].mxu1  ;;  %22214 = vmatpush3.bf16.msra.mxu1 %v23335_v10  ;;  %7805 = vmatprep.subr.bf16.mxu0 %v23338_v25  ;;  %v23359_v10 = vld [vmem:[#allocation6 + $0x1008] ss:$12 sps:$4 sm:$0xff]   ;;  %v23363_v25 = vld [vmem:[#allocation7 + $0x18] sm:$0xff]   ;;  %v23367_v46 = vld [vmem:[#allocation7 + $0x60] sm:$0xff]  }
 0x50f   : > { %v21501_v44 = vpop.f32.mrb[55].mxu1  ;;  %22215 = vmatprep.subr.bf16.mxu1 %v27142_v15  ;;  %v23369_v2 = vld [vmem:[#allocation6 + $0x1038] ss:$12 sps:$4 sm:$0xff]  }
 0x510   : > { %v26260_v48 = vadd.f32 %v21499_v26, %v26238_v49  ;;  %v21502_v14 = vadd.f32 %v21501_v44, %v21500_v7  ;;  %v26268_v49 = vpack.c.bf16 %v25899_v17, %v26026_v27  ;;  %v23361_v27 = vld [vmem:[#allocation6 + $0x100c] ss:$12 sps:$4 sm:$0xff]   ;;  %v23376_v7 = vld [vmem:[#allocation6 + $0x1054] ss:$12 sps:$4 sm:$0xff]  }
 0x511   : > { %7806 = vmatpush1.bf16.msra.mxu0 %v23336_v39  ;;  %v23366_v39 = vld [vmem:[#allocation6 + $0x1024] ss:$12 sps:$4 sm:$0xff]   ;;  %v23373_v26 = vld [vmem:[#allocation7 + $0x28] sm:$0xff]  }
 0x512   : > { %v26263_v21 = vadd.f32 %v21502_v14, %v26241_v12  ;;  %22216 = vmatpush3.bf16.msra.mxu1 %v23339_v54  ;;  %7807 = vmatprep.subr.bf16.mxu0 %v23342_v45  ;;  %v23349_v12 = vld [vmem:[#allocation6 + $0xfd8] ss:$12 sps:$4 sm:$0xff]   ;;  %v23371_v54 = vld [vmem:[#allocation6 + $0x103c] ss:$12 sps:$4 sm:$0xff]   ;;  %v23377_v44 = vld [vmem:[#allocation7 + $0x70] sm:$0xff]  }
 0x513   : > { %22217 = vmatprep.subr.bf16.mxu1 %v27142_v15  ;;  %v23372_v45 = vld [vmem:[#allocation7 + $0x68] sm:$0xff]  }
 0x515   : > { %7808 = vmatpush1.bf16.msra.mxu0 %v23340_v29  ;;  %v23374_v29 = vld [vmem:[#allocation6 + $0x1050] ss:$12 sps:$4 sm:$0xff]  }
 0x516   : > { %22218 = vmatpush3.bf16.msra.mxu1 %v23343_v28  ;;  %7809 = vmatprep.subr.bf16.mxu0 %v23346_v35  ;;  %v23378_v28 = vld [vmem:[#allocation7 + $0x30] sm:$0xff]   ;;  %v23381_v35 = vld [vmem:[#allocation6 + $0x106c] ss:$12 sps:$4 sm:$0xff]  }
 0x517   : > { %21644 = vmatprep.subr.bf16.mxu1 %v23347_v18  ;;  %v23382_v18 = vld [vmem:[#allocation7 + $0x78] sm:$0xff]  }
 0x519   : > { %22220 = vmatmul.mubr.bf16.vlgmr.msra.gmra.mrb[80].mxu1 %v26268_v49  ;;  %7810 = vmatpush1.bf16.msra.mxu0 %v23344_v38 }
 0x51a   : > { %21645 = vmatpush3.bf16.msra.mxu1 %v23348_v52  ;;  %9455 = vmatprep.mubr.bf16.mxu1 %v27149_v41  ;;  %v23383_v41 = vld [vmem:[#allocation7 + $0x38] sm:$0xff]  }
 0x51b   : > { %7811 = vmatprep.subr.bf16.mxu0 %v23351_v58  ;;  %21646 = vmatprep.subr.bf16.mxu1 %v23352_v8 }
 0x51d   : > { %7812 = vmatpush1.bf16.msra.mxu0 %v23349_v12  ;;  %v23379_v12 = vld [vmem:[#allocation6 + $0x1068] ss:$12 sps:$4 sm:$0xff]  }
 0x51e   : > { %21647 = vmatpush3.bf16.msra.mxu1 %v23353_v0  ;;  %7813 = vmatprep.subr.bf16.mxu0 %v23356_v56 }
 0x51f   : > { %21648 = vmatprep.subr.bf16.mxu1 %v23357_v20 }
 0x521   : > { %7814 = vmatpush1.bf16.msra.mxu0 %v23354_v60  ;;  %v23386_v60 = vld [vmem:[#allocation6 + $0x1084] ss:$12 sps:$4 sm:$0xff]  }
 0x522   : > { %21649 = vmatpush3.bf16.msra.mxu1 %v23358_v47  ;;  %7815 = vmatprep.subr.bf16.mxu0 %v23361_v27  ;;  %v23384_v47 = vld [vmem:[#allocation6 + $0x1080] ss:$12 sps:$4 sm:$0xff]  }
 0x523   : > { %21650 = vmatprep.subr.bf16.mxu1 %v23362_v34  ;;  %v23387_v27 = vld [vmem:[#allocation7 + $0xc0] sm:$0xff]  }
 0x524   : > { %v23388_v34 = vld [vmem:[#allocation7 + $0x80] sm:$0xff]  }
 0x525   : > { %7816 = vmatpush1.bf16.msra.mxu0 %v23359_v10  ;;  %v23391_v10 = vld [vmem:[#allocation6 + $0x109c] ss:$12 sps:$4 sm:$0xff]  }
 0x526   : > { %21651 = vmatpush3.bf16.msra.mxu1 %v23363_v25  ;;  %7817 = vmatprep.subr.bf16.mxu0 %v23366_v39  ;;  %v23392_v25 = vld [vmem:[#allocation7 + $0xc8] sm:$0xff]  }
 0x527   : > { %21652 = vmatprep.subr.bf16.mxu1 %v23367_v46  ;;  %v23393_v39 = vld [vmem:[#allocation7 + $0x88] sm:$0xff]   ;;  %v23396_v46 = vld [vmem:[#allocation6 + $0x10b4] ss:$12 sps:$4 sm:$0xff]  }
 0x529   : > { %7818 = vmatpush1.bf16.msra.mxu0 %v23364_v37  ;;  %v23397_v37 = vld [vmem:[#allocation7 + $0xd0] sm:$0xff]  }
 0x52a   : > { %21653 = vmatpush3.bf16.msra.mxu1 %v23368_v51  ;;  %7819 = vmatprep.subr.bf16.mxu0 %v23371_v54  ;;  %v27151_v51 = vld [vmem:[#allocation28_spill] sm:$0xff] }
 0x52b   : > { %21654 = vmatprep.subr.bf16.mxu1 %v23372_v45  ;;  %v27152_v54 = vpack.c.bf16 %v25834_v1, %v27151_v51  ;;  %v23394_v45 = vld [vmem:[#allocation6 + $0x10b0] ss:$12 sps:$4 sm:$0xff]   ;;  %v23404_v1 = vld [vmem:[#allocation6 + $0x10e0] ss:$12 sps:$4 sm:$0xff]  }
 0x52c   : > { %v21519_v14 = vpop.f32.mrb[56].mxu1  ;;  %v27153_v51 = vld [vmem:[#allocation29_spill] sm:$0xff] }
 0x52d   : > { %v21520_v38 = vpop.f32.mrb[57].mxu1  ;;  %7820 = vmatpush1.bf16.msra.mxu0 %v23369_v2  ;;  %v23401_v2 = vld [vmem:[#allocation6 + $0x10cc] ss:$12 sps:$4 sm:$0xff]  }
 0x52e   : > { %v21521_v52 = vadd.f32 %v21520_v38, %v21519_v14  ;;  %v21522_v58 = vpop.f32.mrb[58].mxu1  ;;  %21655 = vmatpush3.bf16.msra.mxu1 %v23373_v26  ;;  %7821 = vmatprep.subr.bf16.mxu0 %v23376_v7  ;;  %v23402_v26 = vld [vmem:[#allocation7 + $0xd8] sm:$0xff]   ;;  %v23406_v7 = vld [vmem:[#allocation6 + $0x10e4] ss:$12 sps:$4 sm:$0xff]   ;;  %v23412_v14 = vld [vmem:[#allocation7 + $0xe8] sm:$0xff]  }
 0x52f   : > { %v21523_v8 = vpop.f32.mrb[59].mxu1  ;;  %21656 = vmatprep.subr.bf16.mxu1 %v23377_v44  ;;  %v23408_v44 = vld [vmem:[#allocation7 + $0xa0] sm:$0xff]  }
 0x530   : > { %v26275_v0 = vadd.f32 %v21521_v52, %v26260_v48  ;;  %v21524_v56 = vadd.f32 %v21523_v8, %v21522_v58  ;;  %v23389_v48 = vld [vmem:[#allocation6 + $0x1098] ss:$12 sps:$4 sm:$0xff]   ;;  %v23416_v38 = vld [vmem:[#allocation6 + $0x1114] ss:$12 sps:$4 sm:$0xff]   ;;  %v23414_v52 = vld [vmem:[#allocation6 + $0x1110] ss:$12 sps:$4 sm:$0xff]  }
 0x531   : > { %7822 = vmatpush1.bf16.msra.mxu0 %v23374_v29  ;;  %v23411_v29 = vld [vmem:[#allocation6 + $0x10fc] ss:$12 sps:$4 sm:$0xff]   ;;  %v23418_v8 = vld [vmem:[#allocation7 + $0xb0] sm:$0xff]  }
 0x532   : > { %v26278_v20 = vadd.f32 %v21524_v56, %v26263_v21  ;;  %21657 = vmatpush3.bf16.msra.mxu1 %v23378_v28  ;;  %7823 = vmatprep.subr.bf16.mxu0 %v23381_v35  ;;  %v27150_v21 = vpack.c.bf16 %v25815_v62, %v25819_v3  ;;  %v23399_v62 = vld [vmem:[#allocation6 + $0x10c8] ss:$12 sps:$4 sm:$0xff]   ;;  %v23403_v3 = vld [vmem:[#allocation7 + $0x98] sm:$0xff]  }
 0x533   : > { %21658 = vmatprep.subr.bf16.mxu1 %v23382_v18  ;;  %v23409_v28 = vld [vmem:[#allocation6 + $0x10f8] ss:$12 sps:$4 sm:$0xff]   ;;  %v23413_v35 = vld [vmem:[#allocation7 + $0xa8] sm:$0xff]   ;;  %v23417_v18 = vld [vmem:[#allocation7 + $0xf0] sm:$0xff]  }
 0x535   : > { %7824 = vmatpush1.bf16.msra.mxu0 %v23379_v12  ;;  %v23421_v12 = vld [vmem:[#allocation6 + $0x112c] ss:$12 sps:$4 sm:$0xff]  }
 0x536   : > { %21659 = vmatpush3.bf16.msra.mxu1 %v23383_v41  ;;  %7836 = vmatprep.subr.bf16.mxu0 %v23386_v60  ;;  %v23422_v41 = vld [vmem:[#allocation7 + $0xf8] sm:$0xff]  }
 0x537   : > { %21666 = vmatprep.subr.bf16.mxu1 %v23387_v27 }
 0x538   : > { %7826 = vmatmul.mubr.bf16.vlgmr.msra.gmra.mrb[12].mxu0 %v25988_v63  ;;  %v23398_v63 = vld [vmem:[#allocation7 + $0x90] sm:$0xff]  }
 0x539   : > { %9456 = vmatmul.mubr.bf16.vlgmr.msra.gmra.mrb[84].mxu1 %v27150_v21  ;;  %7837 = vmatpush1.bf16.msra.mxu0 %v23384_v47 }
 0x53a   : > { %7868 = vmatprep.mubr.bf16.mxu0 %v25990_v9  ;;  %21667 = vmatpush3.bf16.msra.mxu1 %v23388_v34  ;;  %v23407_v9 = vld [vmem:[#allocation7 + $0xe0] sm:$0xff]  }
 0x53b   : > { %9496 = vmatprep.mubr.bf16.mxu1 %v27152_v54  ;;  %7838 = vmatprep.subr.bf16.mxu0 %v23391_v10  ;;  %v27154_v54 = vld [vmem:[#allocation30_spill] sm:$0xff] }
 0x53c   : > { %21668 = vmatprep.subr.bf16.mxu1 %v23392_v25  ;;  %v23423_v25 = vld [vmem:[#allocation7 + $0xb8] sm:$0xff]  }
 0x53d   : > { %7839 = vmatpush1.bf16.msra.mxu0 %v23389_v48  ;;  %v23419_v48 = vld [vmem:[#allocation6 + $0x1128] ss:$12 sps:$4 sm:$0xff]  }
 0x53e   : > { %21669 = vmatpush3.bf16.msra.mxu1 %v23393_v39  ;;  %7840 = vmatprep.subr.bf16.mxu0 %v23396_v46  ;;  %v23426_v39 = vld [vmem:[#allocation6 + $0x1144] ss:$12 sps:$4 sm:$0xff]   ;;  %v23424_v46 = vld [vmem:[#allocation6 + $0x1140] ss:$12 sps:$4 sm:$0xff]  }
 0x53f   : > { %21670 = vmatprep.subr.bf16.mxu1 %v23397_v37  ;;  %v23429_v37 = vld [vmem:[#allocation6 + $0x115c] ss:$12 sps:$4 sm:$0xff]  }
 0x541   : > { %7841 = vmatpush1.bf16.msra.mxu0 %v23394_v45  ;;  %v27155_v45 = vpack.c.bf16 %v27153_v51, %v27154_v54 }
 0x542   : > { %21671 = vmatpush3.bf16.msra.mxu1 %v23398_v63  ;;  %7842 = vmatprep.subr.bf16.mxu0 %v23401_v2  ;;  %v23432_v63 = vld [vmem:[#allocation6 + $0x1174] ss:$12 sps:$4 sm:$0xff]   ;;  %v23430_v2 = vld [vmem:[#allocation6 + $0x1170] ss:$12 sps:$4 sm:$0xff]  }
 0x543   : > { %21672 = vmatprep.subr.bf16.mxu1 %v23402_v26  ;;  %v23435_v26 = vld [vmem:[#allocation6 + $0x118c] ss:$12 sps:$4 sm:$0xff]  }
 0x545   : > { %7843 = vmatpush1.bf16.msra.mxu0 %v23399_v62  ;;  %v23438_v62 = vld [vmem:[#allocation6 + $0x11a4] ss:$12 sps:$4 sm:$0xff]  }
 0x546   : > { %21673 = vmatpush3.bf16.msra.mxu1 %v23403_v3  ;;  %7844 = vmatprep.subr.bf16.mxu0 %v23406_v7  ;;  %v23436_v3 = vld [vmem:[#allocation6 + $0x11a0] ss:$12 sps:$4 sm:$0xff]   ;;  %v23441_v7 = vld [vmem:[#allocation6 + $0x11bc] ss:$12 sps:$4 sm:$0xff]  }
 0x547   : > { %21674 = vmatprep.subr.bf16.mxu1 %v23407_v9  ;;  %v23439_v9 = vld [vmem:[#allocation6 + $0x11b8] ss:$12 sps:$4 sm:$0xff]  }
 0x549   : > { %7845 = vmatpush1.bf16.msra.mxu0 %v23404_v1  ;;  %v23444_v1 = vld [vmem:[#allocation6 + $0x11d4] ss:$12 sps:$4 sm:$0xff]  }
 0x54a   : > { %21675 = vmatpush3.bf16.msra.mxu1 %v23408_v44  ;;  %7846 = vmatprep.subr.bf16.mxu0 %v23411_v29  ;;  %v23442_v44 = vld [vmem:[#allocation6 + $0x11d0] ss:$12 sps:$4 sm:$0xff]  }
 0x54b   : > { %21676 = vmatprep.subr.bf16.mxu1 %v23412_v14 }
 0x54c   : > { %v21541_v58 = vpop.f32.mrb[60].mxu1 }
 0x54d   : > { %v21542_v56 = vpop.f32.mrb[61].mxu1  ;;  %7847 = vmatpush1.bf16.msra.mxu0 %v23409_v28  ;;  %v23447_v28 = vld [vmem:[#allocation6 + $0x11ec] ss:$12 sps:$4 sm:$0xff]  }
 0x54e   : > { %v21543_v60 = vadd.f32 %v21542_v56, %v21541_v58  ;;  %v21544_v47 = vpop.f32.mrb[62].mxu1  ;;  %21677 = vmatpush3.bf16.msra.mxu1 %v23413_v35  ;;  %7848 = vmatprep.subr.bf16.mxu0 %v23416_v38 }
 0x54f   : > { %v21545_v27 = vpop.f32.mrb[63].mxu1  ;;  %21678 = vmatprep.subr.bf16.mxu1 %v23417_v18 }
 0x550   : > { %v8832_v34 = vadd.f32 %v21543_v60, %v26275_v0  ;;  %v21546_v10 = vadd.f32 %v21545_v27, %v21544_v47  ;;  %v23427_v0 = vld [vmem:[#allocation6 + $0x1158] ss:$12 sps:$4 sm:$0xff]   ;;  %v23453_v60 = vld [vmem:[#allocation6 + $0x121c] ss:$12 sps:$4 sm:$0xff]   ;;  %v23456_v27 = vld [vmem:[#allocation6 + $0x1234] ss:$12 sps:$4 sm:$0xff]  }
 0x551   : > { %7849 = vmatpush1.bf16.msra.mxu0 %v23414_v52  ;;  %v23445_v52 = vld [vmem:[#allocation6 + $0x11e8] ss:$12 sps:$4 sm:$0xff]   ;;  %v23451_v47 = vld [vmem:[#allocation6 + $0x1218] ss:$12 sps:$4 sm:$0xff]  }
 0x552   : > { %v8835_v21 = vadd.f32 %v21546_v10, %v26278_v20  ;;  %21679 = vmatpush3.bf16.msra.mxu1 %v23418_v8  ;;  %7850 = vmatprep.subr.bf16.mxu0 %v23421_v12  ;;  %v23433_v20 = vld [vmem:[#allocation6 + $0x1188] ss:$12 sps:$4 sm:$0xff]   ;;  %v23450_v12 = vld [vmem:[#allocation6 + $0x1204] ss:$12 sps:$4 sm:$0xff]  }
 0x553   : > { %21680 = vmatprep.subr.bf16.mxu1 %v23422_v41  ;;  %v23448_v41 = vld [vmem:[#allocation6 + $0x1200] ss:$12 sps:$4 sm:$0xff]   ;;  %v23454_v10 = vld [vmem:[#allocation6 + $0x1230] ss:$12 sps:$4 sm:$0xff]  }
 0x555   : > { %7851 = vmatpush1.bf16.msra.mxu0 %v23419_v48  ;;  %v23457_v48 = vld [vmem:[#allocation6 + $0x1248] ss:$12 sps:$4 sm:$0xff]  }
 0x556   : > { %21681 = vmatpush3.bf16.msra.mxu1 %v23423_v25  ;;  %7852 = vmatprep.subr.bf16.mxu0 %v23426_v39  ;;  %v23462_v25 = vld [vmem:[#allocation6 + $0x1264] ss:$12 sps:$4 sm:$0xff]   ;;  %v23460_v39 = vld [vmem:[#allocation6 + $0x1260] ss:$12 sps:$4 sm:$0xff]  }
 0x559   : > { %9497 = vmatmul.mubr.bf16.vlgmr.msra.gmra.mrb[88].mxu1 %v27155_v45  ;;  %7853 = vmatpush1.bf16.msra.mxu0 %v23424_v46  ;;  %v23463_v46 = vld [vmem:[#allocation6 + $0x1278] ss:$12 sps:$4 sm:$0xff]  }
 0x55a   : > { %7854 = vmatprep.subr.bf16.mxu0 %v23429_v37  ;;  %v23468_v37 = vld [vmem:[#allocation6 + $0x1294] ss:$12 sps:$4 sm:$0xff]  }
 0x55d   : > { %7855 = vmatpush1.bf16.msra.mxu0 %v23427_v0  ;;  %v23471_v0 = vld [vmem:[#allocation6 + $0x12ac] ss:$12 sps:$4 sm:$0xff]  }
 0x55e   : > { %7856 = vmatprep.subr.bf16.mxu0 %v23432_v63 }
 0x561   : > { %7857 = vmatpush1.bf16.msra.mxu0 %v23430_v2 }
 0x562   : > { %7858 = vmatprep.subr.bf16.mxu0 %v23435_v26 }
 0x565   : > { %7859 = vmatpush1.bf16.msra.mxu0 %v23433_v20  ;;  %v23469_v20 = vld [vmem:[#allocation6 + $0x12a8] ss:$12 sps:$4 sm:$0xff]  }
 0x566   : > { %7860 = vmatprep.subr.bf16.mxu0 %v23438_v62 }
 0x569   : > { %7861 = vmatpush1.bf16.msra.mxu0 %v23436_v3  ;;  %v23474_v3 = vld [vmem:[#allocation6 + $0x12c4] ss:$12 sps:$4 sm:$0xff]  }
 0x56a   : > { %7862 = vmatprep.subr.bf16.mxu0 %v23441_v7  ;;  %v23472_v7 = vld [vmem:[#allocation6 + $0x12c0] ss:$12 sps:$4 sm:$0xff]  }
 0x56c   : > { %v21563_v29 = vpop.f32.mrb[64].mxu1 }
 0x56d   : > { %v21564_v14 = vpop.f32.mrb[65].mxu1  ;;  %7863 = vmatpush1.bf16.msra.mxu0 %v23439_v9  ;;  %v23477_v9 = vld [vmem:[#allocation6 + $0x12dc] ss:$12 sps:$4 sm:$0xff]  }
 0x56e   : > { %v21565_v35 = vadd.f32 %v21564_v14, %v21563_v29  ;;  %v21566_v38 = vpop.f32.mrb[66].mxu1  ;;  %7864 = vmatprep.subr.bf16.mxu0 %v23444_v1  ;;  %v23475_v1 = vld [vmem:[#allocation6 + $0x12d8] ss:$12 sps:$4 sm:$0xff]   ;;  %v23478_v29 = vld [vmem:[#allocation6 + $0x12f0] ss:$12 sps:$4 sm:$0xff]  }
 0x56f   : > { %v21567_v18 = vpop.f32.mrb[67].mxu1  ;;  %v23483_v14 = vld [vmem:[#allocation6 + $0x130c] ss:$12 sps:$4 sm:$0xff]  }
 0x570   : > { %v8873_v58 = vadd.f32 %v21565_v35, %v8832_v34  ;;  %v21568_v8 = vadd.f32 %v21567_v18, %v21566_v38  ;;  %v23459_v34 = vld [vmem:[#allocation6 + $0x124c] ss:$12 sps:$4 sm:$0xff]   ;;  %v23486_v35 = vld [vmem:[#allocation6 + $0x1324] ss:$12 sps:$4 sm:$0xff]   ;;  %v23489_v18 = vld [vmem:[#allocation6 + $0x133c] ss:$12 sps:$4 sm:$0xff]  }
 0x571   : > { %7865 = vmatpush1.bf16.msra.mxu0 %v23442_v44  ;;  %v23480_v44 = vld [vmem:[#allocation6 + $0x12f4] ss:$12 sps:$4 sm:$0xff]  }
 0x572   : > { %v8876_v56 = vadd.f32 %v21568_v8, %v8835_v21  ;;  %7866 = vmatprep.subr.bf16.mxu0 %v23447_v28  ;;  %v23465_v21 = vld [vmem:[#allocation6 + $0x127c] ss:$12 sps:$4 sm:$0xff]   ;;  %v23484_v38 = vld [vmem:[#allocation6 + $0x1320] ss:$12 sps:$4 sm:$0xff]  }
 0x573   : > { %v23481_v28 = vld [vmem:[#allocation6 + $0x1308] ss:$12 sps:$4 sm:$0xff]  }
 0x575   : > { %7867 = vmatpush1.bf16.msra.mxu0 %v23445_v52  ;;  %v23487_v52 = vld [vmem:[#allocation6 + $0x1338] ss:$12 sps:$4 sm:$0xff]  }
 0x576   : > { %7879 = vmatprep.subr.bf16.mxu0 %v23450_v12 }
 0x578   : > { %7869 = vmatmul.mubr.bf16.vlgmr.msra.gmra.mrb[12].mxu0 %v25992_v16 }
 0x579   : > { %7880 = vmatpush1.bf16.msra.mxu0 %v23448_v41  ;;  %7911 = vmatprep.mubr.bf16.mxu0 %v25995_v22  ;;  %v23466_v22 = vld [vmem:[#allocation6 + $0x1290] ss:$12 sps:$4 sm:$0xff]  }
 0x57a   : > { %7881 = vmatprep.subr.bf16.mxu0 %v23453_v60 }
 0x57d   : > { %7882 = vmatpush1.bf16.msra.mxu0 %v23451_v47  ;;  %v23495_v47 = vld [vmem:[#allocation6 + $0x136c] ss:$12 sps:$4 sm:$0xff]  }
 0x57e   : > { %7883 = vmatprep.subr.bf16.mxu0 %v23456_v27 }
 0x581   : > { %7884 = vmatpush1.bf16.msra.mxu0 %v23454_v10 }
 0x582   : > { %7885 = vmatprep.subr.bf16.mxu0 %v23459_v34 }
 0x585   : > { %7886 = vmatpush1.bf16.msra.mxu0 %v23457_v48  ;;  %v23493_v48 = vld [vmem:[#allocation6 + $0x1368] ss:$12 sps:$4 sm:$0xff]  }
 0x586   : > { %7887 = vmatprep.subr.bf16.mxu0 %v23462_v25 }
 0x589   : > { %7888 = vmatpush1.bf16.msra.mxu0 %v23460_v39  ;;  %v23498_v39 = vld [vmem:[#allocation6 + $0x1384] ss:$12 sps:$4 sm:$0xff]  }
 0x58a   : > { %7889 = vmatprep.subr.bf16.mxu0 %v23465_v21  ;;  %v23496_v21 = vld [vmem:[#allocation6 + $0x1380] ss:$12 sps:$4 sm:$0xff]  }
 0x58c   : > { %v21585_v16 = vpop.f32.mrb[68].mxu1 }
 0x58d   : > { %v21586_v51 = vpop.f32.mrb[69].mxu1  ;;  %7890 = vmatpush1.bf16.msra.mxu0 %v23463_v46  ;;  %v23501_v46 = vld [vmem:[#allocation6 + $0x139c] ss:$12 sps:$4 sm:$0xff]  }
 0x58e   : > { %v21587_v54 = vadd.f32 %v21586_v51, %v21585_v16  ;;  %v21588_v45 = vpop.f32.mrb[70].mxu1  ;;  %7891 = vmatprep.subr.bf16.mxu0 %v23468_v37  ;;  %v23499_v37 = vld [vmem:[#allocation6 + $0x1398] ss:$12 sps:$4 sm:$0xff]   ;;  %v23504_v16 = vld [vmem:[#allocation6 + $0x13b4] ss:$12 sps:$4 sm:$0xff]  }
 0x58f   : > { %v21589_v63 = vpop.f32.mrb[71].mxu1  ;;  %v23502_v51 = vld [vmem:[#allocation6 + $0x13b0] ss:$12 sps:$4 sm:$0xff]  }
 0x590   : > { %v8914_v2 = vadd.f32 %v21587_v54, %v8873_v58  ;;  %v21590_v26 = vadd.f32 %v21589_v63, %v21588_v45  ;;  %v23492_v58 = vld [vmem:[#allocation6 + $0x1354] ss:$12 sps:$4 sm:$0xff]   ;;  %v23510_v45 = vld [vmem:[#allocation6 + $0x13e4] ss:$12 sps:$4 sm:$0xff]   ;;  %v23513_v63 = vld [vmem:[#allocation6 + $0x13fc] ss:$12 sps:$4 sm:$0xff]  }
 0x591   : > { %7892 = vmatpush1.bf16.msra.mxu0 %v23466_v22  ;;  %v23507_v22 = vld [vmem:[#allocation6 + $0x13cc] ss:$12 sps:$4 sm:$0xff]   ;;  %v23505_v54 = vld [vmem:[#allocation6 + $0x13c8] ss:$12 sps:$4 sm:$0xff]  }
 0x592   : > { %v8917_v62 = vadd.f32 %v21590_v26, %v8876_v56  ;;  %7893 = vmatprep.subr.bf16.mxu0 %v23471_v0  ;;  %v23490_v56 = vld [vmem:[#allocation6 + $0x1350] ss:$12 sps:$4 sm:$0xff]   ;;  %v23508_v0 = vld [vmem:[#allocation6 + $0x13e0] ss:$12 sps:$4 sm:$0xff]  }
 0x595   : > { %7894 = vmatpush1.bf16.msra.mxu0 %v23469_v20  ;;  %v23514_v20 = vld [vmem:[#allocation6 + $0x1410] ss:$12 sps:$4 sm:$0xff]  }
 0x596   : > { %7895 = vmatprep.subr.bf16.mxu0 %v23474_v3 }
 0x599   : > { %7896 = vmatpush1.bf16.msra.mxu0 %v23472_v7  ;;  %v23519_v7 = vld [vmem:[#allocation6 + $0x142c] ss:$12 sps:$4 sm:$0xff]  }
 0x59a   : > { %7897 = vmatprep.subr.bf16.mxu0 %v23477_v9 }
 0x59d   : > { %7898 = vmatpush1.bf16.msra.mxu0 %v23475_v1 }
 0x59e   : > { %7899 = vmatprep.subr.bf16.mxu0 %v23480_v44 }
 0x5a1   : > { %7900 = vmatpush1.bf16.msra.mxu0 %v23478_v29  ;;  %v23517_v29 = vld [vmem:[#allocation6 + $0x1428] ss:$12 sps:$4 sm:$0xff]  }
 0x5a2   : > { %7901 = vmatprep.subr.bf16.mxu0 %v23483_v14  ;;  %v23522_v14 = vld [vmem:[#allocation6 + $0x1444] ss:$12 sps:$4 sm:$0xff]  }
 0x5a5   : > { %7902 = vmatpush1.bf16.msra.mxu0 %v23481_v28 }
 0x5a6   : > { %7903 = vmatprep.subr.bf16.mxu0 %v23486_v35  ;;  %v23520_v35 = vld [vmem:[#allocation6 + $0x1440] ss:$12 sps:$4 sm:$0xff]  }
 0x5a9   : > { %7904 = vmatpush1.bf16.msra.mxu0 %v23484_v38  ;;  %v23525_v38 = vld [vmem:[#allocation6 + $0x145c] ss:$12 sps:$4 sm:$0xff]  }
 0x5aa   : > { %7905 = vmatprep.subr.bf16.mxu0 %v23489_v18  ;;  %v23523_v18 = vld [vmem:[#allocation6 + $0x1458] ss:$12 sps:$4 sm:$0xff]  }
 0x5ac   : > { %v21607_v8 = vpop.f32.mrb[72].mxu1 }
 0x5ad   : > { %v21608_v12 = vpop.f32.mrb[73].mxu1  ;;  %7906 = vmatpush1.bf16.msra.mxu0 %v23487_v52  ;;  %v23528_v52 = vld [vmem:[#allocation6 + $0x1474] ss:$12 sps:$4 sm:$0xff]  }
 0x5ae   : > { %v21609_v41 = vadd.f32 %v21608_v12, %v21607_v8  ;;  %v21610_v60 = vpop.f32.mrb[74].mxu1  ;;  %7907 = vmatprep.subr.bf16.mxu0 %v23492_v58  ;;  %v23526_v58 = vld [vmem:[#allocation6 + $0x1470] ss:$12 sps:$4 sm:$0xff]   ;;  %v23531_v8 = vld [vmem:[#allocation6 + $0x148c] ss:$12 sps:$4 sm:$0xff]   ;;  %v27085_v12 = vlaneseq }
 0x5af   : > { %v21611_v27 = vpop.f32.mrb[75].mxu1 }
 0x5b0   : > { %v8955_v10 = vadd.f32 %v21609_v41, %v8914_v2  ;;  %v21612_v34 = vadd.f32 %v21611_v27, %v21610_v60  ;;  %v23516_v2 = vld [vmem:[#allocation6 + $0x1414] ss:$12 sps:$4 sm:$0xff]   ;;  %v23534_v41 = vld [vmem:[#allocation6 + $0x14a4] ss:$12 sps:$4 sm:$0xff]   ;;  %v26300_v60 = vshrl.u32 %v27085_v12, 7 }
 0x5b1   : > { %7908 = vmatpush1.bf16.msra.mxu0 %v23490_v56  ;;  %v23529_v56 = vld [vmem:[#allocation6 + $0x1488] ss:$12 sps:$4 sm:$0xff]  }
 0x5b2   : > { %v8958_v25 = vadd.f32 %v21612_v34, %v8917_v62  ;;  %7909 = vmatprep.subr.bf16.mxu0 %v23495_v47  ;;  %27156 = vst [vmem:[#allocation28_spill] sm:$0xff] %v26300_v60  ;;  %v23532_v47 = vld [vmem:[#allocation6 + $0x14a0] ss:$12 sps:$4 sm:$0xff]   ;;  %v23537_v27 = vld [vmem:[#allocation6 + $0x14bc] ss:$12 sps:$4 sm:$0xff]  }
 0x5b3   : > { %v26305_v34 = vld [vmem:[#allocation9] sm:$0xf] }
 0x5b5   : > { %7910 = vmatpush1.bf16.msra.mxu0 %v23493_v48  ;;  %v23535_v48 = vld [vmem:[#allocation6 + $0x14b8] ss:$12 sps:$4 sm:$0xff]  }
 0x5b6   : > { %7922 = vmatprep.subr.bf16.mxu0 %v23498_v39  ;;  %v23540_v39 = vld [vmem:[#allocation6 + $0x14d4] ss:$12 sps:$4 sm:$0xff]  }
 0x5b8   : > { %20084 = vmatmul.mubr.msk.bf16.vlgmr.msra.gmra.mrb[12].mxu0 %vm26153_vm12, %v25881_v5  ;;  %v23511_v5 = vld [vmem:[#allocation6 + $0x13f8] ss:$12 sps:$4 sm:$0xff]  }
 0x5b9   : > { %7923 = vmatpush1.bf16.msra.mxu0 %v23496_v21  ;;  %7954 = vmatprep.mubr.bf16.mxu0 %v26010_v61 }
 0x5ba   : > { %7924 = vmatprep.subr.bf16.mxu0 %v23501_v46 }
 0x5bd   : > { %7925 = vmatpush1.bf16.msra.mxu0 %v23499_v37 }
 0x5be   : > { %7926 = vmatprep.subr.bf16.mxu0 %v23504_v16 }
 0x5c1   : > { %7927 = vmatpush1.bf16.msra.mxu0 %v23502_v51 }
 0x5c2   : > { %7928 = vmatprep.subr.bf16.mxu0 %v23507_v22  ;;  %v23538_v22 = vld [vmem:[#allocation6 + $0x14d0] ss:$12 sps:$4 sm:$0xff]  }
 0x5c5   : > { %7929 = vmatpush1.bf16.msra.mxu0 %v23505_v54 }
 0x5c6   : > { %7930 = vmatprep.subr.bf16.mxu0 %v23510_v45  ;;  %v23543_v45 = vld [vmem:[#allocation6 + $0x14ec] ss:$12 sps:$4 sm:$0xff]  }
 0x5c9   : > { %7931 = vmatpush1.bf16.msra.mxu0 %v23508_v0 }
 0x5ca   : > { %7932 = vmatprep.subr.bf16.mxu0 %v23513_v63 }
 0x5cc   : > { %v21629_v61 = vpop.f32.mrb[76].mxu1 }
 0x5cd   : > { %v21630_v26 = vpop.f32.mrb[77].mxu1  ;;  %7933 = vmatpush1.bf16.msra.mxu0 %v23511_v5 }
 0x5ce   : > { %v21631_v62 = vadd.f32 %v21630_v26, %v21629_v61  ;;  %v21632_v3 = vpop.f32.mrb[78].mxu1  ;;  %7934 = vmatprep.subr.bf16.mxu0 %v23516_v2  ;;  %v23541_v26 = vld [vmem:[#allocation6 + $0x14e8] ss:$12 sps:$4 sm:$0xff]  }
 0x5cf   : > { %v21633_v9 = vpop.f32.mrb[79].mxu1 }
 0x5d0   : > { %v21634_v1 = vadd.f32 %v21633_v9, %v21632_v3  ;;  %v8996_v44 = vadd.f32 %v21631_v62, %v8955_v10  ;;  %v26303_v10 = vsub.s32 2, %v26300_v60 }
 0x5d1   : > { %7935 = vmatpush1.bf16.msra.mxu0 %v23514_v20  ;;  %v23546_v20 = vld [vmem:[#allocation6 + $0x1504] ss:$12 sps:$4 sm:$0xff]  }
 0x5d2   : > { %7936 = vmatprep.subr.bf16.mxu0 %v23519_v7  ;;  %v8999_v28 = vadd.f32 %v21634_v1, %v8958_v25  ;;  %27157 = vst [vmem:[#allocation29_spill] sm:$0xff] %v26303_v10  ;;  %v26307_v25 = vld [vmem:[#allocation10] sm:$0xf]  ;;  %v9518_v21 = vrot.slane %v26305_v34, %v26303_v10  ;;  %v27158_v7 = vld [vmem:[#allocation22_spill] sm:$0xff] }
 0x5d3   : > { %v9548_v16 = vrot.slane %v26307_v25, %v26303_v10 }
 0x5d5   : > { %7937 = vmatpush1.bf16.msra.mxu0 %v23517_v29  ;;  %v23549_v29 = vld [vmem:[#allocation6 + $0x151c] ss:$12 sps:$4 sm:$0xff]  }
 0x5d6   : > { %7938 = vmatprep.subr.bf16.mxu0 %v23522_v14  ;;  %v27159_v14 = vld [vmem:[#allocation26_spill] sm:$0xff] }
 0x5d9   : > { %7939 = vmatpush1.bf16.msra.mxu0 %v23520_v35 }
 0x5da   : > { %7940 = vmatprep.subr.bf16.mxu0 %v23525_v38  ;;  %v23552_v38 = vld [vmem:[#allocation6 + $0x1534] ss:$12 sps:$4 sm:$0xff]  }
 0x5dd   : > { %7941 = vmatpush1.bf16.msra.mxu0 %v23523_v18  ;;  %v23550_v18 = vld [vmem:[#allocation6 + $0x1530] ss:$12 sps:$4 sm:$0xff]  }
 0x5de   : > { %7942 = vmatprep.subr.bf16.mxu0 %v23528_v52  ;;  %v23555_v52 = vld [vmem:[#allocation6 + $0x154c] ss:$12 sps:$4 sm:$0xff]  }
 0x5e1   : > { %7943 = vmatpush1.bf16.msra.mxu0 %v23526_v58  ;;  %v23553_v58 = vld [vmem:[#allocation6 + $0x1548] ss:$12 sps:$4 sm:$0xff]  }
 0x5e2   : > { %7944 = vmatprep.subr.bf16.mxu0 %v23531_v8  ;;  %v23558_v8 = vld [vmem:[#allocation6 + $0x1564] ss:$12 sps:$4 sm:$0xff]  }
 0x5e5   : > { %7945 = vmatpush1.bf16.msra.mxu0 %v23529_v56  ;;  %v23556_v56 = vld [vmem:[#allocation6 + $0x1560] ss:$12 sps:$4 sm:$0xff]  }
 0x5e6   : > { %7946 = vmatprep.subr.bf16.mxu0 %v23534_v41  ;;  %v23561_v41 = vld [vmem:[#allocation6 + $0x157c] ss:$12 sps:$4 sm:$0xff]  }
 0x5e9   : > { %7947 = vmatpush1.bf16.msra.mxu0 %v23532_v47  ;;  %v23564_v47 = vld [vmem:[#allocation6 + $0x1594] ss:$12 sps:$4 sm:$0xff]  }
 0x5ea   : > { %7948 = vmatprep.subr.bf16.mxu0 %v23537_v27 }
 0x5ec   : > { %v9036_v46 = vpop.f32.mrb[80].mxu1 }
 0x5ed   : > { %v9037_v37 = vadd.f32 %v9036_v46, %v8996_v44  ;;  %v22221_v51 = vpop.f32.mrb[81].mxu1  ;;  %7949 = vmatpush1.bf16.msra.mxu0 %v23535_v48  ;;  %v23544_v44 = vld [vmem:[#allocation6 + $0x1500] ss:$12 sps:$4 sm:$0xff]   ;;  %v23562_v48 = vld [vmem:[#allocation6 + $0x1590] ss:$12 sps:$4 sm:$0xff]  }
 0x5ee   : > { %v9039_v54 = vpop.f32.mrb[82].mxu1  ;;  %7950 = vmatprep.subr.bf16.mxu0 %v23540_v39  ;;  %v23567_v46 = vld [vmem:[#allocation6 + $0x15ac] ss:$12 sps:$4 sm:$0xff]   ;;  %v23565_v51 = vld [vmem:[#allocation6 + $0x15a8] ss:$12 sps:$4 sm:$0xff]  }
 0x5ef   : > { %v9529_v0 = vmul.f32 %v9518_v21, %v9037_v37  ;;  %v9040_v63 = vadd.f32 %v9039_v54, %v8999_v28  ;;  %v22222_v5 = vpop.f32.mrb[83].mxu1  ;;  %v23547_v28 = vld [vmem:[#allocation6 + $0x1518] ss:$12 sps:$4 sm:$0xff]   ;;  %v23568_v54 = vld [vmem:[#allocation6 + $0x15c0] ss:$12 sps:$4 sm:$0xff]  }
 0x5f0   : > { %v23574_v5 = vld [vmem:[#allocation6 + $0x15f0] ss:$12 sps:$4 sm:$0xff]  }
 0x5f1   : > { %v9559_v2 = vadd.f32 %v9548_v16, %v9529_v0  ;;  %v9533_v61 = vmul.f32 %v9518_v21, %v9040_v63  ;;  %7951 = vmatpush1.bf16.msra.mxu0 %v23538_v22  ;;  %v23570_v22 = vld [vmem:[#allocation6 + $0x15c4] ss:$12 sps:$4 sm:$0xff]   ;;  %v23576_v63 = vld [vmem:[#allocation6 + $0x15f4] ss:$12 sps:$4 sm:$0xff]  }
 0x5f2   : > { %7952 = vmatprep.subr.bf16.mxu0 %v23543_v45  ;;  %v23573_v45 = vld [vmem:[#allocation6 + $0x15dc] ss:$12 sps:$4 sm:$0xff]   ;;  %v23571_v0 = vld [vmem:[#allocation6 + $0x15d8] ss:$12 sps:$4 sm:$0xff]  }
 0x5f3   : > { %v9567_v62 = vmax.f32 %v9559_v2, 0.0  ;;  %v9563_v3 = vadd.f32 %v9548_v16, %v9533_v61  ;;  %v23579_v2 = vld [vmem:[#allocation6 + $0x160c] ss:$12 sps:$4 sm:$0xff]   ;;  %v23577_v61 = vld [vmem:[#allocation6 + $0x1608] ss:$12 sps:$4 sm:$0xff]  }
 0x5f5   : > { %v26314_v9 = vadd.f32 %v9567_v62, %v27158_v7  ;;  %v9571_v1 = vmax.f32 %v9563_v3, 0.0  ;;  %7953 = vmatpush1.bf16.msra.mxu0 %v23541_v26  ;;  %v23582_v26 = vld [vmem:[#allocation6 + $0x1624] ss:$12 sps:$4 sm:$0xff]   ;;  %v23585_v62 = vld [vmem:[#allocation6 + $0x163c] ss:$12 sps:$4 sm:$0xff]   ;;  %v26322_v7 = vsub.s32 3, %v26300_v60 }
 0x5f6   : > { %7965 = vmatprep.subr.bf16.mxu0 %v23546_v20  ;;  %v23580_v20 = vld [vmem:[#allocation6 + $0x1620] ss:$12 sps:$4 sm:$0xff]   ;;  %v23583_v3 = vld [vmem:[#allocation6 + $0x1638] ss:$12 sps:$4 sm:$0xff]  }
 0x5f7   : > { %v26317_v35 = vadd.f32 %v9571_v1, %v27159_v14  ;;  %27160 = vst [vmem:[#allocation30_spill] sm:$0xff] %v26322_v7  ;;  %v23588_v1 = vld [vmem:[#allocation6 + $0x1654] ss:$12 sps:$4 sm:$0xff]   ;;  %v23586_v14 = vld [vmem:[#allocation6 + $0x1650] ss:$12 sps:$4 sm:$0xff]  }
 0x5f8   : > { %7955 = vmatmul.mubr.bf16.vlgmr.msra.gmra.mrb[12].mxu0 %v26013_v23  ;;  %v23559_v23 = vld [vmem:[#allocation6 + $0x1578] ss:$12 sps:$4 sm:$0xff]  }
 0x5f9   : > { %7966 = vmatpush1.bf16.msra.mxu0 %v23544_v44  ;;  %7997 = vmatprep.mubr.bf16.mxu0 %v26016_v36 }
 0x5fa   : > { %7967 = vmatprep.subr.bf16.mxu0 %v23549_v29 }
 0x5fd   : > { %7968 = vmatpush1.bf16.msra.mxu0 %v23547_v28 }
 0x5fe   : > { %7969 = vmatprep.subr.bf16.mxu0 %v23552_v38  ;;  %v9522_v38 = vrot.slane %v26305_v34, %v26322_v7 }
 0x601   : > { %7970 = vmatpush1.bf16.msra.mxu0 %v23550_v18 }
 0x602   : > { %7971 = vmatprep.subr.bf16.mxu0 %v23555_v52  ;;  %v23591_v52 = vld [vmem:[#allocation6 + $0x166c] ss:$12 sps:$4 sm:$0xff]  }
 0x605   : > { %7972 = vmatpush1.bf16.msra.mxu0 %v23553_v58 }
 0x606   : > { %7973 = vmatprep.subr.bf16.mxu0 %v23558_v8 }
 0x609   : > { %7974 = vmatpush1.bf16.msra.mxu0 %v23556_v56  ;;  %v9552_v56 = vrot.slane %v26307_v25, %v26322_v7 }
 0x60a   : > { %7975 = vmatprep.subr.bf16.mxu0 %v23561_v41 }
 0x60c   : > { %v21660_v36 = vpop.f32.mrb[84].mxu1 }
 0x60d   : > { %v21661_v27 = vpop.f32.mrb[85].mxu1  ;;  %7976 = vmatpush1.bf16.msra.mxu0 %v23559_v23  ;;  %v23589_v23 = vld [vmem:[#allocation6 + $0x1668] ss:$12 sps:$4 sm:$0xff]  }
 0x60e   : > { %v21662_v39 = vadd.f32 %v21661_v27, %v21660_v36  ;;  %v21663_v21 = vpop.f32.mrb[86].mxu1  ;;  %7977 = vmatprep.subr.bf16.mxu0 %v23564_v47  ;;  %v23594_v27 = vld [vmem:[#allocation6 + $0x1684] ss:$12 sps:$4 sm:$0xff]  }
 0x60f   : > { %v21664_v37 = vpop.f32.mrb[87].mxu1 }
 0x610   : > { %v21665_v16 = vadd.f32 %v21664_v37, %v21663_v21 }
 0x611   : > { %7978 = vmatpush1.bf16.msra.mxu0 %v23562_v48 }
 0x612   : > { %7979 = vmatprep.subr.bf16.mxu0 %v23567_v46  ;;  %v23592_v46 = vld [vmem:[#allocation6 + $0x1680] ss:$12 sps:$4 sm:$0xff]  }
 0x615   : > { %7980 = vmatpush1.bf16.msra.mxu0 %v23565_v51 }
 0x616   : > { %7981 = vmatprep.subr.bf16.mxu0 %v23570_v22  ;;  %v23597_v22 = vld [vmem:[#allocation6 + $0x169c] ss:$12 sps:$4 sm:$0xff]  }
 0x619   : > { %7982 = vmatpush1.bf16.msra.mxu0 %v23568_v54  ;;  %v27161_v54 = vld [vmem:[#allocation23_spill] sm:$0xff] }
 0x61a   : > { %7983 = vmatprep.subr.bf16.mxu0 %v23573_v45 }
 0x61d   : > { %7984 = vmatpush1.bf16.msra.mxu0 %v23571_v0  ;;  %v27162_v0 = vld [vmem:[#allocation27_spill] sm:$0xff] }
 0x61e   : > { %7985 = vmatprep.subr.bf16.mxu0 %v23576_v63 }
 0x621   : > { %7986 = vmatpush1.bf16.msra.mxu0 %v23574_v5  ;;  %v23600_v5 = vld [vmem:[#allocation6 + $0x16b4] ss:$12 sps:$4 sm:$0xff]  }
 0x622   : > { %7987 = vmatprep.subr.bf16.mxu0 %v23579_v2  ;;  %v23598_v2 = vld [vmem:[#allocation6 + $0x16b0] ss:$12 sps:$4 sm:$0xff]  }
 0x625   : > { %7988 = vmatpush1.bf16.msra.mxu0 %v23577_v61  ;;  %v23603_v61 = vld [vmem:[#allocation6 + $0x16cc] ss:$12 sps:$4 sm:$0xff]  }
 0x626   : > { %7989 = vmatprep.subr.bf16.mxu0 %v23582_v26  ;;  %v23601_v26 = vld [vmem:[#allocation6 + $0x16c8] ss:$12 sps:$4 sm:$0xff]  }
 0x629   : > { %7990 = vmatpush1.bf16.msra.mxu0 %v23580_v20  ;;  %v23606_v20 = vld [vmem:[#allocation6 + $0x16e4] ss:$12 sps:$4 sm:$0xff]  }
 0x62a   : > { %7991 = vmatprep.subr.bf16.mxu0 %v23585_v62  ;;  %v23604_v62 = vld [vmem:[#allocation6 + $0x16e0] ss:$12 sps:$4 sm:$0xff]  }
 0x62c   : > { %v21682_v44 = vpop.f32.mrb[88].mxu1 }
 0x62d   : > { %v21683_v29 = vpop.f32.mrb[89].mxu1  ;;  %7992 = vmatpush1.bf16.msra.mxu0 %v23583_v3  ;;  %v23612_v3 = vld [vmem:[#allocation6 + $0x1714] ss:$12 sps:$4 sm:$0xff]  }
 0x62e   : > { %v21684_v28 = vadd.f32 %v21683_v29, %v21682_v44  ;;  %v21685_v18 = vpop.f32.mrb[90].mxu1  ;;  %7993 = vmatprep.subr.bf16.mxu0 %v23588_v1  ;;  %v23610_v1 = vld [vmem:[#allocation6 + $0x1710] ss:$12 sps:$4 sm:$0xff]   ;;  %v23615_v44 = vld [vmem:[#allocation6 + $0x172c] ss:$12 sps:$4 sm:$0xff]  }
 0x62f   : > { %v21686_v58 = vpop.f32.mrb[91].mxu1  ;;  %v23613_v29 = vld [vmem:[#allocation6 + $0x1728] ss:$12 sps:$4 sm:$0xff]  }
 0x630   : > { %v9499_v8 = vadd.f32 %v21684_v28, %v21662_v39  ;;  %v21687_v41 = vadd.f32 %v21686_v58, %v21685_v18  ;;  %v23616_v28 = vld [vmem:[#allocation6 + $0x1740] ss:$12 sps:$4 sm:$0xff]   ;;  %v23619_v18 = vld [vmem:[#allocation6 + $0x1758] ss:$12 sps:$4 sm:$0xff]   ;;  %v23622_v58 = vld [vmem:[#allocation6 + $0x1770] ss:$12 sps:$4 sm:$0xff]  }
 0x631   : > { %7994 = vmatpush1.bf16.msra.mxu0 %v23586_v14  ;;  %v23618_v14 = vld [vmem:[#allocation6 + $0x1744] ss:$12 sps:$4 sm:$0xff]  }
 0x632   : > { %v9530_v47 = vmul.f32 %v9522_v38, %v9499_v8  ;;  %v9502_v36 = vadd.f32 %v21687_v41, %v21665_v16  ;;  %7995 = vmatprep.subr.bf16.mxu0 %v23591_v52  ;;  %v23595_v16 = vld [vmem:[#allocation6 + $0x1698] ss:$12 sps:$4 sm:$0xff]   ;;  %v23624_v52 = vld [vmem:[#allocation6 + $0x1774] ss:$12 sps:$4 sm:$0xff]  }
 0x633   : > { %v23627_v8 = vld [vmem:[#allocation6 + $0x178c] ss:$12 sps:$4 sm:$0xff]   ;;  %v23630_v41 = vld [vmem:[#allocation6 + $0x17a4] ss:$12 sps:$4 sm:$0xff]  }
 0x634   : > { %v9560_v48 = vadd.f32 %v9552_v56, %v9530_v47  ;;  %v9534_v21 = vmul.f32 %v9522_v38, %v9502_v36  ;;  %v23621_v38 = vld [vmem:[#allocation6 + $0x175c] ss:$12 sps:$4 sm:$0xff]   ;;  %v23631_v36 = vld [vmem:[#allocation6 + $0x17b8] ss:$12 sps:$4 sm:$0xff]  }
 0x635   : > { %7996 = vmatpush1.bf16.msra.mxu0 %v23589_v23  ;;  %v23628_v23 = vld [vmem:[#allocation6 + $0x17a0] ss:$12 sps:$4 sm:$0xff]   ;;  %v23633_v47 = vld [vmem:[#allocation6 + $0x17bc] ss:$12 sps:$4 sm:$0xff]  }
 0x636   : > { %v9568_v37 = vmax.f32 %v9560_v48, 0.0  ;;  %v9564_v51 = vadd.f32 %v9552_v56, %v9534_v21  ;;  %8008 = vmatprep.subr.bf16.mxu0 %v23594_v27  ;;  %v23625_v56 = vld [vmem:[#allocation6 + $0x1788] ss:$12 sps:$4 sm:$0xff]   ;;  %v23634_v48 = vld [vmem:[#allocation6 + $0x17d0] ss:$12 sps:$4 sm:$0xff]  }
 0x637   : > { %v23636_v27 = vld [vmem:[#allocation6 + $0x17d4] ss:$12 sps:$4 sm:$0xff]   ;;  %v23639_v21 = vld [vmem:[#allocation6 + $0x17ec] ss:$12 sps:$4 sm:$0xff]  }
 0x638   : > { %v26329_v39 = vadd.f32 %v9568_v37, %v27161_v54  ;;  %v9572_v45 = vmax.f32 %v9564_v51, 0.0  ;;  %7998 = vmatmul.mubr.bf16.vlgmr.msra.gmra.mrb[12].mxu0 %v26029_v50  ;;  %v23609_v50 = vld [vmem:[#allocation6 + $0x16fc] ss:$12 sps:$4 sm:$0xff]   ;;  %v23642_v37 = vld [vmem:[#allocation6 + $0x1804] ss:$12 sps:$4 sm:$0xff]  }
 0x639   : > { %8009 = vmatpush1.bf16.msra.mxu0 %v23592_v46  ;;  %8040 = vmatprep.mubr.bf16.mxu0 %v26031_v30  ;;  %v23607_v30 = vld [vmem:[#allocation6 + $0x16f8] ss:$12 sps:$4 sm:$0xff]   ;;  %v23637_v46 = vld [vmem:[#allocation6 + $0x17e8] ss:$12 sps:$4 sm:$0xff]   ;;  %v23640_v51 = vld [vmem:[#allocation6 + $0x1800] ss:$12 sps:$4 sm:$0xff]  }
 0x63a   : > { %v26334_v63 = vadd.f32 %v9572_v45, %v27162_v0  ;;  %8010 = vmatprep.subr.bf16.mxu0 %v23597_v22  ;;  %v23645_v22 = vld [vmem:[#allocation6 + $0x181c] ss:$12 sps:$4 sm:$0xff]   ;;  %v23643_v54 = vld [vmem:[#allocation6 + $0x1818] ss:$12 sps:$4 sm:$0xff]   ;;  %v23648_v45 = vld [vmem:[#allocation6 + $0x1834] ss:$12 sps:$4 sm:$0xff]  }
 0x63b   : > { %v23651_v0 = vld [vmem:[#allocation6 + $0x184c] ss:$12 sps:$4 sm:$0xff]  }
 0x63d   : > { %8011 = vmatpush1.bf16.msra.mxu0 %v23595_v16  ;;  %v23646_v16 = vld [vmem:[#allocation6 + $0x1830] ss:$12 sps:$4 sm:$0xff]  }
 0x63e   : > { %8012 = vmatprep.subr.bf16.mxu0 %v23600_v5  ;;  %v23649_v5 = vld [vmem:[#allocation6 + $0x1848] ss:$12 sps:$4 sm:$0xff]  }
 0x641   : > { %8013 = vmatpush1.bf16.msra.mxu0 %v23598_v2  ;;  %v23654_v2 = vld [vmem:[#allocation6 + $0x1864] ss:$12 sps:$4 sm:$0xff]  }
 0x642   : > { %8014 = vmatprep.subr.bf16.mxu0 %v23603_v61  ;;  %v23652_v61 = vld [vmem:[#allocation6 + $0x1860] ss:$12 sps:$4 sm:$0xff]  }
 0x645   : > { %8015 = vmatpush1.bf16.msra.mxu0 %v23601_v26  ;;  %v23657_v26 = vld [vmem:[#allocation6 + $0x187c] ss:$12 sps:$4 sm:$0xff]  }
 0x646   : > { %8016 = vmatprep.subr.bf16.mxu0 %v23606_v20  ;;  %v23660_v20 = vld [vmem:[#allocation6 + $0x1894] ss:$12 sps:$4 sm:$0xff]  }
 0x649   : > { %8017 = vmatpush1.bf16.msra.mxu0 %v23604_v62  ;;  %v23663_v62 = vld [vmem:[#allocation6 + $0x18ac] ss:$12 sps:$4 sm:$0xff]  }
 0x64a   : > { %8018 = vmatprep.subr.bf16.mxu0 %v23609_v50  ;;  %v23661_v50 = vld [vmem:[#allocation6 + $0x18a8] ss:$12 sps:$4 sm:$0xff]  }
 0x64d   : > { %8019 = vmatpush1.bf16.msra.mxu0 %v23607_v30  ;;  %v23666_v30 = vld [vmem:[#allocation6 + $0x18c4] ss:$12 sps:$4 sm:$0xff]  }
 0x64e   : > { %8020 = vmatprep.subr.bf16.mxu0 %v23612_v3  ;;  %v23664_v3 = vld [vmem:[#allocation6 + $0x18c0] ss:$12 sps:$4 sm:$0xff]  }
 0x651   : > { %8021 = vmatpush1.bf16.msra.mxu0 %v23610_v1  ;;  %v23669_v1 = vld [vmem:[#allocation6 + $0x18dc] ss:$12 sps:$4 sm:$0xff]  }
 0x652   : > { %8022 = vmatprep.subr.bf16.mxu0 %v23615_v44  ;;  %v23667_v44 = vld [vmem:[#allocation6 + $0x18d8] ss:$12 sps:$4 sm:$0xff]  }
 0x655   : > { %8023 = vmatpush1.bf16.msra.mxu0 %v23613_v29  ;;  %v23672_v29 = vld [vmem:[#allocation6 + $0x18f4] ss:$12 sps:$4 sm:$0xff]  }
 0x656   : > { %8024 = vmatprep.subr.bf16.mxu0 %v23618_v14  ;;  %v23670_v14 = vld [vmem:[#allocation6 + $0x18f0] ss:$12 sps:$4 sm:$0xff]  }
 0x659   : > { %8025 = vmatpush1.bf16.msra.mxu0 %v23616_v28  ;;  %v23675_v28 = vld [vmem:[#allocation6 + $0x190c] ss:$12 sps:$4 sm:$0xff]  }
 0x65a   : > { %8026 = vmatprep.subr.bf16.mxu0 %v23621_v38  ;;  %v23673_v38 = vld [vmem:[#allocation6 + $0x1908] ss:$12 sps:$4 sm:$0xff]  }
 0x65d   : > { %8027 = vmatpush1.bf16.msra.mxu0 %v23619_v18  ;;  %v23678_v18 = vld [vmem:[#allocation6 + $0x1924] ss:$12 sps:$4 sm:$0xff]  }
 0x65e   : > { %8028 = vmatprep.subr.bf16.mxu0 %v23624_v52  ;;  %v23676_v52 = vld [vmem:[#allocation6 + $0x1920] ss:$12 sps:$4 sm:$0xff]  }
 0x661   : > { %8029 = vmatpush1.bf16.msra.mxu0 %v23622_v58  ;;  %v23681_v58 = vld [vmem:[#allocation6 + $0x193c] ss:$12 sps:$4 sm:$0xff]  }
 0x662   : > { %8030 = vmatprep.subr.bf16.mxu0 %v23627_v8  ;;  %v23679_v8 = vld [vmem:[#allocation6 + $0x1938] ss:$12 sps:$4 sm:$0xff]  }
 0x665   : > { %8031 = vmatpush1.bf16.msra.mxu0 %v23625_v56  ;;  %v23684_v56 = vld [vmem:[#allocation6 + $0x1954] ss:$12 sps:$4 sm:$0xff]  }
 0x666   : > { %8032 = vmatprep.subr.bf16.mxu0 %v23630_v41  ;;  %v23682_v41 = vld [vmem:[#allocation6 + $0x1950] ss:$12 sps:$4 sm:$0xff]  }
 0x669   : > { %8033 = vmatpush1.bf16.msra.mxu0 %v23628_v23  ;;  %v23687_v23 = vld [vmem:[#allocation6 + $0x196c] ss:$12 sps:$4 sm:$0xff]  }
 0x66a   : > { %8034 = vmatprep.subr.bf16.mxu0 %v23633_v47  ;;  %v23685_v47 = vld [vmem:[#allocation6 + $0x1968] ss:$12 sps:$4 sm:$0xff]  }
 0x66d   : > { %8035 = vmatpush1.bf16.msra.mxu0 %v23631_v36  ;;  %v23690_v36 = vld [vmem:[#allocation6 + $0x1984] ss:$12 sps:$4 sm:$0xff]  }
 0x66e   : > { %8036 = vmatprep.subr.bf16.mxu0 %v23636_v27  ;;  %v23688_v27 = vld [vmem:[#allocation6 + $0x1980] ss:$12 sps:$4 sm:$0xff]  }
 0x671   : > { %8037 = vmatpush1.bf16.msra.mxu0 %v23634_v48  ;;  %v23693_v48 = vld [vmem:[#allocation6 + $0x199c] ss:$12 sps:$4 sm:$0xff]  }
 0x672   : > { %8038 = vmatprep.subr.bf16.mxu0 %v23639_v21  ;;  %v23691_v21 = vld [vmem:[#allocation6 + $0x1998] ss:$12 sps:$4 sm:$0xff]  }
 0x675   : > { %8039 = vmatpush1.bf16.msra.mxu0 %v23637_v46  ;;  %v23696_v46 = vld [vmem:[#allocation6 + $0x19b4] ss:$12 sps:$4 sm:$0xff]  }
 0x676   : > { %8051 = vmatprep.subr.bf16.mxu0 %v23642_v37  ;;  %v23694_v37 = vld [vmem:[#allocation6 + $0x19b0] ss:$12 sps:$4 sm:$0xff]  }
 0x678   : > { %8041 = vmatmul.mubr.bf16.vlgmr.msra.gmra.mrb[12].mxu0 %v26034_v31  ;;  %v23655_v31 = vld [vmem:[#allocation6 + $0x1878] ss:$12 sps:$4 sm:$0xff]  }
 0x679   : > { %8052 = vmatpush1.bf16.msra.mxu0 %v23640_v51  ;;  %8083 = vmatprep.mubr.bf16.mxu0 %v26189_v57  ;;  %v23658_v57 = vld [vmem:[#allocation6 + $0x1890] ss:$12 sps:$4 sm:$0xff]   ;;  %v23699_v51 = vld [vmem:[#allocation6 + $0x19cc] ss:$12 sps:$4 sm:$0xff]  }
 0x67a   : > { %8053 = vmatprep.subr.bf16.mxu0 %v23645_v22  ;;  %v23697_v22 = vld [vmem:[#allocation6 + $0x19c8] ss:$12 sps:$4 sm:$0xff]  }
 0x67d   : > { %8054 = vmatpush1.bf16.msra.mxu0 %v23643_v54  ;;  %v23702_v54 = vld [vmem:[#allocation6 + $0x19e4] ss:$12 sps:$4 sm:$0xff]  }
 0x67e   : > { %8055 = vmatprep.subr.bf16.mxu0 %v23648_v45  ;;  %v23700_v45 = vld [vmem:[#allocation6 + $0x19e0] ss:$12 sps:$4 sm:$0xff]  }
 0x681   : > { %8056 = vmatpush1.bf16.msra.mxu0 %v23646_v16  ;;  %v23705_v16 = vld [vmem:[#allocation6 + $0x19fc] ss:$12 sps:$4 sm:$0xff]  }
 0x682   : > { %8057 = vmatprep.subr.bf16.mxu0 %v23651_v0  ;;  %v23708_v0 = vld [vmem:[#allocation6 + $0x1a14] ss:$12 sps:$4 sm:$0xff]  }
 0x685   : > { %8058 = vmatpush1.bf16.msra.mxu0 %v23649_v5  ;;  %v23711_v5 = vld [vmem:[#allocation6 + $0x1a2c] ss:$12 sps:$4 sm:$0xff]  }
 0x686   : > { %8059 = vmatprep.subr.bf16.mxu0 %v23654_v2  ;;  %v23709_v2 = vld [vmem:[#allocation6 + $0x1a28] ss:$12 sps:$4 sm:$0xff]  }
 0x689   : > { %8060 = vmatpush1.bf16.msra.mxu0 %v23652_v61  ;;  %v23714_v61 = vld [vmem:[#allocation6 + $0x1a44] ss:$12 sps:$4 sm:$0xff]  }
 0x68a   : > { %8061 = vmatprep.subr.bf16.mxu0 %v23657_v26  ;;  %v23712_v26 = vld [vmem:[#allocation6 + $0x1a40] ss:$12 sps:$4 sm:$0xff]  }
 0x68d   : > { %8062 = vmatpush1.bf16.msra.mxu0 %v23655_v31  ;;  %v23717_v31 = vld [vmem:[#allocation6 + $0x1a5c] ss:$12 sps:$4 sm:$0xff]  }
 0x68e   : > { %8063 = vmatprep.subr.bf16.mxu0 %v23660_v20  ;;  %v23808_v20 = vld [vmem:[#allocation4 + $0x140] sm:$0xff]  }
 0x68f   : > { %21688 = vmatprep.subr.bf16.mxu1 %v23808_v20  ;;  %v23768_v20 = vld [vmem:[#allocation6 + $0x1bf4] ss:$12 sps:$4 sm:$0xff]  }
 0x691   : > { %8064 = vmatpush1.bf16.msra.mxu0 %v23658_v57  ;;  %v23809_v57 = vld [vmem:[#allocation4 + $0x100] sm:$0xff]  }
 0x692   : > { %8065 = vmatprep.subr.bf16.mxu0 %v23663_v62  ;;  %v23810_v62 = vld [vmem:[#allocation4 + $0x148] sm:$0xff]   ;;  %21689 = vmatpush3.bf16.msra.mxu1 %v23809_v57  ;;  %v23766_v57 = vld [vmem:[#allocation6 + $0x1bf0] ss:$12 sps:$4 sm:$0xff]  }
 0x693   : > { %21690 = vmatprep.subr.bf16.mxu1 %v23810_v62  ;;  %v23771_v62 = vld [vmem:[#allocation6 + $0x1c0c] ss:$12 sps:$4 sm:$0xff]  }
 0x695   : > { %8066 = vmatpush1.bf16.msra.mxu0 %v23661_v50  ;;  %v23715_v50 = vld [vmem:[#allocation6 + $0x1a58] ss:$12 sps:$4 sm:$0xff]  }
 0x696   : > { %8067 = vmatprep.subr.bf16.mxu0 %v23666_v30  ;;  %v23720_v30 = vld [vmem:[#allocation6 + $0x1a74] ss:$12 sps:$4 sm:$0xff]  }
 0x699   : > { %8068 = vmatpush1.bf16.msra.mxu0 %v23664_v3  ;;  %v23811_v3 = vld [vmem:[#allocation4 + $0x108] sm:$0xff]  }
 0x69a   : > { %8069 = vmatprep.subr.bf16.mxu0 %v23669_v1  ;;  %v23812_v1 = vld [vmem:[#allocation4 + $0x150] sm:$0xff]   ;;  %21691 = vmatpush3.bf16.msra.mxu1 %v23811_v3  ;;  %v23772_v3 = vld [vmem:[#allocation6 + $0x1c20] ss:$12 sps:$4 sm:$0xff]  }
 0x69b   : > { %21692 = vmatprep.subr.bf16.mxu1 %v23812_v1  ;;  %v23777_v1 = vld [vmem:[#allocation6 + $0x1c3c] ss:$12 sps:$4 sm:$0xff]  }
 0x69d   : > { %8070 = vmatpush1.bf16.msra.mxu0 %v23667_v44  ;;  %v23718_v44 = vld [vmem:[#allocation6 + $0x1a70] ss:$12 sps:$4 sm:$0xff]  }
 0x69e   : > { %8071 = vmatprep.subr.bf16.mxu0 %v23672_v29  ;;  %v23723_v29 = vld [vmem:[#allocation6 + $0x1a8c] ss:$12 sps:$4 sm:$0xff]  }
 0x6a1   : > { %8072 = vmatpush1.bf16.msra.mxu0 %v23670_v14  ;;  %v23813_v14 = vld [vmem:[#allocation4 + $0x110] sm:$0xff]  }
 0x6a2   : > { %8073 = vmatprep.subr.bf16.mxu0 %v23675_v28  ;;  %v23814_v28 = vld [vmem:[#allocation4 + $0x158] sm:$0xff]   ;;  %21693 = vmatpush3.bf16.msra.mxu1 %v23813_v14 }
 0x6a3   : > { %21694 = vmatprep.subr.bf16.mxu1 %v23814_v28  ;;  %v23778_v14 = vld [vmem:[#allocation6 + $0x1c50] ss:$12 sps:$4 sm:$0xff]   ;;  %v23783_v28 = vld [vmem:[#allocation6 + $0x1c6c] ss:$12 sps:$4 sm:$0xff]  }
 0x6a5   : > { %8074 = vmatpush1.bf16.msra.mxu0 %v23673_v38  ;;  %v23721_v38 = vld [vmem:[#allocation6 + $0x1a88] ss:$12 sps:$4 sm:$0xff]  }
 0x6a6   : > { %8075 = vmatprep.subr.bf16.mxu0 %v23678_v18  ;;  %v23726_v18 = vld [vmem:[#allocation6 + $0x1aa4] ss:$12 sps:$4 sm:$0xff]  }
 0x6a9   : > { %8076 = vmatpush1.bf16.msra.mxu0 %v23676_v52  ;;  %v23815_v52 = vld [vmem:[#allocation4 + $0x118] sm:$0xff]  }
 0x6aa   : > { %8077 = vmatprep.subr.bf16.mxu0 %v23681_v58  ;;  %v23724_v58 = vld [vmem:[#allocation6 + $0x1aa0] ss:$12 sps:$4 sm:$0xff]   ;;  %21695 = vmatpush3.bf16.msra.mxu1 %v23815_v52 }
 0x6ab   : > { %v23784_v52 = vld [vmem:[#allocation6 + $0x1c80] ss:$12 sps:$4 sm:$0xff]  }
 0x6ad   : > { %8078 = vmatpush1.bf16.msra.mxu0 %v23679_v8  ;;  %v23729_v8 = vld [vmem:[#allocation6 + $0x1abc] ss:$12 sps:$4 sm:$0xff]  }
 0x6ae   : > { %8079 = vmatprep.subr.bf16.mxu0 %v23684_v56  ;;  %v23727_v56 = vld [vmem:[#allocation6 + $0x1ab8] ss:$12 sps:$4 sm:$0xff]  }
 0x6b1   : > { %8080 = vmatpush1.bf16.msra.mxu0 %v23682_v41  ;;  %v23732_v41 = vld [vmem:[#allocation6 + $0x1ad4] ss:$12 sps:$4 sm:$0xff]  }
 0x6b2   : > { %8081 = vmatprep.subr.bf16.mxu0 %v23687_v23  ;;  %v23730_v23 = vld [vmem:[#allocation6 + $0x1ad0] ss:$12 sps:$4 sm:$0xff]  }
 0x6b5   : > { %8082 = vmatpush1.bf16.msra.mxu0 %v23685_v47  ;;  %v23735_v47 = vld [vmem:[#allocation6 + $0x1aec] ss:$12 sps:$4 sm:$0xff]  }
 0x6b6   : > { %8094 = vmatprep.subr.bf16.mxu0 %v23690_v36  ;;  %v23733_v36 = vld [vmem:[#allocation6 + $0x1ae8] ss:$12 sps:$4 sm:$0xff]  }
 0x6b8   : > { %20087 = vmatmul.mubr.msk.bf16.vlgmr.msra.gmra.mrb[12].mxu0 %vm26201_vm13, %v26207_v24  ;;  %v23703_v24 = vld [vmem:[#allocation6 + $0x19f8] ss:$12 sps:$4 sm:$0xff]  }
 0x6b9   : > { %8095 = vmatpush1.bf16.msra.mxu0 %v23688_v27  ;;  %8126 = vmatprep.mubr.bf16.mxu0 %v26217_v43  ;;  %v23706_v43 = vld [vmem:[#allocation6 + $0x1a10] ss:$12 sps:$4 sm:$0xff]  }
 0x6ba   : > { %8096 = vmatprep.subr.bf16.mxu0 %v23693_v48  ;;  %v23738_v27 = vld [vmem:[#allocation6 + $0x1b04] ss:$12 sps:$4 sm:$0xff]   ;;  %v23736_v48 = vld [vmem:[#allocation6 + $0x1b00] ss:$12 sps:$4 sm:$0xff]  }
 0x6bd   : > { %8097 = vmatpush1.bf16.msra.mxu0 %v23691_v21  ;;  %v23741_v21 = vld [vmem:[#allocation6 + $0x1b1c] ss:$12 sps:$4 sm:$0xff]  }
 0x6be   : > { %8098 = vmatprep.subr.bf16.mxu0 %v23696_v46  ;;  %v23739_v46 = vld [vmem:[#allocation6 + $0x1b18] ss:$12 sps:$4 sm:$0xff]  }
 0x6c1   : > { %8099 = vmatpush1.bf16.msra.mxu0 %v23694_v37  ;;  %v23744_v37 = vld [vmem:[#allocation6 + $0x1b34] ss:$12 sps:$4 sm:$0xff]  }
 0x6c2   : > { %8100 = vmatprep.subr.bf16.mxu0 %v23699_v51  ;;  %v23742_v51 = vld [vmem:[#allocation6 + $0x1b30] ss:$12 sps:$4 sm:$0xff]  }
 0x6c5   : > { %8101 = vmatpush1.bf16.msra.mxu0 %v23697_v22  ;;  %v23747_v22 = vld [vmem:[#allocation6 + $0x1b4c] ss:$12 sps:$4 sm:$0xff]  }
 0x6c6   : > { %8102 = vmatprep.subr.bf16.mxu0 %v23702_v54  ;;  %v23745_v54 = vld [vmem:[#allocation6 + $0x1b48] ss:$12 sps:$4 sm:$0xff]  }
 0x6c9   : > { %8103 = vmatpush1.bf16.msra.mxu0 %v23700_v45  ;;  %v23750_v45 = vld [vmem:[#allocation6 + $0x1b64] ss:$12 sps:$4 sm:$0xff]  }
 0x6ca   : > { %8104 = vmatprep.subr.bf16.mxu0 %v23705_v16  ;;  %v23748_v16 = vld [vmem:[#allocation6 + $0x1b60] ss:$12 sps:$4 sm:$0xff]  }
 0x6cd   : > { %8105 = vmatpush1.bf16.msra.mxu0 %v23703_v24  ;;  %v23753_v24 = vld [vmem:[#allocation6 + $0x1b7c] ss:$12 sps:$4 sm:$0xff]  }
 0x6ce   : > { %8106 = vmatprep.subr.bf16.mxu0 %v23708_v0  ;;  %v23756_v0 = vld [vmem:[#allocation6 + $0x1b94] ss:$12 sps:$4 sm:$0xff]  }
 0x6d1   : > { %8107 = vmatpush1.bf16.msra.mxu0 %v23706_v43  ;;  %v23759_v43 = vld [vmem:[#allocation6 + $0x1bac] ss:$12 sps:$4 sm:$0xff]  }
 0x6d2   : > { %8108 = vmatprep.subr.bf16.mxu0 %v23711_v5  ;;  %v23757_v5 = vld [vmem:[#allocation6 + $0x1ba8] ss:$12 sps:$4 sm:$0xff]  }
 0x6d5   : > { %8109 = vmatpush1.bf16.msra.mxu0 %v23709_v2  ;;  %v23762_v2 = vld [vmem:[#allocation6 + $0x1bc4] ss:$12 sps:$4 sm:$0xff]  }
 0x6d6   : > { %8110 = vmatprep.subr.bf16.mxu0 %v23714_v61  ;;  %v23760_v61 = vld [vmem:[#allocation6 + $0x1bc0] ss:$12 sps:$4 sm:$0xff]  }
 0x6d9   : > { %8111 = vmatpush1.bf16.msra.mxu0 %v23712_v26  ;;  %v23765_v26 = vld [vmem:[#allocation6 + $0x1bdc] ss:$12 sps:$4 sm:$0xff]  }
 0x6da   : > { %8112 = vmatprep.subr.bf16.mxu0 %v23717_v31  ;;  %v23763_v31 = vld [vmem:[#allocation6 + $0x1bd8] ss:$12 sps:$4 sm:$0xff]  }
 0x6dd   : > { %8113 = vmatpush1.bf16.msra.mxu0 %v23715_v50  ;;  %v23769_v50 = vld [vmem:[#allocation6 + $0x1c08] ss:$12 sps:$4 sm:$0xff]  }
 0x6de   : > { %8114 = vmatprep.subr.bf16.mxu0 %v23720_v30  ;;  %v23774_v30 = vld [vmem:[#allocation6 + $0x1c24] ss:$12 sps:$4 sm:$0xff]  }
 0x6e1   : > { %8115 = vmatpush1.bf16.msra.mxu0 %v23718_v44  ;;  %v23775_v44 = vld [vmem:[#allocation6 + $0x1c38] ss:$12 sps:$4 sm:$0xff]  }
 0x6e2   : > { %8116 = vmatprep.subr.bf16.mxu0 %v23723_v29  ;;  %v23780_v29 = vld [vmem:[#allocation6 + $0x1c54] ss:$12 sps:$4 sm:$0xff]  }
 0x6e5   : > { %8117 = vmatpush1.bf16.msra.mxu0 %v23721_v38  ;;  %v23781_v38 = vld [vmem:[#allocation6 + $0x1c68] ss:$12 sps:$4 sm:$0xff]  }
 0x6e6   : > { %8118 = vmatprep.subr.bf16.mxu0 %v23726_v18  ;;  %v23786_v18 = vld [vmem:[#allocation6 + $0x1c84] ss:$12 sps:$4 sm:$0xff]  }
 0x6e9   : > { %8119 = vmatpush1.bf16.msra.mxu0 %v23724_v58  ;;  %v23789_v58 = vld [vmem:[#allocation6 + $0x1c9c] ss:$12 sps:$4 sm:$0xff]  }
 0x6ea   : > { %8120 = vmatprep.subr.bf16.mxu0 %v23729_v8  ;;  %v23787_v8 = vld [vmem:[#allocation6 + $0x1c98] ss:$12 sps:$4 sm:$0xff]  }
 0x6ed   : > { %8121 = vmatpush1.bf16.msra.mxu0 %v23727_v56  ;;  %v27086_v56 = vmov 0  }
 0x6ee   : > { %8122 = vmatprep.subr.bf16.mxu0 %v23732_v41  ;;  %v23792_v41 = vld [vmem:[#allocation6 + $0x1cb4] ss:$12 sps:$4 sm:$0xff]  }
 0x6f1   : > { %8123 = vmatpush1.bf16.msra.mxu0 %v23730_v23  ;;  %v23790_v23 = vld [vmem:[#allocation6 + $0x1cb0] ss:$12 sps:$4 sm:$0xff]  }
 0x6f2   : > { %8124 = vmatprep.subr.bf16.mxu0 %v23735_v47  ;;  %v23795_v47 = vld [vmem:[#allocation6 + $0x1ccc] ss:$12 sps:$4 sm:$0xff]  }
 0x6f5   : > { %8125 = vmatpush1.bf16.msra.mxu0 %v23733_v36  ;;  %v23793_v36 = vld [vmem:[#allocation6 + $0x1cc8] ss:$12 sps:$4 sm:$0xff]  }
 0x6f6   : > { %8137 = vmatprep.subr.bf16.mxu0 %v23738_v27  ;;  %v23798_v27 = vld [vmem:[#allocation6 + $0x1ce4] ss:$12 sps:$4 sm:$0xff]  }
 0x6f8   : > { %8127 = vmatmul.mubr.bf16.vlgmr.msra.gmra.mrb[12].mxu0 %v26229_v19  ;;  %v23751_v19 = vld [vmem:[#allocation6 + $0x1b78] ss:$12 sps:$4 sm:$0xff]  }
 0x6f9   : > { %8138 = vmatpush1.bf16.msra.mxu0 %v23736_v48  ;;  %8169 = vmatprep.mubr.bf16.mxu0 %v26233_v13  ;;  %v23754_v13 = vld [vmem:[#allocation6 + $0x1b90] ss:$12 sps:$4 sm:$0xff]   ;;  %v23796_v48 = vld [vmem:[#allocation6 + $0x1ce0] ss:$12 sps:$4 sm:$0xff]  }
 0x6fa   : > { %8139 = vmatprep.subr.bf16.mxu0 %v23741_v21  ;;  %v23801_v21 = vld [vmem:[#allocation6 + $0x1cfc] ss:$12 sps:$4 sm:$0xff]  }
 0x6fd   : > { %8140 = vmatpush1.bf16.msra.mxu0 %v23739_v46  ;;  %v23804_v46 = vld [vmem:[#allocation6 + $0x1d14] ss:$12 sps:$4 sm:$0xff]  }
 0x6fe   : > { %8141 = vmatprep.subr.bf16.mxu0 %v23744_v37  ;;  %v23802_v37 = vld [vmem:[#allocation6 + $0x1d10] ss:$12 sps:$4 sm:$0xff]  }
 0x701   : > { %8142 = vmatpush1.bf16.msra.mxu0 %v23742_v51  ;;  %v23807_v51 = vld [vmem:[#allocation6 + $0x1d2c] ss:$12 sps:$4 sm:$0xff]  }
 0x702   : > { %8143 = vmatprep.subr.bf16.mxu0 %v23747_v22  ;;  %v23805_v22 = vld [vmem:[#allocation6 + $0x1d28] ss:$12 sps:$4 sm:$0xff]  }
 0x705   : > { %8144 = vmatpush1.bf16.msra.mxu0 %v23745_v54  ;;  %v23816_v54 = vld [vmem:[#allocation4 + $0x160] sm:$0xff]  }
 0x706   : > { %8145 = vmatprep.subr.bf16.mxu0 %v23750_v45  ;;  %v23817_v45 = vld [vmem:[#allocation4 + $0x120] sm:$0xff]   ;;  %21696 = vmatprep.subr.bf16.mxu1 %v23816_v54 }
 0x707   : > { %21697 = vmatpush3.bf16.msra.mxu1 %v23817_v45 }
 0x709   : > { %8146 = vmatpush1.bf16.msra.mxu0 %v23748_v16  ;;  %v23818_v16 = vld [vmem:[#allocation4 + $0x168] sm:$0xff]  }
 0x70a   : > { %8147 = vmatprep.subr.bf16.mxu0 %v23753_v24  ;;  %v23819_v24 = vld [vmem:[#allocation4 + $0x128] sm:$0xff]   ;;  %21698 = vmatprep.subr.bf16.mxu1 %v23818_v16 }
 0x70b   : > { %21699 = vmatpush3.bf16.msra.mxu1 %v23819_v24 }
 0x70d   : > { %8148 = vmatpush1.bf16.msra.mxu0 %v23751_v19  ;;  %v23820_v19 = vld [vmem:[#allocation4 + $0x170] sm:$0xff]  }
 0x70e   : > { %8149 = vmatprep.subr.bf16.mxu0 %v23756_v0  ;;  %v23821_v0 = vld [vmem:[#allocation4 + $0x130] sm:$0xff]   ;;  %21700 = vmatprep.subr.bf16.mxu1 %v23820_v19 }
 0x70f   : > { %21701 = vmatpush3.bf16.msra.mxu1 %v23821_v0 }
 0x711   : > { %8150 = vmatpush1.bf16.msra.mxu0 %v23754_v13  ;;  %v23822_v13 = vld [vmem:[#allocation4 + $0x178] sm:$0xff]  }
 0x712   : > { %8151 = vmatprep.subr.bf16.mxu0 %v23759_v43  ;;  %v23823_v43 = vld [vmem:[#allocation4 + $0x138] sm:$0xff]   ;;  %21702 = vmatprep.subr.bf16.mxu1 %v23822_v13 }
 0x713   : > { %21703 = vmatpush3.bf16.msra.mxu1 %v23823_v43 }
 0x715   : > { %8152 = vmatpush1.bf16.msra.mxu0 %v23757_v5  ;;  %v23824_v5 = vld [vmem:[#allocation4 + $0x1c0] sm:$0xff]  }
 0x716   : > { %8153 = vmatprep.subr.bf16.mxu0 %v23762_v2  ;;  %21710 = vmatprep.subr.bf16.mxu1 %v23824_v5  ;;  %v26351_v2 = vsub.s32 1, %v26300_v60 }
 0x718   : > { %27164 = vst [vmem:[#allocation26_spill] sm:$0xff] %v26351_v2 }
 0x719   : > { %8154 = vmatpush1.bf16.msra.mxu0 %v23760_v61 }
 0x71a   : > { %8155 = vmatprep.subr.bf16.mxu0 %v23765_v26  ;;  %v9514_v26 = vrot.slane %v26305_v34, %v26351_v2 }
 0x71d   : > { %8156 = vmatpush1.bf16.msra.mxu0 %v23763_v31 }
 0x71e   : > { %8157 = vmatprep.subr.bf16.mxu0 %v23768_v20 }
 0x721   : > { %8158 = vmatpush1.bf16.msra.mxu0 %v23766_v57  ;;  %v9544_v57 = vrot.slane %v26307_v25, %v26351_v2 }
 0x722   : > { %8159 = vmatprep.subr.bf16.mxu0 %v23771_v62 }
 0x725   : > { %8160 = vmatpush1.bf16.msra.mxu0 %v23769_v50 }
 0x726   : > { %8161 = vmatprep.subr.bf16.mxu0 %v23774_v30 }
 0x729   : > { %8162 = vmatpush1.bf16.msra.mxu0 %v23772_v3 }
 0x72a   : > { %8163 = vmatprep.subr.bf16.mxu0 %v23777_v1 }
 0x72d   : > { %8164 = vmatpush1.bf16.msra.mxu0 %v23775_v44 }
 0x72e   : > { %8165 = vmatprep.subr.bf16.mxu0 %v23780_v29 }
 0x731   : > { %8166 = vmatpush1.bf16.msra.mxu0 %v23778_v14 }
 0x732   : > { %8167 = vmatprep.subr.bf16.mxu0 %v23783_v28 }
 0x735   : > { %8168 = vmatpush1.bf16.msra.mxu0 %v23781_v38  ;;  %v9581_v38 = vld [vmem:[#allocation12] sm:$0xf] }
 0x736   : > { %8180 = vmatprep.subr.bf16.mxu0 %v23786_v18 }
 0x738   : > { %8170 = vmatmul.mubr.bf16.vlgmr.msra.gmra.mrb[12].mxu0 %v26245_v6  ;;  %v23799_v6 = vld [vmem:[#allocation6 + $0x1cf8] ss:$12 sps:$4 sm:$0xff]  }
 0x739   : > { %8181 = vmatpush1.bf16.msra.mxu0 %v23784_v52  ;;  %8212 = vmatprep.mubr.bf16.mxu0 %v27086_v56 }
 0x73a   : > { %8182 = vmatprep.subr.bf16.mxu0 %v23789_v58  ;;  %v9590_v58 = vrot.slane %v9581_v38, %v26351_v2 }
 0x73d   : > { %8183 = vmatpush1.bf16.msra.mxu0 %v23787_v8 }
 0x73e   : > { %8184 = vmatprep.subr.bf16.mxu0 %v23792_v41  ;;  %v27165_v41 = vld [vmem:[#allocation20_spill] sm:$0xff] }
 0x741   : > { %8185 = vmatpush1.bf16.msra.mxu0 %v23790_v23 }
 0x742   : > { %8186 = vmatprep.subr.bf16.mxu0 %v23795_v47 }
 0x745   : > { %8187 = vmatpush1.bf16.msra.mxu0 %v23793_v36  ;;  %v27166_v36 = vld [vmem:[#allocation21_spill] sm:$0xff] }
 0x746   : > { %8188 = vmatprep.subr.bf16.mxu0 %v23798_v27 }
 0x749   : > { %8189 = vmatpush1.bf16.msra.mxu0 %v23796_v48 }
 0x74a   : > { %8190 = vmatprep.subr.bf16.mxu0 %v23801_v21  ;;  %v9598_v21 = vrot.slane %v9581_v38, %v26322_v7 }
 0x74c   : > { %v9610_v16 = vmul.f32 %v9598_v21, %v26334_v63  ;;  %v9606_v43 = vmul.f32 %v9598_v21, %v26329_v39 }
 0x74d   : > { %8191 = vmatpush1.bf16.msra.mxu0 %v23799_v6  ;;  %v9611_v6 = vld [vmem:[#allocation13] sm:$0xf] }
 0x74e   : > { %8192 = vmatprep.subr.bf16.mxu0 %v23804_v46  ;;  %v27167_v46 = vld [vmem:[#allocation24_spill] sm:$0xff]  ;;  %v9620_v45 = vrot.slane %v9611_v6, %v26351_v2  ;;  %v9628_v5 = vrot.slane %v9611_v6, %v26322_v7 }
 0x751   : > { %8193 = vmatpush1.bf16.msra.mxu0 %v23802_v37 }
 0x752   : > { %8194 = vmatprep.subr.bf16.mxu0 %v23807_v51 }
 0x755   : > { %8195 = vmatpush1.bf16.msra.mxu0 %v23805_v22  ;;  %v27168_v22 = vld [vmem:[#allocation25_spill] sm:$0xff] }
 0x758   : > { %8213 = vmatmul.mubr.bf16.vlgmr.msra.gmra.mrb[12].mxu0 %v26268_v49  ;;  %v26348_v49 = vsub.s32 0, %v26300_v60 }
 0x75a   : > { %27163 = vst [vmem:[#allocation22_spill] sm:$0xff] %v26348_v49  ;;  %v9510_v61 = vrot.slane %v26305_v34, %v26348_v49  ;;  %v9540_v31 = vrot.slane %v26307_v25, %v26348_v49  ;;  %v9586_v25 = vrot.slane %v9581_v38, %v26348_v49  ;;  %v9616_v19 = vrot.slane %v9611_v6, %v26348_v49 }
 0x82b   : > { %v8214_v20 = vpop.f32.mrb[12].mxu0 }
 0x82c   : > { %v9527_v62 = vmul.f32 %v9510_v61, %v8214_v20  ;;  %v8216_v50 = vpop.f32.mrb[13].mxu0  ;;  %v26379_v20 = vadd.f32 %v9628_v5, %v9610_v16  ;;  %v23854_v16 = vld [vmem:[#allocation6 + $0x1da4] ss:$12 sps:$4 sm:$0xff]  }
 0x82d   : > { %v9528_v30 = vmul.f32 %v9514_v26, %v8216_v50  ;;  %v8218_v3 = vpop.f32.mrb[14].mxu0  ;;  %v26385_v50 = vadd.f32 %v9628_v5, %v9606_v43  ;;  %v23858_v43 = vld [vmem:[#allocation6 + $0x1dd0] ss:$12 sps:$4 sm:$0xff]   ;;  %v23863_v5 = vld [vmem:[#allocation6 + $0x1dec] ss:$12 sps:$4 sm:$0xff]  }
 0x82e   : > { %v9557_v1 = vadd.f32 %v9540_v31, %v9527_v62  ;;  %v9531_v44 = vmul.f32 %v9510_v61, %v8218_v3  ;;  %v8220_v29 = vpop.f32.mrb[15].mxu0  ;;  %27172 = vst [vmem:[#allocation21_spill] sm:$0xff] %v26379_v20  ;;  %v23825_v62 = vld [vmem:[#allocation4 + $0x180] sm:$0xff]  }
 0x82f   : > { %v9558_v14 = vadd.f32 %v9544_v57, %v9528_v30  ;;  %v9532_v28 = vmul.f32 %v9514_v26, %v8220_v29  ;;  %27174 = vst [vmem:[#allocation25_spill] sm:$0xff] %v26385_v50  ;;  %v23826_v30 = vld [vmem:[#allocation4 + $0x1c8] sm:$0xff]   ;;  %v9644_v3 = vpack.c.bf16 %v26379_v20, %v26385_v50  ;;  %v23829_v29 = vld [vmem:[#allocation4 + $0x190] sm:$0xff]  }
 0x830   : > { %v9565_v18 = vmax.f32 %v9557_v1, 0.0  ;;  %v9561_v52 = vadd.f32 %v9540_v31, %v9531_v44  ;;  %v23827_v1 = vld [vmem:[#allocation4 + $0x188] sm:$0xff]   ;;  %v23828_v44 = vld [vmem:[#allocation4 + $0x1d0] sm:$0xff]  }
 0x831   : > { %v9566_v34 = vmax.f32 %v9558_v14, 0.0  ;;  %v9562_v8 = vadd.f32 %v9544_v57, %v9532_v28  ;;  %v23830_v14 = vld [vmem:[#allocation4 + $0x1d8] sm:$0xff]   ;;  %v23927_v20 = vld [vmem:[#allocation6 + $0x1fe8] ss:$12 sps:$4 sm:$0xff]  }
 0x832   : > { %v9573_v23 = vadd.f32 %v9565_v18, %v27165_v41  ;;  %v9569_v47 = vmax.f32 %v9561_v52, 0.0  ;;  %v23831_v28 = vld [vmem:[#allocation4 + $0x198] sm:$0xff]   ;;  %v23832_v18 = vld [vmem:[#allocation4 + $0x1e0] sm:$0xff]   ;;  %v9594_v41 = vrot.slane %v9581_v38, %v26303_v10 }
 0x833   : > { %v9574_v27 = vadd.f32 %v9566_v34, %v27166_v36  ;;  %v9570_v48 = vmax.f32 %v9562_v8, 0.0  ;;  %v23833_v52 = vld [vmem:[#allocation4 + $0x1a0] sm:$0xff]   ;;  %v23834_v34 = vld [vmem:[#allocation4 + $0x1e8] sm:$0xff]   ;;  %v23836_v8 = vld [vmem:[#allocation4 + $0x1f0] sm:$0xff]  }
 0x834   : > { %v9577_v37 = vadd.f32 %v9569_v47, %v27167_v46  ;;  %v9603_v24 = vmul.f32 %v9586_v25, %v9573_v23  ;;  %v23837_v23 = vld [vmem:[#allocation4 + $0x1b0] sm:$0xff]   ;;  %v23838_v47 = vld [vmem:[#allocation4 + $0x1f8] sm:$0xff]   ;;  %v9605_v36 = vmul.f32 %v9594_v41, %v26314_v9  ;;  %v23840_v38 = vld [vmem:[#allocation6 + $0x1d40] ss:$12 sps:$4 sm:$0xff]  }
 0x835   : > { %v9604_v51 = vmul.f32 %v9590_v58, %v9574_v27  ;;  %v9578_v54 = vadd.f32 %v9570_v48, %v27168_v22  ;;  %v9624_v27 = vrot.slane %v9611_v6, %v26303_v10  ;;  %v23839_v48 = vld [vmem:[#allocation4 + $0x1b8] sm:$0xff]   ;;  %v23842_v46 = vld [vmem:[#allocation6 + $0x1d44] ss:$12 sps:$4 sm:$0xff]   ;;  %v23848_v6 = vld [vmem:[#allocation6 + $0x1d74] ss:$12 sps:$4 sm:$0xff]  }
 0x836   : > { %v9607_v0 = vmul.f32 %v9586_v25, %v9577_v37  ;;  %v26381_v57 = vadd.f32 %v9616_v19, %v9603_v24  ;;  %v9609_v25 = vmul.f32 %v9594_v41, %v26317_v35  ;;  %v23845_v35 = vld [vmem:[#allocation6 + $0x1d5c] ss:$12 sps:$4 sm:$0xff]   ;;  %v23843_v9 = vld [vmem:[#allocation6 + $0x1d58] ss:$12 sps:$4 sm:$0xff]   ;;  %v23852_v24 = vld [vmem:[#allocation6 + $0x1da0] ss:$12 sps:$4 sm:$0xff]  }
 0x837   : > { %v9608_v13 = vmul.f32 %v9590_v58, %v9578_v54  ;;  %v26375_v26 = vadd.f32 %v9620_v45, %v9604_v51  ;;  %v23835_v58 = vld [vmem:[#allocation4 + $0x1a8] sm:$0xff]   ;;  %v26397_v37 = vadd.f32 %v9624_v27, %v9605_v36  ;;  %v23846_v22 = vld [vmem:[#allocation6 + $0x1d70] ss:$12 sps:$4 sm:$0xff]  }
 0x838   : > { %v26373_v61 = vadd.f32 %v9616_v19, %v9607_v0  ;;  %27173 = vst [vmem:[#allocation24_spill] sm:$0xff] %v26381_v57  ;;  %v26395_v21 = vadd.f32 %v9624_v27, %v9609_v25  ;;  %v23851_v54 = vld [vmem:[#allocation6 + $0x1d8c] ss:$12 sps:$4 sm:$0xff]   ;;  %v23857_v0 = vld [vmem:[#allocation6 + $0x1dbc] ss:$12 sps:$4 sm:$0xff]  }
 0x839   : > { %27170 = vst [vmem:[#allocation27_spill] sm:$0xff] %v26375_v26  ;;  %v26377_v31 = vadd.f32 %v9620_v45, %v9608_v13  ;;  %27176 = vst [vmem:[#allocation33_spill] sm:$0xff] %v26397_v37  ;;  %v23849_v45 = vld [vmem:[#allocation6 + $0x1d88] ss:$12 sps:$4 sm:$0xff]   ;;  %v23855_v19 = vld [vmem:[#allocation6 + $0x1db8] ss:$12 sps:$4 sm:$0xff]  }
 0x83a   : > { %27169 = vst [vmem:[#allocation23_spill] sm:$0xff] %v26373_v61  ;;  %v9641_v39 = vpack.c.bf16 %v26373_v61, %v26381_v57  ;;  %27175 = vst [vmem:[#allocation32_spill] sm:$0xff] %v26395_v21  ;;  %v9643_v51 = vpack.c.bf16 %v26395_v21, %v26397_v37  ;;  %v23860_v13 = vld [vmem:[#allocation6 + $0x1dd4] ss:$12 sps:$4 sm:$0xff]   ;;  %v23874_v41 = vld [vmem:[#allocation6 + $0x1e30] ss:$12 sps:$4 sm:$0xff]  }
 0x83b   : > { %27171 = vst [vmem:[#allocation20_spill] sm:$0xff] %v26377_v31  ;;  %v9642_v63 = vpack.c.bf16 %v26377_v31, %v26375_v26  ;;  %v23881_v25 = vld [vmem:[#allocation6 + $0x1e4c] ss:$12 sps:$4 sm:$0xff]   ;;  %v23886_v36 = vld [vmem:[#allocation6 + $0x1e64] ss:$12 sps:$4 sm:$0xff]  }
 0x83c   : > { %v23884_v27 = vld [vmem:[#allocation6 + $0x1e60] ss:$12 sps:$4 sm:$0xff]   ;;  %v23923_v21 = vld [vmem:[#allocation6 + $0x1f10] ss:$12 sps:$4 sm:$0xff]  }
 0x83d   : > { %9934 = vmatprep.mubr.bf16.mxu1 %v9642_v63  ;;  %v23867_v63 = vld [vmem:[#allocation6 + $0x1e08] ss:$12 sps:$4 sm:$0xff]  }
 0x83e   : > { %9935 = vmatmul.mubr.bf16.vlgmr.msra.gmra.mrb[92].mxu1 %v9641_v39  ;;  %v23872_v39 = vld [vmem:[#allocation6 + $0x1e20] ss:$12 sps:$4 sm:$0xff]   ;;  %21732 = vmatprep.subr.bf16.mxu0 %v23867_v63 }
 0x83f   : > { %21711 = vmatpush3.bf16.msra.mxu1 %v23825_v62  ;;  %9975 = vmatprep.mubr.bf16.mxu1 %v9644_v3  ;;  %v23868_v62 = vld [vmem:[#allocation6 + $0x1d48] ss:$12 sps:$4 sm:$0xff]   ;;  %v23873_v3 = vld [vmem:[#allocation6 + $0x1d60] ss:$12 sps:$4 sm:$0xff]  }
 0x840   : > { %21712 = vmatprep.subr.bf16.mxu1 %v23826_v30  ;;  %v23861_v30 = vld [vmem:[#allocation6 + $0x1de8] ss:$12 sps:$4 sm:$0xff]   ;;  %21733 = vmatpush3.bf16.msra.mxu0 %v23868_v62 }
 0x841   : > { %21734 = vmatprep.subr.bf16.mxu0 %v23872_v39 }
 0x843   : > { %21713 = vmatpush3.bf16.msra.mxu1 %v23827_v1  ;;  %v23866_v1 = vld [vmem:[#allocation6 + $0x1e04] ss:$12 sps:$4 sm:$0xff]  }
 0x844   : > { %21714 = vmatprep.subr.bf16.mxu1 %v23828_v44  ;;  %v23877_v44 = vld [vmem:[#allocation6 + $0x1e38] ss:$12 sps:$4 sm:$0xff]   ;;  %21735 = vmatpush3.bf16.msra.mxu0 %v23873_v3 }
 0x845   : > { %21736 = vmatprep.subr.bf16.mxu0 %v23877_v44 }
 0x847   : > { %21715 = vmatpush3.bf16.msra.mxu1 %v23829_v29  ;;  %v23864_v29 = vld [vmem:[#allocation6 + $0x1e00] ss:$12 sps:$4 sm:$0xff]  }
 0x848   : > { %21716 = vmatprep.subr.bf16.mxu1 %v23830_v14  ;;  %v23878_v14 = vld [vmem:[#allocation6 + $0x1d78] ss:$12 sps:$4 sm:$0xff]  }
 0x849   : > { %21737 = vmatpush3.bf16.msra.mxu0 %v23878_v14 }
 0x84b   : > { %21717 = vmatpush3.bf16.msra.mxu1 %v23831_v28  ;;  %v23871_v28 = vld [vmem:[#allocation6 + $0x1e1c] ss:$12 sps:$4 sm:$0xff]  }
 0x84c   : > { %21718 = vmatprep.subr.bf16.mxu1 %v23832_v18  ;;  %v23882_v18 = vld [vmem:[#allocation6 + $0x1e50] ss:$12 sps:$4 sm:$0xff]  }
 0x84d   : > { %21738 = vmatprep.subr.bf16.mxu0 %v23882_v18 }
 0x84f   : > { %21719 = vmatpush3.bf16.msra.mxu1 %v23833_v52  ;;  %v23869_v52 = vld [vmem:[#allocation6 + $0x1e18] ss:$12 sps:$4 sm:$0xff]  }
 0x850   : > { %21720 = vmatprep.subr.bf16.mxu1 %v23834_v34  ;;  %v23883_v34 = vld [vmem:[#allocation6 + $0x1d90] ss:$12 sps:$4 sm:$0xff]  }
 0x851   : > { %21739 = vmatpush3.bf16.msra.mxu0 %v23883_v34 }
 0x853   : > { %21721 = vmatpush3.bf16.msra.mxu1 %v23835_v58  ;;  %v23876_v58 = vld [vmem:[#allocation6 + $0x1e34] ss:$12 sps:$4 sm:$0xff]  }
 0x854   : > { %21722 = vmatprep.subr.bf16.mxu1 %v23836_v8  ;;  %v23887_v8 = vld [vmem:[#allocation6 + $0x1e68] ss:$12 sps:$4 sm:$0xff]  }
 0x855   : > { %21740 = vmatprep.subr.bf16.mxu0 %v23887_v8 }
 0x857   : > { %21723 = vmatpush3.bf16.msra.mxu1 %v23837_v23  ;;  %v23888_v23 = vld [vmem:[#allocation6 + $0x1da8] ss:$12 sps:$4 sm:$0xff]  }
 0x858   : > { %21724 = vmatprep.subr.bf16.mxu1 %v23838_v47  ;;  %v23879_v47 = vld [vmem:[#allocation6 + $0x1e48] ss:$12 sps:$4 sm:$0xff]   ;;  %21741 = vmatpush3.bf16.msra.mxu0 %v23888_v23 }
 0x85b   : > { %21725 = vmatpush3.bf16.msra.mxu1 %v23839_v48  ;;  %v23889_v48 = vld [vmem:[#allocation6 + $0x1e78] ss:$12 sps:$4 sm:$0xff]  }
 0x85c   : > { %16352 = vmatprep.subr.bf16.mxu1 %v23842_v46  ;;  %v23891_v46 = vld [vmem:[#allocation6 + $0x1e7c] ss:$12 sps:$4 sm:$0xff]  }
 0x85e   : > { %9976 = vmatmul.mubr.bf16.vlgmr.msra.gmra.mrb[96].mxu1 %v9643_v51  ;;  %v23893_v51 = vld [vmem:[#allocation6 + $0x1dc0] ss:$12 sps:$4 sm:$0xff]  }
 0x85f   : > { %16353 = vmatpush1.bf16.msra.mxu1 %v23840_v38  ;;  %v23892_v38 = vld [vmem:[#allocation6 + $0x1e80] ss:$12 sps:$4 sm:$0xff]  }
 0x860   : > { %16354 = vmatprep.subr.bf16.mxu1 %v23845_v35  ;;  %21742 = vmatprep.subr.bf16.mxu0 %v23892_v38  ;;  %v23894_v35 = vld [vmem:[#allocation6 + $0x1e90] ss:$12 sps:$4 sm:$0xff]  }
 0x861   : > { %21743 = vmatpush3.bf16.msra.mxu0 %v23893_v51  ;;  %v23904_v51 = vld [vmem:[#allocation6 + $0x1ec0] ss:$12 sps:$4 sm:$0xff]  }
 0x863   : > { %16355 = vmatpush1.bf16.msra.mxu1 %v23843_v9  ;;  %v23896_v9 = vld [vmem:[#allocation6 + $0x1e94] ss:$12 sps:$4 sm:$0xff]  }
 0x864   : > { %16356 = vmatprep.subr.bf16.mxu1 %v23848_v6  ;;  %v23897_v6 = vld [vmem:[#allocation6 + $0x1e98] ss:$12 sps:$4 sm:$0xff]  }
 0x865   : > { %21744 = vmatprep.subr.bf16.mxu0 %v23897_v6  ;;  %v23911_v6 = vld [vmem:[#allocation6 + $0x1edc] ss:$12 sps:$4 sm:$0xff]  }
 0x867   : > { %16357 = vmatpush1.bf16.msra.mxu1 %v23846_v22  ;;  %v23898_v22 = vld [vmem:[#allocation6 + $0x1dd8] ss:$12 sps:$4 sm:$0xff]  }
 0x868   : > { %16358 = vmatprep.subr.bf16.mxu1 %v23851_v54  ;;  %v23901_v54 = vld [vmem:[#allocation6 + $0x1eac] ss:$12 sps:$4 sm:$0xff]   ;;  %21745 = vmatpush3.bf16.msra.mxu0 %v23898_v22 }
 0x86b   : > { %16359 = vmatpush1.bf16.msra.mxu1 %v23849_v45  ;;  %v23902_v45 = vld [vmem:[#allocation6 + $0x1eb0] ss:$12 sps:$4 sm:$0xff]  }
 0x86c   : > { %16360 = vmatprep.subr.bf16.mxu1 %v23854_v16  ;;  %v23899_v16 = vld [vmem:[#allocation6 + $0x1ea8] ss:$12 sps:$4 sm:$0xff]   ;;  %21746 = vmatprep.subr.bf16.mxu0 %v23902_v45 }
 0x86f   : > { %16361 = vmatpush1.bf16.msra.mxu1 %v23852_v24  ;;  %v23906_v24 = vld [vmem:[#allocation6 + $0x1ec4] ss:$12 sps:$4 sm:$0xff]  }
 0x870   : > { %16362 = vmatprep.subr.bf16.mxu1 %v23857_v0  ;;  %v23907_v0 = vld [vmem:[#allocation6 + $0x1f88] ss:$12 sps:$4 sm:$0xff]  }
 0x873   : > { %16363 = vmatpush1.bf16.msra.mxu1 %v23855_v19  ;;  %v23903_v19 = vld [vmem:[#allocation6 + $0x1df0] ss:$12 sps:$4 sm:$0xff]  }
 0x874   : > { %16364 = vmatprep.subr.bf16.mxu1 %v23860_v13  ;;  %21747 = vmatpush3.bf16.msra.mxu0 %v23903_v19 }
 0x875   : > { %21754 = vmatprep.subr.bf16.mxu0 %v23907_v0 }
 0x877   : > { %16365 = vmatpush1.bf16.msra.mxu1 %v23858_v43 }
 0x878   : > { %16366 = vmatprep.subr.bf16.mxu1 %v23863_v5 }
 0x87b   : > { %16367 = vmatpush1.bf16.msra.mxu1 %v23861_v30 }
 0x87c   : > { %16368 = vmatprep.subr.bf16.mxu1 %v23866_v1 }
 0x87f   : > { %16369 = vmatpush1.bf16.msra.mxu1 %v23864_v29 }
 0x880   : > { %16370 = vmatprep.subr.bf16.mxu1 %v23871_v28 }
 0x883   : > { %16371 = vmatpush1.bf16.msra.mxu1 %v23869_v52 }
 0x884   : > { %16372 = vmatprep.subr.bf16.mxu1 %v23876_v58 }
 0x887   : > { %16373 = vmatpush1.bf16.msra.mxu1 %v23874_v41 }
 0x888   : > { %16374 = vmatprep.subr.bf16.mxu1 %v23881_v25 }
 0x88b   : > { %16375 = vmatpush1.bf16.msra.mxu1 %v23879_v47 }
 0x88c   : > { %16376 = vmatprep.subr.bf16.mxu1 %v23886_v36 }
 0x88f   : > { %16377 = vmatpush1.bf16.msra.mxu1 %v23884_v27 }
 0x890   : > { %16378 = vmatprep.subr.bf16.mxu1 %v23891_v46 }
 0x893   : > { %16379 = vmatpush1.bf16.msra.mxu1 %v23889_v48 }
 0x894   : > { %16380 = vmatprep.subr.bf16.mxu1 %v23896_v9 }
 0x897   : > { %16381 = vmatpush1.bf16.msra.mxu1 %v23894_v35  ;;  %v23908_v35 = vld [vmem:[#allocation6 + $0x1ec8] ss:$12 sps:$4 sm:$0xff]  }
 0x898   : > { %16382 = vmatprep.subr.bf16.mxu1 %v23901_v54 }
 0x89b   : > { %16383 = vmatpush1.bf16.msra.mxu1 %v23899_v16 }
 0x89c   : > { %16395 = vmatprep.subr.bf16.mxu1 %v23906_v24  ;;  %v23912_v24 = vld [vmem:[#allocation6 + $0x1fa0] ss:$12 sps:$4 sm:$0xff]  }
 0x911   : > { %v21704_v13 = vpop.f32.mrb[92].mxu1 }
 0x912   : > { %v21705_v43 = vpop.f32.mrb[93].mxu1 }
 0x913   : > { %v21706_v5 = vadd.f32 %v21705_v43, %v21704_v13  ;;  %v21707_v63 = vpop.f32.mrb[94].mxu1  ;;  %v27177_v43 = vmov 0.0|0.0  }
 0x914   : > { %v21708_v62 = vpop.f32.mrb[95].mxu1 }
 0x915   : > { %v21709_v39 = vadd.f32 %v21708_v62, %v21707_v63 }
 0x931   : > { %v21726_v30 = vpop.f32.mrb[96].mxu1 }
 0x932   : > { %v21727_v3 = vpop.f32.mrb[97].mxu1 }
 0x933   : > { %v21728_v1 = vadd.f32 %v21727_v3, %v21726_v30  ;;  %v21729_v44 = vpop.f32.mrb[98].mxu1  ;;  %v23909_v30 = vld [vmem:[#allocation6 + $0x1ed8] ss:$12 sps:$4 sm:$0xff]   ;;  %v23913_v3 = vld [vmem:[#allocation6 + $0x1ee0] ss:$12 sps:$4 sm:$0xff]  }
 0x934   : > { %v21730_v29 = vpop.f32.mrb[99].mxu1 }
 0x935   : > { %v9978_v14 = vadd.f32 %v21728_v1, %v21706_v5  ;;  %v21731_v28 = vadd.f32 %v21730_v29, %v21729_v44  ;;  %v27178_v1 = vld [vmem:[#allocation31_spill] sm:$0xff] }
 0x937   : > { %v26401_v18 = vrot.slane %v9978_v14, 5  ;;  %v9981_v52 = vadd.f32 %v21731_v28, %v21709_v39 }
 0x939   : > { %v9992_v34 = vsel %vm969_vm5, 0.0, %v26401_v18  ;;  %v26405_v58 = vrot.slane %v9981_v52, 5  ;;  %v23916_v52 = vld [vmem:[#allocation6 + $0x1ef4] ss:$12 sps:$4 sm:$0xff]  }
 0x93a   : > { %v9995_v8 = vrot.slane %v9992_v34, 1  ;;  %v10001_v41 = vrot.slane %v9992_v34, 3  ;;  %v9998_v23 = vrot.slane %v9992_v34, 2  ;;  %v10007_v47 = vrot.slane %v9992_v34, 5 }
 0x93b   : > { %v26410_v25 = vsel %vm969_vm5, %v26401_v18, %v26405_v58  ;;  %v10004_v46 = vrot.slane %v9992_v34, 4  ;;  %v26423_v9 = vsel %vm969_vm5, %v26405_v58, 0.0  ;;  %v10013_v54 = vrot.slane %v9992_v34, 7 }
 0x93c   : > { %v26414_v36 = vpack.c.bf16 %v26405_v58, %v26410_v25  ;;  %v9996_v27 = vsel %vm980_vm3, %v25851_v32, %v9995_v8  ;;  %v10002_v48 = vsel %vm994_vm6, %v25860_v59, %v10001_v41  ;;  %v26427_v22 = vsel %vm987_vm4, %v25865_v33, %v9998_v23 }
 0x93d   : > { %v10073_v38 = vpack.c.bf16 %v9996_v27, %v25851_v32  ;;  %v10010_v45 = vrot.slane %v9992_v34, 6  ;;  %v10075_v16 = vpack.c.bf16 %v10002_v48, %v25860_v59  ;;  %v10016_v19 = vrot.slane %v26410_v25, 1  ;;  %v23917_v34 = vld [vmem:[#allocation6 + $0x1fb8] ss:$12 sps:$4 sm:$0xff]  }
 0x93e   : > { %v10022_v0 = vrot.slane %v26410_v25, 3  ;;  %v10019_v13 = vrot.slane %v26410_v25, 2  ;;  %v26437_v5 = vsel %vm969_vm5, %v25868_v55, %v10007_v47  ;;  %v26441_v63 = vsel %vm462_vm0, %v25877_v4, %v10004_v46 }
 0x93f   : > { %16384 = vmatprep.mubr.bf16.mxu1 %v10073_v38  ;;  %17244 = vmatprep.mubr.bf16.mxu0 %v10073_v38  ;;  %v10028_v62 = vrot.slane %v26410_v25, 5  ;;  %v10025_v39 = vrot.slane %v26410_v25, 4  ;;  %v26447_v44 = vsel %vm1020_vm2, %v27178_v1, %v10013_v54  ;;  %v26451_v29 = vsel %vm1013_vm7, %v25899_v17, %v10010_v45 }
 0x940   : > { %16385 = vmatmul.mubr.bf16.vlgmr.msra.gmra.mrb[100].mxu1 %v27177_v43  ;;  %17245 = vmatmul.mubr.bf16.vlgmr.msra.gmra.mrb[16].mxu0 %v27177_v43  ;;  %v10017_v14 = vsel %vm980_vm3, %v9995_v8, %v10016_v19  ;;  %v10034_v28 = vrot.slane %v26410_v25, 7  ;;  %v10031_v43 = vrot.slane %v26410_v25, 6  ;;  %v10038_v2 = vrot.slane %v26423_v9, 1 }
 0x941   : > { %16396 = vmatpush1.bf16.msra.mxu1 %v23904_v51  ;;  %21755 = vmatpush3.bf16.msra.mxu0 %v23908_v35  ;;  %v26455_v38 = vpack.c.bf16 %v10017_v14, %v9996_v27  ;;  %v10023_v51 = vsel %vm994_vm6, %v10001_v41, %v10022_v0  ;;  %v10020_v35 = vsel %vm987_vm4, %v9998_v23, %v10019_v13  ;;  %v10041_v49 = vrot.slane %v26423_v9, 2 }
 0x942   : > { %16427 = vmatprep.mubr.bf16.mxu1 %v10075_v16  ;;  %17285 = vmatprep.mubr.bf16.mxu0 %v10075_v16  ;;  %v26460_v12 = vpack.c.bf16 %v10023_v51, %v10002_v48  ;;  %v26463_v8 = vpack.c.bf16 %v10020_v35, %v26427_v22  ;;  %v10029_v56 = vsel %vm969_vm5, %v10007_v47, %v10028_v62  ;;  %v10050_v7 = vrot.slane %v26423_v9, 5 }
 0x943   : > { %16397 = vmatprep.subr.bf16.mxu1 %v23911_v6  ;;  %21756 = vmatprep.subr.bf16.mxu0 %v23912_v24  ;;  %v26467_v16 = vpack.c.bf16 %v10029_v56, %v26437_v5  ;;  %v10026_v27 = vsel %vm462_vm0, %v10004_v46, %v10025_v39  ;;  %v10035_v41 = vsel %vm1020_vm2, %v10013_v54, %v10034_v28  ;;  %v23914_v6 = vld [vmem:[#allocation6 + $0x1ef0] ss:$12 sps:$4 sm:$0xff]   ;;  %v23918_v24 = vld [vmem:[#allocation6 + $0x1ef8] ss:$12 sps:$4 sm:$0xff]   ;;  %v10047_v37 = vrot.slane %v26423_v9, 4 }
 0x944   : > { %v10032_v23 = vsel %vm1013_vm7, %v10010_v45, %v10031_v43  ;;  %v26473_v48 = vpack.c.bf16 %v10026_v27, %v26441_v63  ;;  %v26476_v60 = vpack.c.bf16 %v10035_v41, %v26447_v44  ;;  %v23921_v46 = vld [vmem:[#allocation6 + $0x1f0c] ss:$12 sps:$4 sm:$0xff]   ;;  %v23922_v54 = vld [vmem:[#allocation6 + $0x1fd0] ss:$12 sps:$4 sm:$0xff]   ;;  %v26484_v45 = vpack.c.bf16 %v26410_v25, %v26401_v18  ;;  %v23919_v25 = vld [vmem:[#allocation6 + $0x1f08] ss:$12 sps:$4 sm:$0xff]  }
 0x945   : > { %16398 = vmatpush1.bf16.msra.mxu1 %v23909_v30  ;;  %21757 = vmatpush3.bf16.msra.mxu0 %v23913_v3  ;;  %v26479_v47 = vpack.c.bf16 %v10032_v23, %v26451_v29  ;;  %v10039_v30 = vsel %vm980_vm3, %v10016_v19, %v10038_v2  ;;  %v10044_v3 = vrot.slane %v26423_v9, 3  ;;  %v10042_v50 = vsel %vm987_vm4, %v10019_v13, %v10041_v49 }
 0x946   : > { %16399 = vmatprep.subr.bf16.mxu1 %v23916_v52  ;;  %21758 = vmatprep.subr.bf16.mxu0 %v23917_v34  ;;  %v26490_v10 = vpack.c.bf16 %v10039_v30, %v10017_v14  ;;  %v10056_v52 = vrot.slane %v26423_v9, 7  ;;  %v10053_v34 = vrot.slane %v26423_v9, 6  ;;  %v10051_v57 = vsel %vm969_vm5, %v10028_v62, %v10050_v7  ;;  %v23926_v14 = vld [vmem:[#allocation6 + $0x1f24] ss:$12 sps:$4 sm:$0xff]  }
 0x947   : > { %v10045_v19 = vsel %vm994_vm6, %v10022_v0, %v10044_v3  ;;  %v26500_v26 = vpack.c.bf16 %v10042_v50, %v10020_v35  ;;  %v26502_v31 = vpack.c.bf16 %v10051_v57, %v10029_v56  ;;  %v10048_v9 = vsel %vm462_vm0, %v10025_v39, %v10047_v37  ;;  %v23924_v56 = vld [vmem:[#allocation6 + $0x1f20] ss:$12 sps:$4 sm:$0xff]   ;;  %v23928_v39 = vld [vmem:[#allocation6 + $0x1f28] ss:$12 sps:$4 sm:$0xff]  }
 0x948   : > { %v26498_v61 = vpack.c.bf16 %v10045_v19, %v10023_v51  ;;  %v10054_v0 = vsel %vm1013_vm7, %v10031_v43, %v10053_v34  ;;  %v26509_v13 = vsel %vm980_vm3, %v10038_v2, %v25851_v32  ;;  %v26511_v62 = vpack.c.bf16 %v10048_v9, %v10026_v27  ;;  %v23931_v27 = vld [vmem:[#allocation6 + $0x1f3c] ss:$12 sps:$4 sm:$0xff]  }
 0x949   : > { %16400 = vmatpush1.bf16.msra.mxu1 %v23914_v6  ;;  %21759 = vmatpush3.bf16.msra.mxu0 %v23918_v24  ;;  %v10057_v6 = vsel %vm1020_vm2, %v10034_v28, %v10056_v52  ;;  %v26515_v51 = vpack.c.bf16 %v10054_v0, %v10032_v23  ;;  %v26518_v35 = vpack.c.bf16 %v26509_v13, %v10039_v30 }
 0x94a   : > { %16401 = vmatprep.subr.bf16.mxu1 %v23921_v46  ;;  %21760 = vmatprep.subr.bf16.mxu0 %v23922_v54  ;;  %v26513_v24 = vpack.c.bf16 %v10057_v6, %v10035_v41  ;;  %v26522_v28 = vsel %vm994_vm6, %v10044_v3, %v25860_v59  ;;  %v26526_v2 = vsel %vm987_vm4, %v10041_v49, %v25865_v33  ;;  %v23932_v41 = vld [vmem:[#allocation6 + $0x2000] ss:$12 sps:$4 sm:$0xff]  }
 0x94b   : > { %v26530_v43 = vsel %vm969_vm5, %v10050_v7, %v25868_v55  ;;  %v26536_v23 = vpack.c.bf16 %v26526_v2, %v10042_v50  ;;  %v26543_v49 = vsel %vm462_vm0, %v10047_v37, %v25877_v4  ;;  %v10071_v7 = vsel %vm1020_vm2, %v10056_v52, %v27178_v1  ;;  %v23933_v37 = vld [vmem:[#allocation6 + $0x1f40] ss:$12 sps:$4 sm:$0xff]   ;;  %v23937_v52 = vld [vmem:[#allocation6 + $0x2018] ss:$12 sps:$4 sm:$0xff]  }
 0x94c   : > { %v26539_v46 = vpack.c.bf16 %v26530_v43, %v10051_v57  ;;  %v26552_v54 = vpack.c.bf16 %v26543_v49, %v10048_v9  ;;  %v26554_v30 = vpack.c.bf16 %v10071_v7, %v10057_v6  ;;  %v23929_v57 = vld [vmem:[#allocation6 + $0x1f38] ss:$12 sps:$4 sm:$0xff]   ;;  %v23936_v3 = vld [vmem:[#allocation6 + $0x1f54] ss:$12 sps:$4 sm:$0xff]   ;;  %v23943_v6 = vld [vmem:[#allocation6 + $0x1f70] ss:$12 sps:$4 sm:$0xff]  }
 0x94d   : > { %16402 = vmatpush1.bf16.msra.mxu1 %v23919_v25  ;;  %21761 = vmatpush3.bf16.msra.mxu0 %v23923_v21  ;;  %v26533_v21 = vpack.c.bf16 %v26522_v28, %v10045_v19  ;;  %v23938_v25 = vld [vmem:[#allocation6 + $0x1f58] ss:$12 sps:$4 sm:$0xff]   ;;  %v23939_v9 = vld [vmem:[#allocation6 + $0x1f68] ss:$12 sps:$4 sm:$0xff]  }
 0x94e   : > { %16403 = vmatprep.subr.bf16.mxu1 %v23926_v14  ;;  %21762 = vmatprep.subr.bf16.mxu0 %v23927_v20  ;;  %v26549_v20 = vsel %vm1013_vm7, %v10053_v34, %v25899_v17  ;;  %v23934_v34 = vld [vmem:[#allocation6 + $0x1f50] ss:$12 sps:$4 sm:$0xff]   ;;  %v23941_v19 = vld [vmem:[#allocation6 + $0x1f6c] ss:$12 sps:$4 sm:$0xff]  }
 0x94f   : > { %v26557_v50 = vpack.c.bf16 %v26549_v20, %v10054_v0  ;;  %v23942_v14 = vld [vmem:[#allocation6 + $0x2030] ss:$12 sps:$4 sm:$0xff]  }
 0x950   : > { %v23946_v0 = vld [vmem:[#allocation6 + $0x1f84] ss:$12 sps:$4 sm:$0xff]   ;;  %v23951_v7 = vld [vmem:[#allocation6 + $0x1f9c] ss:$12 sps:$4 sm:$0xff]  }
 0x951   : > { %16404 = vmatpush1.bf16.msra.mxu1 %v23924_v56  ;;  %21763 = vmatpush3.bf16.msra.mxu0 %v23928_v39  ;;  %v23947_v56 = vld [vmem:[#allocation6 + $0x2108] ss:$12 sps:$4 sm:$0xff]   ;;  %v23944_v39 = vld [vmem:[#allocation6 + $0x1f80] ss:$12 sps:$4 sm:$0xff]  }
 0x952   : > { %16405 = vmatprep.subr.bf16.mxu1 %v23931_v27  ;;  %21764 = vmatprep.subr.bf16.mxu0 %v23932_v41  ;;  %v23948_v27 = vld [vmem:[#allocation6 + $0x2048] ss:$12 sps:$4 sm:$0xff]   ;;  %v26561_v41 = vpack.c.bf16 %v26427_v22, %v25865_v33  ;;  %v23954_v22 = vld [vmem:[#allocation6 + $0x1fb0] ss:$12 sps:$4 sm:$0xff]  }
 0x955   : > { %16406 = vmatpush1.bf16.msra.mxu1 %v23929_v57  ;;  %21765 = vmatpush3.bf16.msra.mxu0 %v23933_v37  ;;  %v23952_v57 = vld [vmem:[#allocation6 + $0x2120] ss:$12 sps:$4 sm:$0xff]   ;;  %v26566_v37 = vpack.c.bf16 %v26437_v5, %v25868_v55  ;;  %v23959_v5 = vld [vmem:[#allocation6 + $0x1fc8] ss:$12 sps:$4 sm:$0xff]  }
 0x956   : > { %16407 = vmatprep.subr.bf16.mxu1 %v23936_v3  ;;  %21766 = vmatprep.subr.bf16.mxu0 %v23937_v52  ;;  %v23949_v3 = vld [vmem:[#allocation6 + $0x1f98] ss:$12 sps:$4 sm:$0xff]   ;;  %v23953_v52 = vld [vmem:[#allocation6 + $0x2060] ss:$12 sps:$4 sm:$0xff]  }
 0x959   : > { %16408 = vmatpush1.bf16.msra.mxu1 %v23934_v34  ;;  %21767 = vmatpush3.bf16.msra.mxu0 %v23938_v25  ;;  %v23956_v34 = vld [vmem:[#allocation6 + $0x1fb4] ss:$12 sps:$4 sm:$0xff]   ;;  %v23957_v25 = vld [vmem:[#allocation6 + $0x2138] ss:$12 sps:$4 sm:$0xff]  }
 0x95a   : > { %16409 = vmatprep.subr.bf16.mxu1 %v23941_v19  ;;  %21768 = vmatprep.subr.bf16.mxu0 %v23942_v14  ;;  %v23958_v19 = vld [vmem:[#allocation6 + $0x2078] ss:$12 sps:$4 sm:$0xff]  }
 0x95b   : > { %v23961_v14 = vld [vmem:[#allocation6 + $0x1fcc] ss:$12 sps:$4 sm:$0xff]  }
 0x95d   : > { %16410 = vmatpush1.bf16.msra.mxu1 %v23939_v9  ;;  %21769 = vmatpush3.bf16.msra.mxu0 %v23943_v6  ;;  %v23962_v9 = vld [vmem:[#allocation6 + $0x2150] ss:$12 sps:$4 sm:$0xff]  }
 0x95e   : > { %16411 = vmatprep.subr.bf16.mxu1 %v23946_v0  ;;  %21776 = vmatprep.subr.bf16.mxu0 %v23947_v56  ;;  %v23963_v6 = vld [vmem:[#allocation6 + $0x2090] ss:$12 sps:$4 sm:$0xff]   ;;  %v23967_v56 = vld [vmem:[#allocation6 + $0x2168] ss:$12 sps:$4 sm:$0xff]  }
 0x95f   : > { %v23966_v0 = vld [vmem:[#allocation6 + $0x1fe4] ss:$12 sps:$4 sm:$0xff]  }
 0x960   : > { %17286 = vmatmul.mubr.bf16.vlgmr.msra.gmra.mrb[20].mxu0 %v26561_v41 }
 0x961   : > { %16412 = vmatpush1.bf16.msra.mxu1 %v23944_v39  ;;  %21777 = vmatpush3.bf16.msra.mxu0 %v23948_v27  ;;  %v23964_v39 = vld [vmem:[#allocation6 + $0x1fe0] ss:$12 sps:$4 sm:$0xff]   ;;  %v23968_v27 = vld [vmem:[#allocation6 + $0x20a8] ss:$12 sps:$4 sm:$0xff]  }
 0x962   : > { %17326 = vmatprep.mubr.bf16.mxu0 %v26566_v37  ;;  %16413 = vmatprep.subr.bf16.mxu1 %v23951_v7  ;;  %v23971_v7 = vld [vmem:[#allocation6 + $0x1ffc] ss:$12 sps:$4 sm:$0xff]  }
 0x963   : > { %21778 = vmatprep.subr.bf16.mxu0 %v23952_v57  ;;  %v23972_v57 = vld [vmem:[#allocation6 + $0x2180] ss:$12 sps:$4 sm:$0xff]  }
 0x965   : > { %16414 = vmatpush1.bf16.msra.mxu1 %v23949_v3  ;;  %21779 = vmatpush3.bf16.msra.mxu0 %v23953_v52  ;;  %v23969_v3 = vld [vmem:[#allocation6 + $0x1ff8] ss:$12 sps:$4 sm:$0xff]   ;;  %v23973_v52 = vld [vmem:[#allocation6 + $0x20c0] ss:$12 sps:$4 sm:$0xff]  }
 0x966   : > { %16415 = vmatprep.subr.bf16.mxu1 %v23956_v34  ;;  %21780 = vmatprep.subr.bf16.mxu0 %v23957_v25  ;;  %v23976_v34 = vld [vmem:[#allocation6 + $0x2014] ss:$12 sps:$4 sm:$0xff]   ;;  %v23977_v25 = vld [vmem:[#allocation6 + $0x2198] ss:$12 sps:$4 sm:$0xff]  }
 0x969   : > { %16416 = vmatpush1.bf16.msra.mxu1 %v23954_v22  ;;  %21781 = vmatpush3.bf16.msra.mxu0 %v23958_v19  ;;  %v23974_v22 = vld [vmem:[#allocation6 + $0x2010] ss:$12 sps:$4 sm:$0xff]   ;;  %v23978_v19 = vld [vmem:[#allocation6 + $0x20d8] ss:$12 sps:$4 sm:$0xff]  }
 0x96a   : > { %16417 = vmatprep.subr.bf16.mxu1 %v23961_v14  ;;  %21782 = vmatprep.subr.bf16.mxu0 %v23962_v9  ;;  %v23981_v14 = vld [vmem:[#allocation6 + $0x202c] ss:$12 sps:$4 sm:$0xff]   ;;  %v23982_v9 = vld [vmem:[#allocation6 + $0x21b0] ss:$12 sps:$4 sm:$0xff]  }
 0x96d   : > { %16418 = vmatpush1.bf16.msra.mxu1 %v23959_v5  ;;  %21783 = vmatpush3.bf16.msra.mxu0 %v23963_v6  ;;  %v23979_v5 = vld [vmem:[#allocation6 + $0x2028] ss:$12 sps:$4 sm:$0xff]   ;;  %v23983_v6 = vld [vmem:[#allocation6 + $0x20f0] ss:$12 sps:$4 sm:$0xff]  }
 0x96e   : > { %16419 = vmatprep.subr.bf16.mxu1 %v23966_v0  ;;  %21784 = vmatprep.subr.bf16.mxu0 %v23967_v56  ;;  %v23986_v0 = vld [vmem:[#allocation6 + $0x2044] ss:$12 sps:$4 sm:$0xff]   ;;  %v23987_v56 = vld [vmem:[#allocation6 + $0x2288] ss:$12 sps:$4 sm:$0xff]  }
 0x971   : > { %16420 = vmatpush1.bf16.msra.mxu1 %v23964_v39  ;;  %21785 = vmatpush3.bf16.msra.mxu0 %v23968_v27  ;;  %v23984_v39 = vld [vmem:[#allocation6 + $0x2040] ss:$12 sps:$4 sm:$0xff]   ;;  %v26571_v27 = vpack.c.bf16 %v26441_v63, %v25877_v4 }
 0x972   : > { %16421 = vmatprep.subr.bf16.mxu1 %v23971_v7  ;;  %21786 = vmatprep.subr.bf16.mxu0 %v23972_v57  ;;  %v23988_v7 = vld [vmem:[#allocation6 + $0x21c8] ss:$12 sps:$4 sm:$0xff]   ;;  %v23993_v63 = vld [vmem:[#allocation6 + $0x21e0] ss:$12 sps:$4 sm:$0xff]  }
 0x973   : > { %v23991_v57 = vld [vmem:[#allocation6 + $0x205c] ss:$12 sps:$4 sm:$0xff]  }
 0x975   : > { %16422 = vmatpush1.bf16.msra.mxu1 %v23969_v3  ;;  %21787 = vmatpush3.bf16.msra.mxu0 %v23973_v52  ;;  %v23992_v3 = vld [vmem:[#allocation6 + $0x22a0] ss:$12 sps:$4 sm:$0xff]   ;;  %v26577_v52 = vpack.c.bf16 %v26447_v44, %v27178_v1  ;;  %v24002_v1 = vld [vmem:[#allocation6 + $0x22d0] ss:$12 sps:$4 sm:$0xff]   ;;  %v23999_v44 = vld [vmem:[#allocation6 + $0x2088] ss:$12 sps:$4 sm:$0xff]  }
 0x976   : > { %16423 = vmatprep.subr.bf16.mxu1 %v23976_v34  ;;  %21788 = vmatprep.subr.bf16.mxu0 %v23977_v25  ;;  %v23989_v34 = vld [vmem:[#allocation6 + $0x2058] ss:$12 sps:$4 sm:$0xff]   ;;  %v23996_v25 = vld [vmem:[#allocation6 + $0x2074] ss:$12 sps:$4 sm:$0xff]  }
 0x979   : > { %16424 = vmatpush1.bf16.msra.mxu1 %v23974_v22  ;;  %21789 = vmatpush3.bf16.msra.mxu0 %v23978_v19  ;;  %v23997_v22 = vld [vmem:[#allocation6 + $0x22b8] ss:$12 sps:$4 sm:$0xff]  }
 0x97a   : > { %16425 = vmatprep.subr.bf16.mxu1 %v23981_v14  ;;  %21790 = vmatprep.subr.bf16.mxu0 %v23982_v9  ;;  %v23998_v19 = vld [vmem:[#allocation6 + $0x21f8] ss:$12 sps:$4 sm:$0xff]  }
 0x97b   : > { %v24001_v14 = vld [vmem:[#allocation6 + $0x208c] ss:$12 sps:$4 sm:$0xff]   ;;  %v24006_v9 = vld [vmem:[#allocation6 + $0x20a4] ss:$12 sps:$4 sm:$0xff]  }
 0x97d   : > { %16426 = vmatpush1.bf16.msra.mxu1 %v23979_v5  ;;  %21791 = vmatpush3.bf16.msra.mxu0 %v23983_v6  ;;  %v24007_v5 = vld [vmem:[#allocation6 + $0x22e8] ss:$12 sps:$4 sm:$0xff]   ;;  %v24004_v6 = vld [vmem:[#allocation6 + $0x20a0] ss:$12 sps:$4 sm:$0xff]  }
 0x97e   : > { %16438 = vmatprep.subr.bf16.mxu1 %v23986_v0  ;;  %21798 = vmatprep.subr.bf16.mxu0 %v23987_v56  ;;  %v24008_v0 = vld [vmem:[#allocation6 + $0x2228] ss:$12 sps:$4 sm:$0xff]  }
 0x97f   : > { %v24011_v56 = vld [vmem:[#allocation6 + $0x20bc] ss:$12 sps:$4 sm:$0xff]  }
 0x980   : > { %16428 = vmatmul.mubr.bf16.vlgmr.msra.gmra.mrb[100].mxu1 %v26561_v41  ;;  %17327 = vmatmul.mubr.bf16.vlgmr.msra.gmra.mrb[24].mxu0 %v26571_v27  ;;  %v23994_v41 = vld [vmem:[#allocation6 + $0x2070] ss:$12 sps:$4 sm:$0xff]  }
 0x981   : > { %16439 = vmatpush1.bf16.msra.mxu1 %v23984_v39  ;;  %16470 = vmatprep.mubr.bf16.mxu1 %v26566_v37  ;;  %v24003_v37 = vld [vmem:[#allocation6 + $0x2210] ss:$12 sps:$4 sm:$0xff]   ;;  %v24012_v39 = vld [vmem:[#allocation6 + $0x2300] ss:$12 sps:$4 sm:$0xff]  }
 0x982   : > { %21799 = vmatpush3.bf16.msra.mxu0 %v23988_v7  ;;  %17367 = vmatprep.mubr.bf16.mxu0 %v26577_v52  ;;  %v24009_v7 = vld [vmem:[#allocation6 + $0x20b8] ss:$12 sps:$4 sm:$0xff]  }
 0x983   : > { %16440 = vmatprep.subr.bf16.mxu1 %v23991_v57  ;;  %21800 = vmatprep.subr.bf16.mxu0 %v23992_v3  ;;  %v24013_v57 = vld [vmem:[#allocation6 + $0x2240] ss:$12 sps:$4 sm:$0xff]  }
 0x984   : > { %v24016_v3 = vld [vmem:[#allocation6 + $0x20d4] ss:$12 sps:$4 sm:$0xff]  }
 0x985   : > { %16441 = vmatpush1.bf16.msra.mxu1 %v23989_v34  ;;  %v24017_v34 = vld [vmem:[#allocation6 + $0x2318] ss:$12 sps:$4 sm:$0xff]  }
 0x986   : > { %21801 = vmatpush3.bf16.msra.mxu0 %v23993_v63  ;;  %16442 = vmatprep.subr.bf16.mxu1 %v23996_v25  ;;  %v24014_v63 = vld [vmem:[#allocation6 + $0x20d0] ss:$12 sps:$4 sm:$0xff]   ;;  %v24018_v25 = vld [vmem:[#allocation6 + $0x2258] ss:$12 sps:$4 sm:$0xff]  }
 0x987   : > { %21802 = vmatprep.subr.bf16.mxu0 %v23997_v22  ;;  %v24021_v22 = vld [vmem:[#allocation6 + $0x20ec] ss:$12 sps:$4 sm:$0xff]  }
 0x989   : > { %16443 = vmatpush1.bf16.msra.mxu1 %v23994_v41  ;;  %v24022_v41 = vld [vmem:[#allocation6 + $0x2330] ss:$12 sps:$4 sm:$0xff]  }
 0x98a   : > { %21803 = vmatpush3.bf16.msra.mxu0 %v23998_v19  ;;  %16444 = vmatprep.subr.bf16.mxu1 %v24001_v14  ;;  %v24019_v19 = vld [vmem:[#allocation6 + $0x20e8] ss:$12 sps:$4 sm:$0xff]   ;;  %v24023_v14 = vld [vmem:[#allocation6 + $0x2270] ss:$12 sps:$4 sm:$0xff]  }
 0x98b   : > { %21804 = vmatprep.subr.bf16.mxu0 %v24002_v1  ;;  %v24026_v1 = vld [vmem:[#allocation6 + $0x2104] ss:$12 sps:$4 sm:$0xff]  }
 0x98d   : > { %16445 = vmatpush1.bf16.msra.mxu1 %v23999_v44  ;;  %v24027_v44 = vld [vmem:[#allocation6 + $0x2408] ss:$12 sps:$4 sm:$0xff]  }
 0x98e   : > { %21805 = vmatpush3.bf16.msra.mxu0 %v24003_v37  ;;  %16446 = vmatprep.subr.bf16.mxu1 %v24006_v9  ;;  %v24024_v37 = vld [vmem:[#allocation6 + $0x2100] ss:$12 sps:$4 sm:$0xff]   ;;  %v24028_v9 = vld [vmem:[#allocation6 + $0x2348] ss:$12 sps:$4 sm:$0xff]  }
 0x98f   : > { %21806 = vmatprep.subr.bf16.mxu0 %v24007_v5  ;;  %v26583_v5 = vpack.c.bf16 %v26451_v29, %v25899_v17  ;;  %v24038_v29 = vld [vmem:[#allocation6 + $0x2378] ss:$12 sps:$4 sm:$0xff]  }
 0x991   : > { %16447 = vmatpush1.bf16.msra.mxu1 %v24004_v6  ;;  %v24031_v6 = vld [vmem:[#allocation6 + $0x211c] ss:$12 sps:$4 sm:$0xff]  }
 0x992   : > { %21807 = vmatpush3.bf16.msra.mxu0 %v24008_v0  ;;  %16448 = vmatprep.subr.bf16.mxu1 %v24011_v56  ;;  %v24032_v0 = vld [vmem:[#allocation6 + $0x2420] ss:$12 sps:$4 sm:$0xff]   ;;  %v24029_v56 = vld [vmem:[#allocation6 + $0x2118] ss:$12 sps:$4 sm:$0xff]  }
 0x993   : > { %21808 = vmatprep.subr.bf16.mxu0 %v24012_v39  ;;  %v24033_v39 = vld [vmem:[#allocation6 + $0x2360] ss:$12 sps:$4 sm:$0xff]  }
 0x995   : > { %16449 = vmatpush1.bf16.msra.mxu1 %v24009_v7  ;;  %v24036_v7 = vld [vmem:[#allocation6 + $0x2134] ss:$12 sps:$4 sm:$0xff]  }
 0x996   : > { %21809 = vmatpush3.bf16.msra.mxu0 %v24013_v57  ;;  %16450 = vmatprep.subr.bf16.mxu1 %v24016_v3  ;;  %v24037_v57 = vld [vmem:[#allocation6 + $0x2438] ss:$12 sps:$4 sm:$0xff]   ;;  %v24034_v3 = vld [vmem:[#allocation6 + $0x2130] ss:$12 sps:$4 sm:$0xff]  }
 0x997   : > { %21810 = vmatprep.subr.bf16.mxu0 %v24017_v34  ;;  %v24041_v34 = vld [vmem:[#allocation6 + $0x214c] ss:$12 sps:$4 sm:$0xff]  }
 0x999   : > { %16451 = vmatpush1.bf16.msra.mxu1 %v24014_v63  ;;  %v24042_v63 = vld [vmem:[#allocation6 + $0x2450] ss:$12 sps:$4 sm:$0xff]  }
 0x99a   : > { %21811 = vmatpush3.bf16.msra.mxu0 %v24018_v25  ;;  %16452 = vmatprep.subr.bf16.mxu1 %v24021_v22  ;;  %v24039_v25 = vld [vmem:[#allocation6 + $0x2148] ss:$12 sps:$4 sm:$0xff]   ;;  %v24043_v22 = vld [vmem:[#allocation6 + $0x2390] ss:$12 sps:$4 sm:$0xff]  }
 0x99b   : > { %21812 = vmatprep.subr.bf16.mxu0 %v24022_v41  ;;  %v24046_v41 = vld [vmem:[#allocation6 + $0x2164] ss:$12 sps:$4 sm:$0xff]  }
 0x99d   : > { %16453 = vmatpush1.bf16.msra.mxu1 %v24019_v19  ;;  %v24047_v19 = vld [vmem:[#allocation6 + $0x2468] ss:$12 sps:$4 sm:$0xff]  }
 0x99e   : > { %21813 = vmatpush3.bf16.msra.mxu0 %v24023_v14  ;;  %16454 = vmatprep.subr.bf16.mxu1 %v24026_v1  ;;  %v24044_v14 = vld [vmem:[#allocation6 + $0x2160] ss:$12 sps:$4 sm:$0xff]   ;;  %v24048_v1 = vld [vmem:[#allocation6 + $0x23a8] ss:$12 sps:$4 sm:$0xff]  }
 0x99f   : > { %21820 = vmatprep.subr.bf16.mxu0 %v24027_v44  ;;  %v24051_v44 = vld [vmem:[#allocation6 + $0x217c] ss:$12 sps:$4 sm:$0xff]  }
 0x9a1   : > { %17368 = vmatmul.mubr.bf16.vlgmr.msra.gmra.mrb[28].mxu0 %v26583_v5  ;;  %16455 = vmatpush1.bf16.msra.mxu1 %v24024_v37  ;;  %v24052_v37 = vld [vmem:[#allocation6 + $0x2480] ss:$12 sps:$4 sm:$0xff]  }
 0x9a2   : > { %21821 = vmatpush3.bf16.msra.mxu0 %v24028_v9  ;;  %17408 = vmatprep.mubr.bf16.mxu0 %v26455_v38  ;;  %v24049_v9 = vld [vmem:[#allocation6 + $0x2178] ss:$12 sps:$4 sm:$0xff]  }
 0x9a3   : > { %16456 = vmatprep.subr.bf16.mxu1 %v24031_v6  ;;  %21822 = vmatprep.subr.bf16.mxu0 %v24032_v0  ;;  %v24053_v6 = vld [vmem:[#allocation6 + $0x23c0] ss:$12 sps:$4 sm:$0xff]  }
 0x9a4   : > { %v24056_v0 = vld [vmem:[#allocation6 + $0x2194] ss:$12 sps:$4 sm:$0xff]  }
 0x9a5   : > { %16457 = vmatpush1.bf16.msra.mxu1 %v24029_v56  ;;  %v24057_v56 = vld [vmem:[#allocation6 + $0x2498] ss:$12 sps:$4 sm:$0xff]  }
 0x9a6   : > { %21823 = vmatpush3.bf16.msra.mxu0 %v24033_v39  ;;  %16458 = vmatprep.subr.bf16.mxu1 %v24036_v7  ;;  %v24054_v39 = vld [vmem:[#allocation6 + $0x2190] ss:$12 sps:$4 sm:$0xff]   ;;  %v24058_v7 = vld [vmem:[#allocation6 + $0x23d8] ss:$12 sps:$4 sm:$0xff]  }
 0x9a7   : > { %21824 = vmatprep.subr.bf16.mxu0 %v24037_v57  ;;  %v24061_v57 = vld [vmem:[#allocation6 + $0x21ac] ss:$12 sps:$4 sm:$0xff]  }
 0x9a9   : > { %16459 = vmatpush1.bf16.msra.mxu1 %v24034_v3  ;;  %v24062_v3 = vld [vmem:[#allocation6 + $0x24b0] ss:$12 sps:$4 sm:$0xff]  }
 0x9aa   : > { %21825 = vmatpush3.bf16.msra.mxu0 %v24038_v29  ;;  %16460 = vmatprep.subr.bf16.mxu1 %v24041_v34  ;;  %v24059_v29 = vld [vmem:[#allocation6 + $0x21a8] ss:$12 sps:$4 sm:$0xff]   ;;  %v24063_v34 = vld [vmem:[#allocation6 + $0x23f0] ss:$12 sps:$4 sm:$0xff]  }
 0x9ab   : > { %21826 = vmatprep.subr.bf16.mxu0 %v24042_v63  ;;  %v24066_v63 = vld [vmem:[#allocation6 + $0x21c4] ss:$12 sps:$4 sm:$0xff]  }
 0x9ad   : > { %16461 = vmatpush1.bf16.msra.mxu1 %v24039_v25  ;;  %v24067_v25 = vld [vmem:[#allocation6 + $0x2588] ss:$12 sps:$4 sm:$0xff]  }
 0x9ae   : > { %21827 = vmatpush3.bf16.msra.mxu0 %v24043_v22  ;;  %16462 = vmatprep.subr.bf16.mxu1 %v24046_v41  ;;  %v24064_v22 = vld [vmem:[#allocation6 + $0x21c0] ss:$12 sps:$4 sm:$0xff]   ;;  %v24068_v41 = vld [vmem:[#allocation6 + $0x24c8] ss:$12 sps:$4 sm:$0xff]  }
 0x9af   : > { %21828 = vmatprep.subr.bf16.mxu0 %v24047_v19  ;;  %v26589_v19 = vpack.c.bf16 %v26401_v18, %v27142_v15  ;;  %v24077_v18 = vld [vmem:[#allocation6 + $0x25b8] ss:$12 sps:$4 sm:$0xff]  }
 0x9b1   : > { %16463 = vmatpush1.bf16.msra.mxu1 %v24044_v14  ;;  %v24071_v14 = vld [vmem:[#allocation6 + $0x21dc] ss:$12 sps:$4 sm:$0xff]  }
 0x9b2   : > { %21829 = vmatpush3.bf16.msra.mxu0 %v24048_v1  ;;  %16464 = vmatprep.subr.bf16.mxu1 %v24051_v44  ;;  %v24072_v1 = vld [vmem:[#allocation6 + $0x25a0] ss:$12 sps:$4 sm:$0xff]   ;;  %v24069_v44 = vld [vmem:[#allocation6 + $0x21d8] ss:$12 sps:$4 sm:$0xff]  }
 0x9b3   : > { %21830 = vmatprep.subr.bf16.mxu0 %v24052_v37  ;;  %v24073_v37 = vld [vmem:[#allocation6 + $0x24e0] ss:$12 sps:$4 sm:$0xff]  }
 0x9b5   : > { %16465 = vmatpush1.bf16.msra.mxu1 %v24049_v9  ;;  %v24076_v9 = vld [vmem:[#allocation6 + $0x21f4] ss:$12 sps:$4 sm:$0xff]  }
 0x9b6   : > { %21831 = vmatpush3.bf16.msra.mxu0 %v24053_v6  ;;  %16466 = vmatprep.subr.bf16.mxu1 %v24056_v0  ;;  %v24074_v6 = vld [vmem:[#allocation6 + $0x21f0] ss:$12 sps:$4 sm:$0xff]   ;;  %v24081_v0 = vld [vmem:[#allocation6 + $0x220c] ss:$12 sps:$4 sm:$0xff]  }
 0x9b7   : > { %21832 = vmatprep.subr.bf16.mxu0 %v24057_v56  ;;  %v24082_v56 = vld [vmem:[#allocation6 + $0x25d0] ss:$12 sps:$4 sm:$0xff]  }
 0x9b9   : > { %16467 = vmatpush1.bf16.msra.mxu1 %v24054_v39  ;;  %v24079_v39 = vld [vmem:[#allocation6 + $0x2208] ss:$12 sps:$4 sm:$0xff]  }
 0x9ba   : > { %21833 = vmatpush3.bf16.msra.mxu0 %v24058_v7  ;;  %16468 = vmatprep.subr.bf16.mxu1 %v24061_v57  ;;  %v24086_v7 = vld [vmem:[#allocation6 + $0x2224] ss:$12 sps:$4 sm:$0xff]   ;;  %v24087_v57 = vld [vmem:[#allocation6 + $0x25e8] ss:$12 sps:$4 sm:$0xff]  }
 0x9bb   : > { %21834 = vmatprep.subr.bf16.mxu0 %v24062_v3  ;;  %v24084_v3 = vld [vmem:[#allocation6 + $0x2220] ss:$12 sps:$4 sm:$0xff]  }
 0x9bd   : > { %16469 = vmatpush1.bf16.msra.mxu1 %v24059_v29  ;;  %v24088_v29 = vld [vmem:[#allocation6 + $0x2528] ss:$12 sps:$4 sm:$0xff]  }
 0x9be   : > { %21835 = vmatpush3.bf16.msra.mxu0 %v24063_v34  ;;  %16481 = vmatprep.subr.bf16.mxu1 %v24066_v63  ;;  %v24091_v34 = vld [vmem:[#allocation6 + $0x223c] ss:$12 sps:$4 sm:$0xff]   ;;  %v24092_v63 = vld [vmem:[#allocation6 + $0x2600] ss:$12 sps:$4 sm:$0xff]  }
 0x9bf   : > { %21842 = vmatprep.subr.bf16.mxu0 %v24067_v25  ;;  %v24089_v25 = vld [vmem:[#allocation6 + $0x2238] ss:$12 sps:$4 sm:$0xff]  }
 0x9c0   : > { %16471 = vmatmul.mubr.bf16.vlgmr.msra.gmra.mrb[100].mxu1 %v26571_v27  ;;  %v24078_v27 = vld [vmem:[#allocation6 + $0x24f8] ss:$12 sps:$4 sm:$0xff]  }
 0x9c1   : > { %21119 = vmatmul.mubr.msk.bf16.vlgmr.msra.gmra.mrb[32].mxu0 %vm26072_vm10, %v26589_v19  ;;  %16482 = vmatpush1.bf16.msra.mxu1 %v24064_v22  ;;  %v24093_v22 = vld [vmem:[#allocation6 + $0x2540] ss:$12 sps:$4 sm:$0xff]  }
 0x9c2   : > { %16513 = vmatprep.mubr.bf16.mxu1 %v26577_v52  ;;  %21843 = vmatpush3.bf16.msra.mxu0 %v24068_v41  ;;  %v24083_v52 = vld [vmem:[#allocation6 + $0x2510] ss:$12 sps:$4 sm:$0xff]   ;;  %v24096_v41 = vld [vmem:[#allocation6 + $0x2254] ss:$12 sps:$4 sm:$0xff]  }
 0x9c3   : > { %17449 = vmatprep.mubr.bf16.mxu0 %v26460_v12  ;;  %16483 = vmatprep.subr.bf16.mxu1 %v24071_v14  ;;  %v24097_v14 = vld [vmem:[#allocation6 + $0x2618] ss:$12 sps:$4 sm:$0xff]  }
 0x9c4   : > { %21844 = vmatprep.subr.bf16.mxu0 %v24072_v1  ;;  %v24094_v1 = vld [vmem:[#allocation6 + $0x2250] ss:$12 sps:$4 sm:$0xff]  }
 0x9c5   : > { %16484 = vmatpush1.bf16.msra.mxu1 %v24069_v44  ;;  %v24098_v44 = vld [vmem:[#allocation6 + $0x2558] ss:$12 sps:$4 sm:$0xff]  }
 0x9c6   : > { %21845 = vmatpush3.bf16.msra.mxu0 %v24073_v37  ;;  %16485 = vmatprep.subr.bf16.mxu1 %v24076_v9  ;;  %v24101_v37 = vld [vmem:[#allocation6 + $0x226c] ss:$12 sps:$4 sm:$0xff]   ;;  %v24102_v9 = vld [vmem:[#allocation6 + $0x2630] ss:$12 sps:$4 sm:$0xff]  }
 0x9c7   : > { %21846 = vmatprep.subr.bf16.mxu0 %v24077_v18  ;;  %v24099_v18 = vld [vmem:[#allocation6 + $0x2268] ss:$12 sps:$4 sm:$0xff]  }
 0x9c9   : > { %16486 = vmatpush1.bf16.msra.mxu1 %v24074_v6  ;;  %v24103_v6 = vld [vmem:[#allocation6 + $0x2570] ss:$12 sps:$4 sm:$0xff]  }
 0x9ca   : > { %21847 = vmatpush3.bf16.msra.mxu0 %v24078_v27  ;;  %16487 = vmatprep.subr.bf16.mxu1 %v24081_v0  ;;  %v24106_v27 = vld [vmem:[#allocation6 + $0x2284] ss:$12 sps:$4 sm:$0xff]   ;;  %v24107_v0 = vld [vmem:[#allocation6 + $0x2708] ss:$12 sps:$4 sm:$0xff]  }
 0x9cb   : > { %21848 = vmatprep.subr.bf16.mxu0 %v24082_v56  ;;  %v24104_v56 = vld [vmem:[#allocation6 + $0x2280] ss:$12 sps:$4 sm:$0xff]  }
 0x9cd   : > { %16488 = vmatpush1.bf16.msra.mxu1 %v24079_v39  ;;  %v24108_v39 = vld [vmem:[#allocation6 + $0x2648] ss:$12 sps:$4 sm:$0xff]  }
 0x9ce   : > { %21849 = vmatpush3.bf16.msra.mxu0 %v24083_v52  ;;  %16489 = vmatprep.subr.bf16.mxu1 %v24086_v7  ;;  %v24111_v52 = vld [vmem:[#allocation6 + $0x229c] ss:$12 sps:$4 sm:$0xff]   ;;  %v24112_v7 = vld [vmem:[#allocation6 + $0x2720] ss:$12 sps:$4 sm:$0xff]  }
 0x9cf   : > { %21850 = vmatprep.subr.bf16.mxu0 %v24087_v57  ;;  %v24109_v57 = vld [vmem:[#allocation6 + $0x2298] ss:$12 sps:$4 sm:$0xff]  }
 0x9d1   : > { %16490 = vmatpush1.bf16.msra.mxu1 %v24084_v3  ;;  %v24113_v3 = vld [vmem:[#allocation6 + $0x2660] ss:$12 sps:$4 sm:$0xff]  }
 0x9d2   : > { %21851 = vmatpush3.bf16.msra.mxu0 %v24088_v29  ;;  %16491 = vmatprep.subr.bf16.mxu1 %v24091_v34  ;;  %v24116_v29 = vld [vmem:[#allocation6 + $0x22b4] ss:$12 sps:$4 sm:$0xff]   ;;  %v24117_v34 = vld [vmem:[#allocation6 + $0x2738] ss:$12 sps:$4 sm:$0xff]  }
 0x9d3   : > { %21852 = vmatprep.subr.bf16.mxu0 %v24092_v63  ;;  %v24114_v63 = vld [vmem:[#allocation6 + $0x22b0] ss:$12 sps:$4 sm:$0xff]  }
 0x9d5   : > { %16492 = vmatpush1.bf16.msra.mxu1 %v24089_v25  ;;  %v24118_v25 = vld [vmem:[#allocation6 + $0x2678] ss:$12 sps:$4 sm:$0xff]  }
 0x9d6   : > { %21853 = vmatpush3.bf16.msra.mxu0 %v24093_v22  ;;  %16493 = vmatprep.subr.bf16.mxu1 %v24096_v41  ;;  %v24121_v22 = vld [vmem:[#allocation6 + $0x22cc] ss:$12 sps:$4 sm:$0xff]   ;;  %v24122_v41 = vld [vmem:[#allocation6 + $0x2750] ss:$12 sps:$4 sm:$0xff]  }
 0x9d7   : > { %21854 = vmatprep.subr.bf16.mxu0 %v24097_v14  ;;  %v24119_v14 = vld [vmem:[#allocation6 + $0x22c8] ss:$12 sps:$4 sm:$0xff]  }
 0x9d9   : > { %16494 = vmatpush1.bf16.msra.mxu1 %v24094_v1  ;;  %v24123_v1 = vld [vmem:[#allocation6 + $0x2690] ss:$12 sps:$4 sm:$0xff]  }
 0x9da   : > { %21855 = vmatpush3.bf16.msra.mxu0 %v24098_v44  ;;  %16495 = vmatprep.subr.bf16.mxu1 %v24101_v37  ;;  %v24126_v44 = vld [vmem:[#allocation6 + $0x22e4] ss:$12 sps:$4 sm:$0xff]   ;;  %v24127_v37 = vld [vmem:[#allocation6 + $0x2768] ss:$12 sps:$4 sm:$0xff]  }
 0x9db   : > { %21856 = vmatprep.subr.bf16.mxu0 %v24102_v9  ;;  %v24124_v9 = vld [vmem:[#allocation6 + $0x22e0] ss:$12 sps:$4 sm:$0xff]  }
 0x9dd   : > { %16496 = vmatpush1.bf16.msra.mxu1 %v24099_v18  ;;  %v24128_v18 = vld [vmem:[#allocation6 + $0x26a8] ss:$12 sps:$4 sm:$0xff]  }
 0x9de   : > { %21857 = vmatpush3.bf16.msra.mxu0 %v24103_v6  ;;  %16497 = vmatprep.subr.bf16.mxu1 %v24106_v27  ;;  %v24131_v6 = vld [vmem:[#allocation6 + $0x22fc] ss:$12 sps:$4 sm:$0xff]   ;;  %v24132_v27 = vld [vmem:[#allocation6 + $0x2780] ss:$12 sps:$4 sm:$0xff]  }
 0x9df   : > { %21864 = vmatprep.subr.bf16.mxu0 %v24107_v0  ;;  %v24129_v0 = vld [vmem:[#allocation6 + $0x22f8] ss:$12 sps:$4 sm:$0xff]  }
 0x9e1   : > { %17450 = vmatmul.mubr.bf16.vlgmr.msra.gmra.mrb[36].mxu0 %v26463_v8  ;;  %16498 = vmatpush1.bf16.msra.mxu1 %v24104_v56  ;;  %v24133_v56 = vld [vmem:[#allocation6 + $0x26c0] ss:$12 sps:$4 sm:$0xff]  }
 0x9e2   : > { %21865 = vmatpush3.bf16.msra.mxu0 %v24108_v39  ;;  %17490 = vmatprep.mubr.bf16.mxu0 %v26467_v16  ;;  %v24136_v39 = vld [vmem:[#allocation6 + $0x2314] ss:$12 sps:$4 sm:$0xff]  }
 0x9e3   : > { %16499 = vmatprep.subr.bf16.mxu1 %v24111_v52  ;;  %21866 = vmatprep.subr.bf16.mxu0 %v24112_v7  ;;  %v24137_v52 = vld [vmem:[#allocation6 + $0x2798] ss:$12 sps:$4 sm:$0xff]   ;;  %v24134_v7 = vld [vmem:[#allocation6 + $0x2310] ss:$12 sps:$4 sm:$0xff]  }
 0x9e5   : > { %16500 = vmatpush1.bf16.msra.mxu1 %v24109_v57  ;;  %v24138_v57 = vld [vmem:[#allocation6 + $0x26d8] ss:$12 sps:$4 sm:$0xff]  }
 0x9e6   : > { %21867 = vmatpush3.bf16.msra.mxu0 %v24113_v3  ;;  %16501 = vmatprep.subr.bf16.mxu1 %v24116_v29  ;;  %v24141_v3 = vld [vmem:[#allocation6 + $0x232c] ss:$12 sps:$4 sm:$0xff]   ;;  %v24142_v29 = vld [vmem:[#allocation6 + $0x27b0] ss:$12 sps:$4 sm:$0xff]  }
 0x9e7   : > { %21868 = vmatprep.subr.bf16.mxu0 %v24117_v34  ;;  %v24139_v34 = vld [vmem:[#allocation6 + $0x2328] ss:$12 sps:$4 sm:$0xff]  }
 0x9e9   : > { %16502 = vmatpush1.bf16.msra.mxu1 %v24114_v63  ;;  %v24143_v63 = vld [vmem:[#allocation6 + $0x26f0] ss:$12 sps:$4 sm:$0xff]  }
 0x9ea   : > { %21869 = vmatpush3.bf16.msra.mxu0 %v24118_v25  ;;  %16503 = vmatprep.subr.bf16.mxu1 %v24121_v22  ;;  %v24146_v25 = vld [vmem:[#allocation6 + $0x2344] ss:$12 sps:$4 sm:$0xff]   ;;  %v24147_v22 = vld [vmem:[#allocation6 + $0x2888] ss:$12 sps:$4 sm:$0xff]  }
 0x9eb   : > { %21870 = vmatprep.subr.bf16.mxu0 %v24122_v41  ;;  %v24144_v41 = vld [vmem:[#allocation6 + $0x2340] ss:$12 sps:$4 sm:$0xff]  }
 0x9ed   : > { %16504 = vmatpush1.bf16.msra.mxu1 %v24119_v14  ;;  %v24148_v14 = vld [vmem:[#allocation6 + $0x27c8] ss:$12 sps:$4 sm:$0xff]  }
 0x9ee   : > { %21871 = vmatpush3.bf16.msra.mxu0 %v24123_v1  ;;  %16505 = vmatprep.subr.bf16.mxu1 %v24126_v44  ;;  %v24151_v1 = vld [vmem:[#allocation6 + $0x235c] ss:$12 sps:$4 sm:$0xff]   ;;  %v24152_v44 = vld [vmem:[#allocation6 + $0x28a0] ss:$12 sps:$4 sm:$0xff]  }
 0x9ef   : > { %21872 = vmatprep.subr.bf16.mxu0 %v24127_v37  ;;  %v24149_v37 = vld [vmem:[#allocation6 + $0x2358] ss:$12 sps:$4 sm:$0xff]  }
 0x9f1   : > { %16506 = vmatpush1.bf16.msra.mxu1 %v24124_v9  ;;  %v24153_v9 = vld [vmem:[#allocation6 + $0x27e0] ss:$12 sps:$4 sm:$0xff]  }
 0x9f2   : > { %21873 = vmatpush3.bf16.msra.mxu0 %v24128_v18  ;;  %16507 = vmatprep.subr.bf16.mxu1 %v24131_v6  ;;  %v24156_v18 = vld [vmem:[#allocation6 + $0x2374] ss:$12 sps:$4 sm:$0xff]   ;;  %v24157_v6 = vld [vmem:[#allocation6 + $0x28b8] ss:$12 sps:$4 sm:$0xff]  }
 0x9f3   : > { %21874 = vmatprep.subr.bf16.mxu0 %v24132_v27  ;;  %v24154_v27 = vld [vmem:[#allocation6 + $0x2370] ss:$12 sps:$4 sm:$0xff]  }
 0x9f5   : > { %16508 = vmatpush1.bf16.msra.mxu1 %v24129_v0  ;;  %v24161_v0 = vld [vmem:[#allocation6 + $0x238c] ss:$12 sps:$4 sm:$0xff]  }
 0x9f6   : > { %21875 = vmatpush3.bf16.msra.mxu0 %v24133_v56  ;;  %16509 = vmatprep.subr.bf16.mxu1 %v24136_v39  ;;  %v24162_v56 = vld [vmem:[#allocation6 + $0x28d0] ss:$12 sps:$4 sm:$0xff]   ;;  %v24159_v39 = vld [vmem:[#allocation6 + $0x2388] ss:$12 sps:$4 sm:$0xff]  }
 0x9f7   : > { %21876 = vmatprep.subr.bf16.mxu0 %v24137_v52  ;;  %v24166_v52 = vld [vmem:[#allocation6 + $0x23a4] ss:$12 sps:$4 sm:$0xff]  }
 0x9f9   : > { %16510 = vmatpush1.bf16.msra.mxu1 %v24134_v7  ;;  %v24167_v7 = vld [vmem:[#allocation6 + $0x28e8] ss:$12 sps:$4 sm:$0xff]  }
 0x9fa   : > { %21877 = vmatpush3.bf16.msra.mxu0 %v24138_v57  ;;  %16511 = vmatprep.subr.bf16.mxu1 %v24141_v3  ;;  %v24164_v57 = vld [vmem:[#allocation6 + $0x23a0] ss:$12 sps:$4 sm:$0xff]   ;;  %v24168_v3 = vld [vmem:[#allocation6 + $0x2828] ss:$12 sps:$4 sm:$0xff]  }
 0x9fb   : > { %21878 = vmatprep.subr.bf16.mxu0 %v24142_v29  ;;  %v24171_v29 = vld [vmem:[#allocation6 + $0x23bc] ss:$12 sps:$4 sm:$0xff]  }
 0x9fd   : > { %16512 = vmatpush1.bf16.msra.mxu1 %v24139_v34  ;;  %v24172_v34 = vld [vmem:[#allocation6 + $0x2900] ss:$12 sps:$4 sm:$0xff]  }
 0x9fe   : > { %21879 = vmatpush3.bf16.msra.mxu0 %v24143_v63  ;;  %16524 = vmatprep.subr.bf16.mxu1 %v24146_v25  ;;  %v24169_v63 = vld [vmem:[#allocation6 + $0x23b8] ss:$12 sps:$4 sm:$0xff]   ;;  %v24173_v25 = vld [vmem:[#allocation6 + $0x2840] ss:$12 sps:$4 sm:$0xff]  }
 0x9ff   : > { %21886 = vmatprep.subr.bf16.mxu0 %v24147_v22  ;;  %v24176_v22 = vld [vmem:[#allocation6 + $0x23d4] ss:$12 sps:$4 sm:$0xff]  }
 0xa00   : > { %16514 = vmatmul.mubr.bf16.vlgmr.msra.gmra.mrb[100].mxu1 %v26583_v5  ;;  %v24158_v5 = vld [vmem:[#allocation6 + $0x27f8] ss:$12 sps:$4 sm:$0xff]  }
 0xa01   : > { %17491 = vmatmul.mubr.bf16.vlgmr.msra.gmra.mrb[40].mxu0 %v26473_v48  ;;  %16525 = vmatpush1.bf16.msra.mxu1 %v24144_v41  ;;  %v24177_v41 = vld [vmem:[#allocation6 + $0x2918] ss:$12 sps:$4 sm:$0xff]  }
 0xa02   : > { %16556 = vmatprep.mubr.bf16.mxu1 %v26455_v38  ;;  %21887 = vmatpush3.bf16.msra.mxu0 %v24148_v14  ;;  %v24163_v38 = vld [vmem:[#allocation6 + $0x2810] ss:$12 sps:$4 sm:$0xff]  }
 0xa03   : > { %17531 = vmatprep.mubr.bf16.mxu0 %v26476_v60  ;;  %16526 = vmatprep.subr.bf16.mxu1 %v24151_v1 }
 0xa04   : > { %21888 = vmatprep.subr.bf16.mxu0 %v24152_v44  ;;  %v24174_v44 = vld [vmem:[#allocation6 + $0x23d0] ss:$12 sps:$4 sm:$0xff]  }
 0xa05   : > { %16527 = vmatpush1.bf16.msra.mxu1 %v24149_v37 }
 0xa06   : > { %21889 = vmatpush3.bf16.msra.mxu0 %v24153_v9  ;;  %16528 = vmatprep.subr.bf16.mxu1 %v24156_v18  ;;  %v24178_v18 = vld [vmem:[#allocation6 + $0x2858] ss:$12 sps:$4 sm:$0xff]  }
 0xa07   : > { %21890 = vmatprep.subr.bf16.mxu0 %v24157_v6  ;;  %v24181_v6 = vld [vmem:[#allocation6 + $0x23ec] ss:$12 sps:$4 sm:$0xff]  }
 0xa09   : > { %16529 = vmatpush1.bf16.msra.mxu1 %v24154_v27 }
 0xa0a   : > { %21891 = vmatpush3.bf16.msra.mxu0 %v24158_v5  ;;  %16530 = vmatprep.subr.bf16.mxu1 %v24161_v0  ;;  %v24182_v5 = vld [vmem:[#allocation6 + $0x2930] ss:$12 sps:$4 sm:$0xff]  }
 0xa0b   : > { %21892 = vmatprep.subr.bf16.mxu0 %v24162_v56  ;;  %v24179_v56 = vld [vmem:[#allocation6 + $0x23e8] ss:$12 sps:$4 sm:$0xff]  }
 0xa0d   : > { %16531 = vmatpush1.bf16.msra.mxu1 %v24159_v39  ;;  %v24183_v39 = vld [vmem:[#allocation6 + $0x2870] ss:$12 sps:$4 sm:$0xff]  }
 0xa0e   : > { %21893 = vmatpush3.bf16.msra.mxu0 %v24163_v38  ;;  %16532 = vmatprep.subr.bf16.mxu1 %v24166_v52  ;;  %v24186_v38 = vld [vmem:[#allocation6 + $0x2404] ss:$12 sps:$4 sm:$0xff]   ;;  %v24187_v52 = vld [vmem:[#allocation6 + $0x2a08] ss:$12 sps:$4 sm:$0xff]  }
 0xa0f   : > { %21894 = vmatprep.subr.bf16.mxu0 %v24167_v7  ;;  %v24184_v7 = vld [vmem:[#allocation6 + $0x2400] ss:$12 sps:$4 sm:$0xff]  }
 0xa11   : > { %16533 = vmatpush1.bf16.msra.mxu1 %v24164_v57  ;;  %v24188_v57 = vld [vmem:[#allocation6 + $0x2948] ss:$12 sps:$4 sm:$0xff]  }
 0xa12   : > { %21895 = vmatpush3.bf16.msra.mxu0 %v24168_v3  ;;  %16534 = vmatprep.subr.bf16.mxu1 %v24171_v29  ;;  %v24191_v3 = vld [vmem:[#allocation6 + $0x241c] ss:$12 sps:$4 sm:$0xff]   ;;  %v24192_v29 = vld [vmem:[#allocation6 + $0x2a20] ss:$12 sps:$4 sm:$0xff]  }
 0xa13   : > { %21896 = vmatprep.subr.bf16.mxu0 %v24172_v34  ;;  %v21748_v14 = vpop.f32.mrb[16].mxu0  ;;  %v24189_v34 = vld [vmem:[#allocation6 + $0x2418] ss:$12 sps:$4 sm:$0xff]  }
 0xa14   : > { %v21749_v1 = vpop.f32.mrb[17].mxu0 }
 0xa15   : > { %16535 = vmatpush1.bf16.msra.mxu1 %v24169_v63  ;;  %v26603_v37 = vadd.f32 %v21749_v1, %v21748_v14  ;;  %v21751_v9 = vpop.f32.mrb[18].mxu0  ;;  %v24193_v63 = vld [vmem:[#allocation6 + $0x2960] ss:$12 sps:$4 sm:$0xff]   ;;  %v24198_v14 = vld [vmem:[#allocation6 + $0x2978] ss:$12 sps:$4 sm:$0xff]  }
 0xa16   : > { %21897 = vmatpush3.bf16.msra.mxu0 %v24173_v25  ;;  %16536 = vmatprep.subr.bf16.mxu1 %v24176_v22  ;;  %v21752_v27 = vpop.f32.mrb[19].mxu0  ;;  %v24196_v25 = vld [vmem:[#allocation6 + $0x2434] ss:$12 sps:$4 sm:$0xff]   ;;  %v24197_v22 = vld [vmem:[#allocation6 + $0x2a38] ss:$12 sps:$4 sm:$0xff]  }
 0xa17   : > { %21898 = vmatprep.subr.bf16.mxu0 %v24177_v41  ;;  %v26605_v0 = vadd.f32 %v21752_v27, %v21751_v9  ;;  %v24194_v41 = vld [vmem:[#allocation6 + $0x2430] ss:$12 sps:$4 sm:$0xff]   ;;  %v24201_v1 = vld [vmem:[#allocation6 + $0x244c] ss:$12 sps:$4 sm:$0xff]   ;;  %v24199_v9 = vld [vmem:[#allocation6 + $0x2448] ss:$12 sps:$4 sm:$0xff]  }
 0xa18   : > { %v24207_v27 = vld [vmem:[#allocation6 + $0x2a68] ss:$12 sps:$4 sm:$0xff]  }
 0xa19   : > { %16537 = vmatpush1.bf16.msra.mxu1 %v24174_v44  ;;  %v24202_v44 = vld [vmem:[#allocation6 + $0x2a50] ss:$12 sps:$4 sm:$0xff]  }
 0xa1a   : > { %21899 = vmatpush3.bf16.msra.mxu0 %v24178_v18  ;;  %16538 = vmatprep.subr.bf16.mxu1 %v24181_v6  ;;  %v24203_v18 = vld [vmem:[#allocation6 + $0x2990] ss:$12 sps:$4 sm:$0xff]  }
 0xa1b   : > { %21900 = vmatprep.subr.bf16.mxu0 %v24182_v5  ;;  %v24206_v6 = vld [vmem:[#allocation6 + $0x2464] ss:$12 sps:$4 sm:$0xff]   ;;  %v24204_v5 = vld [vmem:[#allocation6 + $0x2460] ss:$12 sps:$4 sm:$0xff]  }
 0xa1d   : > { %16539 = vmatpush1.bf16.msra.mxu1 %v24179_v56  ;;  %v24208_v56 = vld [vmem:[#allocation6 + $0x29a8] ss:$12 sps:$4 sm:$0xff]  }
 0xa1e   : > { %21901 = vmatpush3.bf16.msra.mxu0 %v24183_v39  ;;  %16540 = vmatprep.subr.bf16.mxu1 %v24186_v38  ;;  %v24211_v39 = vld [vmem:[#allocation6 + $0x247c] ss:$12 sps:$4 sm:$0xff]   ;;  %v24212_v38 = vld [vmem:[#allocation6 + $0x2a80] ss:$12 sps:$4 sm:$0xff]  }
 0xa1f   : > { %21908 = vmatprep.subr.bf16.mxu0 %v24187_v52  ;;  %v24209_v52 = vld [vmem:[#allocation6 + $0x2478] ss:$12 sps:$4 sm:$0xff]  }
 0xa21   : > { %17532 = vmatmul.mubr.bf16.vlgmr.msra.gmra.mrb[44].mxu0 %v26479_v47  ;;  %16541 = vmatpush1.bf16.msra.mxu1 %v24184_v7  ;;  %v24213_v7 = vld [vmem:[#allocation6 + $0x29c0] ss:$12 sps:$4 sm:$0xff]  }
 0xa22   : > { %21909 = vmatpush3.bf16.msra.mxu0 %v24188_v57  ;;  %17572 = vmatprep.mubr.bf16.mxu0 %v26490_v10  ;;  %v24216_v57 = vld [vmem:[#allocation6 + $0x2494] ss:$12 sps:$4 sm:$0xff]  }
 0xa23   : > { %16542 = vmatprep.subr.bf16.mxu1 %v24191_v3  ;;  %21910 = vmatprep.subr.bf16.mxu0 %v24192_v29  ;;  %v24217_v29 = vld [vmem:[#allocation6 + $0x2a98] ss:$12 sps:$4 sm:$0xff]  }
 0xa25   : > { %16543 = vmatpush1.bf16.msra.mxu1 %v24189_v34 }
 0xa26   : > { %21911 = vmatpush3.bf16.msra.mxu0 %v24193_v63  ;;  %16544 = vmatprep.subr.bf16.mxu1 %v24196_v25 }
 0xa27   : > { %21912 = vmatprep.subr.bf16.mxu0 %v24197_v22  ;;  %v24214_v22 = vld [vmem:[#allocation6 + $0x2490] ss:$12 sps:$4 sm:$0xff]  }
 0xa29   : > { %16545 = vmatpush1.bf16.msra.mxu1 %v24194_v41 }
 0xa2a   : > { %21913 = vmatpush3.bf16.msra.mxu0 %v24198_v14  ;;  %16546 = vmatprep.subr.bf16.mxu1 %v24201_v1  ;;  %v24218_v14 = vld [vmem:[#allocation6 + $0x29d8] ss:$12 sps:$4 sm:$0xff]  }
 0xa2b   : > { %21914 = vmatprep.subr.bf16.mxu0 %v24202_v44  ;;  %v24221_v1 = vld [vmem:[#allocation6 + $0x24ac] ss:$12 sps:$4 sm:$0xff]  }
 0xa2d   : > { %16547 = vmatpush1.bf16.msra.mxu1 %v24199_v9 }
 0xa2e   : > { %21915 = vmatpush3.bf16.msra.mxu0 %v24203_v18  ;;  %16548 = vmatprep.subr.bf16.mxu1 %v24206_v6  ;;  %v24222_v18 = vld [vmem:[#allocation6 + $0x2ab0] ss:$12 sps:$4 sm:$0xff]  }
 0xa2f   : > { %21916 = vmatprep.subr.bf16.mxu0 %v24207_v27  ;;  %v24219_v27 = vld [vmem:[#allocation6 + $0x24a8] ss:$12 sps:$4 sm:$0xff]  }
 0xa31   : > { %16549 = vmatpush1.bf16.msra.mxu1 %v24204_v5  ;;  %v24223_v5 = vld [vmem:[#allocation6 + $0x29f0] ss:$12 sps:$4 sm:$0xff]  }
 0xa32   : > { %21917 = vmatpush3.bf16.msra.mxu0 %v24208_v56  ;;  %16550 = vmatprep.subr.bf16.mxu1 %v24211_v39  ;;  %v24226_v56 = vld [vmem:[#allocation6 + $0x24c4] ss:$12 sps:$4 sm:$0xff]   ;;  %v24227_v39 = vld [vmem:[#allocation6 + $0x2b88] ss:$12 sps:$4 sm:$0xff]  }
 0xa33   : > { %v21770_v3 = vpop.f32.mrb[20].mxu0  ;;  %21918 = vmatprep.subr.bf16.mxu0 %v24212_v38  ;;  %v24224_v38 = vld [vmem:[#allocation6 + $0x24c0] ss:$12 sps:$4 sm:$0xff]  }
 0xa34   : > { %v21771_v34 = vpop.f32.mrb[21].mxu0 }
 0xa35   : > { %v21772_v63 = vadd.f32 %v21771_v34, %v21770_v3  ;;  %16551 = vmatpush1.bf16.msra.mxu1 %v24209_v52  ;;  %v21773_v25 = vpop.f32.mrb[22].mxu0  ;;  %v24231_v52 = vld [vmem:[#allocation6 + $0x24dc] ss:$12 sps:$4 sm:$0xff]   ;;  %v24236_v3 = vld [vmem:[#allocation6 + $0x24f4] ss:$12 sps:$4 sm:$0xff]  }
 0xa36   : > { %21919 = vmatpush3.bf16.msra.mxu0 %v24213_v7  ;;  %v21774_v41 = vpop.f32.mrb[23].mxu0  ;;  %16552 = vmatprep.subr.bf16.mxu1 %v24216_v57  ;;  %v24229_v7 = vld [vmem:[#allocation6 + $0x24d8] ss:$12 sps:$4 sm:$0xff]   ;;  %v24233_v57 = vld [vmem:[#allocation6 + $0x2ae0] ss:$12 sps:$4 sm:$0xff]  }
 0xa37   : > { %v26610_v44 = vadd.f32 %v21772_v63, %v26603_v37  ;;  %v21775_v9 = vadd.f32 %v21774_v41, %v21773_v25  ;;  %21920 = vmatprep.subr.bf16.mxu0 %v24217_v29  ;;  %v24228_v37 = vld [vmem:[#allocation6 + $0x2ac8] ss:$12 sps:$4 sm:$0xff]   ;;  %v24237_v29 = vld [vmem:[#allocation6 + $0x2bb8] ss:$12 sps:$4 sm:$0xff]   ;;  %v24242_v63 = vld [vmem:[#allocation6 + $0x2bd0] ss:$12 sps:$4 sm:$0xff]  }
 0xa38   : > { %v24241_v34 = vld [vmem:[#allocation6 + $0x250c] ss:$12 sps:$4 sm:$0xff]   ;;  %v24239_v25 = vld [vmem:[#allocation6 + $0x2508] ss:$12 sps:$4 sm:$0xff]  }
 0xa39   : > { %v26613_v6 = vadd.f32 %v21775_v9, %v26605_v0  ;;  %16553 = vmatpush1.bf16.msra.mxu1 %v24214_v22  ;;  %v24232_v0 = vld [vmem:[#allocation6 + $0x2ba0] ss:$12 sps:$4 sm:$0xff]   ;;  %v24246_v22 = vld [vmem:[#allocation6 + $0x2524] ss:$12 sps:$4 sm:$0xff]   ;;  %v24247_v41 = vld [vmem:[#allocation6 + $0x2be8] ss:$12 sps:$4 sm:$0xff]  }
 0xa3a   : > { %21921 = vmatpush3.bf16.msra.mxu0 %v24218_v14  ;;  %16554 = vmatprep.subr.bf16.mxu1 %v24221_v1  ;;  %v24244_v14 = vld [vmem:[#allocation6 + $0x2520] ss:$12 sps:$4 sm:$0xff]   ;;  %v24248_v1 = vld [vmem:[#allocation6 + $0x2b28] ss:$12 sps:$4 sm:$0xff]  }
 0xa3b   : > { %21922 = vmatprep.subr.bf16.mxu0 %v24222_v18  ;;  %v24251_v9 = vld [vmem:[#allocation6 + $0x253c] ss:$12 sps:$4 sm:$0xff]   ;;  %v24252_v18 = vld [vmem:[#allocation6 + $0x2c00] ss:$12 sps:$4 sm:$0xff]  }
 0xa3d   : > { %16555 = vmatpush1.bf16.msra.mxu1 %v24219_v27  ;;  %v24249_v27 = vld [vmem:[#allocation6 + $0x2538] ss:$12 sps:$4 sm:$0xff]  }
 0xa3e   : > { %21923 = vmatpush3.bf16.msra.mxu0 %v24223_v5  ;;  %16567 = vmatprep.subr.bf16.mxu1 %v24226_v56  ;;  %v24253_v5 = vld [vmem:[#allocation6 + $0x2b40] ss:$12 sps:$4 sm:$0xff]  }
 0xa3f   : > { %21930 = vmatprep.subr.bf16.mxu0 %v24227_v39  ;;  %v24256_v56 = vld [vmem:[#allocation6 + $0x2554] ss:$12 sps:$4 sm:$0xff]  }
 0xa40   : > { %21105 = vmatmul.mubr.msk.bf16.vlgmr.msra.gmra.mrb[100].mxu1 %vm26072_vm10, %v26589_v19  ;;  %v24238_v19 = vld [vmem:[#allocation6 + $0x2af8] ss:$12 sps:$4 sm:$0xff]  }
 0xa41   : > { %21123 = vmatmul.mubr.msk.bf16.vlgmr.msra.gmra.mrb[48].mxu0 %vm26107_vm11, %v26484_v45  ;;  %16568 = vmatpush1.bf16.msra.mxu1 %v24224_v38  ;;  %v24257_v38 = vld [vmem:[#allocation6 + $0x2c18] ss:$12 sps:$4 sm:$0xff]  }
 0xa42   : > { %16599 = vmatprep.mubr.bf16.mxu1 %v26460_v12  ;;  %21931 = vmatpush3.bf16.msra.mxu0 %v24228_v37  ;;  %v24243_v12 = vld [vmem:[#allocation6 + $0x2b10] ss:$12 sps:$4 sm:$0xff]  }
 0xa43   : > { %17613 = vmatprep.mubr.bf16.mxu0 %v26498_v61  ;;  %16569 = vmatprep.subr.bf16.mxu1 %v24231_v52 }
 0xa44   : > { %21932 = vmatprep.subr.bf16.mxu0 %v24232_v0 }
 0xa45   : > { %16570 = vmatpush1.bf16.msra.mxu1 %v24229_v7  ;;  %v24254_v7 = vld [vmem:[#allocation6 + $0x2550] ss:$12 sps:$4 sm:$0xff]  }
 0xa46   : > { %21933 = vmatpush3.bf16.msra.mxu0 %v24233_v57  ;;  %16571 = vmatprep.subr.bf16.mxu1 %v24236_v3  ;;  %v24258_v3 = vld [vmem:[#allocation6 + $0x2b58] ss:$12 sps:$4 sm:$0xff]  }
 0xa47   : > { %21934 = vmatprep.subr.bf16.mxu0 %v24237_v29  ;;  %v24261_v29 = vld [vmem:[#allocation6 + $0x256c] ss:$12 sps:$4 sm:$0xff]  }
 0xa49   : > { %16572 = vmatpush1.bf16.msra.mxu1 %v24234_v11 }
 0xa4a   : > { %21935 = vmatpush3.bf16.msra.mxu0 %v24238_v19  ;;  %16573 = vmatprep.subr.bf16.mxu1 %v24241_v34  ;;  %v24262_v34 = vld [vmem:[#allocation6 + $0x2c30] ss:$12 sps:$4 sm:$0xff]  }
 0xa4b   : > { %21936 = vmatprep.subr.bf16.mxu0 %v24242_v63 }
 0xa4d   : > { %16574 = vmatpush1.bf16.msra.mxu1 %v24239_v25  ;;  %v24259_v25 = vld [vmem:[#allocation6 + $0x2568] ss:$12 sps:$4 sm:$0xff]  }
 0xa4e   : > { %21937 = vmatpush3.bf16.msra.mxu0 %v24243_v12  ;;  %16575 = vmatprep.subr.bf16.mxu1 %v24246_v22  ;;  %v24263_v12 = vld [vmem:[#allocation6 + $0x2b70] ss:$12 sps:$4 sm:$0xff]  }
 0xa4f   : > { %21938 = vmatprep.subr.bf16.mxu0 %v24247_v41  ;;  %v24266_v22 = vld [vmem:[#allocation6 + $0x2584] ss:$12 sps:$4 sm:$0xff]   ;;  %v24267_v41 = vld [vmem:[#allocation6 + $0x2d08] ss:$12 sps:$4 sm:$0xff]  }
 0xa51   : > { %16576 = vmatpush1.bf16.msra.mxu1 %v24244_v14  ;;  %v24264_v14 = vld [vmem:[#allocation6 + $0x2580] ss:$12 sps:$4 sm:$0xff]  }
 0xa52   : > { %21939 = vmatpush3.bf16.msra.mxu0 %v24248_v1  ;;  %16577 = vmatprep.subr.bf16.mxu1 %v24251_v9  ;;  %v24271_v1 = vld [vmem:[#allocation6 + $0x259c] ss:$12 sps:$4 sm:$0xff]   ;;  %v24272_v9 = vld [vmem:[#allocation6 + $0x2d20] ss:$12 sps:$4 sm:$0xff]  }
 0xa53   : > { %v21792_v39 = vpop.f32.mrb[24].mxu0  ;;  %21940 = vmatprep.subr.bf16.mxu0 %v24252_v18  ;;  %v24273_v18 = vld [vmem:[#allocation6 + $0x2c60] ss:$12 sps:$4 sm:$0xff]  }
 0xa54   : > { %v21793_v37 = vpop.f32.mrb[25].mxu0 }
 0xa55   : > { %v21794_v52 = vadd.f32 %v21793_v37, %v21792_v39  ;;  %16578 = vmatpush1.bf16.msra.mxu1 %v24249_v27  ;;  %v21795_v0 = vpop.f32.mrb[26].mxu0  ;;  %v24276_v27 = vld [vmem:[#allocation6 + $0x25b4] ss:$12 sps:$4 sm:$0xff]   ;;  %v24278_v39 = vld [vmem:[#allocation6 + $0x2c78] ss:$12 sps:$4 sm:$0xff]  }
 0xa56   : > { %21941 = vmatpush3.bf16.msra.mxu0 %v24253_v5  ;;  %v21796_v57 = vpop.f32.mrb[27].mxu0  ;;  %16579 = vmatprep.subr.bf16.mxu1 %v24256_v56  ;;  %v24277_v5 = vld [vmem:[#allocation6 + $0x2d38] ss:$12 sps:$4 sm:$0xff]   ;;  %v24274_v56 = vld [vmem:[#allocation6 + $0x25b0] ss:$12 sps:$4 sm:$0xff]  }
 0xa57   : > { %v26624_v11 = vadd.f32 %v21794_v52, %v26610_v44  ;;  %v21797_v19 = vadd.f32 %v21796_v57, %v21795_v0  ;;  %21942 = vmatprep.subr.bf16.mxu0 %v24257_v38  ;;  %v24268_v44 = vld [vmem:[#allocation6 + $0x2c48] ss:$12 sps:$4 sm:$0xff]   ;;  %v24281_v38 = vld [vmem:[#allocation6 + $0x25cc] ss:$12 sps:$4 sm:$0xff]   ;;  %v24282_v37 = vld [vmem:[#allocation6 + $0x2d50] ss:$12 sps:$4 sm:$0xff]  }
 0xa58   : > { %v24279_v52 = vld [vmem:[#allocation6 + $0x25c8] ss:$12 sps:$4 sm:$0xff]   ;;  %v24283_v0 = vld [vmem:[#allocation6 + $0x2c90] ss:$12 sps:$4 sm:$0xff]  }
 0xa59   : > { %v26627_v63 = vadd.f32 %v21797_v19, %v26613_v6  ;;  %16580 = vmatpush1.bf16.msra.mxu1 %v24254_v7  ;;  %v24269_v6 = vld [vmem:[#allocation6 + $0x2598] ss:$12 sps:$4 sm:$0xff]   ;;  %v24287_v57 = vld [vmem:[#allocation6 + $0x2d68] ss:$12 sps:$4 sm:$0xff]  }
 0xa5a   : > { %21943 = vmatpush3.bf16.msra.mxu0 %v24258_v3  ;;  %16581 = vmatprep.subr.bf16.mxu1 %v24261_v29  ;;  %v24286_v7 = vld [vmem:[#allocation6 + $0x25e4] ss:$12 sps:$4 sm:$0xff]   ;;  %v24284_v3 = vld [vmem:[#allocation6 + $0x25e0] ss:$12 sps:$4 sm:$0xff]   ;;  %v24288_v29 = vld [vmem:[#allocation6 + $0x2ca8] ss:$12 sps:$4 sm:$0xff]  }
 0xa5b   : > { %21944 = vmatprep.subr.bf16.mxu0 %v24262_v34  ;;  %v24291_v19 = vld [vmem:[#allocation6 + $0x25fc] ss:$12 sps:$4 sm:$0xff]   ;;  %v24292_v34 = vld [vmem:[#allocation6 + $0x2d80] ss:$12 sps:$4 sm:$0xff]  }
 0xa5d   : > { %16582 = vmatpush1.bf16.msra.mxu1 %v24259_v25  ;;  %v24289_v25 = vld [vmem:[#allocation6 + $0x25f8] ss:$12 sps:$4 sm:$0xff]  }
 0xa5e   : > { %21945 = vmatpush3.bf16.msra.mxu0 %v24263_v12  ;;  %16583 = vmatprep.subr.bf16.mxu1 %v24266_v22  ;;  %v24293_v12 = vld [vmem:[#allocation6 + $0x2cc0] ss:$12 sps:$4 sm:$0xff]  }
 0xa5f   : > { %21952 = vmatprep.subr.bf16.mxu0 %v24267_v41  ;;  %v24296_v22 = vld [vmem:[#allocation6 + $0x2614] ss:$12 sps:$4 sm:$0xff]   ;;  %v24297_v41 = vld [vmem:[#allocation6 + $0x2d98] ss:$12 sps:$4 sm:$0xff]  }
 0xa61   : > { %17614 = vmatmul.mubr.bf16.vlgmr.msra.gmra.mrb[52].mxu0 %v26500_v26  ;;  %16584 = vmatpush1.bf16.msra.mxu1 %v24264_v14 }
 0xa62   : > { %21953 = vmatpush3.bf16.msra.mxu0 %v24268_v44  ;;  %17654 = vmatprep.mubr.bf16.mxu0 %v26502_v31 }
 0xa63   : > { %16585 = vmatprep.subr.bf16.mxu1 %v24271_v1  ;;  %21954 = vmatprep.subr.bf16.mxu0 %v24272_v9  ;;  %v24294_v1 = vld [vmem:[#allocation6 + $0x2610] ss:$12 sps:$4 sm:$0xff]  }
 0xa65   : > { %16586 = vmatpush1.bf16.msra.mxu1 %v24269_v6 }
 0xa66   : > { %21955 = vmatpush3.bf16.msra.mxu0 %v24273_v18  ;;  %16587 = vmatprep.subr.bf16.mxu1 %v24276_v27  ;;  %v24298_v18 = vld [vmem:[#allocation6 + $0x2cd8] ss:$12 sps:$4 sm:$0xff]  }
 0xa67   : > { %21956 = vmatprep.subr.bf16.mxu0 %v24277_v5  ;;  %v24301_v27 = vld [vmem:[#allocation6 + $0x262c] ss:$12 sps:$4 sm:$0xff]  }
 0xa69   : > { %16588 = vmatpush1.bf16.msra.mxu1 %v24274_v56  ;;  %v24302_v56 = vld [vmem:[#allocation6 + $0x2db0] ss:$12 sps:$4 sm:$0xff]  }
 0xa6a   : > { %21957 = vmatpush3.bf16.msra.mxu0 %v24278_v39  ;;  %16589 = vmatprep.subr.bf16.mxu1 %v24281_v38 }
 0xa6b   : > { %21958 = vmatprep.subr.bf16.mxu0 %v24282_v37  ;;  %v24299_v37 = vld [vmem:[#allocation6 + $0x2628] ss:$12 sps:$4 sm:$0xff]  }
 0xa6d   : > { %16590 = vmatpush1.bf16.msra.mxu1 %v24279_v52 }
 0xa6e   : > { %21959 = vmatpush3.bf16.msra.mxu0 %v24283_v0  ;;  %16591 = vmatprep.subr.bf16.mxu1 %v24286_v7  ;;  %v24303_v0 = vld [vmem:[#allocation6 + $0x2cf0] ss:$12 sps:$4 sm:$0xff]  }
 0xa6f   : > { %21960 = vmatprep.subr.bf16.mxu0 %v24287_v57  ;;  %v24306_v7 = vld [vmem:[#allocation6 + $0x2644] ss:$12 sps:$4 sm:$0xff]   ;;  %v24307_v57 = vld [vmem:[#allocation6 + $0x2e88] ss:$12 sps:$4 sm:$0xff]  }
 0xa71   : > { %16592 = vmatpush1.bf16.msra.mxu1 %v24284_v3  ;;  %v24304_v3 = vld [vmem:[#allocation6 + $0x2640] ss:$12 sps:$4 sm:$0xff]  }
 0xa72   : > { %21961 = vmatpush3.bf16.msra.mxu0 %v24288_v29  ;;  %16593 = vmatprep.subr.bf16.mxu1 %v24291_v19  ;;  %v24308_v29 = vld [vmem:[#allocation6 + $0x2dc8] ss:$12 sps:$4 sm:$0xff]   ;;  %v24312_v19 = vld [vmem:[#allocation6 + $0x2ea0] ss:$12 sps:$4 sm:$0xff]  }
 0xa73   : > { %21962 = vmatprep.subr.bf16.mxu0 %v24292_v34  ;;  %v24313_v34 = vld [vmem:[#allocation6 + $0x2de0] ss:$12 sps:$4 sm:$0xff]  }
 0xa74   : > { %v21814_v14 = vpop.f32.mrb[28].mxu0 }
 0xa75   : > { %v21815_v44 = vpop.f32.mrb[29].mxu0  ;;  %16594 = vmatpush1.bf16.msra.mxu1 %v24289_v25  ;;  %v24316_v25 = vld [vmem:[#allocation6 + $0x2674] ss:$12 sps:$4 sm:$0xff]  }
 0xa76   : > { %v21816_v9 = vadd.f32 %v21815_v44, %v21814_v14  ;;  %v21817_v6 = vpop.f32.mrb[30].mxu0  ;;  %21963 = vmatpush3.bf16.msra.mxu0 %v24293_v12  ;;  %16595 = vmatprep.subr.bf16.mxu1 %v24296_v22  ;;  %v24317_v12 = vld [vmem:[#allocation6 + $0x2eb8] ss:$12 sps:$4 sm:$0xff]   ;;  %v24314_v22 = vld [vmem:[#allocation6 + $0x2670] ss:$12 sps:$4 sm:$0xff]  }
 0xa77   : > { %v21818_v5 = vpop.f32.mrb[31].mxu0  ;;  %21964 = vmatprep.subr.bf16.mxu0 %v24297_v41  ;;  %v24321_v41 = vld [vmem:[#allocation6 + $0x268c] ss:$12 sps:$4 sm:$0xff]   ;;  %v24322_v14 = vld [vmem:[#allocation6 + $0x2ed0] ss:$12 sps:$4 sm:$0xff]  }
 0xa78   : > { %v26632_v39 = vadd.f32 %v21816_v9, %v26624_v11  ;;  %v21819_v38 = vadd.f32 %v21818_v5, %v21817_v6  ;;  %v24311_v11 = vld [vmem:[#allocation6 + $0x265c] ss:$12 sps:$4 sm:$0xff]   ;;  %v24324_v6 = vld [vmem:[#allocation6 + $0x26a0] ss:$12 sps:$4 sm:$0xff]  }
 0xa79   : > { %16596 = vmatpush1.bf16.msra.mxu1 %v24294_v1  ;;  %v24319_v44 = vld [vmem:[#allocation6 + $0x2688] ss:$12 sps:$4 sm:$0xff]   ;;  %v24326_v1 = vld [vmem:[#allocation6 + $0x26a4] ss:$12 sps:$4 sm:$0xff]   ;;  %v24332_v5 = vld [vmem:[#allocation6 + $0x2f00] ss:$12 sps:$4 sm:$0xff]  }
 0xa7a   : > { %v26635_v52 = vadd.f32 %v21819_v38, %v26627_v63  ;;  %21965 = vmatpush3.bf16.msra.mxu0 %v24298_v18  ;;  %16597 = vmatprep.subr.bf16.mxu1 %v24301_v27  ;;  %v24309_v63 = vld [vmem:[#allocation6 + $0x2658] ss:$12 sps:$4 sm:$0xff]   ;;  %v24327_v9 = vld [vmem:[#allocation6 + $0x2ee8] ss:$12 sps:$4 sm:$0xff]   ;;  %v24333_v38 = vld [vmem:[#allocation6 + $0x2e40] ss:$12 sps:$4 sm:$0xff]  }
 0xa7b   : > { %21966 = vmatprep.subr.bf16.mxu0 %v24302_v56  ;;  %v24328_v18 = vld [vmem:[#allocation6 + $0x2e28] ss:$12 sps:$4 sm:$0xff]   ;;  %v24329_v56 = vld [vmem:[#allocation6 + $0x26b8] ss:$12 sps:$4 sm:$0xff]  }
 0xa7c   : > { %v24331_v27 = vld [vmem:[#allocation6 + $0x26bc] ss:$12 sps:$4 sm:$0xff]  }
 0xa7d   : > { %16598 = vmatpush1.bf16.msra.mxu1 %v24299_v37  ;;  %v24336_v37 = vld [vmem:[#allocation6 + $0x26d4] ss:$12 sps:$4 sm:$0xff]  }
 0xa7e   : > { %21967 = vmatpush3.bf16.msra.mxu0 %v24303_v0  ;;  %16610 = vmatprep.subr.bf16.mxu1 %v24306_v7  ;;  %v24337_v0 = vld [vmem:[#allocation6 + $0x2f18] ss:$12 sps:$4 sm:$0xff]  }
 0xa7f   : > { %21974 = vmatprep.subr.bf16.mxu0 %v24307_v57 }
 0xa80   : > { %16600 = vmatmul.mubr.bf16.vlgmr.msra.gmra.mrb[100].mxu1 %v26463_v8  ;;  %v24318_v8 = vld [vmem:[#allocation6 + $0x2df8] ss:$12 sps:$4 sm:$0xff]  }
 0xa81   : > { %17655 = vmatmul.mubr.bf16.vlgmr.msra.gmra.mrb[56].mxu0 %v26511_v62  ;;  %16611 = vmatpush1.bf16.msra.mxu1 %v24304_v3  ;;  %v24334_v3 = vld [vmem:[#allocation6 + $0x26d0] ss:$12 sps:$4 sm:$0xff]  }
 0xa82   : > { %16642 = vmatprep.mubr.bf16.mxu1 %v26467_v16  ;;  %21975 = vmatpush3.bf16.msra.mxu0 %v24308_v29  ;;  %v24323_v16 = vld [vmem:[#allocation6 + $0x2e10] ss:$12 sps:$4 sm:$0xff]  }
 0xa83   : > { %17695 = vmatprep.mubr.bf16.mxu0 %v26513_v24  ;;  %16612 = vmatprep.subr.bf16.mxu1 %v24311_v11 }
 0xa84   : > { %21976 = vmatprep.subr.bf16.mxu0 %v24312_v19  ;;  %v24338_v19 = vld [vmem:[#allocation6 + $0x2e58] ss:$12 sps:$4 sm:$0xff]  }
 0xa85   : > { %16613 = vmatpush1.bf16.msra.mxu1 %v24309_v63  ;;  %v24341_v63 = vld [vmem:[#allocation6 + $0x26ec] ss:$12 sps:$4 sm:$0xff]  }
 0xa86   : > { %21977 = vmatpush3.bf16.msra.mxu0 %v24313_v34  ;;  %16614 = vmatprep.subr.bf16.mxu1 %v24316_v25  ;;  %v24342_v25 = vld [vmem:[#allocation6 + $0x2f30] ss:$12 sps:$4 sm:$0xff]  }
 0xa87   : > { %21978 = vmatprep.subr.bf16.mxu0 %v24317_v12 }
 0xa89   : > { %16615 = vmatpush1.bf16.msra.mxu1 %v24314_v22 }
 0xa8a   : > { %21979 = vmatpush3.bf16.msra.mxu0 %v24318_v8  ;;  %16616 = vmatprep.subr.bf16.mxu1 %v24321_v41  ;;  %v24339_v8 = vld [vmem:[#allocation6 + $0x26e8] ss:$12 sps:$4 sm:$0xff]  }
 0xa8b   : > { %21980 = vmatprep.subr.bf16.mxu0 %v24322_v14  ;;  %v24343_v14 = vld [vmem:[#allocation6 + $0x2e70] ss:$12 sps:$4 sm:$0xff]  }
 0xa8d   : > { %16617 = vmatpush1.bf16.msra.mxu1 %v24319_v44  ;;  %v24346_v44 = vld [vmem:[#allocation6 + $0x2704] ss:$12 sps:$4 sm:$0xff]  }
 0xa8e   : > { %21981 = vmatpush3.bf16.msra.mxu0 %v24323_v16  ;;  %16618 = vmatprep.subr.bf16.mxu1 %v24326_v1  ;;  %v24347_v16 = vld [vmem:[#allocation6 + $0x3008] ss:$12 sps:$4 sm:$0xff]   ;;  %v24344_v1 = vld [vmem:[#allocation6 + $0x2700] ss:$12 sps:$4 sm:$0xff]  }
 0xa8f   : > { %21982 = vmatprep.subr.bf16.mxu0 %v24327_v9  ;;  %v24348_v9 = vld [vmem:[#allocation6 + $0x2f48] ss:$12 sps:$4 sm:$0xff]  }
 0xa91   : > { %16619 = vmatpush1.bf16.msra.mxu1 %v24324_v6  ;;  %v24352_v6 = vld [vmem:[#allocation6 + $0x3020] ss:$12 sps:$4 sm:$0xff]  }
 0xa92   : > { %21983 = vmatpush3.bf16.msra.mxu0 %v24328_v18  ;;  %16620 = vmatprep.subr.bf16.mxu1 %v24331_v27  ;;  %v24349_v18 = vld [vmem:[#allocation6 + $0x2718] ss:$12 sps:$4 sm:$0xff]   ;;  %v24356_v27 = vld [vmem:[#allocation6 + $0x2734] ss:$12 sps:$4 sm:$0xff]  }
 0xa93   : > { %21984 = vmatprep.subr.bf16.mxu0 %v24332_v5  ;;  %v24357_v5 = vld [vmem:[#allocation6 + $0x3038] ss:$12 sps:$4 sm:$0xff]  }
 0xa94   : > { %v21836_v7 = vpop.f32.mrb[32].mxu0 }
 0xa95   : > { %v21837_v57 = vpop.f32.mrb[33].mxu0  ;;  %16621 = vmatpush1.bf16.msra.mxu1 %v24329_v56  ;;  %v24354_v56 = vld [vmem:[#allocation6 + $0x2730] ss:$12 sps:$4 sm:$0xff]  }
 0xa96   : > { %v21838_v29 = vadd.f32 %v21837_v57, %v21836_v7  ;;  %v21839_v11 = vpop.f32.mrb[34].mxu0  ;;  %21985 = vmatpush3.bf16.msra.mxu0 %v24333_v38  ;;  %16622 = vmatprep.subr.bf16.mxu1 %v24336_v37  ;;  %v24358_v38 = vld [vmem:[#allocation6 + $0x2f78] ss:$12 sps:$4 sm:$0xff]   ;;  %v24359_v7 = vld [vmem:[#allocation6 + $0x2748] ss:$12 sps:$4 sm:$0xff]  }
 0xa97   : > { %v21840_v34 = vpop.f32.mrb[35].mxu0  ;;  %21986 = vmatprep.subr.bf16.mxu0 %v24337_v0  ;;  %v24361_v37 = vld [vmem:[#allocation6 + $0x274c] ss:$12 sps:$4 sm:$0xff]   ;;  %v24362_v0 = vld [vmem:[#allocation6 + $0x3050] ss:$12 sps:$4 sm:$0xff]  }
 0xa98   : > { %v26642_v12 = vadd.f32 %v21838_v29, %v26632_v39  ;;  %v21841_v22 = vadd.f32 %v21840_v34, %v21839_v11  ;;  %v24351_v39 = vld [vmem:[#allocation6 + $0x271c] ss:$12 sps:$4 sm:$0xff]   ;;  %v24364_v11 = vld [vmem:[#allocation6 + $0x2760] ss:$12 sps:$4 sm:$0xff]  }
 0xa99   : > { %16623 = vmatpush1.bf16.msra.mxu1 %v24334_v3  ;;  %v24363_v57 = vld [vmem:[#allocation6 + $0x2f90] ss:$12 sps:$4 sm:$0xff]   ;;  %v24367_v29 = vld [vmem:[#allocation6 + $0x3068] ss:$12 sps:$4 sm:$0xff]   ;;  %v24372_v34 = vld [vmem:[#allocation6 + $0x3080] ss:$12 sps:$4 sm:$0xff]  }
 0xa9a   : > { %v26645_v41 = vadd.f32 %v21841_v22, %v26635_v52  ;;  %21987 = vmatpush3.bf16.msra.mxu0 %v24338_v19  ;;  %16624 = vmatprep.subr.bf16.mxu1 %v24341_v63  ;;  %v24353_v52 = vld [vmem:[#allocation6 + $0x2f60] ss:$12 sps:$4 sm:$0xff]   ;;  %v24366_v3 = vld [vmem:[#allocation6 + $0x2764] ss:$12 sps:$4 sm:$0xff]   ;;  %v24368_v19 = vld [vmem:[#allocation6 + $0x2fa8] ss:$12 sps:$4 sm:$0xff]  }
 0xa9b   : > { %21988 = vmatprep.subr.bf16.mxu0 %v24342_v25  ;;  %v24371_v63 = vld [vmem:[#allocation6 + $0x277c] ss:$12 sps:$4 sm:$0xff]   ;;  %v24369_v25 = vld [vmem:[#allocation6 + $0x2778] ss:$12 sps:$4 sm:$0xff]   ;;  %v24373_v22 = vld [vmem:[#allocation6 + $0x2fc0] ss:$12 sps:$4 sm:$0xff]  }
 0xa9d   : > { %16625 = vmatpush1.bf16.msra.mxu1 %v24339_v8  ;;  %v24376_v8 = vld [vmem:[#allocation6 + $0x2794] ss:$12 sps:$4 sm:$0xff]  }
 0xa9e   : > { %21989 = vmatpush3.bf16.msra.mxu0 %v24343_v14  ;;  %16626 = vmatprep.subr.bf16.mxu1 %v24346_v44  ;;  %v24377_v14 = vld [vmem:[#allocation6 + $0x3098] ss:$12 sps:$4 sm:$0xff]  }
 0xa9f   : > { %21996 = vmatprep.subr.bf16.mxu0 %v24347_v16 }
 0xaa1   : > { %17696 = vmatmul.mubr.bf16.vlgmr.msra.gmra.mrb[60].mxu0 %v26515_v51  ;;  %16627 = vmatpush1.bf16.msra.mxu1 %v24344_v1  ;;  %v24374_v1 = vld [vmem:[#allocation6 + $0x2790] ss:$12 sps:$4 sm:$0xff]  }
 0xaa2   : > { %21997 = vmatpush3.bf16.msra.mxu0 %v24348_v9  ;;  %17736 = vmatprep.mubr.bf16.mxu0 %v26518_v35 }
 0xaa3   : > { %16628 = vmatprep.subr.bf16.mxu1 %v24351_v39  ;;  %21998 = vmatprep.subr.bf16.mxu0 %v24352_v6  ;;  %v24378_v6 = vld [vmem:[#allocation6 + $0x2fd8] ss:$12 sps:$4 sm:$0xff]  }
 0xaa5   : > { %16629 = vmatpush1.bf16.msra.mxu1 %v24349_v18  ;;  %v24381_v18 = vld [vmem:[#allocation6 + $0x27ac] ss:$12 sps:$4 sm:$0xff]  }
 0xaa6   : > { %21999 = vmatpush3.bf16.msra.mxu0 %v24353_v52  ;;  %16630 = vmatprep.subr.bf16.mxu1 %v24356_v27  ;;  %v24382_v27 = vld [vmem:[#allocation6 + $0x30b0] ss:$12 sps:$4 sm:$0xff]  }
 0xaa7   : > { %22000 = vmatprep.subr.bf16.mxu0 %v24357_v5 }
 0xaa9   : > { %16631 = vmatpush1.bf16.msra.mxu1 %v24354_v56 }
 0xaaa   : > { %22001 = vmatpush3.bf16.msra.mxu0 %v24358_v38  ;;  %16632 = vmatprep.subr.bf16.mxu1 %v24361_v37  ;;  %v24379_v38 = vld [vmem:[#allocation6 + $0x27a8] ss:$12 sps:$4 sm:$0xff]  }
 0xaab   : > { %22002 = vmatprep.subr.bf16.mxu0 %v24362_v0  ;;  %v24383_v0 = vld [vmem:[#allocation6 + $0x2ff0] ss:$12 sps:$4 sm:$0xff]  }
 0xaad   : > { %16633 = vmatpush1.bf16.msra.mxu1 %v24359_v7  ;;  %v24386_v7 = vld [vmem:[#allocation6 + $0x27c4] ss:$12 sps:$4 sm:$0xff]  }
 0xaae   : > { %22003 = vmatpush3.bf16.msra.mxu0 %v24363_v57  ;;  %16634 = vmatprep.subr.bf16.mxu1 %v24366_v3  ;;  %v24387_v57 = vld [vmem:[#allocation6 + $0x3188] ss:$12 sps:$4 sm:$0xff]   ;;  %v24384_v3 = vld [vmem:[#allocation6 + $0x27c0] ss:$12 sps:$4 sm:$0xff]  }
 0xaaf   : > { %22004 = vmatprep.subr.bf16.mxu0 %v24367_v29  ;;  %v24388_v29 = vld [vmem:[#allocation6 + $0x30c8] ss:$12 sps:$4 sm:$0xff]  }
 0xab1   : > { %16635 = vmatpush1.bf16.msra.mxu1 %v24364_v11  ;;  %v24392_v11 = vld [vmem:[#allocation6 + $0x31a0] ss:$12 sps:$4 sm:$0xff]  }
 0xab2   : > { %22005 = vmatpush3.bf16.msra.mxu0 %v24368_v19  ;;  %16636 = vmatprep.subr.bf16.mxu1 %v24371_v63  ;;  %v24393_v19 = vld [vmem:[#allocation6 + $0x30e0] ss:$12 sps:$4 sm:$0xff]  }
 0xab3   : > { %22006 = vmatprep.subr.bf16.mxu0 %v24372_v34  ;;  %v24396_v63 = vld [vmem:[#allocation6 + $0x27f4] ss:$12 sps:$4 sm:$0xff]   ;;  %v24397_v34 = vld [vmem:[#allocation6 + $0x31b8] ss:$12 sps:$4 sm:$0xff]  }
 0xab4   : > { %v21858_v44 = vpop.f32.mrb[36].mxu0 }
 0xab5   : > { %v21859_v16 = vpop.f32.mrb[37].mxu0  ;;  %16637 = vmatpush1.bf16.msra.mxu1 %v24369_v25  ;;  %v24394_v25 = vld [vmem:[#allocation6 + $0x27f0] ss:$12 sps:$4 sm:$0xff]  }
 0xab6   : > { %v21860_v9 = vadd.f32 %v21859_v16, %v21858_v44  ;;  %v21861_v39 = vpop.f32.mrb[38].mxu0  ;;  %22007 = vmatpush3.bf16.msra.mxu0 %v24373_v22  ;;  %16638 = vmatprep.subr.bf16.mxu1 %v24376_v8  ;;  %v24401_v22 = vld [vmem:[#allocation6 + $0x280c] ss:$12 sps:$4 sm:$0xff]   ;;  %v24402_v8 = vld [vmem:[#allocation6 + $0x31d0] ss:$12 sps:$4 sm:$0xff]  }
 0xab7   : > { %v21862_v52 = vpop.f32.mrb[39].mxu0  ;;  %22008 = vmatprep.subr.bf16.mxu0 %v24377_v14  ;;  %v24399_v14 = vld [vmem:[#allocation6 + $0x2808] ss:$12 sps:$4 sm:$0xff]   ;;  %v24406_v44 = vld [vmem:[#allocation6 + $0x2824] ss:$12 sps:$4 sm:$0xff]  }
 0xab8   : > { %v26650_v5 = vadd.f32 %v21860_v9, %v26642_v12  ;;  %v21863_v56 = vadd.f32 %v21862_v52, %v21861_v39  ;;  %v24391_v12 = vld [vmem:[#allocation6 + $0x27dc] ss:$12 sps:$4 sm:$0xff]   ;;  %v24413_v52 = vld [vmem:[#allocation6 + $0x3140] ss:$12 sps:$4 sm:$0xff]  }
 0xab9   : > { %16639 = vmatpush1.bf16.msra.mxu1 %v24374_v1  ;;  %v24407_v16 = vld [vmem:[#allocation6 + $0x31e8] ss:$12 sps:$4 sm:$0xff]   ;;  %v24404_v1 = vld [vmem:[#allocation6 + $0x2820] ss:$12 sps:$4 sm:$0xff]  }
 0xaba   : > { %v26653_v37 = vadd.f32 %v21863_v56, %v26645_v41  ;;  %22009 = vmatpush3.bf16.msra.mxu0 %v24378_v6  ;;  %16640 = vmatprep.subr.bf16.mxu1 %v24381_v18  ;;  %v24389_v41 = vld [vmem:[#allocation6 + $0x27d8] ss:$12 sps:$4 sm:$0xff]   ;;  %v24408_v9 = vld [vmem:[#allocation6 + $0x3128] ss:$12 sps:$4 sm:$0xff]   ;;  %v24412_v6 = vld [vmem:[#allocation6 + $0x3200] ss:$12 sps:$4 sm:$0xff]  }
 0xabb   : > { %22010 = vmatprep.subr.bf16.mxu0 %v24382_v27  ;;  %v24411_v39 = vld [vmem:[#allocation6 + $0x283c] ss:$12 sps:$4 sm:$0xff]   ;;  %v24409_v18 = vld [vmem:[#allocation6 + $0x2838] ss:$12 sps:$4 sm:$0xff]   ;;  %v24416_v27 = vld [vmem:[#allocation6 + $0x2854] ss:$12 sps:$4 sm:$0xff]  }
 0xabc   : > { %v24417_v56 = vld [vmem:[#allocation6 + $0x3218] ss:$12 sps:$4 sm:$0xff]  }
 0xabd   : > { %16641 = vmatpush1.bf16.msra.mxu1 %v24379_v38 }
 0xabe   : > { %22011 = vmatpush3.bf16.msra.mxu0 %v24383_v0  ;;  %16653 = vmatprep.subr.bf16.mxu1 %v24386_v7  ;;  %v24414_v7 = vld [vmem:[#allocation6 + $0x2850] ss:$12 sps:$4 sm:$0xff]  }
 0xabf   : > { %22018 = vmatprep.subr.bf16.mxu0 %v24387_v57 }
 0xac0   : > { %16643 = vmatmul.mubr.bf16.vlgmr.msra.gmra.mrb[100].mxu1 %v26473_v48  ;;  %v24398_v48 = vld [vmem:[#allocation6 + $0x30f8] ss:$12 sps:$4 sm:$0xff]  }
 0xac1   : > { %21126 = vmatmul.mubr.msk.bf16.vlgmr.msra.gmra.mrb[64].mxu0 %vm26153_vm12, %v26414_v36  ;;  %16654 = vmatpush1.bf16.msra.mxu1 %v24384_v3 }
 0xac2   : > { %16685 = vmatprep.mubr.bf16.mxu1 %v26476_v60  ;;  %22019 = vmatpush3.bf16.msra.mxu0 %v24388_v29  ;;  %v24403_v60 = vld [vmem:[#allocation6 + $0x3110] ss:$12 sps:$4 sm:$0xff]   ;;  %v24418_v29 = vld [vmem:[#allocation6 + $0x3158] ss:$12 sps:$4 sm:$0xff]  }
 0xac3   : > { %17777 = vmatprep.mubr.bf16.mxu0 %v26533_v21  ;;  %16655 = vmatprep.subr.bf16.mxu1 %v24391_v12  ;;  %v24421_v12 = vld [vmem:[#allocation6 + $0x286c] ss:$12 sps:$4 sm:$0xff]  }
 0xac4   : > { %22020 = vmatprep.subr.bf16.mxu0 %v24392_v11 }
 0xac5   : > { %16656 = vmatpush1.bf16.msra.mxu1 %v24389_v41  ;;  %v24422_v41 = vld [vmem:[#allocation6 + $0x3230] ss:$12 sps:$4 sm:$0xff]  }
 0xac6   : > { %22021 = vmatpush3.bf16.msra.mxu0 %v24393_v19  ;;  %16657 = vmatprep.subr.bf16.mxu1 %v24396_v63 }
 0xac7   : > { %22022 = vmatprep.subr.bf16.mxu0 %v24397_v34  ;;  %v24419_v34 = vld [vmem:[#allocation6 + $0x2868] ss:$12 sps:$4 sm:$0xff]  }
 0xac9   : > { %16658 = vmatpush1.bf16.msra.mxu1 %v24394_v25 }
 0xaca   : > { %22023 = vmatpush3.bf16.msra.mxu0 %v24398_v48  ;;  %16659 = vmatprep.subr.bf16.mxu1 %v24401_v22  ;;  %v24423_v48 = vld [vmem:[#allocation6 + $0x3170] ss:$12 sps:$4 sm:$0xff]  }
 0xacb   : > { %22024 = vmatprep.subr.bf16.mxu0 %v24402_v8  ;;  %v24426_v22 = vld [vmem:[#allocation6 + $0x2884] ss:$12 sps:$4 sm:$0xff]   ;;  %v24427_v8 = vld [vmem:[#allocation6 + $0x3308] ss:$12 sps:$4 sm:$0xff]  }
 0xacd   : > { %16660 = vmatpush1.bf16.msra.mxu1 %v24399_v14  ;;  %v24424_v14 = vld [vmem:[#allocation6 + $0x2880] ss:$12 sps:$4 sm:$0xff]  }
 0xace   : > { %22025 = vmatpush3.bf16.msra.mxu0 %v24403_v60  ;;  %16661 = vmatprep.subr.bf16.mxu1 %v24406_v44  ;;  %v24428_v60 = vld [vmem:[#allocation6 + $0x3248] ss:$12 sps:$4 sm:$0xff]   ;;  %v24432_v44 = vld [vmem:[#allocation6 + $0x3320] ss:$12 sps:$4 sm:$0xff]  }
 0xacf   : > { %22026 = vmatprep.subr.bf16.mxu0 %v24407_v16  ;;  %v24429_v16 = vld [vmem:[#allocation6 + $0x2898] ss:$12 sps:$4 sm:$0xff]  }
 0xad1   : > { %16662 = vmatpush1.bf16.msra.mxu1 %v24404_v1  ;;  %v24436_v1 = vld [vmem:[#allocation6 + $0x28b4] ss:$12 sps:$4 sm:$0xff]  }
 0xad2   : > { %22027 = vmatpush3.bf16.msra.mxu0 %v24408_v9  ;;  %16663 = vmatprep.subr.bf16.mxu1 %v24411_v39  ;;  %v24437_v9 = vld [vmem:[#allocation6 + $0x3338] ss:$12 sps:$4 sm:$0xff]   ;;  %v24434_v39 = vld [vmem:[#allocation6 + $0x28b0] ss:$12 sps:$4 sm:$0xff]  }
 0xad3   : > { %22028 = vmatprep.subr.bf16.mxu0 %v24412_v6  ;;  %v24438_v6 = vld [vmem:[#allocation6 + $0x3278] ss:$12 sps:$4 sm:$0xff]  }
 0xad4   : > { %v21880_v38 = vpop.f32.mrb[40].mxu0 }
 0xad5   : > { %v21881_v0 = vpop.f32.mrb[41].mxu0  ;;  %16664 = vmatpush1.bf16.msra.mxu1 %v24409_v18  ;;  %v24441_v18 = vld [vmem:[#allocation6 + $0x28cc] ss:$12 sps:$4 sm:$0xff]  }
 0xad6   : > { %v21882_v57 = vadd.f32 %v21881_v0, %v21880_v38  ;;  %v21883_v3 = vpop.f32.mrb[42].mxu0  ;;  %22029 = vmatpush3.bf16.msra.mxu0 %v24413_v52  ;;  %16665 = vmatprep.subr.bf16.mxu1 %v24416_v27  ;;  %v24442_v52 = vld [vmem:[#allocation6 + $0x3350] ss:$12 sps:$4 sm:$0xff]   ;;  %v24439_v27 = vld [vmem:[#allocation6 + $0x28c8] ss:$12 sps:$4 sm:$0xff]  }
 0xad7   : > { %v21884_v11 = vpop.f32.mrb[43].mxu0  ;;  %22030 = vmatprep.subr.bf16.mxu0 %v24417_v56  ;;  %v24443_v56 = vld [vmem:[#allocation6 + $0x3290] ss:$12 sps:$4 sm:$0xff]   ;;  %v24447_v0 = vld [vmem:[#allocation6 + $0x3368] ss:$12 sps:$4 sm:$0xff]  }
 0xad8   : > { %v26662_v19 = vadd.f32 %v21882_v57, %v26650_v5  ;;  %v21885_v63 = vadd.f32 %v21884_v11, %v21883_v3  ;;  %v24431_v5 = vld [vmem:[#allocation6 + $0x289c] ss:$12 sps:$4 sm:$0xff]   ;;  %v24446_v38 = vld [vmem:[#allocation6 + $0x28e4] ss:$12 sps:$4 sm:$0xff]   ;;  %v24453_v11 = vld [vmem:[#allocation6 + $0x32c0] ss:$12 sps:$4 sm:$0xff]  }
 0xad9   : > { %16666 = vmatpush1.bf16.msra.mxu1 %v24414_v7  ;;  %v24444_v7 = vld [vmem:[#allocation6 + $0x28e0] ss:$12 sps:$4 sm:$0xff]   ;;  %v24448_v57 = vld [vmem:[#allocation6 + $0x32a8] ss:$12 sps:$4 sm:$0xff]  }
 0xada   : > { %v26665_v25 = vadd.f32 %v21885_v63, %v26653_v37  ;;  %22031 = vmatpush3.bf16.msra.mxu0 %v24418_v29  ;;  %16667 = vmatprep.subr.bf16.mxu1 %v24421_v12  ;;  %v24433_v37 = vld [vmem:[#allocation6 + $0x3260] ss:$12 sps:$4 sm:$0xff]   ;;  %v24451_v3 = vld [vmem:[#allocation6 + $0x28fc] ss:$12 sps:$4 sm:$0xff]   ;;  %v24449_v12 = vld [vmem:[#allocation6 + $0x28f8] ss:$12 sps:$4 sm:$0xff]  }
 0xadb   : > { %22032 = vmatprep.subr.bf16.mxu0 %v24422_v41  ;;  %v24452_v29 = vld [vmem:[#allocation6 + $0x3380] ss:$12 sps:$4 sm:$0xff]   ;;  %v24457_v63 = vld [vmem:[#allocation6 + $0x3398] ss:$12 sps:$4 sm:$0xff]  }
 0xadc   : > { %v24456_v41 = vld [vmem:[#allocation6 + $0x2914] ss:$12 sps:$4 sm:$0xff]  }
 0xadd   : > { %16668 = vmatpush1.bf16.msra.mxu1 %v24419_v34 }
 0xade   : > { %22033 = vmatpush3.bf16.msra.mxu0 %v24423_v48  ;;  %16669 = vmatprep.subr.bf16.mxu1 %v24426_v22  ;;  %v24454_v22 = vld [vmem:[#allocation6 + $0x2910] ss:$12 sps:$4 sm:$0xff]  }
 0xadf   : > { %22040 = vmatprep.subr.bf16.mxu0 %v24427_v8 }
 0xae1   : > { %17778 = vmatmul.mubr.bf16.vlgmr.msra.gmra.mrb[68].mxu0 %v26536_v23  ;;  %16670 = vmatpush1.bf16.msra.mxu1 %v24424_v14 }
 0xae2   : > { %22041 = vmatpush3.bf16.msra.mxu0 %v24428_v60  ;;  %17818 = vmatprep.mubr.bf16.mxu0 %v26539_v46  ;;  %v24458_v60 = vld [vmem:[#allocation6 + $0x32d8] ss:$12 sps:$4 sm:$0xff]  }
 0xae3   : > { %16671 = vmatprep.subr.bf16.mxu1 %v24431_v5  ;;  %22042 = vmatprep.subr.bf16.mxu0 %v24432_v44  ;;  %v24461_v5 = vld [vmem:[#allocation6 + $0x292c] ss:$12 sps:$4 sm:$0xff]  }
 0xae5   : > { %16672 = vmatpush1.bf16.msra.mxu1 %v24429_v16  ;;  %v24462_v16 = vld [vmem:[#allocation6 + $0x33b0] ss:$12 sps:$4 sm:$0xff]  }
 0xae6   : > { %22043 = vmatpush3.bf16.msra.mxu0 %v24433_v37  ;;  %16673 = vmatprep.subr.bf16.mxu1 %v24436_v1 }
 0xae7   : > { %22044 = vmatprep.subr.bf16.mxu0 %v24437_v9  ;;  %v24459_v9 = vld [vmem:[#allocation6 + $0x2928] ss:$12 sps:$4 sm:$0xff]  }
 0xae9   : > { %16674 = vmatpush1.bf16.msra.mxu1 %v24434_v39 }
 0xaea   : > { %22045 = vmatpush3.bf16.msra.mxu0 %v24438_v6  ;;  %16675 = vmatprep.subr.bf16.mxu1 %v24441_v18  ;;  %v24463_v6 = vld [vmem:[#allocation6 + $0x32f0] ss:$12 sps:$4 sm:$0xff]  }
 0xaeb   : > { %22046 = vmatprep.subr.bf16.mxu0 %v24442_v52  ;;  %v24466_v18 = vld [vmem:[#allocation6 + $0x2944] ss:$12 sps:$4 sm:$0xff]   ;;  %v24467_v52 = vld [vmem:[#allocation6 + $0x3488] ss:$12 sps:$4 sm:$0xff]  }
 0xaed   : > { %16676 = vmatpush1.bf16.msra.mxu1 %v24439_v27  ;;  %v24464_v27 = vld [vmem:[#allocation6 + $0x2940] ss:$12 sps:$4 sm:$0xff]  }
 0xaee   : > { %22047 = vmatpush3.bf16.msra.mxu0 %v24443_v56  ;;  %16677 = vmatprep.subr.bf16.mxu1 %v24446_v38  ;;  %v24468_v56 = vld [vmem:[#allocation6 + $0x33c8] ss:$12 sps:$4 sm:$0xff]   ;;  %v24472_v38 = vld [vmem:[#allocation6 + $0x34a0] ss:$12 sps:$4 sm:$0xff]  }
 0xaef   : > { %22048 = vmatprep.subr.bf16.mxu0 %v24447_v0  ;;  %v24473_v0 = vld [vmem:[#allocation6 + $0x33e0] ss:$12 sps:$4 sm:$0xff]  }
 0xaf1   : > { %16678 = vmatpush1.bf16.msra.mxu1 %v24444_v7  ;;  %v24476_v7 = vld [vmem:[#allocation6 + $0x2974] ss:$12 sps:$4 sm:$0xff]  }
 0xaf2   : > { %22049 = vmatpush3.bf16.msra.mxu0 %v24448_v57  ;;  %16679 = vmatprep.subr.bf16.mxu1 %v24451_v3  ;;  %v24477_v57 = vld [vmem:[#allocation6 + $0x34b8] ss:$12 sps:$4 sm:$0xff]   ;;  %v24474_v3 = vld [vmem:[#allocation6 + $0x2970] ss:$12 sps:$4 sm:$0xff]  }
 0xaf3   : > { %22050 = vmatprep.subr.bf16.mxu0 %v24452_v29  ;;  %v24481_v29 = vld [vmem:[#allocation6 + $0x298c] ss:$12 sps:$4 sm:$0xff]  }
 0xaf4   : > { %v21902_v34 = vpop.f32.mrb[44].mxu0 }
 0xaf5   : > { %v21903_v48 = vpop.f32.mrb[45].mxu0  ;;  %16680 = vmatpush1.bf16.msra.mxu1 %v24449_v12  ;;  %v24482_v12 = vld [vmem:[#allocation6 + $0x34d0] ss:$12 sps:$4 sm:$0xff]  }
 0xaf6   : > { %v21904_v8 = vadd.f32 %v21903_v48, %v21902_v34  ;;  %v21905_v14 = vpop.f32.mrb[46].mxu0  ;;  %22051 = vmatpush3.bf16.msra.mxu0 %v24453_v11  ;;  %16681 = vmatprep.subr.bf16.mxu1 %v24456_v41  ;;  %v24479_v11 = vld [vmem:[#allocation6 + $0x2988] ss:$12 sps:$4 sm:$0xff]   ;;  %v24486_v41 = vld [vmem:[#allocation6 + $0x29a4] ss:$12 sps:$4 sm:$0xff]  }
 0xaf7   : > { %v21906_v44 = vpop.f32.mrb[47].mxu0  ;;  %22052 = vmatprep.subr.bf16.mxu0 %v24457_v63  ;;  %v24487_v63 = vld [vmem:[#allocation6 + $0x34e8] ss:$12 sps:$4 sm:$0xff]   ;;  %v24484_v34 = vld [vmem:[#allocation6 + $0x29a0] ss:$12 sps:$4 sm:$0xff]  }
 0xaf8   : > { %v26670_v37 = vadd.f32 %v21904_v8, %v26662_v19  ;;  %v21907_v1 = vadd.f32 %v21906_v44, %v21905_v14  ;;  %v24471_v19 = vld [vmem:[#allocation6 + $0x295c] ss:$12 sps:$4 sm:$0xff]   ;;  %v24492_v8 = vld [vmem:[#allocation6 + $0x3500] ss:$12 sps:$4 sm:$0xff]   ;;  %v24489_v14 = vld [vmem:[#allocation6 + $0x29b8] ss:$12 sps:$4 sm:$0xff]  }
 0xaf9   : > { %16682 = vmatpush1.bf16.msra.mxu1 %v24454_v22  ;;  %v24488_v48 = vld [vmem:[#allocation6 + $0x3428] ss:$12 sps:$4 sm:$0xff]   ;;  %v24497_v44 = vld [vmem:[#allocation6 + $0x3518] ss:$12 sps:$4 sm:$0xff]  }
 0xafa   : > { %v26673_v39 = vadd.f32 %v21907_v1, %v26665_v25  ;;  %22053 = vmatpush3.bf16.msra.mxu0 %v24458_v60  ;;  %16683 = vmatprep.subr.bf16.mxu1 %v24461_v5  ;;  %v24469_v25 = vld [vmem:[#allocation6 + $0x2958] ss:$12 sps:$4 sm:$0xff]   ;;  %v24491_v22 = vld [vmem:[#allocation6 + $0x29bc] ss:$12 sps:$4 sm:$0xff]   ;;  %v24493_v60 = vld [vmem:[#allocation6 + $0x3440] ss:$12 sps:$4 sm:$0xff]  }
 0xafb   : > { %22054 = vmatprep.subr.bf16.mxu0 %v24462_v16  ;;  %v24496_v5 = vld [vmem:[#allocation6 + $0x29d4] ss:$12 sps:$4 sm:$0xff]  }
 0xafd   : > { %16684 = vmatpush1.bf16.msra.mxu1 %v24459_v9  ;;  %v24494_v9 = vld [vmem:[#allocation6 + $0x29d0] ss:$12 sps:$4 sm:$0xff]  }
 0xafe   : > { %22055 = vmatpush3.bf16.msra.mxu0 %v24463_v6  ;;  %16696 = vmatprep.subr.bf16.mxu1 %v24466_v18 }
 0xaff   : > { %22062 = vmatprep.subr.bf16.mxu0 %v24467_v52  ;;  %v24498_v52 = vld [vmem:[#allocation6 + $0x3458] ss:$12 sps:$4 sm:$0xff]  }
 0xb00   : > { %16686 = vmatmul.mubr.bf16.vlgmr.msra.gmra.mrb[100].mxu1 %v26479_v47  ;;  %v24478_v47 = vld [vmem:[#allocation6 + $0x33f8] ss:$12 sps:$4 sm:$0xff]  }
 0xb01   : > { %17819 = vmatmul.mubr.bf16.vlgmr.msra.gmra.mrb[72].mxu0 %v26552_v54  ;;  %16697 = vmatpush1.bf16.msra.mxu1 %v24464_v27  ;;  %v24501_v27 = vld [vmem:[#allocation6 + $0x29ec] ss:$12 sps:$4 sm:$0xff]  }
 0xb02   : > { %16728 = vmatprep.mubr.bf16.mxu1 %v26490_v10  ;;  %22063 = vmatpush3.bf16.msra.mxu0 %v24468_v56  ;;  %v24483_v10 = vld [vmem:[#allocation6 + $0x3410] ss:$12 sps:$4 sm:$0xff]  }
 0xb03   : > { %17859 = vmatprep.mubr.bf16.mxu0 %v26554_v30  ;;  %16698 = vmatprep.subr.bf16.mxu1 %v24471_v19  ;;  %v24502_v19 = vld [vmem:[#allocation6 + $0x3530] ss:$12 sps:$4 sm:$0xff]  }
 0xb04   : > { %22064 = vmatprep.subr.bf16.mxu0 %v24472_v38 }
 0xb05   : > { %16699 = vmatpush1.bf16.msra.mxu1 %v24469_v25 }
 0xb06   : > { %22065 = vmatpush3.bf16.msra.mxu0 %v24473_v0  ;;  %16700 = vmatprep.subr.bf16.mxu1 %v24476_v7  ;;  %v24499_v0 = vld [vmem:[#allocation6 + $0x29e8] ss:$12 sps:$4 sm:$0xff]  }
 0xb07   : > { %22066 = vmatprep.subr.bf16.mxu0 %v24477_v57  ;;  %v24503_v57 = vld [vmem:[#allocation6 + $0x3470] ss:$12 sps:$4 sm:$0xff]  }
 0xb09   : > { %16701 = vmatpush1.bf16.msra.mxu1 %v24474_v3  ;;  %v24506_v3 = vld [vmem:[#allocation6 + $0x2a04] ss:$12 sps:$4 sm:$0xff]  }
 0xb0a   : > { %22067 = vmatpush3.bf16.msra.mxu0 %v24478_v47  ;;  %16702 = vmatprep.subr.bf16.mxu1 %v24481_v29  ;;  %v24507_v47 = vld [vmem:[#allocation6 + $0x3608] ss:$12 sps:$4 sm:$0xff]   ;;  %v24504_v29 = vld [vmem:[#allocation6 + $0x2a00] ss:$12 sps:$4 sm:$0xff]  }
 0xb0b   : > { %22068 = vmatprep.subr.bf16.mxu0 %v24482_v12  ;;  %v24508_v12 = vld [vmem:[#allocation6 + $0x3548] ss:$12 sps:$4 sm:$0xff]  }
 0xb0d   : > { %16703 = vmatpush1.bf16.msra.mxu1 %v24479_v11  ;;  %v24512_v11 = vld [vmem:[#allocation6 + $0x3620] ss:$12 sps:$4 sm:$0xff]  }
 0xb0e   : > { %22069 = vmatpush3.bf16.msra.mxu0 %v24483_v10  ;;  %16704 = vmatprep.subr.bf16.mxu1 %v24486_v41  ;;  %v26687_v10 = vpack.c.bf16 %v25851_v32, %v26509_v13  ;;  %v24513_v41 = vld [vmem:[#allocation6 + $0x3560] ss:$12 sps:$4 sm:$0xff]   ;;  %v24522_v32 = vld [vmem:[#allocation6 + $0x3650] ss:$12 sps:$4 sm:$0xff]   ;;  %v24519_v13 = vld [vmem:[#allocation6 + $0x2a48] ss:$12 sps:$4 sm:$0xff]  }
 0xb0f   : > { %22070 = vmatprep.subr.bf16.mxu0 %v24487_v63  ;;  %v24516_v63 = vld [vmem:[#allocation6 + $0x2a34] ss:$12 sps:$4 sm:$0xff]  }
 0xb11   : > { %16705 = vmatpush1.bf16.msra.mxu1 %v24484_v34  ;;  %v24517_v34 = vld [vmem:[#allocation6 + $0x3638] ss:$12 sps:$4 sm:$0xff]  }
 0xb12   : > { %22071 = vmatpush3.bf16.msra.mxu0 %v24488_v48  ;;  %16706 = vmatprep.subr.bf16.mxu1 %v24491_v22  ;;  %v24514_v48 = vld [vmem:[#allocation6 + $0x2a30] ss:$12 sps:$4 sm:$0xff]   ;;  %v24518_v22 = vld [vmem:[#allocation6 + $0x3578] ss:$12 sps:$4 sm:$0xff]  }
 0xb13   : > { %22072 = vmatprep.subr.bf16.mxu0 %v24492_v8  ;;  %v24521_v8 = vld [vmem:[#allocation6 + $0x2a4c] ss:$12 sps:$4 sm:$0xff]  }
 0xb14   : > { %v21924_v16 = vpop.f32.mrb[48].mxu0 }
 0xb15   : > { %v21925_v1 = vpop.f32.mrb[49].mxu0  ;;  %16707 = vmatpush1.bf16.msra.mxu1 %v24489_v14  ;;  %v24523_v14 = vld [vmem:[#allocation6 + $0x3590] ss:$12 sps:$4 sm:$0xff]  }
 0xb16   : > { %v21926_v6 = vadd.f32 %v21925_v1, %v21924_v16  ;;  %v21927_v18 = vpop.f32.mrb[50].mxu0  ;;  %22073 = vmatpush3.bf16.msra.mxu0 %v24493_v60  ;;  %16708 = vmatprep.subr.bf16.mxu1 %v24496_v5  ;;  %v24526_v60 = vld [vmem:[#allocation6 + $0x2a64] ss:$12 sps:$4 sm:$0xff]   ;;  %v24527_v5 = vld [vmem:[#allocation6 + $0x3668] ss:$12 sps:$4 sm:$0xff]  }
 0xb17   : > { %v21928_v56 = vpop.f32.mrb[51].mxu0  ;;  %22074 = vmatprep.subr.bf16.mxu0 %v24497_v44  ;;  %v24524_v44 = vld [vmem:[#allocation6 + $0x2a60] ss:$12 sps:$4 sm:$0xff]   ;;  %v24528_v16 = vld [vmem:[#allocation6 + $0x35a8] ss:$12 sps:$4 sm:$0xff]  }
 0xb18   : > { %v26680_v38 = vadd.f32 %v21926_v6, %v26670_v37  ;;  %v21929_v25 = vadd.f32 %v21928_v56, %v21927_v18  ;;  %v24511_v37 = vld [vmem:[#allocation6 + $0x2a1c] ss:$12 sps:$4 sm:$0xff]   ;;  %v24529_v6 = vld [vmem:[#allocation6 + $0x2a78] ss:$12 sps:$4 sm:$0xff]   ;;  %v24533_v18 = vld [vmem:[#allocation6 + $0x35c0] ss:$12 sps:$4 sm:$0xff]  }
 0xb19   : > { %16709 = vmatpush1.bf16.msra.mxu1 %v24494_v9  ;;  %v24531_v1 = vld [vmem:[#allocation6 + $0x2a7c] ss:$12 sps:$4 sm:$0xff]   ;;  %v24532_v9 = vld [vmem:[#allocation6 + $0x3680] ss:$12 sps:$4 sm:$0xff]  }
 0xb1a   : > { %v26683_v7 = vadd.f32 %v21929_v25, %v26673_v39  ;;  %22075 = vmatpush3.bf16.msra.mxu0 %v24498_v52  ;;  %16710 = vmatprep.subr.bf16.mxu1 %v24501_v27  ;;  %v24509_v39 = vld [vmem:[#allocation6 + $0x2a18] ss:$12 sps:$4 sm:$0xff]   ;;  %v24536_v52 = vld [vmem:[#allocation6 + $0x2a94] ss:$12 sps:$4 sm:$0xff]   ;;  %v24534_v25 = vld [vmem:[#allocation6 + $0x2a90] ss:$12 sps:$4 sm:$0xff]  }
 0xb1b   : > { %22076 = vmatprep.subr.bf16.mxu0 %v24502_v19  ;;  %v24537_v27 = vld [vmem:[#allocation6 + $0x3698] ss:$12 sps:$4 sm:$0xff]  }
 0xb1d   : > { %16711 = vmatpush1.bf16.msra.mxu1 %v24499_v0 }
 0xb1e   : > { %22077 = vmatpush3.bf16.msra.mxu0 %v24503_v57  ;;  %16712 = vmatprep.subr.bf16.mxu1 %v24506_v3  ;;  %v24538_v3 = vld [vmem:[#allocation6 + $0x35d8] ss:$12 sps:$4 sm:$0xff]  }
 0xb1f   : > { %22084 = vmatprep.subr.bf16.mxu0 %v24507_v47  ;;  %v24541_v47 = vld [vmem:[#allocation6 + $0x2aac] ss:$12 sps:$4 sm:$0xff]  }
 0xb21   : > { %17860 = vmatmul.mubr.bf16.vlgmr.msra.gmra.mrb[76].mxu0 %v26557_v50  ;;  %16713 = vmatpush1.bf16.msra.mxu1 %v24504_v29 }
 0xb22   : > { %22085 = vmatpush3.bf16.msra.mxu0 %v24508_v12  ;;  %17900 = vmatprep.mubr.bf16.mxu0 %v26687_v10  ;;  %v24542_v12 = vld [vmem:[#allocation6 + $0x36b0] ss:$12 sps:$4 sm:$0xff]  }
 0xb23   : > { %16714 = vmatprep.subr.bf16.mxu1 %v24511_v37  ;;  %22086 = vmatprep.subr.bf16.mxu0 %v24512_v11 }
 0xb25   : > { %16715 = vmatpush1.bf16.msra.mxu1 %v24509_v39  ;;  %v24539_v39 = vld [vmem:[#allocation6 + $0x2aa8] ss:$12 sps:$4 sm:$0xff]  }
 0xb26   : > { %22087 = vmatpush3.bf16.msra.mxu0 %v24513_v41  ;;  %16716 = vmatprep.subr.bf16.mxu1 %v24516_v63  ;;  %v24543_v63 = vld [vmem:[#allocation6 + $0x35f0] ss:$12 sps:$4 sm:$0xff]  }
 0xb27   : > { %22088 = vmatprep.subr.bf16.mxu0 %v24517_v34  ;;  %v24546_v34 = vld [vmem:[#allocation6 + $0x2ac4] ss:$12 sps:$4 sm:$0xff]  }
 0xb29   : > { %16717 = vmatpush1.bf16.msra.mxu1 %v24514_v48  ;;  %v24547_v48 = vld [vmem:[#allocation6 + $0x3788] ss:$12 sps:$4 sm:$0xff]  }
 0xb2a   : > { %22089 = vmatpush3.bf16.msra.mxu0 %v24518_v22  ;;  %16718 = vmatprep.subr.bf16.mxu1 %v24521_v8  ;;  %v24544_v22 = vld [vmem:[#allocation6 + $0x2ac0] ss:$12 sps:$4 sm:$0xff]   ;;  %v24548_v8 = vld [vmem:[#allocation6 + $0x36c8] ss:$12 sps:$4 sm:$0xff]  }
 0xb2b   : > { %22090 = vmatprep.subr.bf16.mxu0 %v24522_v32  ;;  %v24551_v32 = vld [vmem:[#allocation6 + $0x2adc] ss:$12 sps:$4 sm:$0xff]  }
 0xb2d   : > { %16719 = vmatpush1.bf16.msra.mxu1 %v24519_v13  ;;  %v26709_v13 = vpack.c.bf16 %v25860_v59, %v26522_v28  ;;  %v24562_v59 = vld [vmem:[#allocation6 + $0x37d0] ss:$12 sps:$4 sm:$0xff]   ;;  %v24559_v28 = vld [vmem:[#allocation6 + $0x2b08] ss:$12 sps:$4 sm:$0xff]  }
 0xb2e   : > { %22091 = vmatpush3.bf16.msra.mxu0 %v24523_v14  ;;  %16720 = vmatprep.subr.bf16.mxu1 %v24526_v60  ;;  %v24549_v14 = vld [vmem:[#allocation6 + $0x2ad8] ss:$12 sps:$4 sm:$0xff]   ;;  %v24556_v60 = vld [vmem:[#allocation6 + $0x2af4] ss:$12 sps:$4 sm:$0xff]  }
 0xb2f   : > { %22092 = vmatprep.subr.bf16.mxu0 %v24527_v5  ;;  %v24558_v5 = vld [vmem:[#allocation6 + $0x36f8] ss:$12 sps:$4 sm:$0xff]  }
 0xb31   : > { %16721 = vmatpush1.bf16.msra.mxu1 %v24524_v44  ;;  %v24561_v44 = vld [vmem:[#allocation6 + $0x2b0c] ss:$12 sps:$4 sm:$0xff]  }
 0xb32   : > { %22093 = vmatpush3.bf16.msra.mxu0 %v24528_v16  ;;  %16722 = vmatprep.subr.bf16.mxu1 %v24531_v1  ;;  %v24566_v16 = vld [vmem:[#allocation6 + $0x2b24] ss:$12 sps:$4 sm:$0xff]   ;;  %v24567_v1 = vld [vmem:[#allocation6 + $0x37e8] ss:$12 sps:$4 sm:$0xff]  }
 0xb33   : > { %22094 = vmatprep.subr.bf16.mxu0 %v24532_v9  ;;  %v24564_v9 = vld [vmem:[#allocation6 + $0x2b20] ss:$12 sps:$4 sm:$0xff]  }
 0xb34   : > { %v21946_v56 = vpop.f32.mrb[52].mxu0 }
 0xb35   : > { %v21947_v19 = vpop.f32.mrb[53].mxu0  ;;  %16723 = vmatpush1.bf16.msra.mxu1 %v24529_v6  ;;  %v24568_v6 = vld [vmem:[#allocation6 + $0x3728] ss:$12 sps:$4 sm:$0xff]  }
 0xb36   : > { %v21948_v0 = vadd.f32 %v21947_v19, %v21946_v56  ;;  %v21949_v57 = vpop.f32.mrb[54].mxu0  ;;  %22095 = vmatpush3.bf16.msra.mxu0 %v24533_v18  ;;  %16724 = vmatprep.subr.bf16.mxu1 %v24536_v52  ;;  %v24571_v18 = vld [vmem:[#allocation6 + $0x2b3c] ss:$12 sps:$4 sm:$0xff]   ;;  %v24572_v52 = vld [vmem:[#allocation6 + $0x3800] ss:$12 sps:$4 sm:$0xff]  }
 0xb37   : > { %v21950_v29 = vpop.f32.mrb[55].mxu0  ;;  %22096 = vmatprep.subr.bf16.mxu0 %v24537_v27  ;;  %v24569_v27 = vld [vmem:[#allocation6 + $0x2b38] ss:$12 sps:$4 sm:$0xff]   ;;  %v24573_v56 = vld [vmem:[#allocation6 + $0x3740] ss:$12 sps:$4 sm:$0xff]  }
 0xb38   : > { %v26692_v37 = vadd.f32 %v21948_v0, %v26680_v38  ;;  %v21951_v11 = vadd.f32 %v21950_v29, %v21949_v57  ;;  %v26699_v38 = vpack.c.bf16 %v27142_v15, %v26405_v58  ;;  %v24553_v58 = vld [vmem:[#allocation6 + $0x36e0] ss:$12 sps:$4 sm:$0xff]  }
 0xb39   : > { %16725 = vmatpush1.bf16.msra.mxu1 %v24534_v25  ;;  %v24576_v19 = vld [vmem:[#allocation6 + $0x2b54] ss:$12 sps:$4 sm:$0xff]   ;;  %v24577_v25 = vld [vmem:[#allocation6 + $0x3818] ss:$12 sps:$4 sm:$0xff]  }
 0xb3a   : > { %v26695_v41 = vadd.f32 %v21951_v11, %v26683_v7  ;;  %22097 = vmatpush3.bf16.msra.mxu0 %v24538_v3  ;;  %16726 = vmatprep.subr.bf16.mxu1 %v24541_v47  ;;  %v24552_v7 = vld [vmem:[#allocation6 + $0x37a0] ss:$12 sps:$4 sm:$0xff]   ;;  %v24574_v3 = vld [vmem:[#allocation6 + $0x2b50] ss:$12 sps:$4 sm:$0xff]  }
 0xb3b   : > { %22098 = vmatprep.subr.bf16.mxu0 %v24542_v12  ;;  %v24578_v12 = vld [vmem:[#allocation6 + $0x3758] ss:$12 sps:$4 sm:$0xff]  }
 0xb3c   : > { %v24581_v11 = vld [vmem:[#allocation6 + $0x2b6c] ss:$12 sps:$4 sm:$0xff]  }
 0xb3d   : > { %16727 = vmatpush1.bf16.msra.mxu1 %v24539_v39 }
 0xb3e   : > { %22099 = vmatpush3.bf16.msra.mxu0 %v24543_v63  ;;  %16739 = vmatprep.subr.bf16.mxu1 %v24546_v34  ;;  %v24582_v63 = vld [vmem:[#allocation6 + $0x3830] ss:$12 sps:$4 sm:$0xff]  }
 0xb3f   : > { %22106 = vmatprep.subr.bf16.mxu0 %v24547_v48 }
 0xb40   : > { %21109 = vmatmul.mubr.msk.bf16.vlgmr.msra.gmra.mrb[100].mxu1 %vm26107_vm11, %v26484_v45  ;;  %v24554_v45 = vld [vmem:[#allocation6 + $0x2af0] ss:$12 sps:$4 sm:$0xff]  }
 0xb41   : > { %21129 = vmatmul.mubr.msk.bf16.vlgmr.msra.gmra.mrb[80].mxu0 %vm26201_vm13, %v26699_v38  ;;  %16740 = vmatpush1.bf16.msra.mxu1 %v24544_v22  ;;  %v24579_v22 = vld [vmem:[#allocation6 + $0x2b68] ss:$12 sps:$4 sm:$0xff]  }
 0xb42   : > { %16771 = vmatprep.mubr.bf16.mxu1 %v26498_v61  ;;  %22107 = vmatpush3.bf16.msra.mxu0 %v24548_v8  ;;  %v24563_v61 = vld [vmem:[#allocation6 + $0x3710] ss:$12 sps:$4 sm:$0xff]  }
 0xb43   : > { %17941 = vmatprep.mubr.bf16.mxu0 %v26709_v13  ;;  %16741 = vmatprep.subr.bf16.mxu1 %v24551_v32  ;;  %v24583_v32 = vld [vmem:[#allocation6 + $0x3770] ss:$12 sps:$4 sm:$0xff]  }
 0xb44   : > { %22108 = vmatprep.subr.bf16.mxu0 %v24552_v7  ;;  %v24586_v7 = vld [vmem:[#allocation6 + $0x2b84] ss:$12 sps:$4 sm:$0xff]  }
 0xb45   : > { %16742 = vmatpush1.bf16.msra.mxu1 %v24549_v14  ;;  %v24587_v14 = vld [vmem:[#allocation6 + $0x3908] ss:$12 sps:$4 sm:$0xff]  }
 0xb46   : > { %22109 = vmatpush3.bf16.msra.mxu0 %v24553_v58  ;;  %16743 = vmatprep.subr.bf16.mxu1 %v24556_v60  ;;  %v24584_v58 = vld [vmem:[#allocation6 + $0x2b80] ss:$12 sps:$4 sm:$0xff]   ;;  %v24588_v60 = vld [vmem:[#allocation6 + $0x3848] ss:$12 sps:$4 sm:$0xff]  }
 0xb47   : > { %22110 = vmatprep.subr.bf16.mxu0 %v24557_v40  ;;  %v24591_v40 = vld [vmem:[#allocation6 + $0x2b9c] ss:$12 sps:$4 sm:$0xff]  }
 0xb49   : > { %16744 = vmatpush1.bf16.msra.mxu1 %v24554_v45  ;;  %v24592_v45 = vld [vmem:[#allocation6 + $0x3920] ss:$12 sps:$4 sm:$0xff]  }
 0xb4a   : > { %22111 = vmatpush3.bf16.msra.mxu0 %v24558_v5  ;;  %16745 = vmatprep.subr.bf16.mxu1 %v24561_v44  ;;  %v24589_v5 = vld [vmem:[#allocation6 + $0x2b98] ss:$12 sps:$4 sm:$0xff]   ;;  %v24593_v44 = vld [vmem:[#allocation6 + $0x3860] ss:$12 sps:$4 sm:$0xff]  }
 0xb4b   : > { %22112 = vmatprep.subr.bf16.mxu0 %v24562_v59  ;;  %v24596_v59 = vld [vmem:[#allocation6 + $0x2bb4] ss:$12 sps:$4 sm:$0xff]  }
 0xb4d   : > { %16746 = vmatpush1.bf16.msra.mxu1 %v24559_v28  ;;  %v24598_v28 = vld [vmem:[#allocation6 + $0x3878] ss:$12 sps:$4 sm:$0xff]  }
 0xb4e   : > { %22113 = vmatpush3.bf16.msra.mxu0 %v24563_v61  ;;  %16747 = vmatprep.subr.bf16.mxu1 %v24566_v16  ;;  %v24601_v61 = vld [vmem:[#allocation6 + $0x2bcc] ss:$12 sps:$4 sm:$0xff]   ;;  %v24603_v16 = vld [vmem:[#allocation6 + $0x3890] ss:$12 sps:$4 sm:$0xff]  }
 0xb4f   : > { %22114 = vmatprep.subr.bf16.mxu0 %v24567_v1  ;;  %v24606_v1 = vld [vmem:[#allocation6 + $0x2be4] ss:$12 sps:$4 sm:$0xff]  }
 0xb51   : > { %16748 = vmatpush1.bf16.msra.mxu1 %v24564_v9  ;;  %v24607_v9 = vld [vmem:[#allocation6 + $0x3968] ss:$12 sps:$4 sm:$0xff]  }
 0xb52   : > { %22115 = vmatpush3.bf16.msra.mxu0 %v24568_v6  ;;  %16749 = vmatprep.subr.bf16.mxu1 %v24571_v18  ;;  %v24604_v6 = vld [vmem:[#allocation6 + $0x2be0] ss:$12 sps:$4 sm:$0xff]   ;;  %v24608_v18 = vld [vmem:[#allocation6 + $0x38a8] ss:$12 sps:$4 sm:$0xff]  }
 0xb53   : > { %22116 = vmatprep.subr.bf16.mxu0 %v24572_v52  ;;  %v24611_v52 = vld [vmem:[#allocation6 + $0x2bfc] ss:$12 sps:$4 sm:$0xff]  }
 0xb54   : > { %v21968_v0 = vpop.f32.mrb[56].mxu0 }
 0xb55   : > { %v21969_v57 = vpop.f32.mrb[57].mxu0  ;;  %16750 = vmatpush1.bf16.msra.mxu1 %v24569_v27  ;;  %v24612_v27 = vld [vmem:[#allocation6 + $0x3980] ss:$12 sps:$4 sm:$0xff]  }
 0xb56   : > { %v21970_v47 = vadd.f32 %v21969_v57, %v21968_v0  ;;  %v21971_v29 = vpop.f32.mrb[58].mxu0  ;;  %22117 = vmatpush3.bf16.msra.mxu0 %v24573_v56  ;;  %16751 = vmatprep.subr.bf16.mxu1 %v24576_v19  ;;  %v24609_v56 = vld [vmem:[#allocation6 + $0x2bf8] ss:$12 sps:$4 sm:$0xff]   ;;  %v24613_v19 = vld [vmem:[#allocation6 + $0x38c0] ss:$12 sps:$4 sm:$0xff]  }
 0xb57   : > { %v21972_v39 = vpop.f32.mrb[59].mxu0  ;;  %22118 = vmatprep.subr.bf16.mxu0 %v24577_v25  ;;  %v24616_v25 = vld [vmem:[#allocation6 + $0x2c14] ss:$12 sps:$4 sm:$0xff]   ;;  %v24617_v0 = vld [vmem:[#allocation6 + $0x3998] ss:$12 sps:$4 sm:$0xff]  }
 0xb58   : > { %v26714_v34 = vadd.f32 %v21970_v47, %v26692_v37  ;;  %v21973_v48 = vadd.f32 %v21972_v39, %v21971_v29  ;;  %v26721_v37 = vpack.c.bf16 %v25865_v33, %v26526_v2  ;;  %v24597_v33 = vld [vmem:[#allocation6 + $0x3938] ss:$12 sps:$4 sm:$0xff]   ;;  %v24594_v2 = vld [vmem:[#allocation6 + $0x2bb0] ss:$12 sps:$4 sm:$0xff]  }
 0xb59   : > { %16752 = vmatpush1.bf16.msra.mxu1 %v24574_v3  ;;  %v24614_v47 = vld [vmem:[#allocation6 + $0x2c10] ss:$12 sps:$4 sm:$0xff]   ;;  %v24621_v39 = vld [vmem:[#allocation6 + $0x2c2c] ss:$12 sps:$4 sm:$0xff]  }
 0xb5a   : > { %v26717_v8 = vadd.f32 %v21973_v48, %v26695_v41  ;;  %22119 = vmatpush3.bf16.msra.mxu0 %v24578_v12  ;;  %16753 = vmatprep.subr.bf16.mxu1 %v24581_v11  ;;  %v26725_v41 = vpack.c.bf16 %v25868_v55, %v26530_v43  ;;  %v24602_v55 = vld [vmem:[#allocation6 + $0x3950] ss:$12 sps:$4 sm:$0xff]   ;;  %v24599_v43 = vld [vmem:[#allocation6 + $0x2bc8] ss:$12 sps:$4 sm:$0xff]   ;;  %v24618_v11 = vld [vmem:[#allocation6 + $0x38d8] ss:$12 sps:$4 sm:$0xff]  }
 0xb5b   : > { %22120 = vmatprep.subr.bf16.mxu0 %v24582_v63  ;;  %v24622_v48 = vld [vmem:[#allocation6 + $0x39b0] ss:$12 sps:$4 sm:$0xff]  }
 0xb5d   : > { %16754 = vmatpush1.bf16.msra.mxu1 %v24579_v22 }
 0xb5e   : > { %22121 = vmatpush3.bf16.msra.mxu0 %v24583_v32  ;;  %16755 = vmatprep.subr.bf16.mxu1 %v24586_v7  ;;  %v24619_v7 = vld [vmem:[#allocation6 + $0x2c28] ss:$12 sps:$4 sm:$0xff]  }
 0xb5f   : > { %22128 = vmatprep.subr.bf16.mxu0 %v24587_v14 }
 0xb61   : > { %17942 = vmatmul.mubr.bf16.vlgmr.msra.gmra.mrb[84].mxu0 %v26721_v37  ;;  %16756 = vmatpush1.bf16.msra.mxu1 %v24584_v58  ;;  %v24623_v58 = vld [vmem:[#allocation6 + $0x38f0] ss:$12 sps:$4 sm:$0xff]  }
 0xb62   : > { %22129 = vmatpush3.bf16.msra.mxu0 %v24588_v60  ;;  %17982 = vmatprep.mubr.bf16.mxu0 %v26725_v41  ;;  %v24626_v60 = vld [vmem:[#allocation6 + $0x2c44] ss:$12 sps:$4 sm:$0xff]  }
 0xb63   : > { %16757 = vmatprep.subr.bf16.mxu1 %v24591_v40  ;;  %22130 = vmatprep.subr.bf16.mxu0 %v24592_v45  ;;  %v24624_v40 = vld [vmem:[#allocation6 + $0x2c40] ss:$12 sps:$4 sm:$0xff]   ;;  %v24627_v45 = vld [vmem:[#allocation6 + $0x39c8] ss:$12 sps:$4 sm:$0xff]  }
 0xb65   : > { %16758 = vmatpush1.bf16.msra.mxu1 %v24589_v5  ;;  %v24630_v5 = vld [vmem:[#allocation6 + $0x2c5c] ss:$12 sps:$4 sm:$0xff]  }
 0xb66   : > { %22131 = vmatpush3.bf16.msra.mxu0 %v24593_v44  ;;  %16759 = vmatprep.subr.bf16.mxu1 %v24596_v59  ;;  %v24631_v44 = vld [vmem:[#allocation6 + $0x39e0] ss:$12 sps:$4 sm:$0xff]  }
 0xb67   : > { %22132 = vmatprep.subr.bf16.mxu0 %v24597_v33  ;;  %v24634_v59 = vld [vmem:[#allocation6 + $0x2c74] ss:$12 sps:$4 sm:$0xff]  }
 0xb68   : > { %v24636_v33 = vld [vmem:[#allocation6 + $0x2c88] ss:$12 sps:$4 sm:$0xff]  }
 0xb69   : > { %16760 = vmatpush1.bf16.msra.mxu1 %v24594_v2 }
 0xb6a   : > { %22133 = vmatpush3.bf16.msra.mxu0 %v24598_v28  ;;  %16761 = vmatprep.subr.bf16.mxu1 %v24601_v61  ;;  %v24639_v28 = vld [vmem:[#allocation6 + $0x3a10] ss:$12 sps:$4 sm:$0xff]  }
 0xb6b   : > { %22134 = vmatprep.subr.bf16.mxu0 %v24602_v55  ;;  %v24642_v61 = vld [vmem:[#allocation6 + $0x2ca4] ss:$12 sps:$4 sm:$0xff]   ;;  %v27180_v55 = vld [vmem:[#allocation27_spill] sm:$0xff] }
 0xb6d   : > { %16762 = vmatpush1.bf16.msra.mxu1 %v24599_v43  ;;  %v18041_v43 = vrot.slane %v27180_v55, 7 }
 0xb6e   : > { %22135 = vmatpush3.bf16.msra.mxu0 %v24603_v16  ;;  %16763 = vmatprep.subr.bf16.mxu1 %v24606_v1  ;;  %v24640_v16 = vld [vmem:[#allocation6 + $0x2ca0] ss:$12 sps:$4 sm:$0xff]   ;;  %v24643_v1 = vld [vmem:[#allocation6 + $0x3a28] ss:$12 sps:$4 sm:$0xff]  }
 0xb6f   : > { %22136 = vmatprep.subr.bf16.mxu0 %v24607_v9  ;;  %v24646_v9 = vld [vmem:[#allocation6 + $0x2cbc] ss:$12 sps:$4 sm:$0xff]  }
 0xb71   : > { %16764 = vmatpush1.bf16.msra.mxu1 %v24604_v6 }
 0xb72   : > { %22137 = vmatpush3.bf16.msra.mxu0 %v24608_v18  ;;  %16765 = vmatprep.subr.bf16.mxu1 %v24611_v52  ;;  %v18065_v52 = vsel %vm1020_vm2, -inf, %v18041_v43 }
 0xb73   : > { %22138 = vmatprep.subr.bf16.mxu0 %v24612_v27  ;;  %v24644_v27 = vld [vmem:[#allocation6 + $0x2cb8] ss:$12 sps:$4 sm:$0xff]  }
 0xb74   : > { %v21990_v57 = vpop.f32.mrb[60].mxu0 }
 0xb75   : > { %v21991_v3 = vpop.f32.mrb[61].mxu0  ;;  %16766 = vmatpush1.bf16.msra.mxu1 %v24609_v56 }
 0xb76   : > { %v21992_v29 = vadd.f32 %v21991_v3, %v21990_v57  ;;  %v21993_v12 = vpop.f32.mrb[62].mxu0  ;;  %22139 = vmatpush3.bf16.msra.mxu0 %v24613_v19  ;;  %16767 = vmatprep.subr.bf16.mxu1 %v24616_v25  ;;  %v24647_v25 = vld [vmem:[#allocation6 + $0x3a40] ss:$12 sps:$4 sm:$0xff]   ;;  %v18083_v57 = vrot.slane %v18065_v52, 1 }
 0xb77   : > { %v21994_v63 = vpop.f32.mrb[63].mxu0  ;;  %22140 = vmatprep.subr.bf16.mxu0 %v24617_v0  ;;  %v24650_v0 = vld [vmem:[#allocation6 + $0x2cd4] ss:$12 sps:$4 sm:$0xff]  }
 0xb78   : > { %v26730_v22 = vadd.f32 %v21992_v29, %v26714_v34  ;;  %v21995_v32 = vadd.f32 %v21994_v63, %v21993_v12  ;;  %v26737_v34 = vpack.c.bf16 %v25877_v4, %v26543_v49  ;;  %v24632_v4 = vld [vmem:[#allocation6 + $0x2c70] ss:$12 sps:$4 sm:$0xff]   ;;  %v24638_v49 = vld [vmem:[#allocation6 + $0x2c8c] ss:$12 sps:$4 sm:$0xff]  }
 0xb79   : > { %16768 = vmatpush1.bf16.msra.mxu1 %v24614_v47  ;;  %v24648_v29 = vld [vmem:[#allocation6 + $0x2cd0] ss:$12 sps:$4 sm:$0xff]  }
 0xb7a   : > { %v26733_v14 = vadd.f32 %v21995_v32, %v26717_v8  ;;  %22141 = vmatpush3.bf16.msra.mxu0 %v24618_v11  ;;  %16769 = vmatprep.subr.bf16.mxu1 %v24621_v39  ;;  %v24628_v8 = vld [vmem:[#allocation6 + $0x2c58] ss:$12 sps:$4 sm:$0xff]  }
 0xb7b   : > { %22142 = vmatprep.subr.bf16.mxu0 %v24622_v48  ;;  %v24651_v48 = vld [vmem:[#allocation6 + $0x3a58] ss:$12 sps:$4 sm:$0xff]  }
 0xb7c   : > { %v24654_v32 = vld [vmem:[#allocation6 + $0x2cec] ss:$12 sps:$4 sm:$0xff]  }
 0xb7d   : > { %16770 = vmatpush1.bf16.msra.mxu1 %v24619_v7 }
 0xb7e   : > { %22143 = vmatpush3.bf16.msra.mxu0 %v24623_v58  ;;  %16782 = vmatprep.subr.bf16.mxu1 %v24626_v60 }
 0xb7f   : > { %22223 = vmatprep.subr.bf16.mxu0 %v27142_v15 }
 0xb80   : > { %16772 = vmatmul.mubr.bf16.vlgmr.msra.gmra.mrb[100].mxu1 %v26500_v26  ;;  %v24635_v26 = vld [vmem:[#allocation6 + $0x39f8] ss:$12 sps:$4 sm:$0xff]  }
 0xb81   : > { %17983 = vmatmul.mubr.bf16.vlgmr.msra.gmra.mrb[88].mxu0 %v26737_v34  ;;  %16783 = vmatpush1.bf16.msra.mxu1 %v24624_v40 }
 0xb82   : > { %16814 = vmatprep.mubr.bf16.mxu1 %v26502_v31  ;;  %22224 = vmatpush3.bf16.msra.mxu0 %v24627_v45  ;;  %v27179_v31 = vld [vmem:[#allocation20_spill] sm:$0xff] }
 0xb83   : > { %16784 = vmatprep.subr.bf16.mxu1 %v24630_v5  ;;  %22225 = vmatprep.subr.bf16.mxu0 %v27142_v15  ;;  %v18046_v2 = vrot.slane %v27179_v31, 7 }
 0xb84   : > { %22239 = vmatprep.mubr.msk.bf16.mxu0 %vm25407_vm14, %v27142_v15 }
 0xb85   : > { %16785 = vmatpush1.bf16.msra.mxu1 %v24628_v8  ;;  %v18047_v6 = vsel %vm1020_vm2, %v18041_v43, %v18046_v2  ;;  %v18069_v18 = vsel %vm1020_vm2, %v18046_v2, -inf  ;;  %v24656_v43 = vld [vmem:[#allocation6 + $0x2d00] ss:$12 sps:$4 sm:$0xff]  }
 0xb86   : > { %22226 = vmatpush3.bf16.msra.mxu0 %v24631_v44  ;;  %16786 = vmatprep.subr.bf16.mxu1 %v24634_v59  ;;  %v18084_v56 = vrot.slane %v18047_v6, 1  ;;  %v18094_v19 = vrot.slane %v18069_v18, 1  ;;  %v18120_v58 = vrot.slane %v18047_v6, 2  ;;  %v18130_v60 = vrot.slane %v18069_v18, 2  ;;  %v24652_v44 = vld [vmem:[#allocation6 + $0x2ce8] ss:$12 sps:$4 sm:$0xff]  }
 0xb87   : > { %22227 = vmatprep.subr.bf16.mxu0 %v27142_v15  ;;  %v18119_v59 = vrot.slane %v18065_v52, 2  ;;  %v24665_v18 = vld [vmem:[#allocation7 + $0x108] sm:$0xff]  }
 0xb88   : > { %v18085_v12 = vsel %vm980_vm3, %v18083_v57, %v18084_v56  ;;  %v18095_v11 = vsel %vm980_vm3, %v18084_v56, %v18094_v19  ;;  %v24666_v56 = vld [vmem:[#allocation6 + $0x2d30] ss:$12 sps:$4 sm:$0xff]   ;;  %v24671_v57 = vld [vmem:[#allocation6 + $0x2d48] ss:$12 sps:$4 sm:$0xff]  }
 0xb89   : > { %16787 = vmatpush1.bf16.msra.mxu1 %v24632_v4  ;;  %v18109_v5 = vmax.f32 %v18065_v52, %v18085_v12  ;;  %v18113_v8 = vmax.f32 %v18047_v6, %v18095_v11  ;;  %v18121_v2 = vsel %vm987_vm4, %v18119_v59, %v18120_v58  ;;  %v24661_v6 = vld [vmem:[#allocation6 + $0x2d18] ss:$12 sps:$4 sm:$0xff]   ;;  %v24668_v52 = vld [vmem:[#allocation6 + $0x2d34] ss:$12 sps:$4 sm:$0xff]  }
 0xb8a   : > { %22228 = vmatpush3.bf16.msra.mxu0 %v24635_v26  ;;  %16788 = vmatprep.subr.bf16.mxu1 %v24638_v49  ;;  %v24655_v26 = vld [vmem:[#allocation6 + $0x3a70] ss:$12 sps:$4 sm:$0xff]   ;;  %v27183_v11 = vld [vmem:[#allocation24_spill] sm:$0xff] }
 0xb8b   : > { %22229 = vmatprep.subr.bf16.mxu0 %v27142_v15  ;;  %v24658_v49 = vld [vmem:[#allocation6 + $0x2d04] ss:$12 sps:$4 sm:$0xff]   ;;  %v24674_v19 = vld [vmem:[#allocation7 + $0x158] sm:$0xff]  }
 0xb8c   : > { %v24678_v12 = vld [vmem:[#allocation6 + $0x2d64] ss:$12 sps:$4 sm:$0xff]  }
 0xb8d   : > { %16789 = vmatpush1.bf16.msra.mxu1 %v24636_v33  ;;  %v24659_v33 = vld [vmem:[#allocation7 + $0x140] sm:$0xff]  }
 0xb8e   : > { %22230 = vmatpush3.bf16.msra.mxu0 %v24639_v28  ;;  %16790 = vmatprep.subr.bf16.mxu1 %v24642_v61  ;;  %v18145_v28 = vmax.f32 %v18109_v5, %v18121_v2  ;;  %v24683_v5 = vld [vmem:[#allocation6 + $0x2d7c] ss:$12 sps:$4 sm:$0xff]  }
 0xb8f   : > { %22231 = vmatprep.subr.bf16.mxu0 %v27142_v15 }
 0xb91   : > { %16791 = vmatpush1.bf16.msra.mxu1 %v24640_v16  ;;  %v24660_v16 = vld [vmem:[#allocation7 + $0x100] sm:$0xff]  }
 0xb92   : > { %22232 = vmatpush3.bf16.msra.mxu0 %v24643_v1  ;;  %16792 = vmatprep.subr.bf16.mxu1 %v24646_v9  ;;  %v24663_v1 = vld [vmem:[#allocation6 + $0x2d1c] ss:$12 sps:$4 sm:$0xff]  }
 0xb93   : > { %22233 = vmatprep.subr.bf16.mxu0 %v27142_v15  ;;  %v24664_v9 = vld [vmem:[#allocation7 + $0x148] sm:$0xff]  }
 0xb94   : > { %v22012_v3 = vpop.f32.mrb[64].mxu0 }
 0xb95   : > { %v22013_v47 = vpop.f32.mrb[65].mxu0  ;;  %16793 = vmatpush1.bf16.msra.mxu1 %v24644_v27  ;;  %v24669_v27 = vld [vmem:[#allocation7 + $0x150] sm:$0xff]  }
 0xb96   : > { %v22014_v39 = vadd.f32 %v22013_v47, %v22012_v3  ;;  %v22015_v63 = vpop.f32.mrb[66].mxu0  ;;  %22234 = vmatpush3.bf16.msra.mxu0 %v24647_v25  ;;  %16794 = vmatprep.subr.bf16.mxu1 %v24650_v0  ;;  %v27181_v25 = vld [vmem:[#allocation23_spill] sm:$0xff]  ;;  %v27182_v3 = vld [vmem:[#allocation21_spill] sm:$0xff] }
 0xb97   : > { %v22016_v7 = vpop.f32.mrb[67].mxu0  ;;  %22235 = vmatprep.subr.bf16.mxu0 %v27142_v15  ;;  %v18044_v0 = vrot.slane %v27181_v25, 7  ;;  %v18050_v47 = vrot.slane %v27182_v3, 7 }
 0xb98   : > { %v26759_v40 = vadd.f32 %v22014_v39, %v26730_v22  ;;  %v22017_v45 = vadd.f32 %v22016_v7, %v22015_v63  ;;  %v18131_v22 = vsel %vm987_vm4, %v18120_v58, %v18130_v60  ;;  %v18040_v39 = vrot.slane %v27183_v11, 7  ;;  %v24679_v63 = vld [vmem:[#allocation7 + $0x160] sm:$0xff]  }
 0xb99   : > { %16795 = vmatpush1.bf16.msra.mxu1 %v24648_v29  ;;  %v18149_v61 = vmax.f32 %v18113_v8, %v18131_v22  ;;  %v24675_v29 = vld [vmem:[#allocation7 + $0x118] sm:$0xff]   ;;  %v26777_v7 = vsel %vm1020_vm2, %v18044_v0, -inf  ;;  %v24676_v58 = vld [vmem:[#allocation6 + $0x2d60] ss:$12 sps:$4 sm:$0xff]  }
 0xb9a   : > { %v26762_v4 = vadd.f32 %v22017_v45, %v26733_v14  ;;  %22236 = vmatpush3.bf16.msra.mxu0 %v24651_v48  ;;  %16796 = vmatprep.subr.bf16.mxu1 %v24654_v32  ;;  %v26769_v14 = vpack.c.bf16 %v25899_v17, %v26549_v20  ;;  %v24670_v17 = vld [vmem:[#allocation7 + $0x110] sm:$0xff]   ;;  %v24673_v20 = vld [vmem:[#allocation6 + $0x2d4c] ss:$12 sps:$4 sm:$0xff]   ;;  %v26780_v60 = vsel %vm1020_vm2, %v18040_v39, %v18044_v0  ;;  %v24680_v45 = vld [vmem:[#allocation7 + $0x120] sm:$0xff]   ;;  %v18064_v59 = vsel %vm1020_vm2, -inf, %v18040_v39 }
 0xb9b   : > { %22237 = vmatprep.subr.bf16.mxu0 %v27142_v15  ;;  %v18153_v15 = vpack.c.bf16 %v18149_v61, %v18145_v28  ;;  %v27184_v48 = vld [vmem:[#allocation25_spill] sm:$0xff]  ;;  %v24681_v22 = vld [vmem:[#allocation6 + $0x2d78] ss:$12 sps:$4 sm:$0xff]   ;;  %v24690_v0 = vld [vmem:[#allocation7 + $0x130] sm:$0xff]  }
 0xb9c   : > { %v18043_v32 = vrot.slane %v27184_v48, 7  ;;  %v24685_v61 = vld [vmem:[#allocation7 + $0x128] sm:$0xff]  }
 0xb9d   : > { %16797 = vmatpush1.bf16.msra.mxu1 %v24652_v44  ;;  %v24684_v44 = vld [vmem:[#allocation7 + $0x168] sm:$0xff]  }
 0xb9e   : > { %22238 = vmatpush3.bf16.msra.mxu0 %v24655_v26  ;;  %16798 = vmatprep.subr.bf16.mxu1 %v24658_v49  ;;  %v26783_v8 = vsel %vm1020_vm2, %v18043_v32, %v18050_v47  ;;  %v18071_v26 = vsel %vm1020_vm2, %v18050_v47, -inf  ;;  %v18092_v49 = vrot.slane %v26777_v7, 1  ;;  %v18067_v2 = vsel %vm1020_vm2, -inf, %v18043_v32 }
 0xb9f   : > { %22159 = vmatprep.subr.bf16.mxu0 %v24659_v33  ;;  %v18081_v33 = vrot.slane %v26780_v60, 1  ;;  %v18090_v28 = vrot.slane %v26783_v8, 1  ;;  %v18117_v47 = vrot.slane %v26780_v60, 2 }
 0xba1   : > { %22240 = vmatmul.mubr.bf16.vlgmr.msra.gmra.mrb[92].mxu0 %v26769_v14  ;;  %16799 = vmatpush1.bf16.msra.mxu1 %v24656_v43  ;;  %v24688_v43 = vld [vmem:[#allocation6 + $0x2d94] ss:$12 sps:$4 sm:$0xff]  }
 0xba2   : > { %22160 = vmatpush3.bf16.msra.mxu0 %v24660_v16  ;;  %18445 = vmatprep.mubr.bf16.mxu0 %v18153_v15  ;;  %v18080_v16 = vrot.slane %v18064_v59, 1  ;;  %v18089_v15 = vrot.slane %v18067_v2, 1 }
 0xba3   : > { %16800 = vmatprep.subr.bf16.mxu1 %v24663_v1  ;;  %22161 = vmatprep.subr.bf16.mxu0 %v24664_v9  ;;  %v18098_v1 = vrot.slane %v18071_v26, 1  ;;  %v24689_v9 = vld [vmem:[#allocation7 + $0x170] sm:$0xff]  }
 0xba5   : > { %16801 = vmatpush1.bf16.msra.mxu1 %v24661_v6 }
 0xba6   : > { %22162 = vmatpush3.bf16.msra.mxu0 %v24665_v18  ;;  %16802 = vmatprep.subr.bf16.mxu1 %v24668_v52  ;;  %v18082_v18 = vsel %vm980_vm3, %v18080_v16, %v18081_v33  ;;  %v18093_v52 = vsel %vm980_vm3, %v18081_v33, %v18092_v49  ;;  %v18116_v49 = vrot.slane %v18064_v59, 2  ;;  %v18134_v33 = vrot.slane %v18071_v26, 2 }
 0xba7   : > { %22163 = vmatprep.subr.bf16.mxu0 %v24669_v27  ;;  %v18108_v32 = vmax.f32 %v18064_v59, %v18082_v18 }
 0xba8   : > { %v18118_v16 = vsel %vm987_vm4, %v18116_v49, %v18117_v47  ;;  %v24719_v49 = vld [vmem:[#allocation7 + $0x1e0] sm:$0xff]  }
 0xba9   : > { %16803 = vmatpush1.bf16.msra.mxu1 %v24666_v56  ;;  %v24686_v56 = vld [vmem:[#allocation6 + $0x2d90] ss:$12 sps:$4 sm:$0xff]   ;;  %v18144_v59 = vmax.f32 %v18108_v32, %v18118_v16  ;;  %v24711_v32 = vld [vmem:[#allocation6 + $0x2e08] ss:$12 sps:$4 sm:$0xff]  }
 0xbaa   : > { %22164 = vmatpush3.bf16.msra.mxu0 %v24670_v17  ;;  %16804 = vmatprep.subr.bf16.mxu1 %v24673_v20  ;;  %v18091_v17 = vsel %vm980_vm3, %v18089_v15, %v18090_v28 }
 0xbab   : > { %22165 = vmatprep.subr.bf16.mxu0 %v24674_v19 }
 0xbad   : > { %16805 = vmatpush1.bf16.msra.mxu1 %v24671_v57  ;;  %v24693_v57 = vld [vmem:[#allocation6 + $0x2dac] ss:$12 sps:$4 sm:$0xff]  }
 0xbae   : > { %22166 = vmatpush3.bf16.msra.mxu0 %v24675_v29  ;;  %16806 = vmatprep.subr.bf16.mxu1 %v24678_v12  ;;  %v18128_v29 = vrot.slane %v26777_v7, 2  ;;  %v18099_v12 = vsel %vm980_vm3, %v18090_v28, %v18098_v1  ;;  %v18125_v1 = vrot.slane %v18067_v2, 2 }
 0xbaf   : > { %22167 = vmatprep.subr.bf16.mxu0 %v24679_v63  ;;  %v24694_v63 = vld [vmem:[#allocation7 + $0x178] sm:$0xff]   ;;  %v18115_v7 = vmax.f32 %v26783_v8, %v18099_v12 }
 0xbb0   : > { %v24714_v12 = vld [vmem:[#allocation7 + $0x1d8] sm:$0xff]  }
 0xbb1   : > { %16807 = vmatpush1.bf16.msra.mxu1 %v24676_v58  ;;  %v18112_v58 = vmax.f32 %v26780_v60, %v18093_v52  ;;  %v24698_v60 = vld [vmem:[#allocation6 + $0x2dc4] ss:$12 sps:$4 sm:$0xff]  }
 0xbb2   : > { %22168 = vmatpush3.bf16.msra.mxu0 %v24680_v45  ;;  %16808 = vmatprep.subr.bf16.mxu1 %v24683_v5  ;;  %v18126_v45 = vrot.slane %v26783_v8, 2  ;;  %v24700_v52 = vld [vmem:[#allocation7 + $0x180] sm:$0xff]  }
 0xbb3   : > { %22169 = vmatprep.subr.bf16.mxu0 %v24684_v44 }
 0xbb4   : > { %v22034_v6 = vpop.f32.mrb[68].mxu0  ;;  %v18127_v15 = vsel %vm987_vm4, %v18125_v1, %v18126_v45  ;;  %v18135_v8 = vsel %vm987_vm4, %v18126_v45, %v18134_v33  ;;  %v27186_v45 = vld [vmem:[#allocation33_spill] sm:$0xff] }
 0xbb5   : > { %v22035_v27 = vpop.f32.mrb[69].mxu0  ;;  %16809 = vmatpush1.bf16.msra.mxu1 %v24681_v22  ;;  %v24691_v22 = vld [vmem:[#allocation6 + $0x2da8] ss:$12 sps:$4 sm:$0xff]   ;;  %v18151_v18 = vmax.f32 %v18115_v7, %v18135_v8  ;;  %v24716_v33 = vld [vmem:[#allocation6 + $0x2e20] ss:$12 sps:$4 sm:$0xff]  }
 0xbb6   : > { %v22036_v20 = vadd.f32 %v22035_v27, %v22034_v6  ;;  %v22037_v19 = vpop.f32.mrb[70].mxu0  ;;  %22170 = vmatpush3.bf16.msra.mxu0 %v24685_v61  ;;  %16810 = vmatprep.subr.bf16.mxu1 %v24688_v43  ;;  %v18111_v61 = vmax.f32 %v18067_v2, %v18091_v17  ;;  %v24695_v43 = vld [vmem:[#allocation7 + $0x138] sm:$0xff]   ;;  %v24704_v2 = vld [vmem:[#allocation7 + $0x1c8] sm:$0xff]   ;;  %v24720_v7 = vld [vmem:[#allocation7 + $0x1a0] sm:$0xff]  }
 0xbb7   : > { %v22038_v39 = vpop.f32.mrb[71].mxu0  ;;  %22171 = vmatprep.subr.bf16.mxu0 %v24689_v9  ;;  %v24699_v9 = vld [vmem:[#allocation7 + $0x1c0] sm:$0xff]   ;;  %v24729_v8 = vld [vmem:[#allocation7 + $0x1f0] sm:$0xff]  }
 0xbb8   : > { %v26800_v5 = vadd.f32 %v22036_v20, %v26759_v40  ;;  %v22039_v44 = vadd.f32 %v22038_v39, %v22037_v19  ;;  %v18129_v40 = vsel %vm987_vm4, %v18117_v47, %v18128_v29  ;;  %v18147_v6 = vmax.f32 %v18111_v61, %v18127_v15  ;;  %v24701_v20 = vld [vmem:[#allocation6 + $0x2dd8] ss:$12 sps:$4 sm:$0xff]   ;;  %v24705_v19 = vld [vmem:[#allocation7 + $0x188] sm:$0xff]   ;;  %v24706_v47 = vld [vmem:[#allocation6 + $0x2df0] ss:$12 sps:$4 sm:$0xff]  }
 0xbb9   : > { %16811 = vmatpush1.bf16.msra.mxu1 %v24686_v56  ;;  %v18148_v26 = vmax.f32 %v18112_v58, %v18129_v40  ;;  %v24703_v56 = vld [vmem:[#allocation6 + $0x2ddc] ss:$12 sps:$4 sm:$0xff]   ;;  %v24710_v29 = vld [vmem:[#allocation7 + $0x190] sm:$0xff]   ;;  %v27185_v39 = vld [vmem:[#allocation32_spill] sm:$0xff] }
 0xbba   : > { %v26804_v28 = vadd.f32 %v22039_v44, %v26762_v4  ;;  %22172 = vmatpush3.bf16.msra.mxu0 %v24690_v0  ;;  %16812 = vmatprep.subr.bf16.mxu1 %v24693_v57  ;;  %v24696_v4 = vld [vmem:[#allocation6 + $0x2dc0] ss:$12 sps:$4 sm:$0xff]   ;;  %v18155_v17 = vpack.c.bf16 %v18151_v18, %v18147_v6  ;;  %v24709_v57 = vld [vmem:[#allocation7 + $0x1d0] sm:$0xff]   ;;  %v18042_v44 = vrot.slane %v27186_v45, 7 }
 0xbbb   : > { %22173 = vmatprep.subr.bf16.mxu0 %v24694_v63  ;;  %v18152_v27 = vpack.c.bf16 %v18148_v26, %v18144_v59  ;;  %v24708_v0 = vld [vmem:[#allocation6 + $0x2df4] ss:$12 sps:$4 sm:$0xff]   ;;  %v18048_v63 = vrot.slane %v27185_v39, 7  ;;  %v24718_v58 = vld [vmem:[#allocation6 + $0x2e24] ss:$12 sps:$4 sm:$0xff]   ;;  %v24725_v26 = vld [vmem:[#allocation7 + $0x1a8] sm:$0xff]  }
 0xbbc   : > { %v18066_v16 = vsel %vm1020_vm2, -inf, %v18042_v44  ;;  %v24721_v59 = vld [vmem:[#allocation6 + $0x2e38] ss:$12 sps:$4 sm:$0xff]  }
 0xbbd   : > { %16813 = vmatpush1.bf16.msra.mxu1 %v24691_v22  ;;  %v18049_v22 = vsel %vm1020_vm2, %v18042_v44, %v18048_v63  ;;  %v18070_v61 = vsel %vm1020_vm2, %v18048_v63, -inf  ;;  %v18086_v15 = vrot.slane %v18066_v16, 1  ;;  %v24735_v44 = vld [vmem:[#allocation7 + $0x1b8] sm:$0xff]  }
 0xbbe   : > { %22174 = vmatpush3.bf16.msra.mxu0 %v24695_v43  ;;  %16825 = vmatprep.subr.bf16.mxu1 %v24698_v60  ;;  %v24723_v43 = vld [vmem:[#allocation6 + $0x2e3c] ss:$12 sps:$4 sm:$0xff]   ;;  %v18087_v40 = vrot.slane %v18049_v22, 1  ;;  %v18096_v1 = vrot.slane %v18070_v61, 1 }
 0xbbf   : > { %22181 = vmatprep.subr.bf16.mxu0 %v24699_v9  ;;  %v24724_v60 = vld [vmem:[#allocation7 + $0x1e8] sm:$0xff]   ;;  %v24728_v9 = vld [vmem:[#allocation6 + $0x2e54] ss:$12 sps:$4 sm:$0xff]  }
 0xbc0   : > { %16815 = vmatmul.mubr.bf16.vlgmr.msra.gmra.mrb[100].mxu1 %v26511_v62  ;;  %v24713_v62 = vld [vmem:[#allocation6 + $0x2e0c] ss:$12 sps:$4 sm:$0xff]   ;;  %v18088_v6 = vsel %vm980_vm3, %v18086_v15, %v18087_v40  ;;  %v18097_v18 = vsel %vm980_vm3, %v18087_v40, %v18096_v1  ;;  %v24742_v40 = vld [vmem:[#allocation6 + $0x2eb0] ss:$12 sps:$4 sm:$0xff]  }
 0xbc1   : > { %18446 = vmatmul.mubr.bf16.vlgmr.msra.gmra.mrb[96].mxu0 %v18152_v27  ;;  %16826 = vmatpush1.bf16.msra.mxu1 %v24696_v4  ;;  %v24726_v27 = vld [vmem:[#allocation6 + $0x2e50] ss:$12 sps:$4 sm:$0xff]   ;;  %v24747_v1 = vld [vmem:[#allocation6 + $0x2ecc] ss:$12 sps:$4 sm:$0xff]  }
 0xbc2   : > { %16857 = vmatprep.mubr.bf16.mxu1 %v26513_v24  ;;  %22182 = vmatpush3.bf16.msra.mxu0 %v24700_v52  ;;  %v24715_v24 = vld [vmem:[#allocation7 + $0x198] sm:$0xff]  }
 0xbc3   : > { %18486 = vmatprep.mubr.bf16.mxu0 %v18155_v17  ;;  %16827 = vmatprep.subr.bf16.mxu1 %v24703_v56  ;;  %v24730_v17 = vld [vmem:[#allocation7 + $0x1b0] sm:$0xff]   ;;  %v24753_v15 = vld [vmem:[#allocation6 + $0x2efc] ss:$12 sps:$4 sm:$0xff]  }
 0xbc4   : > { %22183 = vmatprep.subr.bf16.mxu0 %v24704_v2 }
 0xbc5   : > { %16828 = vmatpush1.bf16.msra.mxu1 %v24701_v20  ;;  %v24733_v20 = vld [vmem:[#allocation6 + $0x2e6c] ss:$12 sps:$4 sm:$0xff]  }
 0xbc6   : > { %22184 = vmatpush3.bf16.msra.mxu0 %v24705_v19  ;;  %16829 = vmatprep.subr.bf16.mxu1 %v24708_v0  ;;  %v18123_v19 = vrot.slane %v18049_v22, 2  ;;  %v18132_v0 = vrot.slane %v18070_v61, 2 }
 0xbc7   : > { %22185 = vmatprep.subr.bf16.mxu0 %v24709_v57 }
 0xbc8   : > { %v18133_v61 = vsel %vm987_vm4, %v18123_v19, %v18132_v0  ;;  %v24757_v0 = vld [vmem:[#allocation6 + $0x2f28] ss:$12 sps:$4 sm:$0xff]  }
 0xbc9   : > { %16830 = vmatpush1.bf16.msra.mxu1 %v24706_v47  ;;  %v24734_v47 = vld [vmem:[#allocation7 + $0x1f8] sm:$0xff]  }
 0xbca   : > { %22186 = vmatpush3.bf16.msra.mxu0 %v24710_v29  ;;  %16831 = vmatprep.subr.bf16.mxu1 %v24713_v62  ;;  %v18110_v29 = vmax.f32 %v18066_v16, %v18088_v6  ;;  %v18114_v62 = vmax.f32 %v18049_v22, %v18097_v18  ;;  %v24736_v22 = vld [vmem:[#allocation6 + $0x2e80] ss:$12 sps:$4 sm:$0xff]  }
 0xbcb   : > { %22187 = vmatprep.subr.bf16.mxu0 %v24714_v12 }
 0xbcd   : > { %16832 = vmatpush1.bf16.msra.mxu1 %v24711_v32  ;;  %v18122_v32 = vrot.slane %v18066_v16, 2  ;;  %v24744_v16 = vld [vmem:[#allocation6 + $0x2eb4] ss:$12 sps:$4 sm:$0xff]  }
 0xbce   : > { %22188 = vmatpush3.bf16.msra.mxu0 %v24715_v24  ;;  %16833 = vmatprep.subr.bf16.mxu1 %v24718_v58  ;;  %v24731_v24 = vld [vmem:[#allocation6 + $0x2e68] ss:$12 sps:$4 sm:$0xff]  }
 0xbcf   : > { %22189 = vmatprep.subr.bf16.mxu0 %v24719_v49  ;;  %v24738_v49 = vld [vmem:[#allocation6 + $0x2e84] ss:$12 sps:$4 sm:$0xff]  }
 0xbd1   : > { %16834 = vmatpush1.bf16.msra.mxu1 %v24716_v33  ;;  %v18124_v33 = vsel %vm987_vm4, %v18122_v32, %v18123_v19  ;;  %v24768_v32 = vld [vmem:[#allocation6 + $0x2f74] ss:$12 sps:$4 sm:$0xff]  }
 0xbd2   : > { %22190 = vmatpush3.bf16.msra.mxu0 %v24720_v7  ;;  %16835 = vmatprep.subr.bf16.mxu1 %v24723_v43  ;;  %v18146_v7 = vmax.f32 %v18110_v29, %v18124_v33  ;;  %v18150_v43 = vmax.f32 %v18114_v62, %v18133_v61  ;;  %v24760_v29 = vld [vmem:[#allocation6 + $0x2f40] ss:$12 sps:$4 sm:$0xff]   ;;  %v24765_v62 = vld [vmem:[#allocation6 + $0x2f5c] ss:$12 sps:$4 sm:$0xff]  }
 0xbd3   : > { %22191 = vmatprep.subr.bf16.mxu0 %v24724_v60  ;;  %v24777_v33 = vld [vmem:[#allocation6 + $0x2fbc] ss:$12 sps:$4 sm:$0xff]   ;;  %v24780_v61 = vld [vmem:[#allocation6 + $0x2fd4] ss:$12 sps:$4 sm:$0xff]  }
 0xbd4   : > { %v22056_v4 = vpop.f32.mrb[72].mxu0  ;;  %v18154_v60 = vpack.c.bf16 %v18150_v43, %v18146_v7  ;;  %v24778_v43 = vld [vmem:[#allocation6 + $0x2fd0] ss:$12 sps:$4 sm:$0xff]  }
 0xbd5   : > { %v22057_v52 = vpop.f32.mrb[73].mxu0  ;;  %16836 = vmatpush1.bf16.msra.mxu1 %v24721_v59  ;;  %v24745_v59 = vld [vmem:[#allocation6 + $0x2ec8] ss:$12 sps:$4 sm:$0xff]  }
 0xbd6   : > { %v22058_v56 = vadd.f32 %v22057_v52, %v22056_v4  ;;  %v22059_v2 = vpop.f32.mrb[74].mxu0  ;;  %22192 = vmatpush3.bf16.msra.mxu0 %v24725_v26  ;;  %16837 = vmatprep.subr.bf16.mxu1 %v24728_v9  ;;  %v24750_v26 = vld [vmem:[#allocation6 + $0x2ee4] ss:$12 sps:$4 sm:$0xff]   ;;  %v24748_v9 = vld [vmem:[#allocation6 + $0x2ee0] ss:$12 sps:$4 sm:$0xff]  }
 0xbd7   : > { %v22060_v57 = vpop.f32.mrb[75].mxu0  ;;  %22193 = vmatprep.subr.bf16.mxu0 %v24729_v8  ;;  %v24751_v8 = vld [vmem:[#allocation6 + $0x2ef8] ss:$12 sps:$4 sm:$0xff]   ;;  %v24756_v4 = vld [vmem:[#allocation6 + $0x2f14] ss:$12 sps:$4 sm:$0xff]  }
 0xbd8   : > { %v17821_v12 = vadd.f32 %v22058_v56, %v26800_v5  ;;  %v22061_v63 = vadd.f32 %v22060_v57, %v22059_v2  ;;  %v24741_v5 = vld [vmem:[#allocation6 + $0x2e9c] ss:$12 sps:$4 sm:$0xff]   ;;  %v24759_v2 = vld [vmem:[#allocation6 + $0x2f2c] ss:$12 sps:$4 sm:$0xff]  }
 0xbd9   : > { %16838 = vmatpush1.bf16.msra.mxu1 %v24726_v27  ;;  %v24754_v52 = vld [vmem:[#allocation6 + $0x2f10] ss:$12 sps:$4 sm:$0xff]  }
 0xbda   : > { %v17824_v58 = vadd.f32 %v22061_v63, %v26804_v28  ;;  %22194 = vmatpush3.bf16.msra.mxu0 %v24730_v17  ;;  %16839 = vmatprep.subr.bf16.mxu1 %v24733_v20  ;;  %v24739_v28 = vld [vmem:[#allocation6 + $0x2e98] ss:$12 sps:$4 sm:$0xff]  }
 0xbdb   : > { %22195 = vmatprep.subr.bf16.mxu0 %v24734_v47  ;;  %v24762_v47 = vld [vmem:[#allocation6 + $0x2f44] ss:$12 sps:$4 sm:$0xff]  }
 0xbdc   : > { %v24763_v63 = vld [vmem:[#allocation6 + $0x2f58] ss:$12 sps:$4 sm:$0xff]  }
 0xbdd   : > { %16840 = vmatpush1.bf16.msra.mxu1 %v24731_v24  ;;  %v24771_v24 = vld [vmem:[#allocation6 + $0x2f8c] ss:$12 sps:$4 sm:$0xff]  }
 0xbde   : > { %22196 = vmatpush3.bf16.msra.mxu0 %v24735_v44  ;;  %16841 = vmatprep.subr.bf16.mxu1 %v24738_v49  ;;  %v24774_v44 = vld [vmem:[#allocation6 + $0x2fa4] ss:$12 sps:$4 sm:$0xff]   ;;  %v24772_v49 = vld [vmem:[#allocation6 + $0x2fa0] ss:$12 sps:$4 sm:$0xff]  }
 0xbe1   : > { %18487 = vmatmul.mubr.bf16.vlgmr.msra.gmra.mrb[100].mxu0 %v18154_v60  ;;  %16842 = vmatpush1.bf16.msra.mxu1 %v24736_v22  ;;  %v24783_v60 = vld [vmem:[#allocation6 + $0x2fec] ss:$12 sps:$4 sm:$0xff]  }
 0xbe2   : > { %16843 = vmatprep.subr.bf16.mxu1 %v24741_v5 }
 0xbe5   : > { %16844 = vmatpush1.bf16.msra.mxu1 %v24739_v28 }
 0xbe6   : > { %16845 = vmatprep.subr.bf16.mxu1 %v24744_v16 }
 0xbe9   : > { %16846 = vmatpush1.bf16.msra.mxu1 %v24742_v40 }
 0xbea   : > { %16847 = vmatprep.subr.bf16.mxu1 %v24747_v1  ;;  %v24781_v1 = vld [vmem:[#allocation6 + $0x2fe8] ss:$12 sps:$4 sm:$0xff]  }
 0xbed   : > { %16848 = vmatpush1.bf16.msra.mxu1 %v24745_v59 }
 0xbee   : > { %16849 = vmatprep.subr.bf16.mxu1 %v24750_v26  ;;  %v24786_v26 = vld [vmem:[#allocation6 + $0x3004] ss:$12 sps:$4 sm:$0xff]  }
 0xbf1   : > { %16850 = vmatpush1.bf16.msra.mxu1 %v24748_v9  ;;  %v24784_v9 = vld [vmem:[#allocation6 + $0x3000] ss:$12 sps:$4 sm:$0xff]  }
 0xbf2   : > { %16851 = vmatprep.subr.bf16.mxu1 %v24753_v15  ;;  %v24789_v15 = vld [vmem:[#allocation6 + $0x301c] ss:$12 sps:$4 sm:$0xff]  }
 0xbf4   : > { %v22078_v6 = vpop.f32.mrb[76].mxu0 }
 0xbf5   : > { %v22079_v18 = vpop.f32.mrb[77].mxu0  ;;  %16852 = vmatpush1.bf16.msra.mxu1 %v24751_v8  ;;  %v24787_v8 = vld [vmem:[#allocation6 + $0x3018] ss:$12 sps:$4 sm:$0xff]  }
 0xbf6   : > { %v22080_v27 = vadd.f32 %v22079_v18, %v22078_v6  ;;  %v22081_v56 = vpop.f32.mrb[78].mxu0  ;;  %16853 = vmatprep.subr.bf16.mxu1 %v24756_v4  ;;  %v24792_v4 = vld [vmem:[#allocation6 + $0x3034] ss:$12 sps:$4 sm:$0xff]   ;;  %v24790_v6 = vld [vmem:[#allocation6 + $0x3030] ss:$12 sps:$4 sm:$0xff]  }
 0xbf7   : > { %v22082_v17 = vpop.f32.mrb[79].mxu0  ;;  %v24795_v18 = vld [vmem:[#allocation6 + $0x304c] ss:$12 sps:$4 sm:$0xff]  }
 0xbf8   : > { %v17862_v20 = vadd.f32 %v22080_v27, %v17821_v12  ;;  %v22083_v19 = vadd.f32 %v22082_v17, %v22081_v56  ;;  %v24766_v12 = vld [vmem:[#allocation6 + $0x2f70] ss:$12 sps:$4 sm:$0xff]   ;;  %v24796_v56 = vld [vmem:[#allocation6 + $0x3060] ss:$12 sps:$4 sm:$0xff]   ;;  %v24799_v17 = vld [vmem:[#allocation6 + $0x3078] ss:$12 sps:$4 sm:$0xff]  }
 0xbf9   : > { %16854 = vmatpush1.bf16.msra.mxu1 %v24754_v52  ;;  %v24793_v52 = vld [vmem:[#allocation6 + $0x3048] ss:$12 sps:$4 sm:$0xff]   ;;  %v24798_v27 = vld [vmem:[#allocation6 + $0x3064] ss:$12 sps:$4 sm:$0xff]  }
 0xbfa   : > { %v17865_v57 = vadd.f32 %v22083_v19, %v17824_v58  ;;  %16855 = vmatprep.subr.bf16.mxu1 %v24759_v2  ;;  %v24769_v58 = vld [vmem:[#allocation6 + $0x2f88] ss:$12 sps:$4 sm:$0xff]  }
 0xbfb   : > { %v24801_v2 = vld [vmem:[#allocation6 + $0x307c] ss:$12 sps:$4 sm:$0xff]  }
 0xbfd   : > { %16856 = vmatpush1.bf16.msra.mxu1 %v24757_v0 }
 0xbfe   : > { %16868 = vmatprep.subr.bf16.mxu1 %v24762_v47 }
 0xc00   : > { %16858 = vmatmul.mubr.bf16.vlgmr.msra.gmra.mrb[100].mxu1 %v26515_v51  ;;  %v24775_v51 = vld [vmem:[#allocation6 + $0x2fb8] ss:$12 sps:$4 sm:$0xff]  }
 0xc01   : > { %16869 = vmatpush1.bf16.msra.mxu1 %v24760_v29  ;;  %16900 = vmatprep.mubr.bf16.mxu1 %v26518_v35 }
 0xc02   : > { %16870 = vmatprep.subr.bf16.mxu1 %v24765_v62  ;;  %v24807_v62 = vld [vmem:[#allocation6 + $0x30ac] ss:$12 sps:$4 sm:$0xff]  }
 0xc05   : > { %16871 = vmatpush1.bf16.msra.mxu1 %v24763_v63 }
 0xc06   : > { %16872 = vmatprep.subr.bf16.mxu1 %v24768_v32 }
 0xc09   : > { %16873 = vmatpush1.bf16.msra.mxu1 %v24766_v12 }
 0xc0a   : > { %16874 = vmatprep.subr.bf16.mxu1 %v24771_v24  ;;  %v24805_v24 = vld [vmem:[#allocation6 + $0x30a8] ss:$12 sps:$4 sm:$0xff]  }
 0xc0d   : > { %16875 = vmatpush1.bf16.msra.mxu1 %v24769_v58 }
 0xc0e   : > { %16876 = vmatprep.subr.bf16.mxu1 %v24774_v44  ;;  %v24810_v44 = vld [vmem:[#allocation6 + $0x30c4] ss:$12 sps:$4 sm:$0xff]  }
 0xc11   : > { %16877 = vmatpush1.bf16.msra.mxu1 %v24772_v49  ;;  %v24808_v49 = vld [vmem:[#allocation6 + $0x30c0] ss:$12 sps:$4 sm:$0xff]  }
 0xc12   : > { %16878 = vmatprep.subr.bf16.mxu1 %v24777_v33  ;;  %v24813_v33 = vld [vmem:[#allocation6 + $0x30dc] ss:$12 sps:$4 sm:$0xff]  }
 0xc14   : > { %v22100_v35 = vpop.f32.mrb[80].mxu0 }
 0xc15   : > { %v22101_v7 = vpop.f32.mrb[81].mxu0  ;;  %16879 = vmatpush1.bf16.msra.mxu1 %v24775_v51  ;;  %v24811_v51 = vld [vmem:[#allocation6 + $0x30d8] ss:$12 sps:$4 sm:$0xff]  }
 0xc16   : > { %v22102_v22 = vadd.f32 %v22101_v7, %v22100_v35  ;;  %v22103_v5 = vpop.f32.mrb[82].mxu0  ;;  %16880 = vmatprep.subr.bf16.mxu1 %v24780_v61  ;;  %v24816_v61 = vld [vmem:[#allocation6 + $0x30f4] ss:$12 sps:$4 sm:$0xff]   ;;  %v24814_v35 = vld [vmem:[#allocation6 + $0x30f0] ss:$12 sps:$4 sm:$0xff]  }
 0xc17   : > { %v22104_v28 = vpop.f32.mrb[83].mxu0  ;;  %v24819_v7 = vld [vmem:[#allocation6 + $0x310c] ss:$12 sps:$4 sm:$0xff]  }
 0xc18   : > { %v17903_v16 = vadd.f32 %v22102_v22, %v17862_v20  ;;  %v22105_v40 = vadd.f32 %v22104_v28, %v22103_v5  ;;  %v24804_v20 = vld [vmem:[#allocation6 + $0x3094] ss:$12 sps:$4 sm:$0xff]   ;;  %v24822_v22 = vld [vmem:[#allocation6 + $0x3124] ss:$12 sps:$4 sm:$0xff]  }
 0xc19   : > { %16881 = vmatpush1.bf16.msra.mxu1 %v24778_v43  ;;  %v24817_v43 = vld [vmem:[#allocation6 + $0x3108] ss:$12 sps:$4 sm:$0xff]   ;;  %v24820_v5 = vld [vmem:[#allocation6 + $0x3120] ss:$12 sps:$4 sm:$0xff]  }
 0xc1a   : > { %v17906_v59 = vadd.f32 %v22105_v40, %v17865_v57  ;;  %16882 = vmatprep.subr.bf16.mxu1 %v24783_v60  ;;  %v24802_v57 = vld [vmem:[#allocation6 + $0x3090] ss:$12 sps:$4 sm:$0xff]  }
 0xc1b   : > { %v24825_v60 = vld [vmem:[#allocation6 + $0x313c] ss:$12 sps:$4 sm:$0xff]  }
 0xc1d   : > { %16883 = vmatpush1.bf16.msra.mxu1 %v24781_v1 }
 0xc1e   : > { %16884 = vmatprep.subr.bf16.mxu1 %v24786_v26 }
 0xc21   : > { %16885 = vmatpush1.bf16.msra.mxu1 %v24784_v9 }
 0xc22   : > { %16886 = vmatprep.subr.bf16.mxu1 %v24789_v15 }
 0xc25   : > { %16887 = vmatpush1.bf16.msra.mxu1 %v24787_v8  ;;  %v24829_v8 = vld [vmem:[#allocation6 + $0x3168] ss:$12 sps:$4 sm:$0xff]  }
 0xc26   : > { %16888 = vmatprep.subr.bf16.mxu1 %v24792_v4  ;;  %v24834_v4 = vld [vmem:[#allocation6 + $0x3184] ss:$12 sps:$4 sm:$0xff]  }
 0xc29   : > { %16889 = vmatpush1.bf16.msra.mxu1 %v24790_v6 }
 0xc2a   : > { %16890 = vmatprep.subr.bf16.mxu1 %v24795_v18  ;;  %v24832_v18 = vld [vmem:[#allocation6 + $0x3180] ss:$12 sps:$4 sm:$0xff]  }
 0xc2d   : > { %16891 = vmatpush1.bf16.msra.mxu1 %v24793_v52  ;;  %v24837_v52 = vld [vmem:[#allocation6 + $0x319c] ss:$12 sps:$4 sm:$0xff]  }
 0xc2e   : > { %16892 = vmatprep.subr.bf16.mxu1 %v24798_v27  ;;  %v24835_v27 = vld [vmem:[#allocation6 + $0x3198] ss:$12 sps:$4 sm:$0xff]  }
 0xc31   : > { %16893 = vmatpush1.bf16.msra.mxu1 %v24796_v56  ;;  %v24840_v56 = vld [vmem:[#allocation6 + $0x31b4] ss:$12 sps:$4 sm:$0xff]  }
 0xc32   : > { %16894 = vmatprep.subr.bf16.mxu1 %v24801_v2  ;;  %v24838_v2 = vld [vmem:[#allocation6 + $0x31b0] ss:$12 sps:$4 sm:$0xff]  }
 0xc34   : > { %v22122_v19 = vpop.f32.mrb[84].mxu0 }
 0xc35   : > { %v22123_v0 = vpop.f32.mrb[85].mxu0  ;;  %16895 = vmatpush1.bf16.msra.mxu1 %v24799_v17  ;;  %v24843_v17 = vld [vmem:[#allocation6 + $0x31cc] ss:$12 sps:$4 sm:$0xff]  }
 0xc36   : > { %v22124_v47 = vadd.f32 %v22123_v0, %v22122_v19  ;;  %v22125_v29 = vpop.f32.mrb[86].mxu0  ;;  %16896 = vmatprep.subr.bf16.mxu1 %v24804_v20  ;;  %v24841_v20 = vld [vmem:[#allocation6 + $0x31c8] ss:$12 sps:$4 sm:$0xff]   ;;  %v24846_v19 = vld [vmem:[#allocation6 + $0x31e4] ss:$12 sps:$4 sm:$0xff]  }
 0xc37   : > { %v22126_v63 = vpop.f32.mrb[87].mxu0  ;;  %v24844_v0 = vld [vmem:[#allocation6 + $0x31e0] ss:$12 sps:$4 sm:$0xff]  }
 0xc38   : > { %v17944_v32 = vadd.f32 %v22124_v47, %v17903_v16  ;;  %v22127_v12 = vadd.f32 %v22126_v63, %v22125_v29  ;;  %v24826_v16 = vld [vmem:[#allocation6 + $0x3150] ss:$12 sps:$4 sm:$0xff]   ;;  %v26829_v47 = vld [vmem:[#allocation9 + $0x4] sm:$0xf]  ;;  %v24852_v63 = vld [vmem:[#allocation6 + $0x3214] ss:$12 sps:$4 sm:$0xff]  }
 0xc39   : > { %16897 = vmatpush1.bf16.msra.mxu1 %v24802_v57  ;;  %v24849_v57 = vld [vmem:[#allocation6 + $0x31fc] ss:$12 sps:$4 sm:$0xff]   ;;  %v24847_v29 = vld [vmem:[#allocation6 + $0x31f8] ss:$12 sps:$4 sm:$0xff]  }
 0xc3a   : > { %v17947_v58 = vadd.f32 %v22127_v12, %v17906_v59  ;;  %16898 = vmatprep.subr.bf16.mxu1 %v24807_v62  ;;  %v24831_v59 = vld [vmem:[#allocation6 + $0x316c] ss:$12 sps:$4 sm:$0xff]  }
 0xc3b   : > { %v26831_v62 = vld [vmem:[#allocation10 + $0x4] sm:$0xf] }
 0xc3d   : > { %16899 = vmatpush1.bf16.msra.mxu1 %v24805_v24 }
 0xc3e   : > { %16911 = vmatprep.subr.bf16.mxu1 %v24810_v44 }
 0xc40   : > { %21112 = vmatmul.mubr.msk.bf16.vlgmr.msra.gmra.mrb[100].mxu1 %vm26153_vm12, %v26414_v36  ;;  %v24828_v36 = vld [vmem:[#allocation6 + $0x3154] ss:$12 sps:$4 sm:$0xff]  }
 0xc41   : > { %16912 = vmatpush1.bf16.msra.mxu1 %v24808_v49  ;;  %16943 = vmatprep.mubr.bf16.mxu1 %v26533_v21 }
 0xc42   : > { %16913 = vmatprep.subr.bf16.mxu1 %v24813_v33  ;;  %v24850_v33 = vld [vmem:[#allocation6 + $0x3210] ss:$12 sps:$4 sm:$0xff]  }
 0xc45   : > { %16914 = vmatpush1.bf16.msra.mxu1 %v24811_v51 }
 0xc46   : > { %16915 = vmatprep.subr.bf16.mxu1 %v24816_v61  ;;  %v24855_v61 = vld [vmem:[#allocation6 + $0x322c] ss:$12 sps:$4 sm:$0xff]  }
 0xc49   : > { %16916 = vmatpush1.bf16.msra.mxu1 %v24814_v35 }
 0xc4a   : > { %16917 = vmatprep.subr.bf16.mxu1 %v24819_v7 }
 0xc4d   : > { %16918 = vmatpush1.bf16.msra.mxu1 %v24817_v43 }
 0xc4e   : > { %16919 = vmatprep.subr.bf16.mxu1 %v24822_v22  ;;  %v26837_v22 = vld [vmem:[#allocation12 + $0x4] sm:$0xf] }
 0xc51   : > { %16920 = vmatpush1.bf16.msra.mxu1 %v24820_v5 }
 0xc52   : > { %16921 = vmatprep.subr.bf16.mxu1 %v24825_v60 }
 0xc54   : > { %v22144_v21 = vpop.f32.mrb[88].mxu0 }
 0xc55   : > { %v22145_v28 = vpop.f32.mrb[89].mxu0  ;;  %16922 = vmatpush1.bf16.msra.mxu1 %v24823_v53  ;;  %v24853_v53 = vld [vmem:[#allocation6 + $0x3228] ss:$12 sps:$4 sm:$0xff]  }
 0xc56   : > { %v22146_v40 = vadd.f32 %v22145_v28, %v22144_v21  ;;  %v22147_v1 = vpop.f32.mrb[90].mxu0  ;;  %16923 = vmatprep.subr.bf16.mxu1 %v24828_v36  ;;  %v26839_v36 = vld [vmem:[#allocation13 + $0x4] sm:$0xf]  ;;  %v24858_v21 = vld [vmem:[#allocation6 + $0x3244] ss:$12 sps:$4 sm:$0xff]  }
 0xc57   : > { %v22148_v26 = vpop.f32.mrb[91].mxu0 }
 0xc58   : > { %v22149_v9 = vadd.f32 %v22148_v26, %v22147_v1  ;;  %v17985_v15 = vadd.f32 %v22146_v40, %v17944_v32  ;;  %v27187_v32 = vld [vmem:[#allocation29_spill] sm:$0xff] }
 0xc59   : > { %16924 = vmatpush1.bf16.msra.mxu1 %v24826_v16  ;;  %v18509_v12 = vrot.slane %v26829_v47, %v27187_v32  ;;  %v18540_v44 = vrot.slane %v26831_v62, %v27187_v32  ;;  %v18587_v16 = vrot.slane %v26837_v22, %v27187_v32 }
 0xc5a   : > { %16925 = vmatprep.subr.bf16.mxu1 %v24831_v59  ;;  %v17988_v6 = vadd.f32 %v22149_v9, %v17947_v58  ;;  %v18618_v59 = vrot.slane %v26839_v36, %v27187_v32  ;;  %v24856_v9 = vld [vmem:[#allocation6 + $0x3240] ss:$12 sps:$4 sm:$0xff]  }
 0xc5d   : > { %16926 = vmatpush1.bf16.msra.mxu1 %v24829_v8 }
 0xc5e   : > { %16927 = vmatprep.subr.bf16.mxu1 %v24834_v4 }
 0xc61   : > { %16928 = vmatpush1.bf16.msra.mxu1 %v24832_v18 }
 0xc62   : > { %16929 = vmatprep.subr.bf16.mxu1 %v24837_v52  ;;  %v24864_v52 = vld [vmem:[#allocation6 + $0x3274] ss:$12 sps:$4 sm:$0xff]  }
 0xc65   : > { %16930 = vmatpush1.bf16.msra.mxu1 %v24835_v27 }
 0xc66   : > { %16931 = vmatprep.subr.bf16.mxu1 %v24840_v56 }
 0xc69   : > { %16932 = vmatpush1.bf16.msra.mxu1 %v24838_v2 }
 0xc6a   : > { %16933 = vmatprep.subr.bf16.mxu1 %v24843_v17 }
 0xc6d   : > { %16934 = vmatpush1.bf16.msra.mxu1 %v24841_v20 }
 0xc6e   : > { %16935 = vmatprep.subr.bf16.mxu1 %v24846_v19 }
 0xc71   : > { %16936 = vmatpush1.bf16.msra.mxu1 %v24844_v0 }
 0xc72   : > { %16937 = vmatprep.subr.bf16.mxu1 %v24849_v57 }
 0xc74   : > { %v18025_v24 = vpop.f32.mrb[92].mxu0 }
 0xc75   : > { %v18026_v58 = vadd.f32 %v18025_v24, %v17985_v15  ;;  %v22241_v49 = vpop.f32.mrb[93].mxu0  ;;  %16938 = vmatpush1.bf16.msra.mxu1 %v24847_v29  ;;  %v24861_v15 = vld [vmem:[#allocation6 + $0x325c] ss:$12 sps:$4 sm:$0xff]  }
 0xc76   : > { %v18028_v51 = vpop.f32.mrb[94].mxu0  ;;  %16939 = vmatprep.subr.bf16.mxu1 %v24852_v63  ;;  %v24865_v29 = vld [vmem:[#allocation6 + $0x3288] ss:$12 sps:$4 sm:$0xff]   ;;  %v24870_v63 = vld [vmem:[#allocation6 + $0x32a4] ss:$12 sps:$4 sm:$0xff]  }
 0xc77   : > { %v18520_v35 = vmul.f32 %v18509_v12, %v18026_v58  ;;  %v18029_v7 = vadd.f32 %v18028_v51, %v17988_v6  ;;  %v22242_v43 = vpop.f32.mrb[95].mxu0  ;;  %v24868_v51 = vld [vmem:[#allocation6 + $0x32a0] ss:$12 sps:$4 sm:$0xff]  }
 0xc79   : > { %v18551_v5 = vadd.f32 %v18540_v44, %v18520_v35  ;;  %v18524_v60 = vmul.f32 %v18509_v12, %v18029_v7  ;;  %16940 = vmatpush1.bf16.msra.mxu1 %v24850_v33  ;;  %v24873_v35 = vld [vmem:[#allocation6 + $0x32bc] ss:$12 sps:$4 sm:$0xff]  }
 0xc7a   : > { %16941 = vmatprep.subr.bf16.mxu1 %v24855_v61 }
 0xc7b   : > { %v18559_v28 = vmax.f32 %v18551_v5, 0.0  ;;  %v18555_v40 = vadd.f32 %v18540_v44, %v18524_v60 }
 0xc7d   : > { %v18567_v1 = vadd.f32 %v18559_v28, %v27186_v45  ;;  %v18563_v26 = vmax.f32 %v18555_v40, 0.0  ;;  %16942 = vmatpush1.bf16.msra.mxu1 %v24853_v53  ;;  %v24859_v45 = vld [vmem:[#allocation6 + $0x3258] ss:$12 sps:$4 sm:$0xff]  }
 0xc7e   : > { %16954 = vmatprep.subr.bf16.mxu1 %v24858_v21 }
 0xc7f   : > { %v18598_v8 = vmul.f32 %v18587_v16, %v18567_v1  ;;  %v18571_v4 = vadd.f32 %v18563_v26, %v27185_v39  ;;  %v24862_v39 = vld [vmem:[#allocation6 + $0x3270] ss:$12 sps:$4 sm:$0xff]   ;;  %v24876_v1 = vld [vmem:[#allocation6 + $0x32d4] ss:$12 sps:$4 sm:$0xff]  }
 0xc80   : > { %16944 = vmatmul.mubr.bf16.vlgmr.msra.gmra.mrb[100].mxu1 %v26536_v23  ;;  %v24867_v23 = vld [vmem:[#allocation6 + $0x328c] ss:$12 sps:$4 sm:$0xff]  }
 0xc81   : > { %v26848_v6 = vadd.f32 %v18618_v59, %v18598_v8  ;;  %v18602_v18 = vmul.f32 %v18587_v16, %v18571_v4  ;;  %16955 = vmatpush1.bf16.msra.mxu1 %v24856_v9  ;;  %16986 = vmatprep.mubr.bf16.mxu1 %v26539_v46  ;;  %v24871_v16 = vld [vmem:[#allocation6 + $0x32b8] ss:$12 sps:$4 sm:$0xff]  }
 0xc82   : > { %16956 = vmatprep.subr.bf16.mxu1 %v24861_v15 }
 0xc83   : > { %v18645_v27 = vmul.f32 0.70710677, %v26848_v6  ;;  %v26852_v56 = vadd.f32 %v18618_v59, %v18602_v18 }
 0xc85   : > { %v26854_v2 = vclamps-f32 %v18645_v27, 4.0  ;;  %v18649_v17 = vmul.f32 0.70710677, %v26852_v56  ;;  %16957 = vmatpush1.bf16.msra.mxu1 %v24859_v45  ;;  %v24874_v27 = vld [vmem:[#allocation6 + $0x32d0] ss:$12 sps:$4 sm:$0xff]  }
 0xc86   : > { %16958 = vmatprep.subr.bf16.mxu1 %v24864_v52 }
 0xc87   : > { %v26859_v20 = vmul.f32 %v26854_v2, %v26854_v2  ;;  %v26861_v46 = vclamps-f32 %v18649_v17, 4.0 }
 0xc89   : > { %v18677_v19 = vmul.f32 -2.7261424e-10, %v26859_v20  ;;  %v18781_v0 = vmul.f32 -1.45660715e-05, %v26859_v20  ;;  %v26867_v57 = vmul.f32 %v26861_v46, %v26861_v46  ;;  %16959 = vmatpush1.bf16.msra.mxu1 %v24862_v39 }
 0xc8a   : > { %16960 = vmatprep.subr.bf16.mxu1 %v24867_v23 }
 0xc8b   : > { %v18685_v32 = vadd.f32 2.7706815e-08, %v18677_v19  ;;  %v18789_v12 = vadd.f32 -0.00021337405, %v18781_v0  ;;  %v18681_v24 = vmul.f32 -2.7261424e-10, %v26867_v57 }
 0xc8c   : > { %v18785_v58 = vmul.f32 -1.45660715e-05, %v26867_v57  ;;  %v24879_v19 = vld [vmem:[#allocation6 + $0x32ec] ss:$12 sps:$4 sm:$0xff]  }
 0xc8d   : > { %v18693_v44 = vmul.f32 %v18685_v32, %v26859_v20  ;;  %v18797_v49 = vmul.f32 %v18789_v12, %v26859_v20  ;;  %v18689_v33 = vadd.f32 2.7706815e-08, %v18681_v24  ;;  %16961 = vmatpush1.bf16.msra.mxu1 %v24865_v29 }
 0xc8e   : > { %v18793_v61 = vadd.f32 -0.00021337405, %v18785_v58  ;;  %16962 = vmatprep.subr.bf16.mxu1 %v24870_v63 }
 0xc8f   : > { %v18701_v7 = vadd.f32 -2.101024e-06, %v18693_v44  ;;  %v18805_v43 = vadd.f32 -0.001682827, %v18797_v49  ;;  %v18697_v5 = vmul.f32 %v18689_v33, %v26867_v57  ;;  %v24877_v49 = vld [vmem:[#allocation6 + $0x32e8] ss:$12 sps:$4 sm:$0xff]  }
 0xc90   : > { %v18801_v60 = vmul.f32 %v18793_v61, %v26867_v57 }
 0xc91   : > { %v18709_v53 = vmul.f32 %v18701_v7, %v26859_v20  ;;  %v18813_v21 = vmul.f32 %v18805_v43, %v26859_v20  ;;  %v18705_v28 = vadd.f32 -2.101024e-06, %v18697_v5  ;;  %16963 = vmatpush1.bf16.msra.mxu1 %v24868_v51  ;;  %v24882_v51 = vld [vmem:[#allocation6 + $0x3304] ss:$12 sps:$4 sm:$0xff]   ;;  %v24880_v5 = vld [vmem:[#allocation6 + $0x3300] ss:$12 sps:$4 sm:$0xff]  }
 0xc92   : > { %v18809_v40 = vadd.f32 -0.001682827, %v18801_v60  ;;  %16964 = vmatprep.subr.bf16.mxu1 %v24873_v35  ;;  %v24885_v60 = vld [vmem:[#allocation6 + $0x331c] ss:$12 sps:$4 sm:$0xff]  }
 0xc93   : > { %v18717_v59 = vadd.f32 -5.6925062e-05, %v18709_v53  ;;  %v18821_v26 = vadd.f32 -0.0073733293, %v18813_v21  ;;  %v18713_v9 = vmul.f32 %v18705_v28, %v26867_v57 }
 0xc94   : > { %v18817_v15 = vmul.f32 %v18809_v40, %v26867_v57  ;;  %v22175_v8 = vpop.f32.mrb[96].mxu0  ;;  %v24883_v40 = vld [vmem:[#allocation6 + $0x3318] ss:$12 sps:$4 sm:$0xff]  }
 0xc95   : > { %v18725_v4 = vmul.f32 %v18717_v59, %v26859_v20  ;;  %v18829_v18 = vmul.f32 %v18821_v26, %v26859_v20  ;;  %v18721_v45 = vadd.f32 -5.6925062e-05, %v18713_v9  ;;  %v22176_v52 = vpop.f32.mrb[97].mxu0  ;;  %16965 = vmatpush1.bf16.msra.mxu1 %v24871_v16 }
 0xc96   : > { %v18825_v17 = vadd.f32 -0.0073733293, %v18817_v15  ;;  %v26881_v39 = vadd.f32 %v22176_v52, %v22175_v8  ;;  %v22178_v23 = vpop.f32.mrb[98].mxu0  ;;  %16966 = vmatprep.subr.bf16.mxu1 %v24876_v1  ;;  %v24888_v1 = vld [vmem:[#allocation6 + $0x3334] ss:$12 sps:$4 sm:$0xff]  }
 0xc97   : > { %v18733_v0 = vadd.f32 -0.00073499064, %v18725_v4  ;;  %v18837_v29 = vadd.f32 -0.014264739, %v18829_v18  ;;  %v18729_v63 = vmul.f32 %v18721_v45, %v26867_v57  ;;  %v22179_v32 = vpop.f32.mrb[99].mxu0 }
 0xc98   : > { %v18833_v12 = vmul.f32 %v18825_v17, %v26867_v57  ;;  %v26885_v24 = vadd.f32 %v22179_v32, %v22178_v23  ;;  %v24891_v8 = vld [vmem:[#allocation6 + $0x334c] ss:$12 sps:$4 sm:$0xff]   ;;  %v24889_v52 = vld [vmem:[#allocation6 + $0x3348] ss:$12 sps:$4 sm:$0xff]  }
 0xc99   : > { %v18741_v58 = vmul.f32 %v18733_v0, %v26859_v20  ;;  %25120 = vrcp.f32 %v18837_v29  ;;  %v18737_v44 = vadd.f32 -0.00073499064, %v18729_v63  ;;  %16967 = vmatpush1.bf16.msra.mxu1 %v24874_v27  ;;  %v24894_v27 = vld [vmem:[#allocation6 + $0x3364] ss:$12 sps:$4 sm:$0xff]   ;;  %v24897_v0 = vld [vmem:[#allocation6 + $0x337c] ss:$12 sps:$4 sm:$0xff]  }
 0xc9a   : > { %v18841_v33 = vadd.f32 -0.014264739, %v18833_v12  ;;  %16968 = vmatprep.subr.bf16.mxu1 %v24879_v19  ;;  %v24892_v19 = vld [vmem:[#allocation6 + $0x3360] ss:$12 sps:$4 sm:$0xff]   ;;  %v24895_v29 = vld [vmem:[#allocation6 + $0x3378] ss:$12 sps:$4 sm:$0xff]  }
 0xc9b   : > { %v18749_v61 = vadd.f32 -0.0029546, %v18741_v58  ;;  %v18745_v35 = vmul.f32 %v18737_v44, %v26867_v57  ;;  %v24900_v63 = vld [vmem:[#allocation6 + $0x3394] ss:$12 sps:$4 sm:$0xff]  }
 0xc9c   : > { %25122 = vrcp.f32 %v18841_v33  ;;  %v27188_v58 = vld [vmem:[#allocation30_spill] sm:$0xff]  ;;  %v24903_v33 = vld [vmem:[#allocation6 + $0x33ac] ss:$12 sps:$4 sm:$0xff]  }
 0xc9d   : > { %v18757_v7 = vmul.f32 %v18749_v61, %v26859_v20  ;;  %v18753_v43 = vadd.f32 -0.0029546, %v18745_v35  ;;  %16969 = vmatpush1.bf16.msra.mxu1 %v24877_v49  ;;  %v24886_v20 = vld [vmem:[#allocation6 + $0x3330] ss:$12 sps:$4 sm:$0xff]   ;;  %v18513_v44 = vrot.slane %v26829_v47, %v27188_v58  ;;  %v18544_v35 = vrot.slane %v26831_v62, %v27188_v58  ;;  %v24904_v47 = vld [vmem:[#allocation6 + $0x33c0] ss:$12 sps:$4 sm:$0xff]  }
 0xc9e   : > { %16970 = vmatprep.subr.bf16.mxu1 %v24882_v51 }
 0xc9f   : > { %v18765_v53 = vadd.f32 -0.016096033, %v18757_v7  ;;  %v18761_v21 = vmul.f32 %v18753_v43, %v26867_v57  ;;  %v18637_v57 = vmul.f32 0.5, %v26848_v6  ;;  %v24901_v43 = vld [vmem:[#allocation6 + $0x33a8] ss:$12 sps:$4 sm:$0xff]  }
 0xca1   : > { %v18773_v28 = vmul.f32 %v26854_v2, %v18765_v53  ;;  %v18769_v16 = vadd.f32 -0.016096033, %v18761_v21  ;;  %16971 = vmatpush1.bf16.msra.mxu1 %v24880_v5  ;;  %v18641_v2 = vmul.f32 0.5, %v26852_v56  ;;  %v24898_v56 = vld [vmem:[#allocation6 + $0x3390] ss:$12 sps:$4 sm:$0xff]  }
 0xca2   : > { %16972 = vmatprep.subr.bf16.mxu1 %v24885_v60  ;;  %v24906_v53 = vld [vmem:[#allocation6 + $0x33c4] ss:$12 sps:$4 sm:$0xff]  }
 0xca3   : > { %v25121_v59 = vpop.eup %25120  ;;  %v18777_v26 = vmul.f32 %v26861_v46, %v18769_v16 }
 0xca4   : > { %v18848_v9 = vmul.f32 %v25121_v59, %v18773_v28  ;;  %v18622_v59 = vrot.slane %v26839_v36, %v27188_v58 }
 0xca5   : > { %16973 = vmatpush1.bf16.msra.mxu1 %v24883_v40  ;;  %v18591_v40 = vrot.slane %v26837_v22, %v27188_v58  ;;  %v24912_v22 = vld [vmem:[#allocation6 + $0x33f4] ss:$12 sps:$4 sm:$0xff]  }
 0xca6   : > { %v25123_v15 = vpop.eup %25122  ;;  %16974 = vmatprep.subr.bf16.mxu1 %v24888_v1  ;;  %v18861_v4 = vadd.f32 1.0, %v18848_v9  ;;  %v24909_v1 = vld [vmem:[#allocation6 + $0x33dc] ss:$12 sps:$4 sm:$0xff]  }
 0xca7   : > { %v18856_v18 = vmul.f32 %v25123_v15, %v18777_v26 }
 0xca8   : > { %v18869_v17 = vmul.f32 %v18861_v4, %v18637_v57  ;;  %v24913_v57 = vld [vmem:[#allocation6 + $0x3408] ss:$12 sps:$4 sm:$0xff]  }
 0xca9   : > { %v18865_v45 = vadd.f32 1.0, %v18856_v18  ;;  %16975 = vmatpush1.bf16.msra.mxu1 %v24886_v20 }
 0xcaa   : > { %16976 = vmatprep.subr.bf16.mxu1 %v24891_v8 }
 0xcab   : > { %v18873_v23 = vmul.f32 %v18865_v45, %v18641_v2  ;;  %v24918_v45 = vld [vmem:[#allocation6 + $0x3424] ss:$12 sps:$4 sm:$0xff]  }
 0xcad   : > { %v26895_v46 = vadd.f32 %v18873_v23, %v18869_v17  ;;  %16977 = vmatpush1.bf16.msra.mxu1 %v24889_v52  ;;  %v24916_v23 = vld [vmem:[#allocation6 + $0x3420] ss:$12 sps:$4 sm:$0xff]  }
 0xcae   : > { %16978 = vmatprep.subr.bf16.mxu1 %v24894_v27 }
 0xcb1   : > { %16979 = vmatpush1.bf16.msra.mxu1 %v24892_v19  ;;  %v24921_v19 = vld [vmem:[#allocation6 + $0x343c] ss:$12 sps:$4 sm:$0xff]  }
 0xcb2   : > { %16980 = vmatprep.subr.bf16.mxu1 %v24897_v0 }
 0xcb4   : > { %v22197_v6 = vpop.f32.mrb[100].mxu0 }
 0xcb5   : > { %v22198_v32 = vpop.f32.mrb[101].mxu0  ;;  %16981 = vmatpush1.bf16.msra.mxu1 %v24895_v29 }
 0xcb6   : > { %v22199_v12 = vadd.f32 %v22198_v32, %v22197_v6  ;;  %v22200_v49 = vpop.f32.mrb[102].mxu0  ;;  %16982 = vmatprep.subr.bf16.mxu1 %v24900_v63 }
 0xcb7   : > { %v22201_v51 = vpop.f32.mrb[103].mxu0 }
 0xcb8   : > { %v18489_v61 = vadd.f32 %v22199_v12, %v26881_v39  ;;  %v22202_v7 = vadd.f32 %v22201_v51, %v22200_v49 }
 0xcb9   : > { %16983 = vmatpush1.bf16.msra.mxu1 %v24898_v56 }
 0xcba   : > { %v18521_v5 = vmul.f32 %v18513_v44, %v18489_v61  ;;  %v18492_v60 = vadd.f32 %v22202_v7, %v26885_v24  ;;  %16984 = vmatprep.subr.bf16.mxu1 %v24903_v33  ;;  %v24907_v24 = vld [vmem:[#allocation6 + $0x33d8] ss:$12 sps:$4 sm:$0xff]   ;;  %v24924_v61 = vld [vmem:[#allocation6 + $0x3454] ss:$12 sps:$4 sm:$0xff]  }
 0xcbc   : > { %v18552_v21 = vadd.f32 %v18544_v35, %v18521_v5  ;;  %v18525_v28 = vmul.f32 %v18513_v44, %v18492_v60  ;;  %v24919_v44 = vld [vmem:[#allocation6 + $0x3438] ss:$12 sps:$4 sm:$0xff]  }
 0xcbd   : > { %16985 = vmatpush1.bf16.msra.mxu1 %v24901_v43 }
 0xcbe   : > { %v18560_v16 = vmax.f32 %v18552_v21, 0.0  ;;  %v18556_v39 = vadd.f32 %v18544_v35, %v18525_v28  ;;  %16997 = vmatprep.subr.bf16.mxu1 %v24906_v53  ;;  %v24922_v53 = vld [vmem:[#allocation6 + $0x3450] ss:$12 sps:$4 sm:$0xff]  }
 0xcc0   : > { %v18568_v62 = vadd.f32 %v18560_v16, %v27184_v48  ;;  %v18564_v26 = vmax.f32 %v18556_v39, 0.0  ;;  %16987 = vmatmul.mubr.bf16.vlgmr.msra.gmra.mrb[100].mxu1 %v26552_v54  ;;  %v24910_v48 = vld [vmem:[#allocation6 + $0x33f0] ss:$12 sps:$4 sm:$0xff]   ;;  %v24915_v54 = vld [vmem:[#allocation6 + $0x340c] ss:$12 sps:$4 sm:$0xff]  }
 0xcc1   : > { %16998 = vmatpush1.bf16.msra.mxu1 %v24904_v47  ;;  %17029 = vmatprep.mubr.bf16.mxu1 %v26554_v30  ;;  %v24927_v16 = vld [vmem:[#allocation6 + $0x346c] ss:$12 sps:$4 sm:$0xff]  }
 0xcc2   : > { %v18599_v9 = vmul.f32 %v18591_v40, %v18568_v62  ;;  %v18572_v20 = vadd.f32 %v18564_v26, %v27182_v3  ;;  %16999 = vmatprep.subr.bf16.mxu1 %v24909_v1  ;;  %v24925_v26 = vld [vmem:[#allocation6 + $0x3468] ss:$12 sps:$4 sm:$0xff]  }
 0xcc4   : > { %v26911_v15 = vadd.f32 %v18622_v59, %v18599_v9  ;;  %v18603_v8 = vmul.f32 %v18591_v40, %v18572_v20 }
 0xcc5   : > { %17000 = vmatpush1.bf16.msra.mxu1 %v24907_v24 }
 0xcc6   : > { %v18646_v4 = vmul.f32 0.70710677, %v26911_v15  ;;  %v26914_v36 = vadd.f32 %v18622_v59, %v18603_v8  ;;  %17001 = vmatprep.subr.bf16.mxu1 %v24912_v22  ;;  %v24930_v22 = vld [vmem:[#allocation6 + $0x3484] ss:$12 sps:$4 sm:$0xff]  }
 0xcc8   : > { %v26916_v18 = vclamps-f32 %v18646_v4, 4.0  ;;  %v18650_v30 = vmul.f32 0.70710677, %v26914_v36 }
 0xcc9   : > { %17002 = vmatpush1.bf16.msra.mxu1 %v24910_v48 }
 0xcca   : > { %v18670_v3 = vmul.f32 %v26916_v18, %v26916_v18  ;;  %v26921_v2 = vclamps-f32 %v18650_v30, 4.0  ;;  %17003 = vmatprep.subr.bf16.mxu1 %v24915_v54  ;;  %v24928_v30 = vld [vmem:[#allocation6 + $0x3480] ss:$12 sps:$4 sm:$0xff]  }
 0xccc   : > { %v18678_v52 = vmul.f32 -2.7261424e-10, %v18670_v3  ;;  %v18782_v27 = vmul.f32 -1.45660715e-05, %v18670_v3  ;;  %v18674_v17 = vmul.f32 %v26921_v2, %v26921_v2 }
 0xccd   : > { %17004 = vmatpush1.bf16.msra.mxu1 %v24913_v57 }
 0xcce   : > { %v18686_v0 = vadd.f32 2.7706815e-08, %v18678_v52  ;;  %v18790_v29 = vadd.f32 -0.00021337405, %v18782_v27  ;;  %v18682_v63 = vmul.f32 -2.7261424e-10, %v18674_v17  ;;  %17005 = vmatprep.subr.bf16.mxu1 %v24918_v45 }
 0xccf   : > { %v18786_v6 = vmul.f32 -1.45660715e-05, %v18674_v17  ;;  %v24933_v52 = vld [vmem:[#allocation6 + $0x349c] ss:$12 sps:$4 sm:$0xff]  }
 0xcd0   : > { %v18694_v32 = vmul.f32 %v18686_v0, %v18670_v3  ;;  %v18798_v56 = vmul.f32 %v18790_v29, %v18670_v3  ;;  %v18690_v12 = vadd.f32 2.7706815e-08, %v18682_v63  ;;  %v24936_v63 = vld [vmem:[#allocation6 + $0x34b4] ss:$12 sps:$4 sm:$0xff]  }
 0xcd1   : > { %v18794_v58 = vadd.f32 -0.00021337405, %v18786_v6  ;;  %17006 = vmatpush1.bf16.msra.mxu1 %v24916_v23 }
 0xcd2   : > { %v18702_v49 = vadd.f32 -2.101024e-06, %v18694_v32  ;;  %v18806_v33 = vadd.f32 -0.001682827, %v18798_v56  ;;  %v18698_v51 = vmul.f32 %v18690_v12, %v18674_v17  ;;  %17007 = vmatprep.subr.bf16.mxu1 %v24921_v19  ;;  %v24931_v19 = vld [vmem:[#allocation6 + $0x3498] ss:$12 sps:$4 sm:$0xff]  }
 0xcd3   : > { %v18802_v35 = vmul.f32 %v18794_v58, %v18674_v17  ;;  %v24934_v56 = vld [vmem:[#allocation6 + $0x34b0] ss:$12 sps:$4 sm:$0xff]   ;;  %v18890_v58 = vrot.slane %v26895_v46, 4 }
 0xcd4   : > { %v18710_v7 = vmul.f32 %v18702_v49, %v18670_v3  ;;  %v18814_v43 = vmul.f32 %v18806_v33, %v18670_v3  ;;  %v18706_v5 = vadd.f32 -2.101024e-06, %v18698_v51  ;;  %v24939_v49 = vld [vmem:[#allocation6 + $0x34cc] ss:$12 sps:$4 sm:$0xff]   ;;  %v24937_v51 = vld [vmem:[#allocation6 + $0x34c8] ss:$12 sps:$4 sm:$0xff]  }
 0xcd5   : > { %v18810_v60 = vadd.f32 -0.001682827, %v18802_v35  ;;  %17008 = vmatpush1.bf16.msra.mxu1 %v24919_v44 }
 0xcd6   : > { %v18718_v21 = vadd.f32 -5.6925062e-05, %v18710_v7  ;;  %v18822_v28 = vadd.f32 -0.0073733293, %v18814_v43  ;;  %v18714_v47 = vmul.f32 %v18706_v5, %v18674_v17  ;;  %17009 = vmatprep.subr.bf16.mxu1 %v24924_v61  ;;  %v18638_v7 = vmul.f32 0.5, %v26911_v15 }
 0xcd7   : > { %v18818_v40 = vmul.f32 %v18810_v60, %v18674_v17  ;;  %v18642_v43 = vmul.f32 0.5, %v26914_v36  ;;  %v24940_v60 = vld [vmem:[#allocation6 + $0x34e0] ss:$12 sps:$4 sm:$0xff]   ;;  %v24946_v15 = vld [vmem:[#allocation6 + $0x3510] ss:$12 sps:$4 sm:$0xff]  }
 0xcd8   : > { %v18726_v39 = vmul.f32 %v18718_v21, %v18670_v3  ;;  %v18830_v1 = vmul.f32 %v18822_v28, %v18670_v3  ;;  %v18722_v62 = vadd.f32 -5.6925062e-05, %v18714_v47  ;;  %v24945_v28 = vld [vmem:[#allocation6 + $0x34fc] ss:$12 sps:$4 sm:$0xff]  }
 0xcd9   : > { %v18826_v59 = vadd.f32 -0.0073733293, %v18818_v40  ;;  %17010 = vmatpush1.bf16.msra.mxu1 %v24922_v53 }
 0xcda   : > { %v18734_v24 = vadd.f32 -0.00073499064, %v18726_v39  ;;  %v18838_v9 = vadd.f32 -0.014264739, %v18830_v1  ;;  %v18730_v20 = vmul.f32 %v18722_v62, %v18674_v17  ;;  %17011 = vmatprep.subr.bf16.mxu1 %v24927_v16  ;;  %v24943_v16 = vld [vmem:[#allocation6 + $0x34f8] ss:$12 sps:$4 sm:$0xff]  }
 0xcdb   : > { %v18834_v8 = vmul.f32 %v18826_v59, %v18674_v17  ;;  %v24948_v39 = vld [vmem:[#allocation6 + $0x3514] ss:$12 sps:$4 sm:$0xff]   ;;  %v24951_v59 = vld [vmem:[#allocation6 + $0x352c] ss:$12 sps:$4 sm:$0xff]  }
 0xcdc   : > { %v18742_v48 = vmul.f32 %v18734_v24, %v18670_v3  ;;  %25124 = vrcp.f32 %v18838_v9  ;;  %v18738_v4 = vadd.f32 -0.00073499064, %v18730_v20  ;;  %v24949_v24 = vld [vmem:[#allocation6 + $0x3528] ss:$12 sps:$4 sm:$0xff]  }
 0xcdd   : > { %v18842_v54 = vadd.f32 -0.014264739, %v18834_v8  ;;  %17012 = vmatpush1.bf16.msra.mxu1 %v24925_v26 }
 0xcde   : > { %v18750_v57 = vadd.f32 -0.0029546, %v18742_v48  ;;  %v18746_v45 = vmul.f32 %v18738_v4, %v18674_v17  ;;  %17013 = vmatprep.subr.bf16.mxu1 %v24930_v22  ;;  %v24954_v22 = vld [vmem:[#allocation6 + $0x3544] ss:$12 sps:$4 sm:$0xff]   ;;  %v24952_v48 = vld [vmem:[#allocation6 + $0x3540] ss:$12 sps:$4 sm:$0xff]  }
 0xcdf   : > { %25126 = vrcp.f32 %v18842_v54 }
 0xce0   : > { %v18758_v27 = vmul.f32 %v18750_v57, %v18670_v3  ;;  %v18754_v23 = vadd.f32 -0.0029546, %v18746_v45  ;;  %v24955_v45 = vld [vmem:[#allocation6 + $0x3558] ss:$12 sps:$4 sm:$0xff]  }
 0xce1   : > { %17014 = vmatpush1.bf16.msra.mxu1 %v24928_v30  ;;  %v24957_v30 = vld [vmem:[#allocation6 + $0x355c] ss:$12 sps:$4 sm:$0xff]  }
 0xce2   : > { %v18766_v0 = vadd.f32 -0.016096033, %v18758_v27  ;;  %v18762_v29 = vmul.f32 %v18754_v23, %v18674_v17  ;;  %17015 = vmatprep.subr.bf16.mxu1 %v24933_v52  ;;  %v18891_v17 = vadd.f32 %v18890_v58, %v26895_v46  ;;  %v24960_v52 = vld [vmem:[#allocation6 + $0x3574] ss:$12 sps:$4 sm:$0xff]   ;;  %v24958_v27 = vld [vmem:[#allocation6 + $0x3570] ss:$12 sps:$4 sm:$0xff]  }
 0xce3   : > { %v24963_v23 = vld [vmem:[#allocation6 + $0x358c] ss:$12 sps:$4 sm:$0xff]  }
 0xce4   : > { %v18774_v6 = vmul.f32 %v26916_v18, %v18766_v0  ;;  %v18770_v32 = vadd.f32 -0.016096033, %v18762_v29  ;;  %v24942_v18 = vld [vmem:[#allocation6 + $0x34e4] ss:$12 sps:$4 sm:$0xff]   ;;  %v24964_v29 = vld [vmem:[#allocation6 + $0x35a0] ss:$12 sps:$4 sm:$0xff]  }
 0xce5   : > { %17016 = vmatpush1.bf16.msra.mxu1 %v24931_v19  ;;  %v24961_v19 = vld [vmem:[#allocation6 + $0x3588] ss:$12 sps:$4 sm:$0xff]   ;;  %v24966_v0 = vld [vmem:[#allocation6 + $0x35a4] ss:$12 sps:$4 sm:$0xff]   ;;  %v24976_v58 = vld [vmem:[#allocation6 + $0x3600] ss:$12 sps:$4 sm:$0xff]  }
 0xce6   : > { %v25125_v12 = vpop.eup %25124  ;;  %v18778_v44 = vmul.f32 %v26921_v2, %v18770_v32  ;;  %17017 = vmatprep.subr.bf16.mxu1 %v24936_v63  ;;  %v18892_v2 = vrot.slane %v18891_v17, 2  ;;  %v24969_v63 = vld [vmem:[#allocation6 + $0x35bc] ss:$12 sps:$4 sm:$0xff]   ;;  %v24975_v32 = vld [vmem:[#allocation6 + $0x35ec] ss:$12 sps:$4 sm:$0xff]  }
 0xce7   : > { %v18850_v3 = vmul.f32 %v25125_v12, %v18774_v6  ;;  %v24972_v6 = vld [vmem:[#allocation6 + $0x35d4] ss:$12 sps:$4 sm:$0xff]   ;;  %v24978_v12 = vld [vmem:[#allocation6 + $0x3604] ss:$12 sps:$4 sm:$0xff]  }
 0xce8   : > { %v18893_v46 = vadd.f32 %v18892_v2, %v18891_v17  ;;  %v24985_v17 = vld [vmem:[#allocation6 + $0x3648] ss:$12 sps:$4 sm:$0xff]  }
 0xce9   : > { %v25127_v33 = vpop.eup %25126  ;;  %17018 = vmatpush1.bf16.msra.mxu1 %v24934_v56  ;;  %v18862_v61 = vadd.f32 1.0, %v18850_v3  ;;  %v24973_v56 = vld [vmem:[#allocation6 + $0x35e8] ss:$12 sps:$4 sm:$0xff]  }
 0xcea   : > { %v18858_v35 = vmul.f32 %v25127_v33, %v18778_v44  ;;  %17019 = vmatprep.subr.bf16.mxu1 %v24939_v49  ;;  %v18894_v62 = vrot.slane %v18893_v46, 1  ;;  %v24981_v44 = vld [vmem:[#allocation6 + $0x361c] ss:$12 sps:$4 sm:$0xff]   ;;  %v24979_v49 = vld [vmem:[#allocation6 + $0x3618] ss:$12 sps:$4 sm:$0xff]  }
 0xceb   : > { %v18870_v53 = vmul.f32 %v18862_v61, %v18638_v7  ;;  %v24984_v3 = vld [vmem:[#allocation6 + $0x3634] ss:$12 sps:$4 sm:$0xff]   ;;  %v24982_v33 = vld [vmem:[#allocation6 + $0x3630] ss:$12 sps:$4 sm:$0xff]   ;;  %v24991_v7 = vld [vmem:[#allocation6 + $0x3678] ss:$12 sps:$4 sm:$0xff]  }
 0xcec   : > { %v18866_v5 = vadd.f32 1.0, %v18858_v35  ;;  %v18895_v9 = vadd.f32 %v18894_v62, %v18893_v46  ;;  %v24990_v61 = vld [vmem:[#allocation6 + $0x3664] ss:$12 sps:$4 sm:$0xff]   ;;  %v24988_v35 = vld [vmem:[#allocation6 + $0x3660] ss:$12 sps:$4 sm:$0xff]  }
 0xced   : > { %17020 = vmatpush1.bf16.msra.mxu1 %v24937_v51  ;;  %v24987_v51 = vld [vmem:[#allocation6 + $0x364c] ss:$12 sps:$4 sm:$0xff]   ;;  %v24997_v2 = vld [vmem:[#allocation6 + $0x36a8] ss:$12 sps:$4 sm:$0xff]   ;;  %v25006_v46 = vld [vmem:[#allocation6 + $0x36f0] ss:$12 sps:$4 sm:$0xff]  }
 0xcee   : > { %v18874_v21 = vmul.f32 %v18866_v5, %v18642_v43  ;;  %17021 = vmatprep.subr.bf16.mxu1 %v24942_v18  ;;  %v26931_v4 = vmul.f32 0.0625, %v18895_v9  ;;  %v24993_v18 = vld [vmem:[#allocation6 + $0x367c] ss:$12 sps:$4 sm:$0xff]   ;;  %v24996_v43 = vld [vmem:[#allocation6 + $0x3694] ss:$12 sps:$4 sm:$0xff]  }
 0xcef   : > { %v24994_v5 = vld [vmem:[#allocation6 + $0x3690] ss:$12 sps:$4 sm:$0xff]  }
 0xcf0   : > { %v18896_v47 = vadd.f32 %v18874_v21, %v18870_v53  ;;  %v25002_v53 = vld [vmem:[#allocation6 + $0x36c4] ss:$12 sps:$4 sm:$0xff]   ;;  %v25000_v21 = vld [vmem:[#allocation6 + $0x36c0] ss:$12 sps:$4 sm:$0xff]   ;;  %v25017_v62 = vld [vmem:[#allocation6 + $0x373c] ss:$12 sps:$4 sm:$0xff]  }
 0xcf1   : > { %17022 = vmatpush1.bf16.msra.mxu1 %v24940_v60  ;;  %v24999_v60 = vld [vmem:[#allocation6 + $0x36ac] ss:$12 sps:$4 sm:$0xff]   ;;  %v25029_v9 = vld [vmem:[#allocation6 + $0x379c] ss:$12 sps:$4 sm:$0xff]  }
 0xcf2   : > { %v18897_v40 = vrot.slane %v18896_v47, 4  ;;  %17023 = vmatprep.subr.bf16.mxu1 %v24945_v28  ;;  %v25005_v28 = vld [vmem:[#allocation6 + $0x36dc] ss:$12 sps:$4 sm:$0xff]  }
 0xcf4   : > { %v18898_v1 = vadd.f32 %v18897_v40, %v18896_v47  ;;  %v25003_v47 = vld [vmem:[#allocation6 + $0x36d8] ss:$12 sps:$4 sm:$0xff]  }
 0xcf5   : > { %17024 = vmatpush1.bf16.msra.mxu1 %v24943_v16  ;;  %v25008_v16 = vld [vmem:[#allocation6 + $0x36f4] ss:$12 sps:$4 sm:$0xff]   ;;  %v25011_v40 = vld [vmem:[#allocation6 + $0x370c] ss:$12 sps:$4 sm:$0xff]  }
 0xcf6   : > { %v18899_v36 = vrot.slane %v18898_v1, 2  ;;  %17025 = vmatprep.subr.bf16.mxu1 %v24948_v39  ;;  %v25009_v39 = vld [vmem:[#allocation6 + $0x3708] ss:$12 sps:$4 sm:$0xff]  }
 0xcf8   : > { %v18900_v26 = vadd.f32 %v18899_v36, %v18898_v1  ;;  %v25014_v1 = vld [vmem:[#allocation6 + $0x3724] ss:$12 sps:$4 sm:$0xff]   ;;  %v25023_v36 = vld [vmem:[#allocation6 + $0x376c] ss:$12 sps:$4 sm:$0xff]  }
 0xcf9   : > { %17026 = vmatpush1.bf16.msra.mxu1 %v24946_v15  ;;  %v25012_v15 = vld [vmem:[#allocation6 + $0x3720] ss:$12 sps:$4 sm:$0xff]  }
 0xcfa   : > { %v18901_v20 = vrot.slane %v18900_v26, 1  ;;  %17027 = vmatprep.subr.bf16.mxu1 %v24951_v59  ;;  %v25021_v59 = vld [vmem:[#allocation6 + $0x3768] ss:$12 sps:$4 sm:$0xff]  }
 0xcfc   : > { %v18902_v8 = vadd.f32 %v18901_v20, %v18900_v26  ;;  %v25026_v26 = vld [vmem:[#allocation6 + $0x3784] ss:$12 sps:$4 sm:$0xff]  }
 0xcfd   : > { %17028 = vmatpush1.bf16.msra.mxu1 %v24949_v24  ;;  %v25024_v24 = vld [vmem:[#allocation6 + $0x3780] ss:$12 sps:$4 sm:$0xff]   ;;  %v25027_v20 = vld [vmem:[#allocation6 + $0x3798] ss:$12 sps:$4 sm:$0xff]  }
 0xcfe   : > { %v26933_v54 = vmul.f32 0.0625, %v18902_v8  ;;  %17040 = vmatprep.subr.bf16.mxu1 %v24954_v22  ;;  %v25032_v22 = vld [vmem:[#allocation6 + $0x37b4] ss:$12 sps:$4 sm:$0xff]   ;;  %v25030_v8 = vld [vmem:[#allocation6 + $0x37b0] ss:$12 sps:$4 sm:$0xff]  }
 0xd00   : > { %v18913_v57 = vcombine.low %v26931_v4, %v26933_v54  ;;  %17030 = vmatmul.mubr.bf16.vlgmr.msra.gmra.mrb[100].mxu1 %v26557_v50  ;;  %v24967_v50 = vld [vmem:[#allocation6 + $0x35b8] ss:$12 sps:$4 sm:$0xff]  }
 0xd01   : > { %17041 = vmatpush1.bf16.msra.mxu1 %v24952_v48  ;;  %17072 = vmatprep.mubr.bf16.mxu1 %v26687_v10  ;;  %v24970_v10 = vld [vmem:[#allocation6 + $0x35d0] ss:$12 sps:$4 sm:$0xff]   ;;  %v25035_v48 = vld [vmem:[#allocation6 + $0x37cc] ss:$12 sps:$4 sm:$0xff]  }
 0xd02   : > { %17042 = vmatprep.subr.bf16.mxu1 %v24957_v30  ;;  %v25033_v30 = vld [vmem:[#allocation6 + $0x37c8] ss:$12 sps:$4 sm:$0xff]  }
 0xd05   : > { %17043 = vmatpush1.bf16.msra.mxu1 %v24955_v45  ;;  %v25038_v45 = vld [vmem:[#allocation6 + $0x37e4] ss:$12 sps:$4 sm:$0xff]  }
 0xd06   : > { %17044 = vmatprep.subr.bf16.mxu1 %v24960_v52  ;;  %v25036_v52 = vld [vmem:[#allocation6 + $0x37e0] ss:$12 sps:$4 sm:$0xff]  }
 0xd09   : > { %17045 = vmatpush1.bf16.msra.mxu1 %v24958_v27  ;;  %v25041_v27 = vld [vmem:[#allocation6 + $0x37fc] ss:$12 sps:$4 sm:$0xff]  }
 0xd0a   : > { %17046 = vmatprep.subr.bf16.mxu1 %v24963_v23  ;;  %v25039_v23 = vld [vmem:[#allocation6 + $0x37f8] ss:$12 sps:$4 sm:$0xff]  }
 0xd0d   : > { %17047 = vmatpush1.bf16.msra.mxu1 %v24961_v19  ;;  %v25044_v19 = vld [vmem:[#allocation6 + $0x3814] ss:$12 sps:$4 sm:$0xff]  }
 0xd0e   : > { %17048 = vmatprep.subr.bf16.mxu1 %v24966_v0  ;;  %v25042_v0 = vld [vmem:[#allocation6 + $0x3810] ss:$12 sps:$4 sm:$0xff]  }
 0xd11   : > { %17049 = vmatpush1.bf16.msra.mxu1 %v24964_v29  ;;  %v25047_v29 = vld [vmem:[#allocation6 + $0x382c] ss:$12 sps:$4 sm:$0xff]  }
 0xd12   : > { %17050 = vmatprep.subr.bf16.mxu1 %v24969_v63  ;;  %v25045_v63 = vld [vmem:[#allocation6 + $0x3828] ss:$12 sps:$4 sm:$0xff]  }
 0xd15   : > { %17051 = vmatpush1.bf16.msra.mxu1 %v24967_v50  ;;  %v25050_v50 = vld [vmem:[#allocation6 + $0x3844] ss:$12 sps:$4 sm:$0xff]  }
 0xd16   : > { %17052 = vmatprep.subr.bf16.mxu1 %v24972_v6  ;;  %v25048_v6 = vld [vmem:[#allocation6 + $0x3840] ss:$12 sps:$4 sm:$0xff]  }
 0xd19   : > { %17053 = vmatpush1.bf16.msra.mxu1 %v24970_v10  ;;  %v25053_v10 = vld [vmem:[#allocation6 + $0x385c] ss:$12 sps:$4 sm:$0xff]  }
 0xd1a   : > { %17054 = vmatprep.subr.bf16.mxu1 %v24975_v32  ;;  %v25051_v32 = vld [vmem:[#allocation6 + $0x3858] ss:$12 sps:$4 sm:$0xff]  }
 0xd1d   : > { %17055 = vmatpush1.bf16.msra.mxu1 %v24973_v56  ;;  %v25056_v56 = vld [vmem:[#allocation6 + $0x3874] ss:$12 sps:$4 sm:$0xff]  }
 0xd1e   : > { %17056 = vmatprep.subr.bf16.mxu1 %v24978_v12  ;;  %v25054_v12 = vld [vmem:[#allocation6 + $0x3870] ss:$12 sps:$4 sm:$0xff]  }
 0xd21   : > { %17057 = vmatpush1.bf16.msra.mxu1 %v24976_v58  ;;  %v25059_v58 = vld [vmem:[#allocation6 + $0x388c] ss:$12 sps:$4 sm:$0xff]  }
 0xd22   : > { %17058 = vmatprep.subr.bf16.mxu1 %v24981_v44  ;;  %v25057_v44 = vld [vmem:[#allocation6 + $0x3888] ss:$12 sps:$4 sm:$0xff]  }
 0xd25   : > { %17059 = vmatpush1.bf16.msra.mxu1 %v24979_v49  ;;  %v25062_v49 = vld [vmem:[#allocation6 + $0x38a4] ss:$12 sps:$4 sm:$0xff]  }
 0xd26   : > { %17060 = vmatprep.subr.bf16.mxu1 %v24984_v3  ;;  %v25060_v3 = vld [vmem:[#allocation6 + $0x38a0] ss:$12 sps:$4 sm:$0xff]  }
 0xd29   : > { %17061 = vmatpush1.bf16.msra.mxu1 %v24982_v33  ;;  %v25065_v33 = vld [vmem:[#allocation6 + $0x38bc] ss:$12 sps:$4 sm:$0xff]  }
 0xd2a   : > { %17062 = vmatprep.subr.bf16.mxu1 %v24987_v51  ;;  %v25068_v51 = vld [vmem:[#allocation6 + $0x38d4] ss:$12 sps:$4 sm:$0xff]  }
 0xd2d   : > { %17063 = vmatpush1.bf16.msra.mxu1 %v24985_v17  ;;  %v25071_v17 = vld [vmem:[#allocation6 + $0x38ec] ss:$12 sps:$4 sm:$0xff]  }
 0xd2e   : > { %17064 = vmatprep.subr.bf16.mxu1 %v24990_v61  ;;  %v25069_v61 = vld [vmem:[#allocation6 + $0x38e8] ss:$12 sps:$4 sm:$0xff]  }
 0xd31   : > { %17065 = vmatpush1.bf16.msra.mxu1 %v24988_v35  ;;  %v25074_v35 = vld [vmem:[#allocation6 + $0x3904] ss:$12 sps:$4 sm:$0xff]  }
 0xd32   : > { %17066 = vmatprep.subr.bf16.mxu1 %v24993_v18  ;;  %v25072_v18 = vld [vmem:[#allocation6 + $0x3900] ss:$12 sps:$4 sm:$0xff]  }
 0xd35   : > { %17067 = vmatpush1.bf16.msra.mxu1 %v24991_v7  ;;  %v25077_v7 = vld [vmem:[#allocation6 + $0x391c] ss:$12 sps:$4 sm:$0xff]  }
 0xd36   : > { %17068 = vmatprep.subr.bf16.mxu1 %v24996_v43  ;;  %v25075_v43 = vld [vmem:[#allocation6 + $0x3918] ss:$12 sps:$4 sm:$0xff]  }
 0xd39   : > { %17069 = vmatpush1.bf16.msra.mxu1 %v24994_v5  ;;  %v25080_v5 = vld [vmem:[#allocation6 + $0x3934] ss:$12 sps:$4 sm:$0xff]  }
 0xd3a   : > { %17070 = vmatprep.subr.bf16.mxu1 %v24999_v60  ;;  %v25078_v60 = vld [vmem:[#allocation6 + $0x3930] ss:$12 sps:$4 sm:$0xff]  }
 0xd3d   : > { %17071 = vmatpush1.bf16.msra.mxu1 %v24997_v2  ;;  %v25083_v2 = vld [vmem:[#allocation6 + $0x394c] ss:$12 sps:$4 sm:$0xff]  }
 0xd3e   : > { %17083 = vmatprep.subr.bf16.mxu1 %v25002_v53  ;;  %v25081_v53 = vld [vmem:[#allocation6 + $0x3948] ss:$12 sps:$4 sm:$0xff]  }
 0xd40   : > { %21115 = vmatmul.mubr.msk.bf16.vlgmr.msra.gmra.mrb[100].mxu1 %vm26201_vm13, %v26699_v38  ;;  %v25020_v38 = vld [vmem:[#allocation6 + $0x3754] ss:$12 sps:$4 sm:$0xff]  }
 0xd41   : > { %17084 = vmatpush1.bf16.msra.mxu1 %v25000_v21  ;;  %17115 = vmatprep.mubr.bf16.mxu1 %v26709_v13  ;;  %v25018_v13 = vld [vmem:[#allocation6 + $0x3750] ss:$12 sps:$4 sm:$0xff]  }
 0xd42   : > { %17085 = vmatprep.subr.bf16.mxu1 %v25005_v28  ;;  %v25086_v21 = vld [vmem:[#allocation6 + $0x3964] ss:$12 sps:$4 sm:$0xff]   ;;  %v25084_v28 = vld [vmem:[#allocation6 + $0x3960] ss:$12 sps:$4 sm:$0xff]  }
 0xd45   : > { %17086 = vmatpush1.bf16.msra.mxu1 %v25003_v47  ;;  %v25089_v47 = vld [vmem:[#allocation6 + $0x397c] ss:$12 sps:$4 sm:$0xff]  }
 0xd46   : > { %17087 = vmatprep.subr.bf16.mxu1 %v25008_v16  ;;  %v25087_v16 = vld [vmem:[#allocation6 + $0x3978] ss:$12 sps:$4 sm:$0xff]  }
 0xd49   : > { %17088 = vmatpush1.bf16.msra.mxu1 %v25006_v46  ;;  %v25092_v46 = vld [vmem:[#allocation6 + $0x3994] ss:$12 sps:$4 sm:$0xff]  }
 0xd4a   : > { %17089 = vmatprep.subr.bf16.mxu1 %v25011_v40  ;;  %v25090_v40 = vld [vmem:[#allocation6 + $0x3990] ss:$12 sps:$4 sm:$0xff]  }
 0xd4d   : > { %17090 = vmatpush1.bf16.msra.mxu1 %v25009_v39  ;;  %v25095_v39 = vld [vmem:[#allocation6 + $0x39ac] ss:$12 sps:$4 sm:$0xff]  }
 0xd4e   : > { %17091 = vmatprep.subr.bf16.mxu1 %v25014_v1  ;;  %v25093_v1 = vld [vmem:[#allocation6 + $0x39a8] ss:$12 sps:$4 sm:$0xff]  }
 0xd51   : > { %17092 = vmatpush1.bf16.msra.mxu1 %v25012_v15  ;;  %v25098_v15 = vld [vmem:[#allocation6 + $0x39c4] ss:$12 sps:$4 sm:$0xff]  }
 0xd52   : > { %17093 = vmatprep.subr.bf16.mxu1 %v25017_v62  ;;  %v25096_v62 = vld [vmem:[#allocation6 + $0x39c0] ss:$12 sps:$4 sm:$0xff]  }
 0xd55   : > { %17094 = vmatpush1.bf16.msra.mxu1 %v25015_v42  ;;  %v25101_v42 = vld [vmem:[#allocation6 + $0x39dc] ss:$12 sps:$4 sm:$0xff]  }
 0xd56   : > { %17095 = vmatprep.subr.bf16.mxu1 %v25020_v38  ;;  %v25099_v38 = vld [vmem:[#allocation6 + $0x39d8] ss:$12 sps:$4 sm:$0xff]  }
 0xd59   : > { %17096 = vmatpush1.bf16.msra.mxu1 %v25018_v13  ;;  %v27189_v13 = vmov 0  }
 0xd5a   : > { %17097 = vmatprep.subr.bf16.mxu1 %v25023_v36  ;;  %v25104_v36 = vld [vmem:[#allocation6 + $0x39f4] ss:$12 sps:$4 sm:$0xff]  }
 0xd5d   : > { %17098 = vmatpush1.bf16.msra.mxu1 %v25021_v59  ;;  %v25102_v59 = vld [vmem:[#allocation6 + $0x39f0] ss:$12 sps:$4 sm:$0xff]  }
 0xd5e   : > { %17099 = vmatprep.subr.bf16.mxu1 %v25026_v26  ;;  %v25107_v26 = vld [vmem:[#allocation6 + $0x3a0c] ss:$12 sps:$4 sm:$0xff]  }
 0xd61   : > { %17100 = vmatpush1.bf16.msra.mxu1 %v25024_v24  ;;  %v25105_v24 = vld [vmem:[#allocation6 + $0x3a08] ss:$12 sps:$4 sm:$0xff]  }
 0xd62   : > { %17101 = vmatprep.subr.bf16.mxu1 %v25029_v9  ;;  %v25110_v9 = vld [vmem:[#allocation6 + $0x3a24] ss:$12 sps:$4 sm:$0xff]  }
 0xd65   : > { %17102 = vmatpush1.bf16.msra.mxu1 %v25027_v20  ;;  %v25108_v20 = vld [vmem:[#allocation6 + $0x3a20] ss:$12 sps:$4 sm:$0xff]  }
 0xd66   : > { %17103 = vmatprep.subr.bf16.mxu1 %v25032_v22  ;;  %v25113_v22 = vld [vmem:[#allocation6 + $0x3a3c] ss:$12 sps:$4 sm:$0xff]  }
 0xd69   : > { %17104 = vmatpush1.bf16.msra.mxu1 %v25030_v8  ;;  %v25116_v8 = vld [vmem:[#allocation6 + $0x3a54] ss:$12 sps:$4 sm:$0xff]  }
 0xd6a   : > { %17105 = vmatprep.subr.bf16.mxu1 %v25035_v48  ;;  %v25114_v48 = vld [vmem:[#allocation6 + $0x3a50] ss:$12 sps:$4 sm:$0xff]  }
 0xd6d   : > { %17106 = vmatpush1.bf16.msra.mxu1 %v25033_v30  ;;  %v25119_v30 = vld [vmem:[#allocation6 + $0x3a6c] ss:$12 sps:$4 sm:$0xff]  }
 0xd6e   : > { %17107 = vmatprep.subr.bf16.mxu1 %v25038_v45  ;;  %v25117_v45 = vld [vmem:[#allocation6 + $0x3a68] ss:$12 sps:$4 sm:$0xff]  }
 0xd71   : > { %17108 = vmatpush1.bf16.msra.mxu1 %v25036_v52  ;;  %v25136_v52 = vld [vmem:[#allocation9 + $0x4] sm:$0xf] }
 0xd72   : > { %17109 = vmatprep.subr.bf16.mxu1 %v25041_v27  ;;  %v27190_v27 = vld [vmem:[#allocation22_spill] sm:$0xff] }
 0xd75   : > { %17110 = vmatpush1.bf16.msra.mxu1 %v25039_v23  ;;  %v18501_v23 = vrot.slane %v25136_v52, %v27190_v27 }
 0xd76   : > { %17111 = vmatprep.subr.bf16.mxu1 %v25044_v19  ;;  %v27191_v19 = vld [vmem:[#allocation26_spill] sm:$0xff] }
 0xd79   : > { %17112 = vmatpush1.bf16.msra.mxu1 %v25042_v0  ;;  %v18505_v0 = vrot.slane %v25136_v52, %v27191_v19 }
 0xd7a   : > { %17113 = vmatprep.subr.bf16.mxu1 %v25047_v29  ;;  %v25137_v29 = vld [vmem:[#allocation10 + $0x4] sm:$0xf] }
 0xd7d   : > { %17114 = vmatpush1.bf16.msra.mxu1 %v25045_v63  ;;  %v18532_v63 = vrot.slane %v25137_v29, %v27190_v27 }
 0xd7e   : > { %17126 = vmatprep.subr.bf16.mxu1 %v25050_v50 }
 0xd80   : > { %17116 = vmatmul.mubr.bf16.vlgmr.msra.gmra.mrb[100].mxu1 %v26721_v37  ;;  %v25063_v37 = vld [vmem:[#allocation6 + $0x38b8] ss:$12 sps:$4 sm:$0xff]  }
 0xd81   : > { %17127 = vmatpush1.bf16.msra.mxu1 %v25048_v6  ;;  %17158 = vmatprep.mubr.bf16.mxu1 %v26725_v41  ;;  %v25066_v41 = vld [vmem:[#allocation6 + $0x38d0] ss:$12 sps:$4 sm:$0xff]   ;;  %v18536_v6 = vrot.slane %v25137_v29, %v27191_v19 }
 0xd82   : > { %17128 = vmatprep.subr.bf16.mxu1 %v25053_v10 }
 0xd85   : > { %17129 = vmatpush1.bf16.msra.mxu1 %v25051_v32 }
 0xd86   : > { %17130 = vmatprep.subr.bf16.mxu1 %v25056_v56 }
 0xd89   : > { %17131 = vmatpush1.bf16.msra.mxu1 %v25054_v12 }
 0xd8a   : > { %17132 = vmatprep.subr.bf16.mxu1 %v25059_v58 }
 0xd8d   : > { %17133 = vmatpush1.bf16.msra.mxu1 %v25057_v44 }
 0xd8e   : > { %17134 = vmatprep.subr.bf16.mxu1 %v25062_v49 }
 0xd91   : > { %17135 = vmatpush1.bf16.msra.mxu1 %v25060_v3 }
 0xd92   : > { %17136 = vmatprep.subr.bf16.mxu1 %v25065_v33 }
 0xd95   : > { %17137 = vmatpush1.bf16.msra.mxu1 %v25063_v37  ;;  %v25138_v37 = vld [vmem:[#allocation12 + $0x4] sm:$0xf] }
 0xd96   : > { %17138 = vmatprep.subr.bf16.mxu1 %v25068_v51  ;;  %v18579_v51 = vrot.slane %v25138_v37, %v27190_v27 }
 0xd99   : > { %17139 = vmatpush1.bf16.msra.mxu1 %v25066_v41 }
 0xd9a   : > { %17140 = vmatprep.subr.bf16.mxu1 %v25071_v17 }
 0xd9d   : > { %17141 = vmatpush1.bf16.msra.mxu1 %v25069_v61  ;;  %v18583_v61 = vrot.slane %v25138_v37, %v27191_v19 }
 0xd9e   : > { %17142 = vmatprep.subr.bf16.mxu1 %v25074_v35 }
 0xda1   : > { %17143 = vmatpush1.bf16.msra.mxu1 %v25072_v18 }
 0xda2   : > { %17144 = vmatprep.subr.bf16.mxu1 %v25077_v7  ;;  %v25139_v7 = vld [vmem:[#allocation13 + $0x4] sm:$0xf] }
 0xda5   : > { %17145 = vmatpush1.bf16.msra.mxu1 %v25075_v43  ;;  %v18610_v43 = vrot.slane %v25139_v7, %v27190_v27 }
 0xda6   : > { %17146 = vmatprep.subr.bf16.mxu1 %v25080_v5 }
 0xda9   : > { %17147 = vmatpush1.bf16.msra.mxu1 %v25078_v60 }
 0xdaa   : > { %17148 = vmatprep.subr.bf16.mxu1 %v25083_v2  ;;  %v18614_v2 = vrot.slane %v25139_v7, %v27191_v19 }
 0xdad   : > { %17149 = vmatpush1.bf16.msra.mxu1 %v25081_v53 }
 0xdae   : > { %17150 = vmatprep.subr.bf16.mxu1 %v25086_v21 }
 0xdb1   : > { %17151 = vmatpush1.bf16.msra.mxu1 %v25084_v28 }
 0xdb2   : > { %17152 = vmatprep.subr.bf16.mxu1 %v25089_v47 }
 0xdb5   : > { %17153 = vmatpush1.bf16.msra.mxu1 %v25087_v16 }
 0xdb6   : > { %17154 = vmatprep.subr.bf16.mxu1 %v25092_v46 }
 0xdb9   : > { %17155 = vmatpush1.bf16.msra.mxu1 %v25090_v40 }
 0xdba   : > { %17156 = vmatprep.subr.bf16.mxu1 %v25095_v39 }
 0xdbd   : > { %17157 = vmatpush1.bf16.msra.mxu1 %v25093_v1 }
 0xdbe   : > { %17169 = vmatprep.subr.bf16.mxu1 %v25098_v15 }
 0xdc0   : > { %17159 = vmatmul.mubr.bf16.vlgmr.msra.gmra.mrb[100].mxu1 %v26737_v34  ;;  %v25111_v34 = vld [vmem:[#allocation6 + $0x3a38] ss:$12 sps:$4 sm:$0xff]  }
 0xdc1   : > { %17170 = vmatpush1.bf16.msra.mxu1 %v25096_v62  ;;  %17201 = vmatprep.mubr.bf16.mxu1 %v27189_v13 }
 0xdc2   : > { %17171 = vmatprep.subr.bf16.mxu1 %v25101_v42 }
 0xdc5   : > { %17172 = vmatpush1.bf16.msra.mxu1 %v25099_v38 }
 0xdc6   : > { %17173 = vmatprep.subr.bf16.mxu1 %v25104_v36 }
 0xdc9   : > { %17174 = vmatpush1.bf16.msra.mxu1 %v25102_v59 }
 0xdca   : > { %17175 = vmatprep.subr.bf16.mxu1 %v25107_v26 }
 0xdcd   : > { %17176 = vmatpush1.bf16.msra.mxu1 %v25105_v24 }
 0xdce   : > { %17177 = vmatprep.subr.bf16.mxu1 %v25110_v9 }
 0xdd1   : > { %17178 = vmatpush1.bf16.msra.mxu1 %v25108_v20 }
 0xdd2   : > { %17179 = vmatprep.subr.bf16.mxu1 %v25113_v22 }
 0xdd5   : > { %17180 = vmatpush1.bf16.msra.mxu1 %v25111_v34 }
 0xdd6   : > { %17181 = vmatprep.subr.bf16.mxu1 %v25116_v8 }
 0xdd9   : > { %17182 = vmatpush1.bf16.msra.mxu1 %v25114_v48 }
 0xdda   : > { %17183 = vmatprep.subr.bf16.mxu1 %v25119_v30 }
 0xddd   : > { %17184 = vmatpush1.bf16.msra.mxu1 %v25117_v45 }
 0xde0   : > { %17202 = vmatmul.mubr.bf16.vlgmr.msra.gmra.mrb[100].mxu1 %v26769_v14 }
 0xeb3   : > { %v17203_v50 = vpop.f32.mrb[100].mxu1 }
 0xeb4   : > { %v18518_v10 = vmul.f32 %v18501_v23, %v17203_v50  ;;  %v17205_v32 = vpop.f32.mrb[101].mxu1 }
 0xeb5   : > { %v18519_v56 = vmul.f32 %v18505_v0, %v17205_v32  ;;  %v17207_v12 = vpop.f32.mrb[102].mxu1 }
 0xeb6   : > { %v18549_v58 = vadd.f32 %v18532_v63, %v18518_v10  ;;  %v18522_v44 = vmul.f32 %v18501_v23, %v17207_v12  ;;  %v17209_v49 = vpop.f32.mrb[103].mxu1 }
 0xeb7   : > { %v18550_v3 = vadd.f32 %v18536_v6, %v18519_v56  ;;  %v18523_v14 = vmul.f32 %v18505_v0, %v17209_v49 }
 0xeb8   : > { %v18557_v33 = vmax.f32 %v18549_v58, 0.0  ;;  %v18553_v41 = vadd.f32 %v18532_v63, %v18522_v44 }
 0xeb9   : > { %v18558_v17 = vmax.f32 %v18550_v3, 0.0  ;;  %v18554_v35 = vadd.f32 %v18536_v6, %v18523_v14 }
 0xeba   : > { %v18565_v18 = vadd.f32 %v18557_v33, %v27183_v11  ;;  %v18561_v5 = vmax.f32 %v18553_v41, 0.0 }
 0xebb   : > { %v18566_v60 = vadd.f32 %v18558_v17, %v27180_v55  ;;  %v18562_v53 = vmax.f32 %v18554_v35, 0.0 }
 0xebc   : > { %v18596_v21 = vmul.f32 %v18579_v51, %v18565_v18  ;;  %v18569_v28 = vadd.f32 %v18561_v5, %v27181_v25 }
 0xebd   : > { %v18597_v47 = vmul.f32 %v18583_v61, %v18566_v60  ;;  %v18570_v16 = vadd.f32 %v18562_v53, %v27179_v31 }
 0xebe   : > { %v26960_v46 = vadd.f32 %v18610_v43, %v18596_v21  ;;  %v18600_v40 = vmul.f32 %v18579_v51, %v18569_v28 }
 0xebf   : > { %v26962_v39 = vadd.f32 %v18614_v2, %v18597_v47  ;;  %v18601_v11 = vmul.f32 %v18583_v61, %v18570_v16 }
 0xec0   : > { %v18643_v1 = vmul.f32 0.70710677, %v26960_v46  ;;  %v26965_v15 = vadd.f32 %v18610_v43, %v18600_v40 }
 0xec1   : > { %v18644_v55 = vmul.f32 0.70710677, %v26962_v39  ;;  %v26968_v62 = vadd.f32 %v18614_v2, %v18601_v11 }
 0xec2   : > { %v26970_v42 = vclamps-f32 %v18643_v1, 4.0  ;;  %v18647_v25 = vmul.f32 0.70710677, %v26965_v15 }
 0xec3   : > { %v26973_v38 = vclamps-f32 %v18644_v55, 4.0  ;;  %v18648_v31 = vmul.f32 0.70710677, %v26968_v62 }
 0xec4   : > { %v26978_v13 = vmul.f32 %v26970_v42, %v26970_v42  ;;  %v26980_v36 = vclamps-f32 %v18647_v25, 4.0 }
 0xec5   : > { %v26984_v59 = vmul.f32 %v26973_v38, %v26973_v38  ;;  %v26986_v26 = vclamps-f32 %v18648_v31, 4.0 }
 0xec6   : > { %v18675_v24 = vmul.f32 -2.7261424e-10, %v26978_v13  ;;  %v18779_v9 = vmul.f32 -1.45660715e-05, %v26978_v13  ;;  %v26992_v20 = vmul.f32 %v26980_v36, %v26980_v36 }
 0xec7   : > { %v18676_v22 = vmul.f32 -2.7261424e-10, %v26984_v59  ;;  %v18780_v34 = vmul.f32 -1.45660715e-05, %v26984_v59  ;;  %v26998_v8 = vmul.f32 %v26986_v26, %v26986_v26 }
 0xec8   : > { %v18683_v48 = vadd.f32 2.7706815e-08, %v18675_v24  ;;  %v18787_v30 = vadd.f32 -0.00021337405, %v18779_v9  ;;  %v18679_v45 = vmul.f32 -2.7261424e-10, %v26992_v20 }
 0xec9   : > { %v18684_v52 = vadd.f32 2.7706815e-08, %v18676_v22  ;;  %v18788_v27 = vadd.f32 -0.00021337405, %v18780_v34  ;;  %v18783_v23 = vmul.f32 -1.45660715e-05, %v26992_v20 }
 0xeca   : > { %v18691_v19 = vmul.f32 %v18683_v48, %v26978_v13  ;;  %v18795_v0 = vmul.f32 %v18787_v30, %v26978_v13  ;;  %v18687_v29 = vadd.f32 2.7706815e-08, %v18679_v45  ;;  %v18680_v63 = vmul.f32 -2.7261424e-10, %v26998_v8 }
 0xecb   : > { %v18692_v50 = vmul.f32 %v18684_v52, %v26984_v59  ;;  %v18796_v6 = vmul.f32 %v18788_v27, %v26984_v59  ;;  %v18791_v10 = vadd.f32 -0.00021337405, %v18783_v23  ;;  %v18784_v32 = vmul.f32 -1.45660715e-05, %v26998_v8 }
 0xecc   : > { %v18699_v56 = vadd.f32 -2.101024e-06, %v18691_v19  ;;  %v18803_v12 = vadd.f32 -0.001682827, %v18795_v0  ;;  %v18695_v58 = vmul.f32 %v18687_v29, %v26992_v20  ;;  %v18688_v44 = vadd.f32 2.7706815e-08, %v18680_v63 }
 0xecd   : > { %v18700_v49 = vadd.f32 -2.101024e-06, %v18692_v50  ;;  %v18804_v3 = vadd.f32 -0.001682827, %v18796_v6  ;;  %v18799_v14 = vmul.f32 %v18791_v10, %v26992_v20  ;;  %v18792_v33 = vadd.f32 -0.00021337405, %v18784_v32 }
 0xece   : > { %v18707_v37 = vmul.f32 %v18699_v56, %v26978_v13  ;;  %v18811_v51 = vmul.f32 %v18803_v12, %v26978_v13  ;;  %v18703_v41 = vadd.f32 -2.101024e-06, %v18695_v58  ;;  %v18696_v17 = vmul.f32 %v18688_v44, %v26998_v8 }
 0xecf   : > { %v18708_v61 = vmul.f32 %v18700_v49, %v26984_v59  ;;  %v18812_v35 = vmul.f32 %v18804_v3, %v26984_v59  ;;  %v18807_v18 = vadd.f32 -0.001682827, %v18799_v14  ;;  %v18800_v7 = vmul.f32 %v18792_v33, %v26998_v8 }
 0xed0   : > { %v18715_v43 = vadd.f32 -5.6925062e-05, %v18707_v37  ;;  %v18819_v5 = vadd.f32 -0.0073733293, %v18811_v51  ;;  %v18711_v60 = vmul.f32 %v18703_v41, %v26992_v20  ;;  %v18704_v2 = vadd.f32 -2.101024e-06, %v18696_v17 }
 0xed1   : > { %v18716_v53 = vadd.f32 -5.6925062e-05, %v18708_v61  ;;  %v18820_v21 = vadd.f32 -0.0073733293, %v18812_v35  ;;  %v18815_v28 = vmul.f32 %v18807_v18, %v26992_v20  ;;  %v18808_v47 = vadd.f32 -0.001682827, %v18800_v7 }
 0xed2   : > { %v18723_v16 = vmul.f32 %v18715_v43, %v26978_v13  ;;  %v18827_v40 = vmul.f32 %v18819_v5, %v26978_v13  ;;  %v18719_v11 = vadd.f32 -5.6925062e-05, %v18711_v60  ;;  %v18712_v1 = vmul.f32 %v18704_v2, %v26998_v8 }
 0xed3   : > { %v18724_v55 = vmul.f32 %v18716_v53, %v26984_v59  ;;  %v18828_v25 = vmul.f32 %v18820_v21, %v26984_v59  ;;  %v18823_v31 = vadd.f32 -0.0073733293, %v18815_v28  ;;  %v18816_v24 = vmul.f32 %v18808_v47, %v26998_v8 }
 0xed4   : > { %v18731_v9 = vadd.f32 -0.00073499064, %v18723_v16  ;;  %v18835_v22 = vadd.f32 -0.014264739, %v18827_v40  ;;  %v18727_v34 = vmul.f32 %v18719_v11, %v26992_v20  ;;  %v18720_v48 = vadd.f32 -5.6925062e-05, %v18712_v1 }
 0xed5   : > { %v18732_v30 = vadd.f32 -0.00073499064, %v18724_v55  ;;  %v18836_v45 = vadd.f32 -0.014264739, %v18828_v25  ;;  %v18831_v52 = vmul.f32 %v18823_v31, %v26992_v20  ;;  %v18824_v27 = vadd.f32 -0.0073733293, %v18816_v24 }
 0xed6   : > { %v18739_v23 = vmul.f32 %v18731_v9, %v26978_v13  ;;  %25128 = vrcp.f32 %v18835_v22  ;;  %v18735_v19 = vadd.f32 -0.00073499064, %v18727_v34  ;;  %v18728_v0 = vmul.f32 %v18720_v48, %v26998_v8 }
 0xed7   : > { %v18740_v29 = vmul.f32 %v18732_v30, %v26984_v59  ;;  %25130 = vrcp.f32 %v18836_v45  ;;  %v18839_v63 = vadd.f32 -0.014264739, %v18831_v52  ;;  %v18832_v50 = vmul.f32 %v18824_v27, %v26998_v8 }
 0xed8   : > { %v18747_v6 = vadd.f32 -0.0029546, %v18739_v23  ;;  %v18743_v10 = vmul.f32 %v18735_v19, %v26992_v20  ;;  %v18736_v32 = vadd.f32 -0.00073499064, %v18728_v0  ;;  %v18636_v16 = vmul.f32 0.5, %v26962_v39 }
 0xed9   : > { %v18748_v56 = vadd.f32 -0.0029546, %v18740_v29  ;;  %25132 = vrcp.f32 %v18839_v63  ;;  %v18840_v12 = vadd.f32 -0.014264739, %v18832_v50  ;;  %v18640_v11 = vmul.f32 0.5, %v26968_v62  ;;  %v27192_v63 = vld [vmem:[#allocation28_spill] sm:$0xff] }
 0xeda   : > { %v18755_v58 = vmul.f32 %v18747_v6, %v26978_v13  ;;  %v18751_v44 = vadd.f32 -0.0029546, %v18743_v10  ;;  %v18744_v49 = vmul.f32 %v18736_v32, %v26998_v8  ;;  %v25409_v30 = vmov 1966171168  }
 0xedb   : > { %v18756_v3 = vmul.f32 %v18748_v56, %v26984_v59  ;;  %25134 = vrcp.f32 %v18840_v12  ;;  %v18915_v45 = vunpack.c.l.s4 %v25409_v30  ;;  %v27193_v12 = vlaneseq }
 0xedc   : > { %v18763_v14 = vadd.f32 -0.016096033, %v18755_v58  ;;  %v18759_v33 = vmul.f32 %v18751_v44, %v26992_v20  ;;  %v18752_v37 = vadd.f32 -0.0029546, %v18744_v49 }
 0xedd   : > { %v18764_v51 = vadd.f32 -0.016096033, %v18756_v3  ;;  %v18916_v62 = vunpack.c.0.s8 %v18915_v45  ;;  %vm18939_vm15 = vcmp.lt.s32.totalorder %v27193_v12, 512 }
 0xede   : > { %v18771_v41 = vmul.f32 %v26970_v42, %v18763_v14  ;;  %v18767_v17 = vadd.f32 -0.016096033, %v18759_v33  ;;  %v18760_v61 = vmul.f32 %v18752_v37, %v26998_v8  ;;  %v18635_v42 = vmul.f32 0.5, %v26960_v46 }
 0xedf   : > { %v18772_v35 = vmul.f32 %v26973_v38, %v18764_v51  ;;  %v18639_v8 = vmul.f32 0.5, %v26965_v15  ;;  %v18919_v50 = vsub.s32 %v18916_v62, %v27192_v63 }
 0xee0   : > { %v25129_v18 = vpop.eup %25128  ;;  %v18775_v13 = vmul.f32 %v26980_v36, %v18767_v17  ;;  %v18768_v7 = vadd.f32 -0.016096033, %v18760_v61 }
 0xee1   : > { %v25131_v43 = vpop.eup %25130  ;;  %v18844_v5 = vmul.f32 %v25129_v18, %v18771_v41  ;;  %v18927_v32 = vrot.slane %v18913_v57, %v18919_v50 }
 0xee2   : > { %v18846_v59 = vmul.f32 %v25131_v43, %v18772_v35  ;;  %v18776_v60 = vmul.f32 %v26986_v26, %v18768_v7 }
 0xee3   : > { %v25133_v2 = vpop.eup %25132  ;;  %v18859_v20 = vadd.f32 1.0, %v18844_v5 }
 0xee4   : > { %v18852_v53 = vmul.f32 %v25133_v2, %v18775_v13  ;;  %v18860_v28 = vadd.f32 1.0, %v18846_v59 }
 0xee5   : > { %v25135_v21 = vpop.eup %25134  ;;  %v18867_v36 = vmul.f32 %v18859_v20, %v18635_v42 }
 0xee6   : > { %v18863_v47 = vadd.f32 1.0, %v18852_v53  ;;  %v18854_v38 = vmul.f32 %v25135_v21, %v18776_v60  ;;  %v18868_v55 = vmul.f32 %v18860_v28, %v18636_v16 }
 0xee8   : > { %v18871_v40 = vmul.f32 %v18863_v47, %v18639_v8  ;;  %v18864_v1 = vadd.f32 1.0, %v18854_v38 }
 0xeea   : > { %v18875_v26 = vadd.f32 %v18871_v40, %v18867_v36  ;;  %v18872_v25 = vmul.f32 %v18864_v1, %v18640_v11 }
 0xeec   : > { %v18876_v31 = vrot.slane %v18875_v26, 4  ;;  %v18882_v24 = vadd.f32 %v18872_v25, %v18868_v55 }
 0xeee   : > { %v18877_v9 = vadd.f32 %v18876_v31, %v18875_v26  ;;  %v18883_v22 = vrot.slane %v18882_v24, 4 }
 0xef0   : > { %v18878_v46 = vrot.slane %v18877_v9, 2  ;;  %v18884_v34 = vadd.f32 %v18883_v22, %v18882_v24 }
 0xef2   : > { %v18879_v15 = vadd.f32 %v18878_v46, %v18877_v9  ;;  %v18885_v48 = vrot.slane %v18884_v34, 2 }
 0xef4   : > { %v18880_v39 = vrot.slane %v18879_v15, 1  ;;  %v18886_v52 = vadd.f32 %v18885_v48, %v18884_v34 }
 0xef6   : > { %v18881_v27 = vadd.f32 %v18880_v39, %v18879_v15  ;;  %v18887_v23 = vrot.slane %v18886_v52, 1 }
 0xef8   : > { %v18904_v19 = vmul.f32 0.0625, %v18881_v27  ;;  %v18888_v0 = vadd.f32 %v18887_v23, %v18886_v52 }
 0xefa   : > { %v18905_v29 = vmul.f32 0.0625, %v18888_v0 }
 0xefc   : > { %v18912_v6 = vcombine.low %v18904_v19, %v18905_v29 }
 0xefe   : > { %v18920_v10 = vrot.slane %v18912_v6, %v18919_v50 }
 0xf00   : > { %v18928_v56 = vcombine.low %v18920_v10, %v18927_v32 }
 0xf02   : > { %v18935_v58 = vrot.slane %v18928_v56, %v18919_v50 }
 0xf04   : > { %18941 = vst.msk [vmem:[%s445_s24] sm:$0xf] %vm18939_vm15, %v18935_v58 }
 0xf05 PF: > { %s24_s30 = sadd.s32 1, %s25390_s30  }
 0xf06   : > { %p21_p11 = scmp.ge.s32.totalorder %s24_s30, 4  }
 0xf08   :  { %23 = sbr.rel (!%p21_p11) target bundleno = 5 (0x5), region = 126 }
 0xf0f   :  { %18961 = vsyncpa [#allocation3], 1 }
 0xf10   :  { %18963 = vsyncpa [#allocation3 + $0x1], 1 }
 0xf11   :  { %18964 = vsyncpa [#allocation5], 1 }
 0xf12   :  { %18965 = vsyncpa [#allocation8], 1 }
 0xf13   :  { %18966 = vsyncpa [#allocation11], 1 }
 0xf14   :  { %18967 = vsyncpa [#allocation14], 1 }

</bundles_post_ra>
